<compile_context>
chip_gen: v7x
topology: tpu7x:2x2x1
jax: 0.10.0
libtpu: 0.0.40
codegen_flags: <defaults>
</compile_context>

<pallas_src>
import functools

import jax
import jax.numpy as jnp
from jax.experimental import pallas as pl
from jax.experimental.pallas import tpu as pltpu


def _round_up(n, m):
    return ((n + m - 1) // m) * m


# ----------------------------------------------------------------------------
# 1x1 conv (+ fused concat variants) + folded BN + ReLU, tiled over M rows
# ----------------------------------------------------------------------------
def _conv1x1_kernel(x_ref, w_ref, s_ref, b_ref, o_ref):
    acc = jnp.dot(x_ref[...].astype(jnp.bfloat16), w_ref[...],
                  preferred_element_type=jnp.float32)
    o_ref[...] = jnp.maximum(acc * s_ref[...] + b_ref[...], 0.0)


def _conv1x1_cat4_kernel(x1_ref, x2_ref, x3_ref, x4_ref, w_ref, s_ref, b_ref, o_ref):
    # cv5 on cat(x1, x2, x3, x4): 4 partial matmuls, concat never materialized.
    acc = jnp.dot(x1_ref[...].astype(jnp.bfloat16), w_ref[0],
                  preferred_element_type=jnp.float32)
    acc = acc + jnp.dot(x2_ref[...].astype(jnp.bfloat16), w_ref[1],
                        preferred_element_type=jnp.float32)
    acc = acc + jnp.dot(x3_ref[...].astype(jnp.bfloat16), w_ref[2],
                        preferred_element_type=jnp.float32)
    acc = acc + jnp.dot(x4_ref[...].astype(jnp.bfloat16), w_ref[3],
                        preferred_element_type=jnp.float32)
    o_ref[...] = jnp.maximum(acc * s_ref[...] + b_ref[...], 0.0)


def _conv1x1_cat2_kernel(x1_ref, x2_ref, w_ref, s_ref, b_ref, o_ref):
    # cv7 on cat(y1, y2): 2 partial matmuls.
    acc = jnp.dot(x1_ref[...].astype(jnp.bfloat16), w_ref[0],
                  preferred_element_type=jnp.float32)
    acc = acc + jnp.dot(x2_ref[...].astype(jnp.bfloat16), w_ref[1],
                        preferred_element_type=jnp.float32)
    o_ref[...] = jnp.maximum(acc * s_ref[...] + b_ref[...], 0.0)


def _tiled_conv1x1(kernel, xs, w, scale, bias, *, tm=512):
    """Shared wrapper: tile the M = B*H*W row axis, keep weights resident."""
    M = xs[0].shape[0]
    cout = w.shape[-1]
    tm = min(tm, _round_up(M, 8))           # tm multiple of 8
    Mp = _round_up(M, tm)
    if Mp != M:                              # pad rows so the grid divides evenly
        xs = [jnp.pad(x, ((0, Mp - M), (0, 0))) for x in xs]

    x_specs = [pl.BlockSpec((tm, x.shape[1]), lambda i: (i, 0)) for x in xs]
    w_spec = pl.BlockSpec(w.shape, lambda i: (0,) * w.ndim)      # resident weights
    p_spec = pl.BlockSpec((1, cout), lambda i: (0, 0))           # resident BN scale/bias

    out = pl.pallas_call(
        kernel,
        out_shape=jax.ShapeDtypeStruct((Mp, cout), jnp.float32),
        grid=(Mp // tm,),
        in_specs=x_specs + [w_spec, p_spec, p_spec],
        out_specs=pl.BlockSpec((tm, cout), lambda i: (i, 0)),
        compiler_params=pltpu.CompilerParams(dimension_semantics=("parallel",)),
    )(*xs, w, scale, bias)
    return out[:M] if Mp != M else out


def conv1x1_bn_relu(xm, w, s, b):
    return _tiled_conv1x1(_conv1x1_kernel, [xm], w, s, b)


def conv1x1_cat4_bn_relu(x1, x2, x3, x4, w, s, b):
    return _tiled_conv1x1(_conv1x1_cat4_kernel, [x1, x2, x3, x4], w, s, b)


def conv1x1_cat2_bn_relu(x1, x2, w, s, b):
    return _tiled_conv1x1(_conv1x1_cat2_kernel, [x1, x2], w, s, b)


# ----------------------------------------------------------------------------
# 3x3 conv (stride 1, pad 1) + folded BN + ReLU, NHWC, one image per grid step
# ----------------------------------------------------------------------------
def _conv3x3_kernel(x_ref, w_ref, s_ref, b_ref, o_ref, pad_ref, *, H, W):
    cin = x_ref.shape[-1]
    cout = o_ref.shape[-1]
    # zero-padded copy of the image (true zero padding of the conv)
    pad_ref[...] = jnp.zeros(pad_ref.shape, pad_ref.dtype)
    pad_ref[1:H + 1, 1:W + 1, :] = x_ref[0]
    acc = jnp.zeros((H * W, cout), jnp.float32)
    for dh in range(3):
        for dw in range(3):
            patch = pad_ref[dh:dh + H, dw:dw + W, :].reshape(H * W, cin)
            acc = acc + jnp.dot(patch.astype(jnp.bfloat16), w_ref[dh * 3 + dw],
                                preferred_element_type=jnp.float32)
    y = jnp.maximum(acc * s_ref[...] + b_ref[...], 0.0)
    o_ref[0] = y.reshape(H, W, cout)


def conv3x3_bn_relu(x, w9, scale, bias):
    # x: (B, H, W, Cin) NHWC; w9: (9, Cin, Cout) bf16
    B, H, W, Cin = x.shape
    Cout = w9.shape[-1]
    return pl.pallas_call(
        functools.partial(_conv3x3_kernel, H=H, W=W),
        out_shape=jax.ShapeDtypeStruct((B, H, W, Cout), jnp.float32),
        grid=(B,),
        in_specs=[pl.BlockSpec((1, H, W, Cin), lambda b: (b, 0, 0, 0)),
                  pl.BlockSpec((9, Cin, Cout), lambda b: (0, 0, 0)),
                  pl.BlockSpec((1, Cout), lambda b: (0, 0)),
                  pl.BlockSpec((1, Cout), lambda b: (0, 0))],
        out_specs=pl.BlockSpec((1, H, W, Cout), lambda b: (b, 0, 0, 0)),
        scratch_shapes=[pltpu.VMEM((H + 2, W + 2, Cin), jnp.float32)],
        compiler_params=pltpu.CompilerParams(dimension_semantics=("parallel",)),
    )(x, w9, scale, bias)


# ----------------------------------------------------------------------------
# Fused chain of three MaxPool2d(5, stride=1, pad=2) — separable 1x5 then 5x1
# ----------------------------------------------------------------------------
def _maxpool5_chain_kernel(x_ref, o1_ref, o2_ref, o3_ref, padw_ref, padh_ref, *, H, W):
    # Input is post-ReLU (non-negative), so zero padding == -inf padding.
    padw_ref[...] = jnp.zeros(padw_ref.shape, padw_ref.dtype)
    padh_ref[...] = jnp.zeros(padh_ref.shape, padh_ref.dtype)

    def pool5(v):                      # v: (H, W, C)
        padw_ref[:, 2:W + 2, :] = v
        m = padw_ref[:, 0:W, :]
        for dw in range(1, 5):         # 1x5 row max
            m = jnp.maximum(m, padw_ref[:, dw:dw + W, :])
        padh_ref[2:H + 2, :, :] = m
        m2 = padh_ref[0:H, :, :]
        for dh in range(1, 5):         # 5x1 column max
            m2 = jnp.maximum(m2, padh_ref[dh:dh + H, :, :])
        return m2

    p1 = pool5(x_ref[0])
    o1_ref[0] = p1
    p2 = pool5(p1)                     # intermediate pools stay in VMEM
    o2_ref[0] = p2
    p3 = pool5(p2)
    o3_ref[0] = p3


def fused_maxpool5_chain(x):
    # x: (B, H, W, C) NHWC, non-negative. Returns (m(x), m(m(x)), m(m(m(x)))).
    B, H, W, C = x.shape
    ct = C
    if C > 256:                        # chunk channels for large C (v7x VMEM budget)
        for cand in (256, 128):
            if C % cand == 0:
                ct = cand
                break
    blk = pl.BlockSpec((1, H, W, ct), lambda b, c: (b, 0, 0, c))
    return pl.pallas_call(
        functools.partial(_maxpool5_chain_kernel, H=H, W=W),
        out_shape=(jax.ShapeDtypeStruct((B, H, W, C), jnp.float32),) * 3,
        grid=(B, C // ct),
        in_specs=[blk],
        out_specs=(blk, blk, blk),
        scratch_shapes=[pltpu.VMEM((H, W + 4, ct), jnp.float32),
                        pltpu.VMEM((H + 4, W, ct), jnp.float32)],
        compiler_params=pltpu.CompilerParams(
            dimension_semantics=("parallel", "parallel")),
    )(x)


# ----------------------------------------------------------------------------
# Full SimCSPSPPF forward (NCHW in / NCHW out)
# ----------------------------------------------------------------------------
def simcsp_sppf_forward(x_nchw, p):
    B, C1, H, W = x_nchw.shape
    c_ = p["w1"].shape[-1]
    c2 = p["w7"].shape[-1]
    M = B * H * W

    x = jnp.transpose(x_nchw, (0, 2, 3, 1))          # NCHW -> NHWC, once
    xm = x.reshape(M, C1)

    # x1 = cv4(cv3(cv1(x)))
    t = conv1x1_bn_relu(xm, p["w1"], p["s1"], p["b1"])
    t = conv3x3_bn_relu(t.reshape(B, H, W, c_), p["w3"], p["s3"], p["b3"])
    x1m = conv1x1_bn_relu(t.reshape(M, c_), p["w4"], p["s4"], p["b4"])
    x1 = x1m.reshape(B, H, W, c_)

    # x2 = m(x1), x3 = m(x2), x4 = m(x3)  — single fused kernel
    x2, x3, x4 = fused_maxpool5_chain(x1)

    # y1 = cv6(cv5(cat(x1, x2, x3, x4)))  — concat fused into cv5
    y = conv1x1_cat4_bn_relu(x1m, x2.reshape(M, c_), x3.reshape(M, c_),
                             x4.reshape(M, c_), p["w5"], p["s5"], p["b5"])
    y1m = conv3x3_bn_relu(y.reshape(B, H, W, c_),
                          p["w6"], p["s6"], p["b6"]).reshape(M, c_)

    # y2 = cv2(x)
    y2m = conv1x1_bn_relu(xm, p["w2"], p["s2"], p["b2"])

    # out = cv7(cat(y1, y2))  — concat fused into cv7
    outm = conv1x1_cat2_bn_relu(y1m, y2m, p["w7"], p["s7"], p["b7"])
    return jnp.transpose(outm.reshape(B, H, W, c2), (0, 3, 1, 2))


# ----------------------------------------------------------------------------
# Deterministic parameter construction (folded BatchNorm, bf16 weights)
# ----------------------------------------------------------------------------
def _fold_bn(key, c, eps=1e-5):
    k1, k2, k3, k4 = jax.random.split(key, 4)
    gamma = 1.0 + 0.1 * jax.random.normal(k1, (c,), jnp.float32)
    beta = 0.1 * jax.random.normal(k2, (c,), jnp.float32)
    mean = 0.1 * jax.random.normal(k3, (c,), jnp.float32)
    var = jnp.abs(jax.random.normal(k4, (c,), jnp.float32)) + 0.5
    scale = gamma / jnp.sqrt(var + eps)
    bias = beta - mean * scale
    return scale.reshape(1, c), bias.reshape(1, c)


def make_params(key, c1, c2, e=0.5):
    c_ = int(2 * c2 * e)
    ks = jax.random.split(key, 14)

    def w(k, shape):
        return (0.1 * jax.random.normal(k, shape, jnp.float32)).astype(jnp.bfloat16)

    p = {}
    p["w1"] = w(ks[0], (c1, c_));      p["s1"], p["b1"] = _fold_bn(ks[1], c_)   # cv1
    p["w2"] = w(ks[2], (c1, c_));      p["s2"], p["b2"] = _fold_bn(ks[3], c_)   # cv2
    p["w3"] = w(ks[4], (9, c_, c_));   p["s3"], p["b3"] = _fold_bn(ks[5], c_)   # cv3 (3x3)
    p["w4"] = w(ks[6], (c_, c_));      p["s4"], p["b4"] = _fold_bn(ks[7], c_)   # cv4
    p["w5"] = w(ks[8], (4, c_, c_));   p["s5"], p["b5"] = _fold_bn(ks[9], c_)   # cv5 (4*c_ -> c_)
    p["w6"] = w(ks[10], (9, c_, c_));  p["s6"], p["b6"] = _fold_bn(ks[11], c_)  # cv6 (3x3)
    p["w7"] = w(ks[12], (2, c_, c2));  p["s7"], p["b7"] = _fold_bn(ks[13], c2)  # cv7 (2*c_ -> c2)
    return p


if __name__ == "__main__":
    key = jax.random.PRNGKey(0)
    kx, kp = jax.random.split(key)

    # SimCSPSPPF(c1=32, c2=32, e=0.5, k=5) -> c_ = 32
    B, c1, H, W = 2, 32, 16, 16
    c2 = 32

    x = jax.random.normal(kx, (B, c1, H, W), jnp.float32)
    params = make_params(kp, c1, c2)

    out = jax.jit(simcsp_sppf_forward)(x, params)
    out = jax.block_until_ready(out)

    assert out.shape == (B, c2, H, W), out.shape
    assert bool(jnp.all(jnp.isfinite(out)))
    print("KERNEL_OK")
</pallas_src>

<mosaic_0001>
module attributes {stable_mosaic.version = 11 : i64} {
  func.func @_conv1x1_kernel(%arg0: i32, %arg1: memref<512x32xf32, #tpu.memory_space<vmem>>, %arg2: memref<32x32xbf16, #tpu.memory_space<vmem>>, %arg3: memref<1x32xf32, #tpu.memory_space<vmem>>, %arg4: memref<1x32xf32, #tpu.memory_space<vmem>>, %arg5: memref<512x32xf32, #tpu.memory_space<vmem>>) attributes {dimension_semantics = [#tpu.dimension_semantics<parallel>], iteration_bounds = array<i64: 1>, scalar_prefetch = 0 : i64, scratch_operands = 0 : i64, tpu.core_type = #tpu.core_type<tc>, window_params = [{transform_indices = @transform_0, window_bounds = array<i64: 512, 32>}, {pipeline_mode = #tpu.pipeline_mode<synchronous>, transform_indices = @transform_1, window_bounds = array<i64: 32, 32>}, {pipeline_mode = #tpu.pipeline_mode<synchronous>, transform_indices = @transform_2, window_bounds = array<i64: 1, 32>}, {pipeline_mode = #tpu.pipeline_mode<synchronous>, transform_indices = @transform_3, window_bounds = array<i64: 1, 32>}, {transform_indices = @transform_4, window_bounds = array<i64: 512, 32>}]} {
    %c0 = arith.constant 0 : index
    %c0_0 = arith.constant 0 : index
    %0 = vector.load %arg1[%c0, %c0_0] : memref<512x32xf32, #tpu.memory_space<vmem>>, vector<512x32xf32>
    %1 = arith.truncf %0 : vector<512x32xf32> to vector<512x32xbf16>
    %c0_1 = arith.constant 0 : index
    %c0_2 = arith.constant 0 : index
    %2 = vector.load %arg2[%c0_1, %c0_2] : memref<32x32xbf16, #tpu.memory_space<vmem>>, vector<32x32xbf16>
    %cst = arith.constant dense<0.000000e+00> : vector<512x32xf32>
    %3 = tpu.matmul %1, %2, %cst {dimension_numbers = #tpu.dot_dimension_numbers<[1], [0], [0], [1], [0, 0, 1, 1], [], []>} : vector<512x32xbf16>, vector<32x32xbf16>, vector<512x32xf32> -> vector<512x32xf32>
    %c0_3 = arith.constant 0 : index
    %c0_4 = arith.constant 0 : index
    %4 = vector.load %arg3[%c0_3, %c0_4] : memref<1x32xf32, #tpu.memory_space<vmem>>, vector<1x32xf32>
    %5 = vector.broadcast %4 : vector<1x32xf32> to vector<512x32xf32>
    %6 = arith.mulf %3, %5 : vector<512x32xf32>
    %c0_5 = arith.constant 0 : index
    %c0_6 = arith.constant 0 : index
    %7 = vector.load %arg4[%c0_5, %c0_6] : memref<1x32xf32, #tpu.memory_space<vmem>>, vector<1x32xf32>
    %8 = vector.broadcast %7 : vector<1x32xf32> to vector<512x32xf32>
    %9 = arith.addf %6, %8 : vector<512x32xf32>
    %cst_7 = arith.constant 0.000000e+00 : f32
    %10 = vector.broadcast %cst_7 : f32 to vector<512x32xf32>
    %11 = arith.maximumf %9, %10 : vector<512x32xf32>
    %c0_8 = arith.constant 0 : index
    %c0_9 = arith.constant 0 : index
    %12 = vector.load %arg5[%c0_8, %c0_9] : memref<512x32xf32, #tpu.memory_space<vmem>>, vector<512x32xf32>
    tpu.vector_store %arg5[%c0_8, %c0_9], %11 {strides = array<i32>} : memref<512x32xf32, #tpu.memory_space<vmem>>, vector<512x32xf32>,
    return
  }
  func.func @transform_0(%arg0: i32) -> (i32, i32) {
    %c0_i32 = arith.constant 0 : i32
    %c0_i32_0 = arith.constant 0 : i32
    return %arg0, %c0_i32 : i32, i32
  }
  func.func @transform_1(%arg0: i32) -> (i32, i32) {
    %c0_i32 = arith.constant 0 : i32
    %c0_i32_0 = arith.constant 0 : i32
    %c0_i32_1 = arith.constant 0 : i32
    return %c0_i32, %c0_i32_0 : i32, i32
  }
  func.func @transform_2(%arg0: i32) -> (i32, i32) {
    %c0_i32 = arith.constant 0 : i32
    %c0_i32_0 = arith.constant 0 : i32
    %c0_i32_1 = arith.constant 0 : i32
    return %c0_i32, %c0_i32_0 : i32, i32
  }
  func.func @transform_3(%arg0: i32) -> (i32, i32) {
    %c0_i32 = arith.constant 0 : i32
    %c0_i32_0 = arith.constant 0 : i32
    %c0_i32_1 = arith.constant 0 : i32
    return %c0_i32, %c0_i32_0 : i32, i32
  }
  func.func @transform_4(%arg0: i32) -> (i32, i32) {
    %c0_i32 = arith.constant 0 : i32
    %c0_i32_0 = arith.constant 0 : i32
    return %arg0, %c0_i32 : i32, i32
  }
}

module attributes {stable_mosaic.version = 11 : i64} {
  func.func @_conv1x1_kernel(%arg0: i32, %arg1: memref<512x32xf32, #tpu.memory_space<vmem>>, %arg2: memref<32x32xbf16, #tpu.memory_space<vmem>>, %arg3: memref<1x32xf32, #tpu.memory_space<vmem>>, %arg4: memref<1x32xf32, #tpu.memory_space<vmem>>, %arg5: memref<512x32xf32, #tpu.memory_space<vmem>>) attributes {dimension_semantics = [#tpu.dimension_semantics<parallel>], iteration_bounds = array<i64: 1>, scalar_prefetch = 0 : i64, scratch_operands = 0 : i64, tpu.core_type = #tpu.core_type<tc>, window_params = [{transform_indices = @transform_0, window_bounds = array<i64: 512, 32>}, {pipeline_mode = #tpu.pipeline_mode<synchronous>, transform_indices = @transform_1, window_bounds = array<i64: 32, 32>}, {pipeline_mode = #tpu.pipeline_mode<synchronous>, transform_indices = @transform_2, window_bounds = array<i64: 1, 32>}, {pipeline_mode = #tpu.pipeline_mode<synchronous>, transform_indices = @transform_3, window_bounds = array<i64: 1, 32>}, {transform_indices = @transform_4, window_bounds = array<i64: 512, 32>}]} {
    %c0 = arith.constant 0 : index
    %c0_0 = arith.constant 0 : index
    %0 = vector.load %arg1[%c0, %c0_0] : memref<512x32xf32, #tpu.memory_space<vmem>>, vector<512x32xf32>
    %1 = arith.truncf %0 : vector<512x32xf32> to vector<512x32xbf16>
    %c0_1 = arith.constant 0 : index
    %c0_2 = arith.constant 0 : index
    %2 = vector.load %arg2[%c0_1, %c0_2] : memref<32x32xbf16, #tpu.memory_space<vmem>>, vector<32x32xbf16>
    %cst = arith.constant dense<0.000000e+00> : vector<512x32xf32>
    %3 = tpu.matmul %1, %2, %cst {dimension_numbers = #tpu.dot_dimension_numbers<[1], [0], [0], [1], [0, 0, 1, 1], [], []>} : vector<512x32xbf16>, vector<32x32xbf16>, vector<512x32xf32> -> vector<512x32xf32>
    %c0_3 = arith.constant 0 : index
    %c0_4 = arith.constant 0 : index
    %4 = vector.load %arg3[%c0_3, %c0_4] : memref<1x32xf32, #tpu.memory_space<vmem>>, vector<1x32xf32>
    %5 = vector.broadcast %4 : vector<1x32xf32> to vector<512x32xf32>
    %6 = arith.mulf %3, %5 : vector<512x32xf32>
    %c0_5 = arith.constant 0 : index
    %c0_6 = arith.constant 0 : index
    %7 = vector.load %arg4[%c0_5, %c0_6] : memref<1x32xf32, #tpu.memory_space<vmem>>, vector<1x32xf32>
    %8 = vector.broadcast %7 : vector<1x32xf32> to vector<512x32xf32>
    %9 = arith.addf %6, %8 : vector<512x32xf32>
    %cst_7 = arith.constant 0.000000e+00 : f32
    %10 = vector.broadcast %cst_7 : f32 to vector<512x32xf32>
    %11 = arith.maximumf %9, %10 : vector<512x32xf32>
    %c0_8 = arith.constant 0 : index
    %c0_9 = arith.constant 0 : index
    %12 = vector.load %arg5[%c0_8, %c0_9] : memref<512x32xf32, #tpu.memory_space<vmem>>, vector<512x32xf32>
    tpu.vector_store %arg5[%c0_8, %c0_9], %11 {strides = array<i32>} : memref<512x32xf32, #tpu.memory_space<vmem>>, vector<512x32xf32>,
    return
  }
  func.func @transform_0(%arg0: i32) -> (i32, i32) {
    %c0_i32 = arith.constant 0 : i32
    %c0_i32_0 = arith.constant 0 : i32
    return %arg0, %c0_i32 : i32, i32
  }
  func.func @transform_1(%arg0: i32) -> (i32, i32) {
    %c0_i32 = arith.constant 0 : i32
    %c0_i32_0 = arith.constant 0 : i32
    %c0_i32_1 = arith.constant 0 : i32
    return %c0_i32, %c0_i32_0 : i32, i32
  }
  func.func @transform_2(%arg0: i32) -> (i32, i32) {
    %c0_i32 = arith.constant 0 : i32
    %c0_i32_0 = arith.constant 0 : i32
    %c0_i32_1 = arith.constant 0 : i32
    return %c0_i32, %c0_i32_0 : i32, i32
  }
  func.func @transform_3(%arg0: i32) -> (i32, i32) {
    %c0_i32 = arith.constant 0 : i32
    %c0_i32_0 = arith.constant 0 : i32
    %c0_i32_1 = arith.constant 0 : i32
    return %c0_i32, %c0_i32_0 : i32, i32
  }
  func.func @transform_4(%arg0: i32) -> (i32, i32) {
    %c0_i32 = arith.constant 0 : i32
    %c0_i32_0 = arith.constant 0 : i32
    return %arg0, %c0_i32 : i32, i32
  }
}

module attributes {stable_mosaic.version = 11 : i64} {
  func.func @_maxpool5_chain_kernel(%arg0: i32, %arg1: i32, %arg2: memref<1x16x16x32xf32, #tpu.memory_space<vmem>>, %arg3: memref<1x16x16x32xf32, #tpu.memory_space<vmem>>, %arg4: memref<1x16x16x32xf32, #tpu.memory_space<vmem>>, %arg5: memref<1x16x16x32xf32, #tpu.memory_space<vmem>>, %arg6: memref<16x20x32xf32, #tpu.memory_space<vmem>>, %arg7: memref<20x16x32xf32, #tpu.memory_space<vmem>>) attributes {dimension_semantics = [#tpu.dimension_semantics<parallel>, #tpu.dimension_semantics<parallel>], iteration_bounds = array<i64: 2, 1>, scalar_prefetch = 0 : i64, scratch_operands = 2 : i64, tpu.core_type = #tpu.core_type<tc>, window_params = [{transform_indices = @transform_0, window_bounds = array<i64: 1, 16, 16, 32>}, {transform_indices = @transform_1, window_bounds = array<i64: 1, 16, 16, 32>}, {transform_indices = @transform_2, window_bounds = array<i64: 1, 16, 16, 32>}, {transform_indices = @transform_3, window_bounds = array<i64: 1, 16, 16, 32>}]} {
    %cst = arith.constant 0.000000e+00 : f32
    %0 = vector.broadcast %cst : f32 to vector<16x20x32xf32>
    %c0 = arith.constant 0 : index
    %c0_0 = arith.constant 0 : index
    %c0_1 = arith.constant 0 : index
    %1 = vector.load %arg6[%c0, %c0_0, %c0_1] : memref<16x20x32xf32, #tpu.memory_space<vmem>>, vector<16x20x32xf32>
    tpu.vector_store %arg6[%c0, %c0_0, %c0_1], %0 {strides = array<i32>} : memref<16x20x32xf32, #tpu.memory_space<vmem>>, vector<16x20x32xf32>,
    %cst_2 = arith.constant 0.000000e+00 : f32
    %2 = vector.broadcast %cst_2 : f32 to vector<20x16x32xf32>
    %c0_3 = arith.constant 0 : index
    %c0_4 = arith.constant 0 : index
    %c0_5 = arith.constant 0 : index
    %3 = vector.load %arg7[%c0_3, %c0_4, %c0_5] : memref<20x16x32xf32, #tpu.memory_space<vmem>>, vector<20x16x32xf32>
    tpu.vector_store %arg7[%c0_3, %c0_4, %c0_5], %2 {strides = array<i32>} : memref<20x16x32xf32, #tpu.memory_space<vmem>>, vector<20x16x32xf32>,
    %c0_6 = arith.constant 0 : index
    %c0_7 = arith.constant 0 : index
    %c0_8 = arith.constant 0 : index
    %c0_9 = arith.constant 0 : index
    %4 = vector.load %arg2[%c0_6, %c0_7, %c0_8, %c0_9] : memref<1x16x16x32xf32, #tpu.memory_space<vmem>>, vector<1x16x16x32xf32>
    %5 = vector.shape_cast %4 : vector<1x16x16x32xf32> to vector<16x16x32xf32>
    %c0_10 = arith.constant 0 : index
    %c2 = arith.constant 2 : index
    %c0_11 = arith.constant 0 : index
    %6 = vector.load %arg6[%c0_10, %c2, %c0_11] : memref<16x20x32xf32, #tpu.memory_space<vmem>>, vector<16x16x32xf32>
    tpu.vector_store %arg6[%c0_10, %c2, %c0_11], %5 {strides = array<i32>} : memref<16x20x32xf32, #tpu.memory_space<vmem>>, vector<16x16x32xf32>,
    %c0_12 = arith.constant 0 : index
    %c0_13 = arith.constant 0 : index
    %c0_14 = arith.constant 0 : index
    %7 = vector.load %arg6[%c0_12, %c0_13, %c0_14] : memref<16x20x32xf32, #tpu.memory_space<vmem>>, vector<16x16x32xf32>
    %c0_15 = arith.constant 0 : index
    %c1 = arith.constant 1 : index
    %c0_16 = arith.constant 0 : index
    %8 = vector.load %arg6[%c0_15, %c1, %c0_16] : memref<16x20x32xf32, #tpu.memory_space<vmem>>, vector<16x16x32xf32>
    %9 = arith.maximumf %7, %8 : vector<16x16x32xf32>
    %c0_17 = arith.constant 0 : index
    %c2_18 = arith.constant 2 : index
    %c0_19 = arith.constant 0 : index
    %10 = vector.load %arg6[%c0_17, %c2_18, %c0_19] : memref<16x20x32xf32, #tpu.memory_space<vmem>>, vector<16x16x32xf32>
    %11 = arith.maximumf %9, %10 : vector<16x16x32xf32>
    %c0_20 = arith.constant 0 : index
    %c3 = arith.constant 3 : index
    %c0_21 = arith.constant 0 : index
    %12 = vector.load %arg6[%c0_20, %c3, %c0_21] : memref<16x20x32xf32, #tpu.memory_space<vmem>>, vector<16x16x32xf32>
    %13 = arith.maximumf %11, %12 : vector<16x16x32xf32>
    %c0_22 = arith.constant 0 : index
    %c4 = arith.constant 4 : index
    %c0_23 = arith.constant 0 : index
    %14 = vector.load %arg6[%c0_22, %c4, %c0_23] : memref<16x20x32xf32, #tpu.memory_space<vmem>>, vector<16x16x32xf32>
    %15 = arith.maximumf %13, %14 : vector<16x16x32xf32>
    %c2_24 = arith.constant 2 : index
    %c0_25 = arith.constant 0 : index
    %c0_26 = arith.constant 0 : index
    %16 = vector.load %arg7[%c2_24, %c0_25, %c0_26] : memref<20x16x32xf32, #tpu.memory_space<vmem>>, vector<16x16x32xf32>
    tpu.vector_store %arg7[%c2_24, %c0_25, %c0_26], %15 {strides = array<i32>} : memref<20x16x32xf32, #tpu.memory_space<vmem>>, vector<16x16x32xf32>,
    %c0_27 = arith.constant 0 : index
    %c0_28 = arith.constant 0 : index
    %c0_29 = arith.constant 0 : index
    %17 = vector.load %arg7[%c0_27, %c0_28, %c0_29] : memref<20x16x32xf32, #tpu.memory_space<vmem>>, vector<16x16x32xf32>
    %c1_30 = arith.constant 1 : index
    %c0_31 = arith.constant 0 : index
    %c0_32 = arith.constant 0 : index
    %18 = vector.load %arg7[%c1_30, %c0_31, %c0_32] : memref<20x16x32xf32, #tpu.memory_space<vmem>>, vector<16x16x32xf32>
    %19 = arith.maximumf %17, %18 : vector<16x16x32xf32>
    %c2_33 = arith.constant 2 : index
    %c0_34 = arith.constant 0 : index
    %c0_35 = arith.constant 0 : index
    %20 = vector.load %arg7[%c2_33, %c0_34, %c0_35] : memref<20x16x32xf32, #tpu.memory_space<vmem>>, vector<16x16x32xf32>
    %21 = arith.maximumf %19, %20 : vector<16x16x32xf32>
    %c3_36 = arith.constant 3 : index
    %c0_37 = arith.constant 0 : index
    %c0_38 = arith.constant 0 : index
    %22 = vector.load %arg7[%c3_36, %c0_37, %c0_38] : memref<20x16x32xf32, #tpu.memory_space<vmem>>, vector<16x16x32xf32>
    %23 = arith.maximumf %21, %22 : vector<16x16x32xf32>
    %c4_39 = arith.constant 4 : index
    %c0_40 = arith.constant 0 : index
    %c0_41 = arith.constant 0 : index
    %24 = vector.load %arg7[%c4_39, %c0_40, %c0_41] : memref<20x16x32xf32, #tpu.memory_space<vmem>>, vector<16x16x32xf32>
    %25 = arith.maximumf %23, %24 : vector<16x16x32xf32>
    %c0_42 = arith.constant 0 : index
    %c0_43 = arith.constant 0 : index
    %c0_44 = arith.constant 0 : index
    %c0_45 = arith.constant 0 : index
    %26 = vector.load %arg3[%c0_42, %c0_43, %c0_44, %c0_45] : memref<1x16x16x32xf32, #tpu.memory_space<vmem>>, vector<1x16x16x32xf32>
    %27 = vector.shape_cast %26 : vector<1x16x16x32xf32> to vector<16x16x32xf32>
    %28 = vector.shape_cast %25 : vector<16x16x32xf32> to vector<1x16x16x32xf32>
    tpu.vector_store %arg3[%c0_42, %c0_43, %c0_44, %c0_45], %28 {strides = array<i32>} : memref<1x16x16x32xf32, #tpu.memory_space<vmem>>, vector<1x16x16x32xf32>,
    %c0_46 = arith.constant 0 : index
    %c2_47 = arith.constant 2 : index
    %c0_48 = arith.constant 0 : index
    %29 = vector.load %arg6[%c0_46, %c2_47, %c0_48] : memref<16x20x32xf32, #tpu.memory_space<vmem>>, vector<16x16x32xf32>
    tpu.vector_store %arg6[%c0_46, %c2_47, %c0_48], %25 {strides = array<i32>} : memref<16x20x32xf32, #tpu.memory_space<vmem>>, vector<16x16x32xf32>,
    %c0_49 = arith.constant 0 : index
    %c0_50 = arith.constant 0 : index
    %c0_51 = arith.constant 0 : index
    %30 = vector.load %arg6[%c0_49, %c0_50, %c0_51] : memref<16x20x32xf32, #tpu.memory_space<vmem>>, vector<16x16x32xf32>
    %c0_52 = arith.constant 0 : index
    %c1_53 = arith.constant 1 : index
    %c0_54 = arith.constant 0 : index
    %31 = vector.load %arg6[%c0_52, %c1_53, %c0_54] : memref<16x20x32xf32, #tpu.memory_space<vmem>>, vector<16x16x32xf32>
    %32 = arith.maximumf %30, %31 : vector<16x16x32xf32>
    %c0_55 = arith.constant 0 : index
    %c2_56 = arith.constant 2 : index
    %c0_57 = arith.constant 0 : index
    %33 = vector.load %arg6[%c0_55, %c2_56, %c0_57] : memref<16x20x32xf32, #tpu.memory_space<vmem>>, vector<16x16x32xf32>
    %34 = arith.maximumf %32, %33 : vector<16x16x32xf32>
    %c0_58 = arith.constant 0 : index
    %c3_59 = arith.constant 3 : index
    %c0_60 = arith.constant 0 : index
    %35 = vector.load %arg6[%c0_58, %c3_59, %c0_60] : memref<16x20x32xf32, #tpu.memory_space<vmem>>, vector<16x16x32xf32>
    %36 = arith.maximumf %34, %35 : vector<16x16x32xf32>
    %c0_61 = arith.constant 0 : index
    %c4_62 = arith.constant 4 : index
    %c0_63 = arith.constant 0 : index
    %37 = vector.load %arg6[%c0_61, %c4_62, %c0_63] : memref<16x20x32xf32, #tpu.memory_space<vmem>>, vector<16x16x32xf32>
    %38 = arith.maximumf %36, %37 : vector<16x16x32xf32>
    %c2_64 = arith.constant 2 : index
    %c0_65 = arith.constant 0 : index
    %c0_66 = arith.constant 0 : index
    %39 = vector.load %arg7[%c2_64, %c0_65, %c0_66] : memref<20x16x32xf32, #tpu.memory_space<vmem>>, vector<16x16x32xf32>
    tpu.vector_store %arg7[%c2_64, %c0_65, %c0_66], %38 {strides = array<i32>} : memref<20x16x32xf32, #tpu.memory_space<vmem>>, vector<16x16x32xf32>,
    %c0_67 = arith.constant 0 : index
    %c0_68 = arith.constant 0 : index
    %c0_69 = arith.constant 0 : index
    %40 = vector.load %arg7[%c0_67, %c0_68, %c0_69] : memref<20x16x32xf32, #tpu.memory_space<vmem>>, vector<16x16x32xf32>
    %c1_70 = arith.constant 1 : index
    %c0_71 = arith.constant 0 : index
    %c0_72 = arith.constant 0 : index
    %41 = vector.load %arg7[%c1_70, %c0_71, %c0_72] : memref<20x16x32xf32, #tpu.memory_space<vmem>>, vector<16x16x32xf32>
    %42 = arith.maximumf %40, %41 : vector<16x16x32xf32>
    %c2_73 = arith.constant 2 : index
    %c0_74 = arith.constant 0 : index
    %c0_75 = arith.constant 0 : index
    %43 = vector.load %arg7[%c2_73, %c0_74, %c0_75] : memref<20x16x32xf32, #tpu.memory_space<vmem>>, vector<16x16x32xf32>
    %44 = arith.maximumf %42, %43 : vector<16x16x32xf32>
    %c3_76 = arith.constant 3 : index
    %c0_77 = arith.constant 0 : index
    %c0_78 = arith.constant 0 : index
    %45 = vector.load %arg7[%c3_76, %c0_77, %c0_78] : memref<20x16x32xf32, #tpu.memory_space<vmem>>, vector<16x16x32xf32>
    %46 = arith.maximumf %44, %45 : vector<16x16x32xf32>
    %c4_79 = arith.constant 4 : index
    %c0_80 = arith.constant 0 : index
    %c0_81 = arith.constant 0 : index
    %47 = vector.load %arg7[%c4_79, %c0_80, %c0_81] : memref<20x16x32xf32, #tpu.memory_space<vmem>>, vector<16x16x32xf32>
    %48 = arith.maximumf %46, %47 : vector<16x16x32xf32>
    %c0_82 = arith.constant 0 : index
    %c0_83 = arith.constant 0 : index
    %c0_84 = arith.constant 0 : index
    %c0_85 = arith.constant 0 : index
    %49 = vector.load %arg4[%c0_82, %c0_83, %c0_84, %c0_85] : memref<1x16x16x32xf32, #tpu.memory_space<vmem>>, vector<1x16x16x32xf32>
    %50 = vector.shape_cast %49 : vector<1x16x16x32xf32> to vector<16x16x32xf32>
    %51 = vector.shape_cast %48 : vector<16x16x32xf32> to vector<1x16x16x32xf32>
    tpu.vector_store %arg4[%c0_82, %c0_83, %c0_84, %c0_85], %51 {strides = array<i32>} : memref<1x16x16x32xf32, #tpu.memory_space<vmem>>, vector<1x16x16x32xf32>,
    %c0_86 = arith.constant 0 : index
    %c2_87 = arith.constant 2 : index
    %c0_88 = arith.constant 0 : index
    %52 = vector.load %arg6[%c0_86, %c2_87, %c0_88] : memref<16x20x32xf32, #tpu.memory_space<vmem>>, vector<16x16x32xf32>
    tpu.vector_store %arg6[%c0_86, %c2_87, %c0_88], %48 {strides = array<i32>} : memref<16x20x32xf32, #tpu.memory_space<vmem>>, vector<16x16x32xf32>,
    %c0_89 = arith.constant 0 : index
    %c0_90 = arith.constant 0 : index
    %c0_91 = arith.constant 0 : index
    %53 = vector.load %arg6[%c0_89, %c0_90, %c0_91] : memref<16x20x32xf32, #tpu.memory_space<vmem>>, vector<16x16x32xf32>
    %c0_92 = arith.constant 0 : index
    %c1_93 = arith.constant 1 : index
    %c0_94 = arith.constant 0 : index
    %54 = vector.load %arg6[%c0_92, %c1_93, %c0_94] : memref<16x20x32xf32, #tpu.memory_space<vmem>>, vector<16x16x32xf32>
    %55 = arith.maximumf %53, %54 : vector<16x16x32xf32>
    %c0_95 = arith.constant 0 : index
    %c2_96 = arith.constant 2 : index
    %c0_97 = arith.constant 0 : index
    %56 = vector.load %arg6[%c0_95, %c2_96, %c0_97] : memref<16x20x32xf32, #tpu.memory_space<vmem>>, vector<16x16x32xf32>
    %57 = arith.maximumf %55, %56 : vector<16x16x32xf32>
    %c0_98 = arith.constant 0 : index
    %c3_99 = arith.constant 3 : index
    %c0_100 = arith.constant 0 : index
    %58 = vector.load %arg6[%c0_98, %c3_99, %c0_100] : memref<16x20x32xf32, #tpu.memory_space<vmem>>, vector<16x16x32xf32>
    %59 = arith.maximumf %57, %58 : vector<16x16x32xf32>
    %c0_101 = arith.constant 0 : index
    %c4_102 = arith.constant 4 : index
    %c0_103 = arith.constant 0 : index
    %60 = vector.load %arg6[%c0_101, %c4_102, %c0_103] : memref<16x20x32xf32, #tpu.memory_space<vmem>>, vector<16x16x32xf32>
    %61 = arith.maximumf %59, %60 : vector<16x16x32xf32>
    %c2_104 = arith.constant 2 : index
    %c0_105 = arith.constant 0 : index
    %c0_106 = arith.constant 0 : index
    %62 = vector.load %arg7[%c2_104, %c0_105, %c0_106] : memref<20x16x32xf32, #tpu.memory_space<vmem>>, vector<16x16x32xf32>
    tpu.vector_store %arg7[%c2_104, %c0_105, %c0_106], %61 {strides = array<i32>} : memref<20x16x32xf32, #tpu.memory_space<vmem>>, vector<16x16x32xf32>,
    %c0_107 = arith.constant 0 : index
    %c0_108 = arith.constant 0 : index
    %c0_109 = arith.constant 0 : index
    %63 = vector.load %arg7[%c0_107, %c0_108, %c0_109] : memref<20x16x32xf32, #tpu.memory_space<vmem>>, vector<16x16x32xf32>
    %c1_110 = arith.constant 1 : index
    %c0_111 = arith.constant 0 : index
    %c0_112 = arith.constant 0 : index
    %64 = vector.load %arg7[%c1_110, %c0_111, %c0_112] : memref<20x16x32xf32, #tpu.memory_space<vmem>>, vector<16x16x32xf32>
    %65 = arith.maximumf %63, %64 : vector<16x16x32xf32>
    %c2_113 = arith.constant 2 : index
    %c0_114 = arith.constant 0 : index
    %c0_115 = arith.constant 0 : index
    %66 = vector.load %arg7[%c2_113, %c0_114, %c0_115] : memref<20x16x32xf32, #tpu.memory_space<vmem>>, vector<16x16x32xf32>
    %67 = arith.maximumf %65, %66 : vector<16x16x32xf32>
    %c3_116 = arith.constant 3 : index
    %c0_117 = arith.constant 0 : index
    %c0_118 = arith.constant 0 : index
    %68 = vector.load %arg7[%c3_116, %c0_117, %c0_118] : memref<20x16x32xf32, #tpu.memory_space<vmem>>, vector<16x16x32xf32>
    %69 = arith.maximumf %67, %68 : vector<16x16x32xf32>
    %c4_119 = arith.constant 4 : index
    %c0_120 = arith.constant 0 : index
    %c0_121 = arith.constant 0 : index
    %70 = vector.load %arg7[%c4_119, %c0_120, %c0_121] : memref<20x16x32xf32, #tpu.memory_space<vmem>>, vector<16x16x32xf32>
    %71 = arith.maximumf %69, %70 : vector<16x16x32xf32>
    %c0_122 = arith.constant 0 : index
    %c0_123 = arith.constant 0 : index
    %c0_124 = arith.constant 0 : index
    %c0_125 = arith.constant 0 : index
    %72 = vector.load %arg5[%c0_122, %c0_123, %c0_124, %c0_125] : memref<1x16x16x32xf32, #tpu.memory_space<vmem>>, vector<1x16x16x32xf32>
    %73 = vector.shape_cast %72 : vector<1x16x16x32xf32> to vector<16x16x32xf32>
    %74 = vector.shape_cast %71 : vector<16x16x32xf32> to vector<1x16x16x32xf32>
    tpu.vector_store %arg5[%c0_122, %c0_123, %c0_124, %c0_125], %74 {strides = array<i32>} : memref<1x16x16x32xf32, #tpu.memory_space<vmem>>, vector<1x16x16x32xf32>,
    return
  }
  func.func @transform_0(%arg0: i32, %arg1: i32) -> (i32, i32, i32, i32) {
    %c0_i32 = arith.constant 0 : i32
    %c0_i32_0 = arith.constant 0 : i32
    %c0_i32_1 = arith.constant 0 : i32
    return %arg0, %c0_i32, %c0_i32_0, %arg1 : i32, i32, i32, i32
  }
  func.func @transform_1(%arg0: i32, %arg1: i32) -> (i32, i32, i32, i32) {
    %c0_i32 = arith.constant 0 : i32
    %c0_i32_0 = arith.constant 0 : i32
    %c0_i32_1 = arith.constant 0 : i32
    return %arg0, %c0_i32, %c0_i32_0, %arg1 : i32, i32, i32, i32
  }
  func.func @transform_2(%arg0: i32, %arg1: i32) -> (i32, i32, i32, i32) {
    %c0_i32 = arith.constant 0 : i32
    %c0_i32_0 = arith.constant 0 : i32
    %c0_i32_1 = arith.constant 0 : i32
    return %arg0, %c0_i32, %c0_i32_0, %arg1 : i32, i32, i32, i32
  }
  func.func @transform_3(%arg0: i32, %arg1: i32) -> (i32, i32, i32, i32) {
    %c0_i32 = arith.constant 0 : i32
    %c0_i32_0 = arith.constant 0 : i32
    %c0_i32_1 = arith.constant 0 : i32
    return %arg0, %c0_i32, %c0_i32_0, %arg1 : i32, i32, i32, i32
  }
}

module attributes {stable_mosaic.version = 11 : i64} {
  func.func @_conv3x3_kernel(%arg0: i32, %arg1: memref<1x16x16x32xf32, #tpu.memory_space<vmem>>, %arg2: memref<9x32x32xbf16, #tpu.memory_space<vmem>>, %arg3: memref<1x32xf32, #tpu.memory_space<vmem>>, %arg4: memref<1x32xf32, #tpu.memory_space<vmem>>, %arg5: memref<1x16x16x32xf32, #tpu.memory_space<vmem>>, %arg6: memref<18x18x32xf32, #tpu.memory_space<vmem>>) attributes {dimension_semantics = [#tpu.dimension_semantics<parallel>], iteration_bounds = array<i64: 2>, scalar_prefetch = 0 : i64, scratch_operands = 1 : i64, tpu.core_type = #tpu.core_type<tc>, window_params = [{transform_indices = @transform_0, window_bounds = array<i64: 1, 16, 16, 32>}, {pipeline_mode = #tpu.pipeline_mode<synchronous>, transform_indices = @transform_1, window_bounds = array<i64: 9, 32, 32>}, {pipeline_mode = #tpu.pipeline_mode<synchronous>, transform_indices = @transform_2, window_bounds = array<i64: 1, 32>}, {pipeline_mode = #tpu.pipeline_mode<synchronous>, transform_indices = @transform_3, window_bounds = array<i64: 1, 32>}, {transform_indices = @transform_4, window_bounds = array<i64: 1, 16, 16, 32>}]} {
    %cst = arith.constant 0.000000e+00 : f32
    %0 = vector.broadcast %cst : f32 to vector<18x18x32xf32>
    %c0 = arith.constant 0 : index
    %c0_0 = arith.constant 0 : index
    %c0_1 = arith.constant 0 : index
    %1 = vector.load %arg6[%c0, %c0_0, %c0_1] : memref<18x18x32xf32, #tpu.memory_space<vmem>>, vector<18x18x32xf32>
    tpu.vector_store %arg6[%c0, %c0_0, %c0_1], %0 {strides = array<i32>} : memref<18x18x32xf32, #tpu.memory_space<vmem>>, vector<18x18x32xf32>,
    %c0_2 = arith.constant 0 : index
    %c0_3 = arith.constant 0 : index
    %c0_4 = arith.constant 0 : index
    %c0_5 = arith.constant 0 : index
    %2 = vector.load %arg1[%c0_2, %c0_3, %c0_4, %c0_5] : memref<1x16x16x32xf32, #tpu.memory_space<vmem>>, vector<1x16x16x32xf32>
    %3 = vector.shape_cast %2 : vector<1x16x16x32xf32> to vector<16x16x32xf32>
    %c1 = arith.constant 1 : index
    %c1_6 = arith.constant 1 : index
    %c0_7 = arith.constant 0 : index
    %4 = vector.load %arg6[%c1, %c1_6, %c0_7] : memref<18x18x32xf32, #tpu.memory_space<vmem>>, vector<16x16x32xf32>
    tpu.vector_store %arg6[%c1, %c1_6, %c0_7], %3 {strides = array<i32>} : memref<18x18x32xf32, #tpu.memory_space<vmem>>, vector<16x16x32xf32>,
    %cst_8 = arith.constant 0.000000e+00 : f32
    %5 = vector.broadcast %cst_8 : f32 to vector<256x32xf32>
    %c0_9 = arith.constant 0 : index
    %c0_10 = arith.constant 0 : index
    %c0_11 = arith.constant 0 : index
    %6 = vector.load %arg6[%c0_9, %c0_10, %c0_11] : memref<18x18x32xf32, #tpu.memory_space<vmem>>, vector<16x16x32xf32>
    %7 = vector.shape_cast %6 : vector<16x16x32xf32> to vector<256x32xf32>
    %8 = arith.truncf %7 : vector<256x32xf32> to vector<256x32xbf16>
    %c0_12 = arith.constant 0 : index
    %c0_13 = arith.constant 0 : index
    %c0_14 = arith.constant 0 : index
    %9 = vector.load %arg2[%c0_12, %c0_13, %c0_14] : memref<9x32x32xbf16, #tpu.memory_space<vmem>>, vector<1x32x32xbf16>
    %10 = vector.shape_cast %9 : vector<1x32x32xbf16> to vector<32x32xbf16>
    %cst_15 = arith.constant dense<0.000000e+00> : vector<256x32xf32>
    %11 = tpu.matmul %8, %10, %cst_15 {dimension_numbers = #tpu.dot_dimension_numbers<[1], [0], [0], [1], [0, 0, 1, 1], [], []>} : vector<256x32xbf16>, vector<32x32xbf16>, vector<256x32xf32> -> vector<256x32xf32>
    %12 = arith.addf %5, %11 : vector<256x32xf32>
    %c0_16 = arith.constant 0 : index
    %c1_17 = arith.constant 1 : index
    %c0_18 = arith.constant 0 : index
    %13 = vector.load %arg6[%c0_16, %c1_17, %c0_18] : memref<18x18x32xf32, #tpu.memory_space<vmem>>, vector<16x16x32xf32>
    %14 = vector.shape_cast %13 : vector<16x16x32xf32> to vector<256x32xf32>
    %15 = arith.truncf %14 : vector<256x32xf32> to vector<256x32xbf16>
    %c1_19 = arith.constant 1 : index
    %c0_20 = arith.constant 0 : index
    %c0_21 = arith.constant 0 : index
    %16 = vector.load %arg2[%c1_19, %c0_20, %c0_21] : memref<9x32x32xbf16, #tpu.memory_space<vmem>>, vector<1x32x32xbf16>
    %17 = vector.shape_cast %16 : vector<1x32x32xbf16> to vector<32x32xbf16>
    %cst_22 = arith.constant dense<0.000000e+00> : vector<256x32xf32>
    %18 = tpu.matmul %15, %17, %cst_22 {dimension_numbers = #tpu.dot_dimension_numbers<[1], [0], [0], [1], [0, 0, 1, 1], [], []>} : vector<256x32xbf16>, vector<32x32xbf16>, vector<256x32xf32> -> vector<256x32xf32>
    %19 = arith.addf %12, %18 : vector<256x32xf32>
    %c0_23 = arith.constant 0 : index
    %c2 = arith.constant 2 : index
    %c0_24 = arith.constant 0 : index
    %20 = vector.load %arg6[%c0_23, %c2, %c0_24] : memref<18x18x32xf32, #tpu.memory_space<vmem>>, vector<16x16x32xf32>
    %21 = vector.shape_cast %20 : vector<16x16x32xf32> to vector<256x32xf32>
    %22 = arith.truncf %21 : vector<256x32xf32> to vector<256x32xbf16>
    %c2_25 = arith.constant 2 : index
    %c0_26 = arith.constant 0 : index
    %c0_27 = arith.constant 0 : index
    %23 = vector.load %arg2[%c2_25, %c0_26, %c0_27] : memref<9x32x32xbf16, #tpu.memory_space<vmem>>, vector<1x32x32xbf16>
    %24 = vector.shape_cast %23 : vector<1x32x32xbf16> to vector<32x32xbf16>
    %cst_28 = arith.constant dense<0.000000e+00> : vector<256x32xf32>
    %25 = tpu.matmul %22, %24, %cst_28 {dimension_numbers = #tpu.dot_dimension_numbers<[1], [0], [0], [1], [0, 0, 1, 1], [], []>} : vector<256x32xbf16>, vector<32x32xbf16>, vector<256x32xf32> -> vector<256x32xf32>
    %26 = arith.addf %19, %25 : vector<256x32xf32>
    %c1_29 = arith.constant 1 : index
    %c0_30 = arith.constant 0 : index
    %c0_31 = arith.constant 0 : index
    %27 = vector.load %arg6[%c1_29, %c0_30, %c0_31] : memref<18x18x32xf32, #tpu.memory_space<vmem>>, vector<16x16x32xf32>
    %28 = vector.shape_cast %27 : vector<16x16x32xf32> to vector<256x32xf32>
    %29 = arith.truncf %28 : vector<256x32xf32> to vector<256x32xbf16>
    %c3 = arith.constant 3 : index
    %c0_32 = arith.constant 0 : index
    %c0_33 = arith.constant 0 : index
    %30 = vector.load %arg2[%c3, %c0_32, %c0_33] : memref<9x32x32xbf16, #tpu.memory_space<vmem>>, vector<1x32x32xbf16>
    %31 = vector.shape_cast %30 : vector<1x32x32xbf16> to vector<32x32xbf16>
    %cst_34 = arith.constant dense<0.000000e+00> : vector<256x32xf32>
    %32 = tpu.matmul %29, %31, %cst_34 {dimension_numbers = #tpu.dot_dimension_numbers<[1], [0], [0], [1], [0, 0, 1, 1], [], []>} : vector<256x32xbf16>, vector<32x32xbf16>, vector<256x32xf32> -> vector<256x32xf32>
    %33 = arith.addf %26, %32 : vector<256x32xf32>
    %c1_35 = arith.constant 1 : index
    %c1_36 = arith.constant 1 : index
    %c0_37 = arith.constant 0 : index
    %34 = vector.load %arg6[%c1_35, %c1_36, %c0_37] : memref<18x18x32xf32, #tpu.memory_space<vmem>>, vector<16x16x32xf32>
    %35 = vector.shape_cast %34 : vector<16x16x32xf32> to vector<256x32xf32>
    %36 = arith.truncf %35 : vector<256x32xf32> to vector<256x32xbf16>
    %c4 = arith.constant 4 : index
    %c0_38 = arith.constant 0 : index
    %c0_39 = arith.constant 0 : index
    %37 = vector.load %arg2[%c4, %c0_38, %c0_39] : memref<9x32x32xbf16, #tpu.memory_space<vmem>>, vector<1x32x32xbf16>
    %38 = vector.shape_cast %37 : vector<1x32x32xbf16> to vector<32x32xbf16>
    %cst_40 = arith.constant dense<0.000000e+00> : vector<256x32xf32>
    %39 = tpu.matmul %36, %38, %cst_40 {dimension_numbers = #tpu.dot_dimension_numbers<[1], [0], [0], [1], [0, 0, 1, 1], [], []>} : vector<256x32xbf16>, vector<32x32xbf16>, vector<256x32xf32> -> vector<256x32xf32>
    %40 = arith.addf %33, %39 : vector<256x32xf32>
    %c1_41 = arith.constant 1 : index
    %c2_42 = arith.constant 2 : index
    %c0_43 = arith.constant 0 : index
    %41 = vector.load %arg6[%c1_41, %c2_42, %c0_43] : memref<18x18x32xf32, #tpu.memory_space<vmem>>, vector<16x16x32xf32>
    %42 = vector.shape_cast %41 : vector<16x16x32xf32> to vector<256x32xf32>
    %43 = arith.truncf %42 : vector<256x32xf32> to vector<256x32xbf16>
    %c5 = arith.constant 5 : index
    %c0_44 = arith.constant 0 : index
    %c0_45 = arith.constant 0 : index
    %44 = vector.load %arg2[%c5, %c0_44, %c0_45] : memref<9x32x32xbf16, #tpu.memory_space<vmem>>, vector<1x32x32xbf16>
    %45 = vector.shape_cast %44 : vector<1x32x32xbf16> to vector<32x32xbf16>
    %cst_46 = arith.constant dense<0.000000e+00> : vector<256x32xf32>
    %46 = tpu.matmul %43, %45, %cst_46 {dimension_numbers = #tpu.dot_dimension_numbers<[1], [0], [0], [1], [0, 0, 1, 1], [], []>} : vector<256x32xbf16>, vector<32x32xbf16>, vector<256x32xf32> -> vector<256x32xf32>
    %47 = arith.addf %40, %46 : vector<256x32xf32>
    %c2_47 = arith.constant 2 : index
    %c0_48 = arith.constant 0 : index
    %c0_49 = arith.constant 0 : index
    %48 = vector.load %arg6[%c2_47, %c0_48, %c0_49] : memref<18x18x32xf32, #tpu.memory_space<vmem>>, vector<16x16x32xf32>
    %49 = vector.shape_cast %48 : vector<16x16x32xf32> to vector<256x32xf32>
    %50 = arith.truncf %49 : vector<256x32xf32> to vector<256x32xbf16>
    %c6 = arith.constant 6 : index
    %c0_50 = arith.constant 0 : index
    %c0_51 = arith.constant 0 : index
    %51 = vector.load %arg2[%c6, %c0_50, %c0_51] : memref<9x32x32xbf16, #tpu.memory_space<vmem>>, vector<1x32x32xbf16>
    %52 = vector.shape_cast %51 : vector<1x32x32xbf16> to vector<32x32xbf16>
    %cst_52 = arith.constant dense<0.000000e+00> : vector<256x32xf32>
    %53 = tpu.matmul %50, %52, %cst_52 {dimension_numbers = #tpu.dot_dimension_numbers<[1], [0], [0], [1], [0, 0, 1, 1], [], []>} : vector<256x32xbf16>, vector<32x32xbf16>, vector<256x32xf32> -> vector<256x32xf32>
    %54 = arith.addf %47, %53 : vector<256x32xf32>
    %c2_53 = arith.constant 2 : index
    %c1_54 = arith.constant 1 : index
    %c0_55 = arith.constant 0 : index
    %55 = vector.load %arg6[%c2_53, %c1_54, %c0_55] : memref<18x18x32xf32, #tpu.memory_space<vmem>>, vector<16x16x32xf32>
    %56 = vector.shape_cast %55 : vector<16x16x32xf32> to vector<256x32xf32>
    %57 = arith.truncf %56 : vector<256x32xf32> to vector<256x32xbf16>
    %c7 = arith.constant 7 : index
    %c0_56 = arith.constant 0 : index
    %c0_57 = arith.constant 0 : index
    %58 = vector.load %arg2[%c7, %c0_56, %c0_57] : memref<9x32x32xbf16, #tpu.memory_space<vmem>>, vector<1x32x32xbf16>
    %59 = vector.shape_cast %58 : vector<1x32x32xbf16> to vector<32x32xbf16>
    %cst_58 = arith.constant dense<0.000000e+00> : vector<256x32xf32>
    %60 = tpu.matmul %57, %59, %cst_58 {dimension_numbers = #tpu.dot_dimension_numbers<[1], [0], [0], [1], [0, 0, 1, 1], [], []>} : vector<256x32xbf16>, vector<32x32xbf16>, vector<256x32xf32> -> vector<256x32xf32>
    %61 = arith.addf %54, %60 : vector<256x32xf32>
    %c2_59 = arith.constant 2 : index
    %c2_60 = arith.constant 2 : index
    %c0_61 = arith.constant 0 : index
    %62 = vector.load %arg6[%c2_59, %c2_60, %c0_61] : memref<18x18x32xf32, #tpu.memory_space<vmem>>, vector<16x16x32xf32>
    %63 = vector.shape_cast %62 : vector<16x16x32xf32> to vector<256x32xf32>
    %64 = arith.truncf %63 : vector<256x32xf32> to vector<256x32xbf16>
    %c8 = arith.constant 8 : index
    %c0_62 = arith.constant 0 : index
    %c0_63 = arith.constant 0 : index
    %65 = vector.load %arg2[%c8, %c0_62, %c0_63] : memref<9x32x32xbf16, #tpu.memory_space<vmem>>, vector<1x32x32xbf16>
    %66 = vector.shape_cast %65 : vector<1x32x32xbf16> to vector<32x32xbf16>
    %cst_64 = arith.constant dense<0.000000e+00> : vector<256x32xf32>
    %67 = tpu.matmul %64, %66, %cst_64 {dimension_numbers = #tpu.dot_dimension_numbers<[1], [0], [0], [1], [0, 0, 1, 1], [], []>} : vector<256x32xbf16>, vector<32x32xbf16>, vector<256x32xf32> -> vector<256x32xf32>
    %68 = arith.addf %61, %67 : vector<256x32xf32>
    %c0_65 = arith.constant 0 : index
    %c0_66 = arith.constant 0 : index
    %69 = vector.load %arg3[%c0_65, %c0_66] : memref<1x32xf32, #tpu.memory_space<vmem>>, vector<1x32xf32>
    %70 = vector.broadcast %69 : vector<1x32xf32> to vector<256x32xf32>
    %71 = arith.mulf %68, %70 : vector<256x32xf32>
    %c0_67 = arith.constant 0 : index
    %c0_68 = arith.constant 0 : index
    %72 = vector.load %arg4[%c0_67, %c0_68] : memref<1x32xf32, #tpu.memory_space<vmem>>, vector<1x32xf32>
    %73 = vector.broadcast %72 : vector<1x32xf32> to vector<256x32xf32>
    %74 = arith.addf %71, %73 : vector<256x32xf32>
    %cst_69 = arith.constant 0.000000e+00 : f32
    %75 = vector.broadcast %cst_69 : f32 to vector<256x32xf32>
    %76 = arith.maximumf %74, %75 : vector<256x32xf32>
    %77 = vector.shape_cast %76 : vector<256x32xf32> to vector<16x16x32xf32>
    %c0_70 = arith.constant 0 : index
    %c0_71 = arith.constant 0 : index
    %c0_72 = arith.constant 0 : index
    %c0_73 = arith.constant 0 : index
    %78 = vector.load %arg5[%c0_70, %c0_71, %c0_72, %c0_73] : memref<1x16x16x32xf32, #tpu.memory_space<vmem>>, vector<1x16x16x32xf32>
    %79 = vector.shape_cast %78 : vector<1x16x16x32xf32> to vector<16x16x32xf32>
    %80 = vector.shape_cast %77 : vector<16x16x32xf32> to vector<1x16x16x32xf32>
    tpu.vector_store %arg5[%c0_70, %c0_71, %c0_72, %c0_73], %80 {strides = array<i32>} : memref<1x16x16x32xf32, #tpu.memory_space<vmem>>, vector<1x16x16x32xf32>,
    return
  }
  func.func @transform_0(%arg0: i32) -> (i32, i32, i32, i32) {
    %c0_i32 = arith.constant 0 : i32
    %c0_i32_0 = arith.constant 0 : i32
    %c0_i32_1 = arith.constant 0 : i32
    %c0_i32_2 = arith.constant 0 : i32
    return %arg0, %c0_i32, %c0_i32_0, %c0_i32_1 : i32, i32, i32, i32
  }
  func.func @transform_1(%arg0: i32) -> (i32, i32, i32) {
    %c0_i32 = arith.constant 0 : i32
    %c0_i32_0 = arith.constant 0 : i32
    %c0_i32_1 = arith.constant 0 : i32
    %c0_i32_2 = arith.constant 0 : i32
    return %c0_i32, %c0_i32_0, %c0_i32_1 : i32, i32, i32
  }
  func.func @transform_2(%arg0: i32) -> (i32, i32) {
    %c0_i32 = arith.constant 0 : i32
    %c0_i32_0 = arith.constant 0 : i32
    %c0_i32_1 = arith.constant 0 : i32
    return %c0_i32, %c0_i32_0 : i32, i32
  }
  func.func @transform_3(%arg0: i32) -> (i32, i32) {
    %c0_i32 = arith.constant 0 : i32
    %c0_i32_0 = arith.constant 0 : i32
    %c0_i32_1 = arith.constant 0 : i32
    return %c0_i32, %c0_i32_0 : i32, i32
  }
  func.func @transform_4(%arg0: i32) -> (i32, i32, i32, i32) {
    %c0_i32 = arith.constant 0 : i32
    %c0_i32_0 = arith.constant 0 : i32
    %c0_i32_1 = arith.constant 0 : i32
    %c0_i32_2 = arith.constant 0 : i32
    return %arg0, %c0_i32, %c0_i32_0, %c0_i32_1 : i32, i32, i32, i32
  }
}

module attributes {stable_mosaic.version = 11 : i64} {
  func.func @_conv1x1_cat2_kernel(%arg0: i32, %arg1: memref<512x32xf32, #tpu.memory_space<vmem>>, %arg2: memref<512x32xf32, #tpu.memory_space<vmem>>, %arg3: memref<2x32x32xbf16, #tpu.memory_space<vmem>>, %arg4: memref<1x32xf32, #tpu.memory_space<vmem>>, %arg5: memref<1x32xf32, #tpu.memory_space<vmem>>, %arg6: memref<512x32xf32, #tpu.memory_space<vmem>>) attributes {dimension_semantics = [#tpu.dimension_semantics<parallel>], iteration_bounds = array<i64: 1>, scalar_prefetch = 0 : i64, scratch_operands = 0 : i64, tpu.core_type = #tpu.core_type<tc>, window_params = [{transform_indices = @transform_0, window_bounds = array<i64: 512, 32>}, {transform_indices = @transform_1, window_bounds = array<i64: 512, 32>}, {pipeline_mode = #tpu.pipeline_mode<synchronous>, transform_indices = @transform_2, window_bounds = array<i64: 2, 32, 32>}, {pipeline_mode = #tpu.pipeline_mode<synchronous>, transform_indices = @transform_3, window_bounds = array<i64: 1, 32>}, {pipeline_mode = #tpu.pipeline_mode<synchronous>, transform_indices = @transform_4, window_bounds = array<i64: 1, 32>}, {transform_indices = @transform_5, window_bounds = array<i64: 512, 32>}]} {
    %c0 = arith.constant 0 : index
    %c0_0 = arith.constant 0 : index
    %0 = vector.load %arg1[%c0, %c0_0] : memref<512x32xf32, #tpu.memory_space<vmem>>, vector<512x32xf32>
    %1 = arith.truncf %0 : vector<512x32xf32> to vector<512x32xbf16>
    %c0_1 = arith.constant 0 : index
    %c0_2 = arith.constant 0 : index
    %c0_3 = arith.constant 0 : index
    %2 = vector.load %arg3[%c0_1, %c0_2, %c0_3] : memref<2x32x32xbf16, #tpu.memory_space<vmem>>, vector<1x32x32xbf16>
    %3 = vector.shape_cast %2 : vector<1x32x32xbf16> to vector<32x32xbf16>
    %cst = arith.constant dense<0.000000e+00> : vector<512x32xf32>
    %4 = tpu.matmul %1, %3, %cst {dimension_numbers = #tpu.dot_dimension_numbers<[1], [0], [0], [1], [0, 0, 1, 1], [], []>} : vector<512x32xbf16>, vector<32x32xbf16>, vector<512x32xf32> -> vector<512x32xf32>
    %c0_4 = arith.constant 0 : index
    %c0_5 = arith.constant 0 : index
    %5 = vector.load %arg2[%c0_4, %c0_5] : memref<512x32xf32, #tpu.memory_space<vmem>>, vector<512x32xf32>
    %6 = arith.truncf %5 : vector<512x32xf32> to vector<512x32xbf16>
    %c1 = arith.constant 1 : index
    %c0_6 = arith.constant 0 : index
    %c0_7 = arith.constant 0 : index
    %7 = vector.load %arg3[%c1, %c0_6, %c0_7] : memref<2x32x32xbf16, #tpu.memory_space<vmem>>, vector<1x32x32xbf16>
    %8 = vector.shape_cast %7 : vector<1x32x32xbf16> to vector<32x32xbf16>
    %cst_8 = arith.constant dense<0.000000e+00> : vector<512x32xf32>
    %9 = tpu.matmul %6, %8, %cst_8 {dimension_numbers = #tpu.dot_dimension_numbers<[1], [0], [0], [1], [0, 0, 1, 1], [], []>} : vector<512x32xbf16>, vector<32x32xbf16>, vector<512x32xf32> -> vector<512x32xf32>
    %10 = arith.addf %4, %9 : vector<512x32xf32>
    %c0_9 = arith.constant 0 : index
    %c0_10 = arith.constant 0 : index
    %11 = vector.load %arg4[%c0_9, %c0_10] : memref<1x32xf32, #tpu.memory_space<vmem>>, vector<1x32xf32>
    %12 = vector.broadcast %11 : vector<1x32xf32> to vector<512x32xf32>
    %13 = arith.mulf %10, %12 : vector<512x32xf32>
    %c0_11 = arith.constant 0 : index
    %c0_12 = arith.constant 0 : index
    %14 = vector.load %arg5[%c0_11, %c0_12] : memref<1x32xf32, #tpu.memory_space<vmem>>, vector<1x32xf32>
    %15 = vector.broadcast %14 : vector<1x32xf32> to vector<512x32xf32>
    %16 = arith.addf %13, %15 : vector<512x32xf32>
    %cst_13 = arith.constant 0.000000e+00 : f32
    %17 = vector.broadcast %cst_13 : f32 to vector<512x32xf32>
    %18 = arith.maximumf %16, %17 : vector<512x32xf32>
    %c0_14 = arith.constant 0 : index
    %c0_15 = arith.constant 0 : index
    %19 = vector.load %arg6[%c0_14, %c0_15] : memref<512x32xf32, #tpu.memory_space<vmem>>, vector<512x32xf32>
    tpu.vector_store %arg6[%c0_14, %c0_15], %18 {strides = array<i32>} : memref<512x32xf32, #tpu.memory_space<vmem>>, vector<512x32xf32>,
    return
  }
  func.func @transform_0(%arg0: i32) -> (i32, i32) {
    %c0_i32 = arith.constant 0 : i32
    %c0_i32_0 = arith.constant 0 : i32
    return %arg0, %c0_i32 : i32, i32
  }
  func.func @transform_1(%arg0: i32) -> (i32, i32) {
    %c0_i32 = arith.constant 0 : i32
    %c0_i32_0 = arith.constant 0 : i32
    return %arg0, %c0_i32 : i32, i32
  }
  func.func @transform_2(%arg0: i32) -> (i32, i32, i32) {
    %c0_i32 = arith.constant 0 : i32
    %c0_i32_0 = arith.constant 0 : i32
    %c0_i32_1 = arith.constant 0 : i32
    %c0_i32_2 = arith.constant 0 : i32
    return %c0_i32, %c0_i32_0, %c0_i32_1 : i32, i32, i32
  }
  func.func @transform_3(%arg0: i32) -> (i32, i32) {
    %c0_i32 = arith.constant 0 : i32
    %c0_i32_0 = arith.constant 0 : i32
    %c0_i32_1 = arith.constant 0 : i32
    return %c0_i32, %c0_i32_0 : i32, i32
  }
  func.func @transform_4(%arg0: i32) -> (i32, i32) {
    %c0_i32 = arith.constant 0 : i32
    %c0_i32_0 = arith.constant 0 : i32
    %c0_i32_1 = arith.constant 0 : i32
    return %c0_i32, %c0_i32_0 : i32, i32
  }
  func.func @transform_5(%arg0: i32) -> (i32, i32) {
    %c0_i32 = arith.constant 0 : i32
    %c0_i32_0 = arith.constant 0 : i32
    return %arg0, %c0_i32 : i32, i32
  }
}

module attributes {stable_mosaic.version = 11 : i64} {
  func.func @_conv1x1_cat4_kernel(%arg0: i32, %arg1: memref<512x32xf32, #tpu.memory_space<vmem>>, %arg2: memref<512x32xf32, #tpu.memory_space<vmem>>, %arg3: memref<512x32xf32, #tpu.memory_space<vmem>>, %arg4: memref<512x32xf32, #tpu.memory_space<vmem>>, %arg5: memref<4x32x32xbf16, #tpu.memory_space<vmem>>, %arg6: memref<1x32xf32, #tpu.memory_space<vmem>>, %arg7: memref<1x32xf32, #tpu.memory_space<vmem>>, %arg8: memref<512x32xf32, #tpu.memory_space<vmem>>) attributes {dimension_semantics = [#tpu.dimension_semantics<parallel>], iteration_bounds = array<i64: 1>, scalar_prefetch = 0 : i64, scratch_operands = 0 : i64, tpu.core_type = #tpu.core_type<tc>, window_params = [{transform_indices = @transform_0, window_bounds = array<i64: 512, 32>}, {transform_indices = @transform_1, window_bounds = array<i64: 512, 32>}, {transform_indices = @transform_2, window_bounds = array<i64: 512, 32>}, {transform_indices = @transform_3, window_bounds = array<i64: 512, 32>}, {pipeline_mode = #tpu.pipeline_mode<synchronous>, transform_indices = @transform_4, window_bounds = array<i64: 4, 32, 32>}, {pipeline_mode = #tpu.pipeline_mode<synchronous>, transform_indices = @transform_5, window_bounds = array<i64: 1, 32>}, {pipeline_mode = #tpu.pipeline_mode<synchronous>, transform_indices = @transform_6, window_bounds = array<i64: 1, 32>}, {transform_indices = @transform_7, window_bounds = array<i64: 512, 32>}]} {
    %c0 = arith.constant 0 : index
    %c0_0 = arith.constant 0 : index
    %0 = vector.load %arg1[%c0, %c0_0] : memref<512x32xf32, #tpu.memory_space<vmem>>, vector<512x32xf32>
    %1 = arith.truncf %0 : vector<512x32xf32> to vector<512x32xbf16>
    %c0_1 = arith.constant 0 : index
    %c0_2 = arith.constant 0 : index
    %c0_3 = arith.constant 0 : index
    %2 = vector.load %arg5[%c0_1, %c0_2, %c0_3] : memref<4x32x32xbf16, #tpu.memory_space<vmem>>, vector<1x32x32xbf16>
    %3 = vector.shape_cast %2 : vector<1x32x32xbf16> to vector<32x32xbf16>
    %cst = arith.constant dense<0.000000e+00> : vector<512x32xf32>
    %4 = tpu.matmul %1, %3, %cst {dimension_numbers = #tpu.dot_dimension_numbers<[1], [0], [0], [1], [0, 0, 1, 1], [], []>} : vector<512x32xbf16>, vector<32x32xbf16>, vector<512x32xf32> -> vector<512x32xf32>
    %c0_4 = arith.constant 0 : index
    %c0_5 = arith.constant 0 : index
    %5 = vector.load %arg2[%c0_4, %c0_5] : memref<512x32xf32, #tpu.memory_space<vmem>>, vector<512x32xf32>
    %6 = arith.truncf %5 : vector<512x32xf32> to vector<512x32xbf16>
    %c1 = arith.constant 1 : index
    %c0_6 = arith.constant 0 : index
    %c0_7 = arith.constant 0 : index
    %7 = vector.load %arg5[%c1, %c0_6, %c0_7] : memref<4x32x32xbf16, #tpu.memory_space<vmem>>, vector<1x32x32xbf16>
    %8 = vector.shape_cast %7 : vector<1x32x32xbf16> to vector<32x32xbf16>
    %cst_8 = arith.constant dense<0.000000e+00> : vector<512x32xf32>
    %9 = tpu.matmul %6, %8, %cst_8 {dimension_numbers = #tpu.dot_dimension_numbers<[1], [0], [0], [1], [0, 0, 1, 1], [], []>} : vector<512x32xbf16>, vector<32x32xbf16>, vector<512x32xf32> -> vector<512x32xf32>
    %10 = arith.addf %4, %9 : vector<512x32xf32>
    %c0_9 = arith.constant 0 : index
    %c0_10 = arith.constant 0 : index
    %11 = vector.load %arg3[%c0_9, %c0_10] : memref<512x32xf32, #tpu.memory_space<vmem>>, vector<512x32xf32>
    %12 = arith.truncf %11 : vector<512x32xf32> to vector<512x32xbf16>
    %c2 = arith.constant 2 : index
    %c0_11 = arith.constant 0 : index
    %c0_12 = arith.constant 0 : index
    %13 = vector.load %arg5[%c2, %c0_11, %c0_12] : memref<4x32x32xbf16, #tpu.memory_space<vmem>>, vector<1x32x32xbf16>
    %14 = vector.shape_cast %13 : vector<1x32x32xbf16> to vector<32x32xbf16>
    %cst_13 = arith.constant dense<0.000000e+00> : vector<512x32xf32>
    %15 = tpu.matmul %12, %14, %cst_13 {dimension_numbers = #tpu.dot_dimension_numbers<[1], [0], [0], [1], [0, 0, 1, 1], [], []>} : vector<512x32xbf16>, vector<32x32xbf16>, vector<512x32xf32> -> vector<512x32xf32>
    %16 = arith.addf %10, %15 : vector<512x32xf32>
    %c0_14 = arith.constant 0 : index
    %c0_15 = arith.constant 0 : index
    %17 = vector.load %arg4[%c0_14, %c0_15] : memref<512x32xf32, #tpu.memory_space<vmem>>, vector<512x32xf32>
    %18 = arith.truncf %17 : vector<512x32xf32> to vector<512x32xbf16>
    %c3 = arith.constant 3 : index
    %c0_16 = arith.constant 0 : index
    %c0_17 = arith.constant 0 : index
    %19 = vector.load %arg5[%c3, %c0_16, %c0_17] : memref<4x32x32xbf16, #tpu.memory_space<vmem>>, vector<1x32x32xbf16>
    %20 = vector.shape_cast %19 : vector<1x32x32xbf16> to vector<32x32xbf16>
    %cst_18 = arith.constant dense<0.000000e+00> : vector<512x32xf32>
    %21 = tpu.matmul %18, %20, %cst_18 {dimension_numbers = #tpu.dot_dimension_numbers<[1], [0], [0], [1], [0, 0, 1, 1], [], []>} : vector<512x32xbf16>, vector<32x32xbf16>, vector<512x32xf32> -> vector<512x32xf32>
    %22 = arith.addf %16, %21 : vector<512x32xf32>
    %c0_19 = arith.constant 0 : index
    %c0_20 = arith.constant 0 : index
    %23 = vector.load %arg6[%c0_19, %c0_20] : memref<1x32xf32, #tpu.memory_space<vmem>>, vector<1x32xf32>
    %24 = vector.broadcast %23 : vector<1x32xf32> to vector<512x32xf32>
    %25 = arith.mulf %22, %24 : vector<512x32xf32>
    %c0_21 = arith.constant 0 : index
    %c0_22 = arith.constant 0 : index
    %26 = vector.load %arg7[%c0_21, %c0_22] : memref<1x32xf32, #tpu.memory_space<vmem>>, vector<1x32xf32>
    %27 = vector.broadcast %26 : vector<1x32xf32> to vector<512x32xf32>
    %28 = arith.addf %25, %27 : vector<512x32xf32>
    %cst_23 = arith.constant 0.000000e+00 : f32
    %29 = vector.broadcast %cst_23 : f32 to vector<512x32xf32>
    %30 = arith.maximumf %28, %29 : vector<512x32xf32>
    %c0_24 = arith.constant 0 : index
    %c0_25 = arith.constant 0 : index
    %31 = vector.load %arg8[%c0_24, %c0_25] : memref<512x32xf32, #tpu.memory_space<vmem>>, vector<512x32xf32>
    tpu.vector_store %arg8[%c0_24, %c0_25], %30 {strides = array<i32>} : memref<512x32xf32, #tpu.memory_space<vmem>>, vector<512x32xf32>,
    return
  }
  func.func @transform_0(%arg0: i32) -> (i32, i32) {
    %c0_i32 = arith.constant 0 : i32
    %c0_i32_0 = arith.constant 0 : i32
    return %arg0, %c0_i32 : i32, i32
  }
  func.func @transform_1(%arg0: i32) -> (i32, i32) {
    %c0_i32 = arith.constant 0 : i32
    %c0_i32_0 = arith.constant 0 : i32
    return %arg0, %c0_i32 : i32, i32
  }
  func.func @transform_2(%arg0: i32) -> (i32, i32) {
    %c0_i32 = arith.constant 0 : i32
    %c0_i32_0 = arith.constant 0 : i32
    return %arg0, %c0_i32 : i32, i32
  }
  func.func @transform_3(%arg0: i32) -> (i32, i32) {
    %c0_i32 = arith.constant 0 : i32
    %c0_i32_0 = arith.constant 0 : i32
    return %arg0, %c0_i32 : i32, i32
  }
  func.func @transform_4(%arg0: i32) -> (i32, i32, i32) {
    %c0_i32 = arith.constant 0 : i32
    %c0_i32_0 = arith.constant 0 : i32
    %c0_i32_1 = arith.constant 0 : i32
    %c0_i32_2 = arith.constant 0 : i32
    return %c0_i32, %c0_i32_0, %c0_i32_1 : i32, i32, i32
  }
  func.func @transform_5(%arg0: i32) -> (i32, i32) {
    %c0_i32 = arith.constant 0 : i32
    %c0_i32_0 = arith.constant 0 : i32
    %c0_i32_1 = arith.constant 0 : i32
    return %c0_i32, %c0_i32_0 : i32, i32
  }
  func.func @transform_6(%arg0: i32) -> (i32, i32) {
    %c0_i32 = arith.constant 0 : i32
    %c0_i32_0 = arith.constant 0 : i32
    %c0_i32_1 = arith.constant 0 : i32
    return %c0_i32, %c0_i32_0 : i32, i32
  }
  func.func @transform_7(%arg0: i32) -> (i32, i32) {
    %c0_i32 = arith.constant 0 : i32
    %c0_i32_0 = arith.constant 0 : i32
    return %arg0, %c0_i32 : i32, i32
  }
}

</mosaic_0001>

<bundles_post_ra>
// kernel: simcsp_sppf_forward.8
= control target key start
LH: loop header
LB: loop body
LE: loop exit
PB: predicated region body
PF: predicated region fallthrough
CT: control target
= control target key end

     0   :  { %9 = vsyncpa [#allocation3], 0  ;;  %s976_s15 = smov [#allocation2]   ;;  %s1448_s0 = inlined_call_operand.hbm [shape: f32[512,32], index: 0, kind: input, shape index: {}]   ;;  %s1449_s1 = inlined_call_operand.vmem [shape: bf16[32,32], index: 1, kind: input, shape index: {}]   ;;  %s1450_s2 = inlined_call_operand.vmem [shape: f32[1,32], index: 2, kind: input, shape index: {}]   ;;  %s1451_s3 = inlined_call_operand.vmem [shape: f32[1,32], index: 3, kind: input, shape index: {}]   ;;  %s1452_s4 = inlined_call_operand.vmem [shape: f32[512,32], index: 4, kind: output, shape index: {}]  }
   0x1   :  { %s15_s16 = sshll.u32 %s976_s15, 4  ;;  %s952_s19 = scalar_lea.hbm %s1448_s0, 8192  ;;  %s16_s16 = int_to_ptr.vmem [resolvable:$true] %s15_s16 }
   0x2   :  { %p953_p0 = scmp.ne.s32.totalorder %s1448_s0, %s952_s19  ;;  %p956_p1 = scmp.lt.u32.totalorder %s952_s19, %s1448_s0 }
   0x4   :  { %p958_p2 = pnand %p956_p1, %p953_p0 }
   0x6   :  { %961 = shalt.err (!%p958_p2)
}
   0x7   :  { %s962_s24 = scalar_lea.vmem %s16_s16, 8192  ;;  %p967_p4 = scmp.lt.s32.totalorder %s16_s16, %s16_s16 }
   0x8   :  { %p963_p3 = scmp.ne.s32.totalorder %s16_s16, %s962_s24  ;;  %p968_p5 = scmp.lt.s32.totalorder %s962_s24, %s962_s24 }
   0xa   :  { %p969_p6 = por %p968_p5, %p967_p4 }
   0xc   :  { %p970_p7 = pnand %p969_p6, %p963_p3 }
   0xe   :  { %973 = shalt.err (!%p970_p7)
}
   0xf   :  { %s977_s25 = smov 128   ;;  %s978_s26 = smov 8  }
  0x10   :  { %21 = dma.hbm_to_vmem [thread:$0]  %s1448_s0, 8192, %s16_s16, [#allocation3], %s977_s25, %s977_s25, %s978_s26  }
  0x11   :  { %974 = dma.done.wait [#allocation3], 8192  }
  0x12   :  { %975 = vsyncadd [#allocation3], 4294959104  ;;  %v950_v0 = vld [vmem:[%s1449_s1] sm:$0xff]   ;;  %v951_v1 = vld [vmem:[%s1449_s1 + $0x8] sm:$0xff]   ;;  %vm144_vm0 = vcmask 261120  }
  0x13   :  { %875 = vmatprep.subr.bf16.mxu0 %v950_v0  ;;  %943 = vmatprep.subr.bf16.mxu1 %v950_v0  ;;  %v32_v2 = vld [vmem:[#allocation2] sm:$0xff]  ;;  %v33_v3 = vld [vmem:[#allocation2 + $0x8] sm:$0xff]  ;;  %v34_v7 = vld [vmem:[#allocation2 + $0x10] sm:$0xff] }
  0x14   :  { %v64_v4 = vld [vmem:[#allocation2 + $0x100] sm:$0xff]  ;;  %876 = vmatpush3.bf16.msra.mxu0 %v950_v0  ;;  %945 = vmatpush3.bf16.msra.mxu1 %v950_v0  ;;  %v96_v5 = vpack.c.bf16 %v33_v3, %v32_v2  ;;  %v65_v6 = vld [vmem:[#allocation2 + $0x108] sm:$0xff]  ;;  %v35_v8 = vld [vmem:[#allocation2 + $0x18] sm:$0xff] }
  0x15   :  { %877 = vmatprep.subr.bf16.mxu0 %v951_v1  ;;  %944 = vmatprep.subr.bf16.mxu1 %v951_v1  ;;  %v112_v9 = vpack.c.bf16 %v65_v6, %v64_v4  ;;  %v66_v10 = vld [vmem:[#allocation2 + $0x110] sm:$0xff]  ;;  %v67_v11 = vld [vmem:[#allocation2 + $0x118] sm:$0xff]  ;;  %v36_v12 = vld [vmem:[#allocation2 + $0x20] sm:$0xff]  ;;  %v97_v16 = vpack.c.bf16 %v35_v8, %v34_v7 }
  0x16   :  { %879 = vmatprep.mubr.msk.bf16.mxu0 %vm144_vm0, %v96_v5  ;;  %v37_v13 = vld [vmem:[#allocation2 + $0x28] sm:$0xff]  ;;  %v68_v14 = vld [vmem:[#allocation2 + $0x120] sm:$0xff]  ;;  %v113_v17 = vpack.c.bf16 %v67_v11, %v66_v10  ;;  %v38_v20 = vld [vmem:[#allocation2 + $0x30] sm:$0xff] }
  0x17   :  { %v69_v15 = vld [vmem:[#allocation2 + $0x128] sm:$0xff]  ;;  %911 = vmatprep.mubr.msk.bf16.mxu1 %vm144_vm0, %v112_v9  ;;  %v98_v18 = vpack.c.bf16 %v37_v13, %v36_v12  ;;  %v39_v21 = vld [vmem:[#allocation2 + $0x38] sm:$0xff]  ;;  %v70_v22 = vld [vmem:[#allocation2 + $0x130] sm:$0xff] }
  0x18   :  { %878 = vmatpush3.bf16.msra.mxu0 %v951_v1  ;;  %946 = vmatpush3.bf16.msra.mxu1 %v951_v1  ;;  %v114_v19 = vpack.c.bf16 %v69_v15, %v68_v14  ;;  %v71_v23 = vld [vmem:[#allocation2 + $0x138] sm:$0xff]  ;;  %v40_v24 = vld [vmem:[#allocation2 + $0x40] sm:$0xff]  ;;  %v41_v25 = vld [vmem:[#allocation2 + $0x48] sm:$0xff]  ;;  %v99_v28 = vpack.c.bf16 %v39_v21, %v38_v20 }
  0x19   :  { %v72_v26 = vld [vmem:[#allocation2 + $0x140] sm:$0xff]  ;;  %v73_v27 = vld [vmem:[#allocation2 + $0x148] sm:$0xff]  ;;  %v115_v29 = vpack.c.bf16 %v71_v23, %v70_v22  ;;  %v100_v30 = vpack.c.bf16 %v41_v25, %v40_v24  ;;  %v42_v32 = vld [vmem:[#allocation2 + $0x50] sm:$0xff] }
  0x1a   :  { %v116_v31 = vpack.c.bf16 %v73_v27, %v72_v26  ;;  %v43_v33 = vld [vmem:[#allocation2 + $0x58] sm:$0xff]  ;;  %v74_v34 = vld [vmem:[#allocation2 + $0x150] sm:$0xff]  ;;  %v44_v36 = vld [vmem:[#allocation2 + $0x60] sm:$0xff] }
  0x1b   :  { %880 = vmatmul.mubr.msk.bf16.vlgmr.msra.gmra.mrb[0].mxu0 %vm144_vm0, %v97_v16  ;;  %912 = vmatmul.mubr.msk.bf16.vlgmr.msra.gmra.mrb[0].mxu1 %vm144_vm0, %v113_v17  ;;  %v75_v35 = vld [vmem:[#allocation2 + $0x158] sm:$0xff]  ;;  %v45_v37 = vld [vmem:[#allocation2 + $0x68] sm:$0xff]  ;;  %v76_v38 = vld [vmem:[#allocation2 + $0x160] sm:$0xff]  ;;  %v101_v40 = vpack.c.bf16 %v43_v33, %v42_v32 }
  0x1c   :  { %883 = vmatprep.mubr.msk.bf16.mxu0 %vm144_vm0, %v98_v18  ;;  %915 = vmatprep.mubr.msk.bf16.mxu1 %vm144_vm0, %v114_v19  ;;  %v77_v39 = vld [vmem:[#allocation2 + $0x168] sm:$0xff]  ;;  %v117_v41 = vpack.c.bf16 %v75_v35, %v74_v34  ;;  %v102_v42 = vpack.c.bf16 %v45_v37, %v44_v36  ;;  %v46_v44 = vld [vmem:[#allocation2 + $0x70] sm:$0xff]  ;;  %v47_v45 = vld [vmem:[#allocation2 + $0x78] sm:$0xff] }
  0x1d   :  { %v118_v43 = vpack.c.bf16 %v77_v39, %v76_v38  ;;  %v78_v46 = vld [vmem:[#allocation2 + $0x170] sm:$0xff]  ;;  %v79_v47 = vld [vmem:[#allocation2 + $0x178] sm:$0xff]  ;;  %v48_v48 = vld [vmem:[#allocation2 + $0x80] sm:$0xff]  ;;  %v103_v52 = vpack.c.bf16 %v47_v45, %v46_v44 }
  0x1e   :  { %v49_v49 = vld [vmem:[#allocation2 + $0x88] sm:$0xff]  ;;  %v80_v50 = vld [vmem:[#allocation2 + $0x180] sm:$0xff]  ;;  %v119_v53 = vpack.c.bf16 %v79_v47, %v78_v46  ;;  %v50_v56 = vld [vmem:[#allocation2 + $0x90] sm:$0xff] }
  0x1f   :  { %v81_v51 = vld [vmem:[#allocation2 + $0x188] sm:$0xff]  ;;  %v104_v54 = vpack.c.bf16 %v49_v49, %v48_v48  ;;  %v51_v57 = vld [vmem:[#allocation2 + $0x98] sm:$0xff]  ;;  %v82_v58 = vld [vmem:[#allocation2 + $0x190] sm:$0xff] }
  0x20   :  { %v120_v55 = vpack.c.bf16 %v81_v51, %v80_v50  ;;  %v83_v59 = vld [vmem:[#allocation2 + $0x198] sm:$0xff]  ;;  %v52_v60 = vld [vmem:[#allocation2 + $0xa0] sm:$0xff]  ;;  %v53_v61 = vld [vmem:[#allocation2 + $0xa8] sm:$0xff]  ;;  %v105_v0 = vpack.c.bf16 %v51_v57, %v50_v56 }
  0x21   :  { %v84_v62 = vld [vmem:[#allocation2 + $0x1a0] sm:$0xff]  ;;  %v85_v63 = vld [vmem:[#allocation2 + $0x1a8] sm:$0xff]  ;;  %v121_v1 = vpack.c.bf16 %v83_v59, %v82_v58  ;;  %v106_v2 = vpack.c.bf16 %v53_v61, %v52_v60  ;;  %v54_v4 = vld [vmem:[#allocation2 + $0xb0] sm:$0xff] }
  0x22   :  { %v122_v3 = vpack.c.bf16 %v85_v63, %v84_v62  ;;  %v55_v5 = vld [vmem:[#allocation2 + $0xb8] sm:$0xff]  ;;  %v86_v6 = vld [vmem:[#allocation2 + $0x1b0] sm:$0xff]  ;;  %v56_v8 = vld [vmem:[#allocation2 + $0xc0] sm:$0xff] }
  0x23   :  { %884 = vmatmul.mubr.msk.bf16.gmra.mrb[4].mxu0 %vm144_vm0, %v99_v28  ;;  %916 = vmatmul.mubr.msk.bf16.gmra.mrb[4].mxu1 %vm144_vm0, %v115_v29  ;;  %v87_v7 = vld [vmem:[#allocation2 + $0x1b8] sm:$0xff]  ;;  %v57_v9 = vld [vmem:[#allocation2 + $0xc8] sm:$0xff]  ;;  %v88_v10 = vld [vmem:[#allocation2 + $0x1c0] sm:$0xff]  ;;  %v107_v12 = vpack.c.bf16 %v55_v5, %v54_v4 }
  0x24   :  { %887 = vmatprep.mubr.msk.bf16.mxu0 %vm144_vm0, %v100_v30  ;;  %919 = vmatprep.mubr.msk.bf16.mxu1 %vm144_vm0, %v116_v31  ;;  %v89_v11 = vld [vmem:[#allocation2 + $0x1c8] sm:$0xff]  ;;  %v123_v13 = vpack.c.bf16 %v87_v7, %v86_v6  ;;  %v108_v14 = vpack.c.bf16 %v57_v9, %v56_v8  ;;  %v58_v16 = vld [vmem:[#allocation2 + $0xd0] sm:$0xff]  ;;  %v59_v17 = vld [vmem:[#allocation2 + $0xd8] sm:$0xff] }
  0x25   :  { %v124_v15 = vpack.c.bf16 %v89_v11, %v88_v10  ;;  %v90_v18 = vld [vmem:[#allocation2 + $0x1d0] sm:$0xff]  ;;  %v91_v19 = vld [vmem:[#allocation2 + $0x1d8] sm:$0xff]  ;;  %v60_v20 = vld [vmem:[#allocation2 + $0xe0] sm:$0xff]  ;;  %v109_v24 = vpack.c.bf16 %v59_v17, %v58_v16 }
  0x26   :  { %v61_v21 = vld [vmem:[#allocation2 + $0xe8] sm:$0xff]  ;;  %v92_v22 = vld [vmem:[#allocation2 + $0x1e0] sm:$0xff]  ;;  %v125_v25 = vpack.c.bf16 %v91_v19, %v90_v18  ;;  %v62_v28 = vld [vmem:[#allocation2 + $0xf0] sm:$0xff] }
  0x27   :  { %v93_v23 = vld [vmem:[#allocation2 + $0x1e8] sm:$0xff]  ;;  %v110_v26 = vpack.c.bf16 %v61_v21, %v60_v20  ;;  %v63_v29 = vld [vmem:[#allocation2 + $0xf8] sm:$0xff]  ;;  %v94_v30 = vld [vmem:[#allocation2 + $0x1f0] sm:$0xff] }
  0x28   :  { %v126_v27 = vpack.c.bf16 %v93_v23, %v92_v22  ;;  %v95_v31 = vld [vmem:[#allocation2 + $0x1f8] sm:$0xff]  ;;  %v111_v32 = vpack.c.bf16 %v63_v29, %v62_v28  ;;  %v1057_v34 = vld [vmem:[%s1450_s2] ss:$0 sm:$0xff] }
  0x29   :  { %v127_v33 = vpack.c.bf16 %v95_v31, %v94_v30  ;;  %v1062_v36 = vld [vmem:[%s1451_s3] ss:$0 sm:$0xff] }
  0x2b   :  { %888 = vmatmul.mubr.msk.bf16.gmra.mrb[8].mxu0 %vm144_vm0, %v101_v40  ;;  %920 = vmatmul.mubr.msk.bf16.gmra.mrb[8].mxu1 %vm144_vm0, %v117_v41 }
  0x2c   :  { %891 = vmatprep.mubr.msk.bf16.mxu0 %vm144_vm0, %v102_v42  ;;  %923 = vmatprep.mubr.msk.bf16.mxu1 %vm144_vm0, %v118_v43 }
  0x33   :  { %892 = vmatmul.mubr.msk.bf16.gmra.mrb[12].mxu0 %vm144_vm0, %v103_v52  ;;  %924 = vmatmul.mubr.msk.bf16.gmra.mrb[12].mxu1 %vm144_vm0, %v119_v53 }
  0x34   :  { %895 = vmatprep.mubr.msk.bf16.mxu0 %vm144_vm0, %v104_v54  ;;  %927 = vmatprep.mubr.msk.bf16.mxu1 %vm144_vm0, %v120_v55 }
  0x3b   :  { %896 = vmatmul.mubr.msk.bf16.gmra.mrb[16].mxu0 %vm144_vm0, %v105_v0  ;;  %928 = vmatmul.mubr.msk.bf16.gmra.mrb[16].mxu1 %vm144_vm0, %v121_v1 }
  0x3c   :  { %899 = vmatprep.mubr.msk.bf16.mxu0 %vm144_vm0, %v106_v2  ;;  %931 = vmatprep.mubr.msk.bf16.mxu1 %vm144_vm0, %v122_v3 }
  0x43   :  { %900 = vmatmul.mubr.msk.bf16.gmra.mrb[20].mxu0 %vm144_vm0, %v107_v12  ;;  %932 = vmatmul.mubr.msk.bf16.gmra.mrb[20].mxu1 %vm144_vm0, %v123_v13 }
  0x44   :  { %903 = vmatprep.mubr.msk.bf16.mxu0 %vm144_vm0, %v108_v14  ;;  %935 = vmatprep.mubr.msk.bf16.mxu1 %vm144_vm0, %v124_v15 }
  0x4b   :  { %904 = vmatmul.mubr.msk.bf16.gmra.mrb[24].mxu0 %vm144_vm0, %v109_v24  ;;  %936 = vmatmul.mubr.msk.bf16.gmra.mrb[24].mxu1 %vm144_vm0, %v125_v25 }
  0x4c   :  { %907 = vmatprep.mubr.msk.bf16.mxu0 %vm144_vm0, %v110_v26  ;;  %939 = vmatprep.mubr.msk.bf16.mxu1 %vm144_vm0, %v126_v27 }
  0x53   :  { %908 = vmatmul.mubr.msk.bf16.gmra.mrb[28].mxu0 %vm144_vm0, %v111_v32  ;;  %940 = vmatmul.mubr.msk.bf16.gmra.mrb[28].mxu1 %vm144_vm0, %v127_v33 }
  0xee   :  { %v881_v35 = vpop.f32.mrb[0].mxu0  ;;  %v913_v37 = vpop.f32.mrb[0].mxu1 }
  0xef   :  { %v539_v38 = vmul.f32 %v881_v35, %v1057_v34  ;;  %v571_v39 = vmul.f32 %v913_v37, %v1057_v34  ;;  %v275_v40 = vpop.f32.mrb[1].mxu0  ;;  %v403_v41 = vpop.f32.mrb[1].mxu1 }
  0xf0   :  { %v537_v42 = vmul.f32 %v1057_v34, %v275_v40  ;;  %v569_v43 = vmul.f32 %v1057_v34, %v403_v41  ;;  %v882_v44 = vpop.f32.mrb[2].mxu0  ;;  %v914_v45 = vpop.f32.mrb[2].mxu1 }
  0xf1   :  { %v610_v46 = vadd.f32 %v1062_v36, %v539_v38  ;;  %v642_v47 = vadd.f32 %v1062_v36, %v571_v39  ;;  %v540_v48 = vmul.f32 %v882_v44, %v1057_v34  ;;  %v572_v49 = vmul.f32 %v914_v45, %v1057_v34  ;;  %v278_v50 = vpop.f32.mrb[3].mxu0  ;;  %v406_v51 = vpop.f32.mrb[3].mxu1 }
  0xf2   :  { %v608_v52 = vadd.f32 %v1062_v36, %v537_v42  ;;  %v640_v53 = vadd.f32 %v1062_v36, %v569_v43  ;;  %v538_v54 = vmul.f32 %v1057_v34, %v278_v50  ;;  %v570_v55 = vmul.f32 %v1057_v34, %v406_v51 }
  0xf3   :  { %v674_v56 = vmax.f32 %v610_v46, 0.0  ;;  %v706_v57 = vmax.f32 %v642_v47, 0.0  ;;  %v611_v58 = vadd.f32 %v1062_v36, %v540_v48  ;;  %v643_v59 = vadd.f32 %v1062_v36, %v572_v49 }
  0xf4   :  { %v672_v60 = vmax.f32 %v608_v52, 0.0  ;;  %v704_v61 = vmax.f32 %v640_v53, 0.0  ;;  %v609_v62 = vadd.f32 %v1062_v36, %v538_v54  ;;  %v641_v63 = vadd.f32 %v1062_v36, %v570_v55 }
  0xf5   :  { %738 = vst.msk [vmem:[%s1452_s4 + $0x10] sm:$0xff] %vm144_vm0, %v674_v56  ;;  %770 = vst.msk [vmem:[%s1452_s4 + $0x110] sm:$0xff] %vm144_vm0, %v706_v57  ;;  %v675_v0 = vmax.f32 %v611_v58, 0.0  ;;  %v707_v1 = vmax.f32 %v643_v59, 0.0 }
  0xf6   :  { %736 = vst.msk [vmem:[%s1452_s4] sm:$0xff] %vm144_vm0, %v672_v60  ;;  %768 = vst.msk [vmem:[%s1452_s4 + $0x100] sm:$0xff] %vm144_vm0, %v704_v61  ;;  %v673_v2 = vmax.f32 %v609_v62, 0.0  ;;  %v705_v3 = vmax.f32 %v641_v63, 0.0  ;;  %v885_v4 = vpop.f32.mrb[4].mxu0  ;;  %v917_v5 = vpop.f32.mrb[4].mxu1 }
  0xf7   :  { %739 = vst.msk [vmem:[%s1452_s4 + $0x18] sm:$0xff] %vm144_vm0, %v675_v0  ;;  %771 = vst.msk [vmem:[%s1452_s4 + $0x118] sm:$0xff] %vm144_vm0, %v707_v1  ;;  %v543_v6 = vmul.f32 %v885_v4, %v1057_v34  ;;  %v575_v7 = vmul.f32 %v917_v5, %v1057_v34  ;;  %v291_v8 = vpop.f32.mrb[5].mxu0  ;;  %v419_v9 = vpop.f32.mrb[5].mxu1 }
  0xf8   :  { %737 = vst.msk [vmem:[%s1452_s4 + $0x8] sm:$0xff] %vm144_vm0, %v673_v2  ;;  %769 = vst.msk [vmem:[%s1452_s4 + $0x108] sm:$0xff] %vm144_vm0, %v705_v3  ;;  %v541_v10 = vmul.f32 %v1057_v34, %v291_v8  ;;  %v573_v11 = vmul.f32 %v1057_v34, %v419_v9  ;;  %v886_v12 = vpop.f32.mrb[6].mxu0  ;;  %v918_v13 = vpop.f32.mrb[6].mxu1 }
  0xf9   :  { %v614_v14 = vadd.f32 %v1062_v36, %v543_v6  ;;  %v646_v15 = vadd.f32 %v1062_v36, %v575_v7  ;;  %v544_v16 = vmul.f32 %v886_v12, %v1057_v34  ;;  %v576_v17 = vmul.f32 %v918_v13, %v1057_v34  ;;  %v294_v18 = vpop.f32.mrb[7].mxu0  ;;  %v422_v19 = vpop.f32.mrb[7].mxu1 }
  0xfa   :  { %v612_v20 = vadd.f32 %v1062_v36, %v541_v10  ;;  %v644_v21 = vadd.f32 %v1062_v36, %v573_v11  ;;  %v542_v22 = vmul.f32 %v1057_v34, %v294_v18  ;;  %v574_v23 = vmul.f32 %v1057_v34, %v422_v19 }
  0xfb   :  { %v678_v24 = vmax.f32 %v614_v14, 0.0  ;;  %v710_v25 = vmax.f32 %v646_v15, 0.0  ;;  %v615_v26 = vadd.f32 %v1062_v36, %v544_v16  ;;  %v647_v27 = vadd.f32 %v1062_v36, %v576_v17 }
  0xfc   :  { %v676_v28 = vmax.f32 %v612_v20, 0.0  ;;  %v708_v29 = vmax.f32 %v644_v21, 0.0  ;;  %v613_v30 = vadd.f32 %v1062_v36, %v542_v22  ;;  %v645_v31 = vadd.f32 %v1062_v36, %v574_v23 }
  0xfd   :  { %742 = vst.msk [vmem:[%s1452_s4 + $0x30] sm:$0xff] %vm144_vm0, %v678_v24  ;;  %774 = vst.msk [vmem:[%s1452_s4 + $0x130] sm:$0xff] %vm144_vm0, %v710_v25  ;;  %v679_v32 = vmax.f32 %v615_v26, 0.0  ;;  %v711_v33 = vmax.f32 %v647_v27, 0.0 }
  0xfe   :  { %740 = vst.msk [vmem:[%s1452_s4 + $0x20] sm:$0xff] %vm144_vm0, %v676_v28  ;;  %772 = vst.msk [vmem:[%s1452_s4 + $0x120] sm:$0xff] %vm144_vm0, %v708_v29  ;;  %v677_v35 = vmax.f32 %v613_v30, 0.0  ;;  %v709_v37 = vmax.f32 %v645_v31, 0.0  ;;  %v889_v38 = vpop.f32.mrb[8].mxu0  ;;  %v921_v39 = vpop.f32.mrb[8].mxu1 }
  0xff   :  { %743 = vst.msk [vmem:[%s1452_s4 + $0x38] sm:$0xff] %vm144_vm0, %v679_v32  ;;  %775 = vst.msk [vmem:[%s1452_s4 + $0x138] sm:$0xff] %vm144_vm0, %v711_v33  ;;  %v547_v40 = vmul.f32 %v889_v38, %v1057_v34  ;;  %v579_v41 = vmul.f32 %v921_v39, %v1057_v34  ;;  %v307_v42 = vpop.f32.mrb[9].mxu0  ;;  %v435_v43 = vpop.f32.mrb[9].mxu1 }
 0x100   :  { %741 = vst.msk [vmem:[%s1452_s4 + $0x28] sm:$0xff] %vm144_vm0, %v677_v35  ;;  %773 = vst.msk [vmem:[%s1452_s4 + $0x128] sm:$0xff] %vm144_vm0, %v709_v37  ;;  %v545_v44 = vmul.f32 %v1057_v34, %v307_v42  ;;  %v577_v45 = vmul.f32 %v1057_v34, %v435_v43  ;;  %v890_v46 = vpop.f32.mrb[10].mxu0  ;;  %v922_v47 = vpop.f32.mrb[10].mxu1 }
 0x101   :  { %v618_v48 = vadd.f32 %v1062_v36, %v547_v40  ;;  %v650_v49 = vadd.f32 %v1062_v36, %v579_v41  ;;  %v548_v50 = vmul.f32 %v890_v46, %v1057_v34  ;;  %v580_v51 = vmul.f32 %v922_v47, %v1057_v34  ;;  %v310_v52 = vpop.f32.mrb[11].mxu0  ;;  %v438_v53 = vpop.f32.mrb[11].mxu1 }
 0x102   :  { %v616_v54 = vadd.f32 %v1062_v36, %v545_v44  ;;  %v648_v55 = vadd.f32 %v1062_v36, %v577_v45  ;;  %v546_v56 = vmul.f32 %v1057_v34, %v310_v52  ;;  %v578_v57 = vmul.f32 %v1057_v34, %v438_v53 }
 0x103   :  { %v682_v58 = vmax.f32 %v618_v48, 0.0  ;;  %v714_v59 = vmax.f32 %v650_v49, 0.0  ;;  %v619_v60 = vadd.f32 %v1062_v36, %v548_v50  ;;  %v651_v61 = vadd.f32 %v1062_v36, %v580_v51 }
 0x104   :  { %v680_v62 = vmax.f32 %v616_v54, 0.0  ;;  %v712_v63 = vmax.f32 %v648_v55, 0.0  ;;  %v617_v0 = vadd.f32 %v1062_v36, %v546_v56  ;;  %v649_v1 = vadd.f32 %v1062_v36, %v578_v57 }
 0x105   :  { %746 = vst.msk [vmem:[%s1452_s4 + $0x50] sm:$0xff] %vm144_vm0, %v682_v58  ;;  %778 = vst.msk [vmem:[%s1452_s4 + $0x150] sm:$0xff] %vm144_vm0, %v714_v59  ;;  %v683_v2 = vmax.f32 %v619_v60, 0.0  ;;  %v715_v3 = vmax.f32 %v651_v61, 0.0 }
 0x106   :  { %744 = vst.msk [vmem:[%s1452_s4 + $0x40] sm:$0xff] %vm144_vm0, %v680_v62  ;;  %776 = vst.msk [vmem:[%s1452_s4 + $0x140] sm:$0xff] %vm144_vm0, %v712_v63  ;;  %v681_v4 = vmax.f32 %v617_v0, 0.0  ;;  %v713_v5 = vmax.f32 %v649_v1, 0.0  ;;  %v893_v6 = vpop.f32.mrb[12].mxu0  ;;  %v925_v7 = vpop.f32.mrb[12].mxu1 }
 0x107   :  { %747 = vst.msk [vmem:[%s1452_s4 + $0x58] sm:$0xff] %vm144_vm0, %v683_v2  ;;  %779 = vst.msk [vmem:[%s1452_s4 + $0x158] sm:$0xff] %vm144_vm0, %v715_v3  ;;  %v551_v8 = vmul.f32 %v893_v6, %v1057_v34  ;;  %v583_v9 = vmul.f32 %v925_v7, %v1057_v34  ;;  %v323_v10 = vpop.f32.mrb[13].mxu0  ;;  %v451_v11 = vpop.f32.mrb[13].mxu1 }
 0x108   :  { %745 = vst.msk [vmem:[%s1452_s4 + $0x48] sm:$0xff] %vm144_vm0, %v681_v4  ;;  %777 = vst.msk [vmem:[%s1452_s4 + $0x148] sm:$0xff] %vm144_vm0, %v713_v5  ;;  %v549_v12 = vmul.f32 %v1057_v34, %v323_v10  ;;  %v581_v13 = vmul.f32 %v1057_v34, %v451_v11  ;;  %v894_v14 = vpop.f32.mrb[14].mxu0  ;;  %v926_v15 = vpop.f32.mrb[14].mxu1 }
 0x109   :  { %v622_v16 = vadd.f32 %v1062_v36, %v551_v8  ;;  %v654_v17 = vadd.f32 %v1062_v36, %v583_v9  ;;  %v552_v18 = vmul.f32 %v894_v14, %v1057_v34  ;;  %v584_v19 = vmul.f32 %v926_v15, %v1057_v34  ;;  %v326_v20 = vpop.f32.mrb[15].mxu0  ;;  %v454_v21 = vpop.f32.mrb[15].mxu1 }
 0x10a   :  { %v620_v22 = vadd.f32 %v1062_v36, %v549_v12  ;;  %v652_v23 = vadd.f32 %v1062_v36, %v581_v13  ;;  %v550_v24 = vmul.f32 %v1057_v34, %v326_v20  ;;  %v582_v25 = vmul.f32 %v1057_v34, %v454_v21 }
 0x10b   :  { %v686_v26 = vmax.f32 %v622_v16, 0.0  ;;  %v718_v27 = vmax.f32 %v654_v17, 0.0  ;;  %v623_v28 = vadd.f32 %v1062_v36, %v552_v18  ;;  %v655_v29 = vadd.f32 %v1062_v36, %v584_v19 }
 0x10c   :  { %v684_v30 = vmax.f32 %v620_v22, 0.0  ;;  %v716_v31 = vmax.f32 %v652_v23, 0.0  ;;  %v621_v32 = vadd.f32 %v1062_v36, %v550_v24  ;;  %v653_v33 = vadd.f32 %v1062_v36, %v582_v25 }
 0x10d   :  { %750 = vst.msk [vmem:[%s1452_s4 + $0x70] sm:$0xff] %vm144_vm0, %v686_v26  ;;  %782 = vst.msk [vmem:[%s1452_s4 + $0x170] sm:$0xff] %vm144_vm0, %v718_v27  ;;  %v687_v35 = vmax.f32 %v623_v28, 0.0  ;;  %v719_v37 = vmax.f32 %v655_v29, 0.0 }
 0x10e   :  { %748 = vst.msk [vmem:[%s1452_s4 + $0x60] sm:$0xff] %vm144_vm0, %v684_v30  ;;  %780 = vst.msk [vmem:[%s1452_s4 + $0x160] sm:$0xff] %vm144_vm0, %v716_v31  ;;  %v685_v38 = vmax.f32 %v621_v32, 0.0  ;;  %v717_v39 = vmax.f32 %v653_v33, 0.0  ;;  %v897_v40 = vpop.f32.mrb[16].mxu0  ;;  %v929_v41 = vpop.f32.mrb[16].mxu1 }
 0x10f   :  { %751 = vst.msk [vmem:[%s1452_s4 + $0x78] sm:$0xff] %vm144_vm0, %v687_v35  ;;  %783 = vst.msk [vmem:[%s1452_s4 + $0x178] sm:$0xff] %vm144_vm0, %v719_v37  ;;  %v555_v42 = vmul.f32 %v897_v40, %v1057_v34  ;;  %v587_v43 = vmul.f32 %v929_v41, %v1057_v34  ;;  %v339_v44 = vpop.f32.mrb[17].mxu0  ;;  %v467_v45 = vpop.f32.mrb[17].mxu1 }
 0x110   :  { %749 = vst.msk [vmem:[%s1452_s4 + $0x68] sm:$0xff] %vm144_vm0, %v685_v38  ;;  %781 = vst.msk [vmem:[%s1452_s4 + $0x168] sm:$0xff] %vm144_vm0, %v717_v39  ;;  %v553_v46 = vmul.f32 %v1057_v34, %v339_v44  ;;  %v585_v47 = vmul.f32 %v1057_v34, %v467_v45  ;;  %v898_v48 = vpop.f32.mrb[18].mxu0  ;;  %v930_v49 = vpop.f32.mrb[18].mxu1 }
 0x111   :  { %v626_v50 = vadd.f32 %v1062_v36, %v555_v42  ;;  %v658_v51 = vadd.f32 %v1062_v36, %v587_v43  ;;  %v556_v52 = vmul.f32 %v898_v48, %v1057_v34  ;;  %v588_v53 = vmul.f32 %v930_v49, %v1057_v34  ;;  %v342_v54 = vpop.f32.mrb[19].mxu0  ;;  %v470_v55 = vpop.f32.mrb[19].mxu1 }
 0x112   :  { %v624_v56 = vadd.f32 %v1062_v36, %v553_v46  ;;  %v656_v57 = vadd.f32 %v1062_v36, %v585_v47  ;;  %v554_v58 = vmul.f32 %v1057_v34, %v342_v54  ;;  %v586_v59 = vmul.f32 %v1057_v34, %v470_v55 }
 0x113   :  { %v690_v60 = vmax.f32 %v626_v50, 0.0  ;;  %v722_v61 = vmax.f32 %v658_v51, 0.0  ;;  %v627_v62 = vadd.f32 %v1062_v36, %v556_v52  ;;  %v659_v63 = vadd.f32 %v1062_v36, %v588_v53 }
 0x114   :  { %v688_v0 = vmax.f32 %v624_v56, 0.0  ;;  %v720_v1 = vmax.f32 %v656_v57, 0.0  ;;  %v625_v2 = vadd.f32 %v1062_v36, %v554_v58  ;;  %v657_v3 = vadd.f32 %v1062_v36, %v586_v59 }
 0x115   :  { %754 = vst.msk [vmem:[%s1452_s4 + $0x90] sm:$0xff] %vm144_vm0, %v690_v60  ;;  %786 = vst.msk [vmem:[%s1452_s4 + $0x190] sm:$0xff] %vm144_vm0, %v722_v61  ;;  %v691_v4 = vmax.f32 %v627_v62, 0.0  ;;  %v723_v5 = vmax.f32 %v659_v63, 0.0 }
 0x116   :  { %752 = vst.msk [vmem:[%s1452_s4 + $0x80] sm:$0xff] %vm144_vm0, %v688_v0  ;;  %784 = vst.msk [vmem:[%s1452_s4 + $0x180] sm:$0xff] %vm144_vm0, %v720_v1  ;;  %v689_v6 = vmax.f32 %v625_v2, 0.0  ;;  %v721_v7 = vmax.f32 %v657_v3, 0.0  ;;  %v901_v8 = vpop.f32.mrb[20].mxu0  ;;  %v933_v9 = vpop.f32.mrb[20].mxu1 }
 0x117   :  { %755 = vst.msk [vmem:[%s1452_s4 + $0x98] sm:$0xff] %vm144_vm0, %v691_v4  ;;  %787 = vst.msk [vmem:[%s1452_s4 + $0x198] sm:$0xff] %vm144_vm0, %v723_v5  ;;  %v559_v10 = vmul.f32 %v901_v8, %v1057_v34  ;;  %v591_v11 = vmul.f32 %v933_v9, %v1057_v34  ;;  %v355_v12 = vpop.f32.mrb[21].mxu0  ;;  %v483_v13 = vpop.f32.mrb[21].mxu1 }
 0x118   :  { %753 = vst.msk [vmem:[%s1452_s4 + $0x88] sm:$0xff] %vm144_vm0, %v689_v6  ;;  %785 = vst.msk [vmem:[%s1452_s4 + $0x188] sm:$0xff] %vm144_vm0, %v721_v7  ;;  %v557_v14 = vmul.f32 %v1057_v34, %v355_v12  ;;  %v589_v15 = vmul.f32 %v1057_v34, %v483_v13  ;;  %v902_v16 = vpop.f32.mrb[22].mxu0  ;;  %v934_v17 = vpop.f32.mrb[22].mxu1 }
 0x119   :  { %v630_v18 = vadd.f32 %v1062_v36, %v559_v10  ;;  %v662_v19 = vadd.f32 %v1062_v36, %v591_v11  ;;  %v560_v20 = vmul.f32 %v902_v16, %v1057_v34  ;;  %v592_v21 = vmul.f32 %v934_v17, %v1057_v34  ;;  %v358_v22 = vpop.f32.mrb[23].mxu0  ;;  %v486_v23 = vpop.f32.mrb[23].mxu1 }
 0x11a   :  { %v628_v24 = vadd.f32 %v1062_v36, %v557_v14  ;;  %v660_v25 = vadd.f32 %v1062_v36, %v589_v15  ;;  %v558_v26 = vmul.f32 %v1057_v34, %v358_v22  ;;  %v590_v27 = vmul.f32 %v1057_v34, %v486_v23 }
 0x11b   :  { %v694_v28 = vmax.f32 %v630_v18, 0.0  ;;  %v726_v29 = vmax.f32 %v662_v19, 0.0  ;;  %v631_v30 = vadd.f32 %v1062_v36, %v560_v20  ;;  %v663_v31 = vadd.f32 %v1062_v36, %v592_v21 }
 0x11c   :  { %v692_v32 = vmax.f32 %v628_v24, 0.0  ;;  %v724_v33 = vmax.f32 %v660_v25, 0.0  ;;  %v629_v35 = vadd.f32 %v1062_v36, %v558_v26  ;;  %v661_v37 = vadd.f32 %v1062_v36, %v590_v27 }
 0x11d   :  { %758 = vst.msk [vmem:[%s1452_s4 + $0xb0] sm:$0xff] %vm144_vm0, %v694_v28  ;;  %790 = vst.msk [vmem:[%s1452_s4 + $0x1b0] sm:$0xff] %vm144_vm0, %v726_v29  ;;  %v695_v38 = vmax.f32 %v631_v30, 0.0  ;;  %v727_v39 = vmax.f32 %v663_v31, 0.0 }
 0x11e   :  { %756 = vst.msk [vmem:[%s1452_s4 + $0xa0] sm:$0xff] %vm144_vm0, %v692_v32  ;;  %788 = vst.msk [vmem:[%s1452_s4 + $0x1a0] sm:$0xff] %vm144_vm0, %v724_v33  ;;  %v693_v40 = vmax.f32 %v629_v35, 0.0  ;;  %v725_v41 = vmax.f32 %v661_v37, 0.0  ;;  %v905_v42 = vpop.f32.mrb[24].mxu0  ;;  %v937_v43 = vpop.f32.mrb[24].mxu1 }
 0x11f   :  { %759 = vst.msk [vmem:[%s1452_s4 + $0xb8] sm:$0xff] %vm144_vm0, %v695_v38  ;;  %791 = vst.msk [vmem:[%s1452_s4 + $0x1b8] sm:$0xff] %vm144_vm0, %v727_v39  ;;  %v563_v44 = vmul.f32 %v905_v42, %v1057_v34  ;;  %v595_v45 = vmul.f32 %v937_v43, %v1057_v34  ;;  %v371_v46 = vpop.f32.mrb[25].mxu0  ;;  %v499_v47 = vpop.f32.mrb[25].mxu1 }
 0x120   :  { %757 = vst.msk [vmem:[%s1452_s4 + $0xa8] sm:$0xff] %vm144_vm0, %v693_v40  ;;  %789 = vst.msk [vmem:[%s1452_s4 + $0x1a8] sm:$0xff] %vm144_vm0, %v725_v41  ;;  %v561_v48 = vmul.f32 %v1057_v34, %v371_v46  ;;  %v593_v49 = vmul.f32 %v1057_v34, %v499_v47  ;;  %v906_v50 = vpop.f32.mrb[26].mxu0  ;;  %v938_v51 = vpop.f32.mrb[26].mxu1 }
 0x121   :  { %v634_v52 = vadd.f32 %v1062_v36, %v563_v44  ;;  %v666_v53 = vadd.f32 %v1062_v36, %v595_v45  ;;  %v564_v54 = vmul.f32 %v906_v50, %v1057_v34  ;;  %v596_v55 = vmul.f32 %v938_v51, %v1057_v34  ;;  %v374_v56 = vpop.f32.mrb[27].mxu0  ;;  %v502_v57 = vpop.f32.mrb[27].mxu1 }
 0x122   :  { %v632_v58 = vadd.f32 %v1062_v36, %v561_v48  ;;  %v664_v59 = vadd.f32 %v1062_v36, %v593_v49  ;;  %v562_v60 = vmul.f32 %v1057_v34, %v374_v56  ;;  %v594_v61 = vmul.f32 %v1057_v34, %v502_v57 }
 0x123   :  { %v698_v62 = vmax.f32 %v634_v52, 0.0  ;;  %v730_v63 = vmax.f32 %v666_v53, 0.0  ;;  %v635_v0 = vadd.f32 %v1062_v36, %v564_v54  ;;  %v667_v1 = vadd.f32 %v1062_v36, %v596_v55 }
 0x124   :  { %v696_v2 = vmax.f32 %v632_v58, 0.0  ;;  %v728_v3 = vmax.f32 %v664_v59, 0.0  ;;  %v633_v4 = vadd.f32 %v1062_v36, %v562_v60  ;;  %v665_v5 = vadd.f32 %v1062_v36, %v594_v61 }
 0x125   :  { %762 = vst.msk [vmem:[%s1452_s4 + $0xd0] sm:$0xff] %vm144_vm0, %v698_v62  ;;  %794 = vst.msk [vmem:[%s1452_s4 + $0x1d0] sm:$0xff] %vm144_vm0, %v730_v63  ;;  %v699_v6 = vmax.f32 %v635_v0, 0.0  ;;  %v731_v7 = vmax.f32 %v667_v1, 0.0 }
 0x126   :  { %760 = vst.msk [vmem:[%s1452_s4 + $0xc0] sm:$0xff] %vm144_vm0, %v696_v2  ;;  %792 = vst.msk [vmem:[%s1452_s4 + $0x1c0] sm:$0xff] %vm144_vm0, %v728_v3  ;;  %v697_v8 = vmax.f32 %v633_v4, 0.0  ;;  %v729_v9 = vmax.f32 %v665_v5, 0.0  ;;  %v909_v10 = vpop.f32.mrb[28].mxu0  ;;  %v941_v11 = vpop.f32.mrb[28].mxu1 }
 0x127   :  { %763 = vst.msk [vmem:[%s1452_s4 + $0xd8] sm:$0xff] %vm144_vm0, %v699_v6  ;;  %795 = vst.msk [vmem:[%s1452_s4 + $0x1d8] sm:$0xff] %vm144_vm0, %v731_v7  ;;  %v567_v12 = vmul.f32 %v909_v10, %v1057_v34  ;;  %v599_v13 = vmul.f32 %v941_v11, %v1057_v34  ;;  %v387_v14 = vpop.f32.mrb[29].mxu0  ;;  %v515_v15 = vpop.f32.mrb[29].mxu1 }
 0x128   :  { %761 = vst.msk [vmem:[%s1452_s4 + $0xc8] sm:$0xff] %vm144_vm0, %v697_v8  ;;  %793 = vst.msk [vmem:[%s1452_s4 + $0x1c8] sm:$0xff] %vm144_vm0, %v729_v9  ;;  %v565_v16 = vmul.f32 %v1057_v34, %v387_v14  ;;  %v597_v17 = vmul.f32 %v1057_v34, %v515_v15  ;;  %v910_v18 = vpop.f32.mrb[30].mxu0  ;;  %v942_v19 = vpop.f32.mrb[30].mxu1 }
 0x129   :  { %v638_v20 = vadd.f32 %v1062_v36, %v567_v12  ;;  %v670_v21 = vadd.f32 %v1062_v36, %v599_v13  ;;  %v568_v22 = vmul.f32 %v910_v18, %v1057_v34  ;;  %v600_v23 = vmul.f32 %v942_v19, %v1057_v34  ;;  %v390_v24 = vpop.f32.mrb[31].mxu0  ;;  %v518_v25 = vpop.f32.mrb[31].mxu1 }
 0x12a   :  { %v636_v26 = vadd.f32 %v1062_v36, %v565_v16  ;;  %v668_v27 = vadd.f32 %v1062_v36, %v597_v17  ;;  %v566_v28 = vmul.f32 %v1057_v34, %v390_v24  ;;  %v598_v29 = vmul.f32 %v1057_v34, %v518_v25 }
 0x12b   :  { %v702_v30 = vmax.f32 %v638_v20, 0.0  ;;  %v734_v31 = vmax.f32 %v670_v21, 0.0  ;;  %v639_v32 = vadd.f32 %v1062_v36, %v568_v22  ;;  %v671_v33 = vadd.f32 %v1062_v36, %v600_v23 }
 0x12c   :  { %v700_v35 = vmax.f32 %v636_v26, 0.0  ;;  %v732_v37 = vmax.f32 %v668_v27, 0.0  ;;  %v637_v38 = vadd.f32 %v1062_v36, %v566_v28  ;;  %v669_v39 = vadd.f32 %v1062_v36, %v598_v29 }
 0x12d   :  { %766 = vst.msk [vmem:[%s1452_s4 + $0xf0] sm:$0xff] %vm144_vm0, %v702_v30  ;;  %798 = vst.msk [vmem:[%s1452_s4 + $0x1f0] sm:$0xff] %vm144_vm0, %v734_v31  ;;  %v703_v34 = vmax.f32 %v639_v32, 0.0  ;;  %v735_v40 = vmax.f32 %v671_v33, 0.0 }
 0x12e   :  { %764 = vst.msk [vmem:[%s1452_s4 + $0xe0] sm:$0xff] %vm144_vm0, %v700_v35  ;;  %796 = vst.msk [vmem:[%s1452_s4 + $0x1e0] sm:$0xff] %vm144_vm0, %v732_v37  ;;  %v701_v36 = vmax.f32 %v637_v38, 0.0  ;;  %v733_v41 = vmax.f32 %v669_v39, 0.0 }
 0x12f   :  { %767 = vst.msk [vmem:[%s1452_s4 + $0xf8] sm:$0xff] %vm144_vm0, %v703_v34  ;;  %799 = vst.msk [vmem:[%s1452_s4 + $0x1f8] sm:$0xff] %vm144_vm0, %v735_v40 }
 0x130   :  { %765 = vst.msk [vmem:[%s1452_s4 + $0xe8] sm:$0xff] %vm144_vm0, %v701_v36  ;;  %797 = vst.msk [vmem:[%s1452_s4 + $0x1e8] sm:$0xff] %vm144_vm0, %v733_v41 }
 0x131   :  { %804 = vsyncpa [#allocation3], 1 }

// kernel: simcsp_sppf_forward.10
= control target key start
LH: loop header
LB: loop body
LE: loop exit
PB: predicated region body
PF: predicated region fallthrough
CT: control target
= control target key end

     0   :  { %vm130_vm0 = vcmask 261120   ;;  %s1583_s1 = inlined_call_operand.vmem [shape: bf16[32,32], index: 1, kind: input, shape index: {}]   ;;  %s1584_s0 = inlined_call_operand.vmem [shape: f32[512,32], index: 0, kind: input, shape index: {}]   ;;  %s1585_s2 = inlined_call_operand.vmem [shape: f32[1,32], index: 2, kind: input, shape index: {}]   ;;  %s1586_s3 = inlined_call_operand.vmem [shape: f32[1,32], index: 3, kind: input, shape index: {}]   ;;  %s1587_s4 = inlined_call_operand.vmem [shape: f32[512,32], index: 4, kind: output, shape index: {}]  }
   0x1   :  { %v932_v0 = vld [vmem:[%s1583_s1] sm:$0xff]   ;;  %v933_v1 = vld [vmem:[%s1583_s1 + $0x8] sm:$0xff]   ;;  %v20_v7 = vld [vmem:[%s1584_s0 + $0x10] sm:$0xff] }
   0x2   :  { %860 = vmatprep.subr.bf16.mxu0 %v932_v0  ;;  %928 = vmatprep.subr.bf16.mxu1 %v932_v0  ;;  %v18_v2 = vld [vmem:[%s1584_s0] sm:$0xff]  ;;  %v19_v3 = vld [vmem:[%s1584_s0 + $0x8] sm:$0xff]  ;;  %v21_v8 = vld [vmem:[%s1584_s0 + $0x18] sm:$0xff] }
   0x3   :  { %v50_v4 = vld [vmem:[%s1584_s0 + $0x100] sm:$0xff]  ;;  %861 = vmatpush3.bf16.msra.mxu0 %v932_v0  ;;  %930 = vmatpush3.bf16.msra.mxu1 %v932_v0  ;;  %v82_v5 = vpack.c.bf16 %v19_v3, %v18_v2  ;;  %v51_v6 = vld [vmem:[%s1584_s0 + $0x108] sm:$0xff]  ;;  %v52_v10 = vld [vmem:[%s1584_s0 + $0x110] sm:$0xff]  ;;  %v83_v16 = vpack.c.bf16 %v21_v8, %v20_v7 }
   0x4   :  { %862 = vmatprep.subr.bf16.mxu0 %v933_v1  ;;  %929 = vmatprep.subr.bf16.mxu1 %v933_v1  ;;  %v98_v9 = vpack.c.bf16 %v51_v6, %v50_v4  ;;  %v53_v11 = vld [vmem:[%s1584_s0 + $0x118] sm:$0xff]  ;;  %v22_v12 = vld [vmem:[%s1584_s0 + $0x20] sm:$0xff]  ;;  %v23_v13 = vld [vmem:[%s1584_s0 + $0x28] sm:$0xff] }
   0x5   :  { %864 = vmatprep.mubr.msk.bf16.mxu0 %vm130_vm0, %v82_v5  ;;  %v54_v14 = vld [vmem:[%s1584_s0 + $0x120] sm:$0xff]  ;;  %v55_v15 = vld [vmem:[%s1584_s0 + $0x128] sm:$0xff]  ;;  %v99_v17 = vpack.c.bf16 %v53_v11, %v52_v10  ;;  %v84_v18 = vpack.c.bf16 %v23_v13, %v22_v12  ;;  %v24_v20 = vld [vmem:[%s1584_s0 + $0x30] sm:$0xff] }
   0x6   :  { %896 = vmatprep.mubr.msk.bf16.mxu1 %vm130_vm0, %v98_v9  ;;  %v100_v19 = vpack.c.bf16 %v55_v15, %v54_v14  ;;  %v25_v21 = vld [vmem:[%s1584_s0 + $0x38] sm:$0xff]  ;;  %v56_v22 = vld [vmem:[%s1584_s0 + $0x130] sm:$0xff]  ;;  %v26_v24 = vld [vmem:[%s1584_s0 + $0x40] sm:$0xff] }
   0x7   :  { %863 = vmatpush3.bf16.msra.mxu0 %v933_v1  ;;  %931 = vmatpush3.bf16.msra.mxu1 %v933_v1  ;;  %v57_v23 = vld [vmem:[%s1584_s0 + $0x138] sm:$0xff]  ;;  %v27_v25 = vld [vmem:[%s1584_s0 + $0x48] sm:$0xff]  ;;  %v58_v26 = vld [vmem:[%s1584_s0 + $0x140] sm:$0xff]  ;;  %v85_v28 = vpack.c.bf16 %v25_v21, %v24_v20 }
   0x8   :  { %v59_v27 = vld [vmem:[%s1584_s0 + $0x148] sm:$0xff]  ;;  %v101_v29 = vpack.c.bf16 %v57_v23, %v56_v22  ;;  %v86_v30 = vpack.c.bf16 %v27_v25, %v26_v24  ;;  %v28_v32 = vld [vmem:[%s1584_s0 + $0x50] sm:$0xff]  ;;  %v29_v33 = vld [vmem:[%s1584_s0 + $0x58] sm:$0xff] }
   0x9   :  { %v102_v31 = vpack.c.bf16 %v59_v27, %v58_v26  ;;  %v60_v34 = vld [vmem:[%s1584_s0 + $0x150] sm:$0xff]  ;;  %v61_v35 = vld [vmem:[%s1584_s0 + $0x158] sm:$0xff]  ;;  %v30_v36 = vld [vmem:[%s1584_s0 + $0x60] sm:$0xff]  ;;  %v87_v40 = vpack.c.bf16 %v29_v33, %v28_v32 }
   0xa   :  { %865 = vmatmul.mubr.msk.bf16.vlgmr.msra.gmra.mrb[0].mxu0 %vm130_vm0, %v83_v16  ;;  %897 = vmatmul.mubr.msk.bf16.vlgmr.msra.gmra.mrb[0].mxu1 %vm130_vm0, %v99_v17  ;;  %v31_v37 = vld [vmem:[%s1584_s0 + $0x68] sm:$0xff]  ;;  %v62_v38 = vld [vmem:[%s1584_s0 + $0x160] sm:$0xff]  ;;  %v103_v41 = vpack.c.bf16 %v61_v35, %v60_v34  ;;  %v32_v44 = vld [vmem:[%s1584_s0 + $0x70] sm:$0xff] }
   0xb   :  { %868 = vmatprep.mubr.msk.bf16.mxu0 %vm130_vm0, %v84_v18  ;;  %900 = vmatprep.mubr.msk.bf16.mxu1 %vm130_vm0, %v100_v19  ;;  %v63_v39 = vld [vmem:[%s1584_s0 + $0x168] sm:$0xff]  ;;  %v88_v42 = vpack.c.bf16 %v31_v37, %v30_v36  ;;  %v33_v45 = vld [vmem:[%s1584_s0 + $0x78] sm:$0xff]  ;;  %v64_v46 = vld [vmem:[%s1584_s0 + $0x170] sm:$0xff] }
   0xc   :  { %v104_v43 = vpack.c.bf16 %v63_v39, %v62_v38  ;;  %v65_v47 = vld [vmem:[%s1584_s0 + $0x178] sm:$0xff]  ;;  %v34_v48 = vld [vmem:[%s1584_s0 + $0x80] sm:$0xff]  ;;  %v35_v49 = vld [vmem:[%s1584_s0 + $0x88] sm:$0xff]  ;;  %v89_v52 = vpack.c.bf16 %v33_v45, %v32_v44 }
   0xd   :  { %v66_v50 = vld [vmem:[%s1584_s0 + $0x180] sm:$0xff]  ;;  %v67_v51 = vld [vmem:[%s1584_s0 + $0x188] sm:$0xff]  ;;  %v105_v53 = vpack.c.bf16 %v65_v47, %v64_v46  ;;  %v90_v54 = vpack.c.bf16 %v35_v49, %v34_v48  ;;  %v36_v56 = vld [vmem:[%s1584_s0 + $0x90] sm:$0xff] }
   0xe   :  { %v106_v55 = vpack.c.bf16 %v67_v51, %v66_v50  ;;  %v37_v57 = vld [vmem:[%s1584_s0 + $0x98] sm:$0xff]  ;;  %v68_v58 = vld [vmem:[%s1584_s0 + $0x190] sm:$0xff]  ;;  %v38_v60 = vld [vmem:[%s1584_s0 + $0xa0] sm:$0xff] }
   0xf   :  { %v69_v59 = vld [vmem:[%s1584_s0 + $0x198] sm:$0xff]  ;;  %v39_v61 = vld [vmem:[%s1584_s0 + $0xa8] sm:$0xff]  ;;  %v70_v62 = vld [vmem:[%s1584_s0 + $0x1a0] sm:$0xff]  ;;  %v91_v0 = vpack.c.bf16 %v37_v57, %v36_v56 }
  0x10   :  { %v71_v63 = vld [vmem:[%s1584_s0 + $0x1a8] sm:$0xff]  ;;  %v107_v1 = vpack.c.bf16 %v69_v59, %v68_v58  ;;  %v92_v2 = vpack.c.bf16 %v39_v61, %v38_v60  ;;  %v40_v4 = vld [vmem:[%s1584_s0 + $0xb0] sm:$0xff]  ;;  %v41_v5 = vld [vmem:[%s1584_s0 + $0xb8] sm:$0xff] }
  0x11   :  { %v108_v3 = vpack.c.bf16 %v71_v63, %v70_v62  ;;  %v72_v6 = vld [vmem:[%s1584_s0 + $0x1b0] sm:$0xff]  ;;  %v73_v7 = vld [vmem:[%s1584_s0 + $0x1b8] sm:$0xff]  ;;  %v42_v8 = vld [vmem:[%s1584_s0 + $0xc0] sm:$0xff]  ;;  %v93_v12 = vpack.c.bf16 %v41_v5, %v40_v4 }
  0x12   :  { %869 = vmatmul.mubr.msk.bf16.gmra.mrb[4].mxu0 %vm130_vm0, %v85_v28  ;;  %901 = vmatmul.mubr.msk.bf16.gmra.mrb[4].mxu1 %vm130_vm0, %v101_v29  ;;  %v43_v9 = vld [vmem:[%s1584_s0 + $0xc8] sm:$0xff]  ;;  %v74_v10 = vld [vmem:[%s1584_s0 + $0x1c0] sm:$0xff]  ;;  %v109_v13 = vpack.c.bf16 %v73_v7, %v72_v6  ;;  %v44_v16 = vld [vmem:[%s1584_s0 + $0xd0] sm:$0xff] }
  0x13   :  { %872 = vmatprep.mubr.msk.bf16.mxu0 %vm130_vm0, %v86_v30  ;;  %904 = vmatprep.mubr.msk.bf16.mxu1 %vm130_vm0, %v102_v31  ;;  %v75_v11 = vld [vmem:[%s1584_s0 + $0x1c8] sm:$0xff]  ;;  %v94_v14 = vpack.c.bf16 %v43_v9, %v42_v8  ;;  %v45_v17 = vld [vmem:[%s1584_s0 + $0xd8] sm:$0xff]  ;;  %v76_v18 = vld [vmem:[%s1584_s0 + $0x1d0] sm:$0xff] }
  0x14   :  { %v110_v15 = vpack.c.bf16 %v75_v11, %v74_v10  ;;  %v77_v19 = vld [vmem:[%s1584_s0 + $0x1d8] sm:$0xff]  ;;  %v46_v20 = vld [vmem:[%s1584_s0 + $0xe0] sm:$0xff]  ;;  %v47_v21 = vld [vmem:[%s1584_s0 + $0xe8] sm:$0xff]  ;;  %v95_v24 = vpack.c.bf16 %v45_v17, %v44_v16 }
  0x15   :  { %v78_v22 = vld [vmem:[%s1584_s0 + $0x1e0] sm:$0xff]  ;;  %v79_v23 = vld [vmem:[%s1584_s0 + $0x1e8] sm:$0xff]  ;;  %v111_v25 = vpack.c.bf16 %v77_v19, %v76_v18  ;;  %v96_v26 = vpack.c.bf16 %v47_v21, %v46_v20  ;;  %v48_v28 = vld [vmem:[%s1584_s0 + $0xf0] sm:$0xff] }
  0x16   :  { %v112_v27 = vpack.c.bf16 %v79_v23, %v78_v22  ;;  %v49_v29 = vld [vmem:[%s1584_s0 + $0xf8] sm:$0xff]  ;;  %v80_v30 = vld [vmem:[%s1584_s0 + $0x1f0] sm:$0xff]  ;;  %v1192_v34 = vld [vmem:[%s1585_s2] ss:$0 sm:$0xff] }
  0x17   :  { %v81_v31 = vld [vmem:[%s1584_s0 + $0x1f8] sm:$0xff]  ;;  %v97_v32 = vpack.c.bf16 %v49_v29, %v48_v28  ;;  %v1197_v36 = vld [vmem:[%s1586_s3] ss:$0 sm:$0xff] }
  0x18   :  { %v113_v33 = vpack.c.bf16 %v81_v31, %v80_v30 }
  0x1a   :  { %873 = vmatmul.mubr.msk.bf16.gmra.mrb[8].mxu0 %vm130_vm0, %v87_v40  ;;  %905 = vmatmul.mubr.msk.bf16.gmra.mrb[8].mxu1 %vm130_vm0, %v103_v41 }
  0x1b   :  { %876 = vmatprep.mubr.msk.bf16.mxu0 %vm130_vm0, %v88_v42  ;;  %908 = vmatprep.mubr.msk.bf16.mxu1 %vm130_vm0, %v104_v43 }
  0x22   :  { %877 = vmatmul.mubr.msk.bf16.gmra.mrb[12].mxu0 %vm130_vm0, %v89_v52  ;;  %909 = vmatmul.mubr.msk.bf16.gmra.mrb[12].mxu1 %vm130_vm0, %v105_v53 }
  0x23   :  { %880 = vmatprep.mubr.msk.bf16.mxu0 %vm130_vm0, %v90_v54  ;;  %912 = vmatprep.mubr.msk.bf16.mxu1 %vm130_vm0, %v106_v55 }
  0x2a   :  { %881 = vmatmul.mubr.msk.bf16.gmra.mrb[16].mxu0 %vm130_vm0, %v91_v0  ;;  %913 = vmatmul.mubr.msk.bf16.gmra.mrb[16].mxu1 %vm130_vm0, %v107_v1 }
  0x2b   :  { %884 = vmatprep.mubr.msk.bf16.mxu0 %vm130_vm0, %v92_v2  ;;  %916 = vmatprep.mubr.msk.bf16.mxu1 %vm130_vm0, %v108_v3 }
  0x32   :  { %885 = vmatmul.mubr.msk.bf16.gmra.mrb[20].mxu0 %vm130_vm0, %v93_v12  ;;  %917 = vmatmul.mubr.msk.bf16.gmra.mrb[20].mxu1 %vm130_vm0, %v109_v13 }
  0x33   :  { %888 = vmatprep.mubr.msk.bf16.mxu0 %vm130_vm0, %v94_v14  ;;  %920 = vmatprep.mubr.msk.bf16.mxu1 %vm130_vm0, %v110_v15 }
  0x3a   :  { %889 = vmatmul.mubr.msk.bf16.gmra.mrb[24].mxu0 %vm130_vm0, %v95_v24  ;;  %921 = vmatmul.mubr.msk.bf16.gmra.mrb[24].mxu1 %vm130_vm0, %v111_v25 }
  0x3b   :  { %892 = vmatprep.mubr.msk.bf16.mxu0 %vm130_vm0, %v96_v26  ;;  %924 = vmatprep.mubr.msk.bf16.mxu1 %vm130_vm0, %v112_v27 }
  0x42   :  { %893 = vmatmul.mubr.msk.bf16.gmra.mrb[28].mxu0 %vm130_vm0, %v97_v32  ;;  %925 = vmatmul.mubr.msk.bf16.gmra.mrb[28].mxu1 %vm130_vm0, %v113_v33 }
  0xdd   :  { %v866_v35 = vpop.f32.mrb[0].mxu0  ;;  %v898_v37 = vpop.f32.mrb[0].mxu1 }
  0xde   :  { %v525_v38 = vmul.f32 %v866_v35, %v1192_v34  ;;  %v557_v39 = vmul.f32 %v898_v37, %v1192_v34  ;;  %v261_v40 = vpop.f32.mrb[1].mxu0  ;;  %v389_v41 = vpop.f32.mrb[1].mxu1 }
  0xdf   :  { %v523_v42 = vmul.f32 %v1192_v34, %v261_v40  ;;  %v555_v43 = vmul.f32 %v1192_v34, %v389_v41  ;;  %v867_v44 = vpop.f32.mrb[2].mxu0  ;;  %v899_v45 = vpop.f32.mrb[2].mxu1 }
  0xe0   :  { %v596_v46 = vadd.f32 %v1197_v36, %v525_v38  ;;  %v628_v47 = vadd.f32 %v1197_v36, %v557_v39  ;;  %v526_v48 = vmul.f32 %v867_v44, %v1192_v34  ;;  %v558_v49 = vmul.f32 %v899_v45, %v1192_v34  ;;  %v264_v50 = vpop.f32.mrb[3].mxu0  ;;  %v392_v51 = vpop.f32.mrb[3].mxu1 }
  0xe1   :  { %v594_v52 = vadd.f32 %v1197_v36, %v523_v42  ;;  %v626_v53 = vadd.f32 %v1197_v36, %v555_v43  ;;  %v524_v54 = vmul.f32 %v1192_v34, %v264_v50  ;;  %v556_v55 = vmul.f32 %v1192_v34, %v392_v51 }
  0xe2   :  { %v660_v56 = vmax.f32 %v596_v46, 0.0  ;;  %v692_v57 = vmax.f32 %v628_v47, 0.0  ;;  %v597_v58 = vadd.f32 %v1197_v36, %v526_v48  ;;  %v629_v59 = vadd.f32 %v1197_v36, %v558_v49 }
  0xe3   :  { %v658_v60 = vmax.f32 %v594_v52, 0.0  ;;  %v690_v61 = vmax.f32 %v626_v53, 0.0  ;;  %v595_v62 = vadd.f32 %v1197_v36, %v524_v54  ;;  %v627_v63 = vadd.f32 %v1197_v36, %v556_v55 }
  0xe4   :  { %724 = vst.msk [vmem:[%s1587_s4 + $0x10] sm:$0xff] %vm130_vm0, %v660_v56  ;;  %756 = vst.msk [vmem:[%s1587_s4 + $0x110] sm:$0xff] %vm130_vm0, %v692_v57  ;;  %v661_v0 = vmax.f32 %v597_v58, 0.0  ;;  %v693_v1 = vmax.f32 %v629_v59, 0.0 }
  0xe5   :  { %722 = vst.msk [vmem:[%s1587_s4] sm:$0xff] %vm130_vm0, %v658_v60  ;;  %754 = vst.msk [vmem:[%s1587_s4 + $0x100] sm:$0xff] %vm130_vm0, %v690_v61  ;;  %v659_v2 = vmax.f32 %v595_v62, 0.0  ;;  %v691_v3 = vmax.f32 %v627_v63, 0.0  ;;  %v870_v4 = vpop.f32.mrb[4].mxu0  ;;  %v902_v5 = vpop.f32.mrb[4].mxu1 }
  0xe6   :  { %725 = vst.msk [vmem:[%s1587_s4 + $0x18] sm:$0xff] %vm130_vm0, %v661_v0  ;;  %757 = vst.msk [vmem:[%s1587_s4 + $0x118] sm:$0xff] %vm130_vm0, %v693_v1  ;;  %v529_v6 = vmul.f32 %v870_v4, %v1192_v34  ;;  %v561_v7 = vmul.f32 %v902_v5, %v1192_v34  ;;  %v277_v8 = vpop.f32.mrb[5].mxu0  ;;  %v405_v9 = vpop.f32.mrb[5].mxu1 }
  0xe7   :  { %723 = vst.msk [vmem:[%s1587_s4 + $0x8] sm:$0xff] %vm130_vm0, %v659_v2  ;;  %755 = vst.msk [vmem:[%s1587_s4 + $0x108] sm:$0xff] %vm130_vm0, %v691_v3  ;;  %v527_v10 = vmul.f32 %v1192_v34, %v277_v8  ;;  %v559_v11 = vmul.f32 %v1192_v34, %v405_v9  ;;  %v871_v12 = vpop.f32.mrb[6].mxu0  ;;  %v903_v13 = vpop.f32.mrb[6].mxu1 }
  0xe8   :  { %v600_v14 = vadd.f32 %v1197_v36, %v529_v6  ;;  %v632_v15 = vadd.f32 %v1197_v36, %v561_v7  ;;  %v530_v16 = vmul.f32 %v871_v12, %v1192_v34  ;;  %v562_v17 = vmul.f32 %v903_v13, %v1192_v34  ;;  %v280_v18 = vpop.f32.mrb[7].mxu0  ;;  %v408_v19 = vpop.f32.mrb[7].mxu1 }
  0xe9   :  { %v598_v20 = vadd.f32 %v1197_v36, %v527_v10  ;;  %v630_v21 = vadd.f32 %v1197_v36, %v559_v11  ;;  %v528_v22 = vmul.f32 %v1192_v34, %v280_v18  ;;  %v560_v23 = vmul.f32 %v1192_v34, %v408_v19 }
  0xea   :  { %v664_v24 = vmax.f32 %v600_v14, 0.0  ;;  %v696_v25 = vmax.f32 %v632_v15, 0.0  ;;  %v601_v26 = vadd.f32 %v1197_v36, %v530_v16  ;;  %v633_v27 = vadd.f32 %v1197_v36, %v562_v17 }
  0xeb   :  { %v662_v28 = vmax.f32 %v598_v20, 0.0  ;;  %v694_v29 = vmax.f32 %v630_v21, 0.0  ;;  %v599_v30 = vadd.f32 %v1197_v36, %v528_v22  ;;  %v631_v31 = vadd.f32 %v1197_v36, %v560_v23 }
  0xec   :  { %728 = vst.msk [vmem:[%s1587_s4 + $0x30] sm:$0xff] %vm130_vm0, %v664_v24  ;;  %760 = vst.msk [vmem:[%s1587_s4 + $0x130] sm:$0xff] %vm130_vm0, %v696_v25  ;;  %v665_v32 = vmax.f32 %v601_v26, 0.0  ;;  %v697_v33 = vmax.f32 %v633_v27, 0.0 }
  0xed   :  { %726 = vst.msk [vmem:[%s1587_s4 + $0x20] sm:$0xff] %vm130_vm0, %v662_v28  ;;  %758 = vst.msk [vmem:[%s1587_s4 + $0x120] sm:$0xff] %vm130_vm0, %v694_v29  ;;  %v663_v35 = vmax.f32 %v599_v30, 0.0  ;;  %v695_v37 = vmax.f32 %v631_v31, 0.0  ;;  %v874_v38 = vpop.f32.mrb[8].mxu0  ;;  %v906_v39 = vpop.f32.mrb[8].mxu1 }
  0xee   :  { %729 = vst.msk [vmem:[%s1587_s4 + $0x38] sm:$0xff] %vm130_vm0, %v665_v32  ;;  %761 = vst.msk [vmem:[%s1587_s4 + $0x138] sm:$0xff] %vm130_vm0, %v697_v33  ;;  %v533_v40 = vmul.f32 %v874_v38, %v1192_v34  ;;  %v565_v41 = vmul.f32 %v906_v39, %v1192_v34  ;;  %v293_v42 = vpop.f32.mrb[9].mxu0  ;;  %v421_v43 = vpop.f32.mrb[9].mxu1 }
  0xef   :  { %727 = vst.msk [vmem:[%s1587_s4 + $0x28] sm:$0xff] %vm130_vm0, %v663_v35  ;;  %759 = vst.msk [vmem:[%s1587_s4 + $0x128] sm:$0xff] %vm130_vm0, %v695_v37  ;;  %v531_v44 = vmul.f32 %v1192_v34, %v293_v42  ;;  %v563_v45 = vmul.f32 %v1192_v34, %v421_v43  ;;  %v875_v46 = vpop.f32.mrb[10].mxu0  ;;  %v907_v47 = vpop.f32.mrb[10].mxu1 }
  0xf0   :  { %v604_v48 = vadd.f32 %v1197_v36, %v533_v40  ;;  %v636_v49 = vadd.f32 %v1197_v36, %v565_v41  ;;  %v534_v50 = vmul.f32 %v875_v46, %v1192_v34  ;;  %v566_v51 = vmul.f32 %v907_v47, %v1192_v34  ;;  %v296_v52 = vpop.f32.mrb[11].mxu0  ;;  %v424_v53 = vpop.f32.mrb[11].mxu1 }
  0xf1   :  { %v602_v54 = vadd.f32 %v1197_v36, %v531_v44  ;;  %v634_v55 = vadd.f32 %v1197_v36, %v563_v45  ;;  %v532_v56 = vmul.f32 %v1192_v34, %v296_v52  ;;  %v564_v57 = vmul.f32 %v1192_v34, %v424_v53 }
  0xf2   :  { %v668_v58 = vmax.f32 %v604_v48, 0.0  ;;  %v700_v59 = vmax.f32 %v636_v49, 0.0  ;;  %v605_v60 = vadd.f32 %v1197_v36, %v534_v50  ;;  %v637_v61 = vadd.f32 %v1197_v36, %v566_v51 }
  0xf3   :  { %v666_v62 = vmax.f32 %v602_v54, 0.0  ;;  %v698_v63 = vmax.f32 %v634_v55, 0.0  ;;  %v603_v0 = vadd.f32 %v1197_v36, %v532_v56  ;;  %v635_v1 = vadd.f32 %v1197_v36, %v564_v57 }
  0xf4   :  { %732 = vst.msk [vmem:[%s1587_s4 + $0x50] sm:$0xff] %vm130_vm0, %v668_v58  ;;  %764 = vst.msk [vmem:[%s1587_s4 + $0x150] sm:$0xff] %vm130_vm0, %v700_v59  ;;  %v669_v2 = vmax.f32 %v605_v60, 0.0  ;;  %v701_v3 = vmax.f32 %v637_v61, 0.0 }
  0xf5   :  { %730 = vst.msk [vmem:[%s1587_s4 + $0x40] sm:$0xff] %vm130_vm0, %v666_v62  ;;  %762 = vst.msk [vmem:[%s1587_s4 + $0x140] sm:$0xff] %vm130_vm0, %v698_v63  ;;  %v667_v4 = vmax.f32 %v603_v0, 0.0  ;;  %v699_v5 = vmax.f32 %v635_v1, 0.0  ;;  %v878_v6 = vpop.f32.mrb[12].mxu0  ;;  %v910_v7 = vpop.f32.mrb[12].mxu1 }
  0xf6   :  { %733 = vst.msk [vmem:[%s1587_s4 + $0x58] sm:$0xff] %vm130_vm0, %v669_v2  ;;  %765 = vst.msk [vmem:[%s1587_s4 + $0x158] sm:$0xff] %vm130_vm0, %v701_v3  ;;  %v537_v8 = vmul.f32 %v878_v6, %v1192_v34  ;;  %v569_v9 = vmul.f32 %v910_v7, %v1192_v34  ;;  %v309_v10 = vpop.f32.mrb[13].mxu0  ;;  %v437_v11 = vpop.f32.mrb[13].mxu1 }
  0xf7   :  { %731 = vst.msk [vmem:[%s1587_s4 + $0x48] sm:$0xff] %vm130_vm0, %v667_v4  ;;  %763 = vst.msk [vmem:[%s1587_s4 + $0x148] sm:$0xff] %vm130_vm0, %v699_v5  ;;  %v535_v12 = vmul.f32 %v1192_v34, %v309_v10  ;;  %v567_v13 = vmul.f32 %v1192_v34, %v437_v11  ;;  %v879_v14 = vpop.f32.mrb[14].mxu0  ;;  %v911_v15 = vpop.f32.mrb[14].mxu1 }
  0xf8   :  { %v608_v16 = vadd.f32 %v1197_v36, %v537_v8  ;;  %v640_v17 = vadd.f32 %v1197_v36, %v569_v9  ;;  %v538_v18 = vmul.f32 %v879_v14, %v1192_v34  ;;  %v570_v19 = vmul.f32 %v911_v15, %v1192_v34  ;;  %v312_v20 = vpop.f32.mrb[15].mxu0  ;;  %v440_v21 = vpop.f32.mrb[15].mxu1 }
  0xf9   :  { %v606_v22 = vadd.f32 %v1197_v36, %v535_v12  ;;  %v638_v23 = vadd.f32 %v1197_v36, %v567_v13  ;;  %v536_v24 = vmul.f32 %v1192_v34, %v312_v20  ;;  %v568_v25 = vmul.f32 %v1192_v34, %v440_v21 }
  0xfa   :  { %v672_v26 = vmax.f32 %v608_v16, 0.0  ;;  %v704_v27 = vmax.f32 %v640_v17, 0.0  ;;  %v609_v28 = vadd.f32 %v1197_v36, %v538_v18  ;;  %v641_v29 = vadd.f32 %v1197_v36, %v570_v19 }
  0xfb   :  { %v670_v30 = vmax.f32 %v606_v22, 0.0  ;;  %v702_v31 = vmax.f32 %v638_v23, 0.0  ;;  %v607_v32 = vadd.f32 %v1197_v36, %v536_v24  ;;  %v639_v33 = vadd.f32 %v1197_v36, %v568_v25 }
  0xfc   :  { %736 = vst.msk [vmem:[%s1587_s4 + $0x70] sm:$0xff] %vm130_vm0, %v672_v26  ;;  %768 = vst.msk [vmem:[%s1587_s4 + $0x170] sm:$0xff] %vm130_vm0, %v704_v27  ;;  %v673_v35 = vmax.f32 %v609_v28, 0.0  ;;  %v705_v37 = vmax.f32 %v641_v29, 0.0 }
  0xfd   :  { %734 = vst.msk [vmem:[%s1587_s4 + $0x60] sm:$0xff] %vm130_vm0, %v670_v30  ;;  %766 = vst.msk [vmem:[%s1587_s4 + $0x160] sm:$0xff] %vm130_vm0, %v702_v31  ;;  %v671_v38 = vmax.f32 %v607_v32, 0.0  ;;  %v703_v39 = vmax.f32 %v639_v33, 0.0  ;;  %v882_v40 = vpop.f32.mrb[16].mxu0  ;;  %v914_v41 = vpop.f32.mrb[16].mxu1 }
  0xfe   :  { %737 = vst.msk [vmem:[%s1587_s4 + $0x78] sm:$0xff] %vm130_vm0, %v673_v35  ;;  %769 = vst.msk [vmem:[%s1587_s4 + $0x178] sm:$0xff] %vm130_vm0, %v705_v37  ;;  %v541_v42 = vmul.f32 %v882_v40, %v1192_v34  ;;  %v573_v43 = vmul.f32 %v914_v41, %v1192_v34  ;;  %v325_v44 = vpop.f32.mrb[17].mxu0  ;;  %v453_v45 = vpop.f32.mrb[17].mxu1 }
  0xff   :  { %735 = vst.msk [vmem:[%s1587_s4 + $0x68] sm:$0xff] %vm130_vm0, %v671_v38  ;;  %767 = vst.msk [vmem:[%s1587_s4 + $0x168] sm:$0xff] %vm130_vm0, %v703_v39  ;;  %v539_v46 = vmul.f32 %v1192_v34, %v325_v44  ;;  %v571_v47 = vmul.f32 %v1192_v34, %v453_v45  ;;  %v883_v48 = vpop.f32.mrb[18].mxu0  ;;  %v915_v49 = vpop.f32.mrb[18].mxu1 }
 0x100   :  { %v612_v50 = vadd.f32 %v1197_v36, %v541_v42  ;;  %v644_v51 = vadd.f32 %v1197_v36, %v573_v43  ;;  %v542_v52 = vmul.f32 %v883_v48, %v1192_v34  ;;  %v574_v53 = vmul.f32 %v915_v49, %v1192_v34  ;;  %v328_v54 = vpop.f32.mrb[19].mxu0  ;;  %v456_v55 = vpop.f32.mrb[19].mxu1 }
 0x101   :  { %v610_v56 = vadd.f32 %v1197_v36, %v539_v46  ;;  %v642_v57 = vadd.f32 %v1197_v36, %v571_v47  ;;  %v540_v58 = vmul.f32 %v1192_v34, %v328_v54  ;;  %v572_v59 = vmul.f32 %v1192_v34, %v456_v55 }
 0x102   :  { %v676_v60 = vmax.f32 %v612_v50, 0.0  ;;  %v708_v61 = vmax.f32 %v644_v51, 0.0  ;;  %v613_v62 = vadd.f32 %v1197_v36, %v542_v52  ;;  %v645_v63 = vadd.f32 %v1197_v36, %v574_v53 }
 0x103   :  { %v674_v0 = vmax.f32 %v610_v56, 0.0  ;;  %v706_v1 = vmax.f32 %v642_v57, 0.0  ;;  %v611_v2 = vadd.f32 %v1197_v36, %v540_v58  ;;  %v643_v3 = vadd.f32 %v1197_v36, %v572_v59 }
 0x104   :  { %740 = vst.msk [vmem:[%s1587_s4 + $0x90] sm:$0xff] %vm130_vm0, %v676_v60  ;;  %772 = vst.msk [vmem:[%s1587_s4 + $0x190] sm:$0xff] %vm130_vm0, %v708_v61  ;;  %v677_v4 = vmax.f32 %v613_v62, 0.0  ;;  %v709_v5 = vmax.f32 %v645_v63, 0.0 }
 0x105   :  { %738 = vst.msk [vmem:[%s1587_s4 + $0x80] sm:$0xff] %vm130_vm0, %v674_v0  ;;  %770 = vst.msk [vmem:[%s1587_s4 + $0x180] sm:$0xff] %vm130_vm0, %v706_v1  ;;  %v675_v6 = vmax.f32 %v611_v2, 0.0  ;;  %v707_v7 = vmax.f32 %v643_v3, 0.0  ;;  %v886_v8 = vpop.f32.mrb[20].mxu0  ;;  %v918_v9 = vpop.f32.mrb[20].mxu1 }
 0x106   :  { %741 = vst.msk [vmem:[%s1587_s4 + $0x98] sm:$0xff] %vm130_vm0, %v677_v4  ;;  %773 = vst.msk [vmem:[%s1587_s4 + $0x198] sm:$0xff] %vm130_vm0, %v709_v5  ;;  %v545_v10 = vmul.f32 %v886_v8, %v1192_v34  ;;  %v577_v11 = vmul.f32 %v918_v9, %v1192_v34  ;;  %v341_v12 = vpop.f32.mrb[21].mxu0  ;;  %v469_v13 = vpop.f32.mrb[21].mxu1 }
 0x107   :  { %739 = vst.msk [vmem:[%s1587_s4 + $0x88] sm:$0xff] %vm130_vm0, %v675_v6  ;;  %771 = vst.msk [vmem:[%s1587_s4 + $0x188] sm:$0xff] %vm130_vm0, %v707_v7  ;;  %v543_v14 = vmul.f32 %v1192_v34, %v341_v12  ;;  %v575_v15 = vmul.f32 %v1192_v34, %v469_v13  ;;  %v887_v16 = vpop.f32.mrb[22].mxu0  ;;  %v919_v17 = vpop.f32.mrb[22].mxu1 }
 0x108   :  { %v616_v18 = vadd.f32 %v1197_v36, %v545_v10  ;;  %v648_v19 = vadd.f32 %v1197_v36, %v577_v11  ;;  %v546_v20 = vmul.f32 %v887_v16, %v1192_v34  ;;  %v578_v21 = vmul.f32 %v919_v17, %v1192_v34  ;;  %v344_v22 = vpop.f32.mrb[23].mxu0  ;;  %v472_v23 = vpop.f32.mrb[23].mxu1 }
 0x109   :  { %v614_v24 = vadd.f32 %v1197_v36, %v543_v14  ;;  %v646_v25 = vadd.f32 %v1197_v36, %v575_v15  ;;  %v544_v26 = vmul.f32 %v1192_v34, %v344_v22  ;;  %v576_v27 = vmul.f32 %v1192_v34, %v472_v23 }
 0x10a   :  { %v680_v28 = vmax.f32 %v616_v18, 0.0  ;;  %v712_v29 = vmax.f32 %v648_v19, 0.0  ;;  %v617_v30 = vadd.f32 %v1197_v36, %v546_v20  ;;  %v649_v31 = vadd.f32 %v1197_v36, %v578_v21 }
 0x10b   :  { %v678_v32 = vmax.f32 %v614_v24, 0.0  ;;  %v710_v33 = vmax.f32 %v646_v25, 0.0  ;;  %v615_v35 = vadd.f32 %v1197_v36, %v544_v26  ;;  %v647_v37 = vadd.f32 %v1197_v36, %v576_v27 }
 0x10c   :  { %744 = vst.msk [vmem:[%s1587_s4 + $0xb0] sm:$0xff] %vm130_vm0, %v680_v28  ;;  %776 = vst.msk [vmem:[%s1587_s4 + $0x1b0] sm:$0xff] %vm130_vm0, %v712_v29  ;;  %v681_v38 = vmax.f32 %v617_v30, 0.0  ;;  %v713_v39 = vmax.f32 %v649_v31, 0.0 }
 0x10d   :  { %742 = vst.msk [vmem:[%s1587_s4 + $0xa0] sm:$0xff] %vm130_vm0, %v678_v32  ;;  %774 = vst.msk [vmem:[%s1587_s4 + $0x1a0] sm:$0xff] %vm130_vm0, %v710_v33  ;;  %v679_v40 = vmax.f32 %v615_v35, 0.0  ;;  %v711_v41 = vmax.f32 %v647_v37, 0.0  ;;  %v890_v42 = vpop.f32.mrb[24].mxu0  ;;  %v922_v43 = vpop.f32.mrb[24].mxu1 }
 0x10e   :  { %745 = vst.msk [vmem:[%s1587_s4 + $0xb8] sm:$0xff] %vm130_vm0, %v681_v38  ;;  %777 = vst.msk [vmem:[%s1587_s4 + $0x1b8] sm:$0xff] %vm130_vm0, %v713_v39  ;;  %v549_v44 = vmul.f32 %v890_v42, %v1192_v34  ;;  %v581_v45 = vmul.f32 %v922_v43, %v1192_v34  ;;  %v357_v46 = vpop.f32.mrb[25].mxu0  ;;  %v485_v47 = vpop.f32.mrb[25].mxu1 }
 0x10f   :  { %743 = vst.msk [vmem:[%s1587_s4 + $0xa8] sm:$0xff] %vm130_vm0, %v679_v40  ;;  %775 = vst.msk [vmem:[%s1587_s4 + $0x1a8] sm:$0xff] %vm130_vm0, %v711_v41  ;;  %v547_v48 = vmul.f32 %v1192_v34, %v357_v46  ;;  %v579_v49 = vmul.f32 %v1192_v34, %v485_v47  ;;  %v891_v50 = vpop.f32.mrb[26].mxu0  ;;  %v923_v51 = vpop.f32.mrb[26].mxu1 }
 0x110   :  { %v620_v52 = vadd.f32 %v1197_v36, %v549_v44  ;;  %v652_v53 = vadd.f32 %v1197_v36, %v581_v45  ;;  %v550_v54 = vmul.f32 %v891_v50, %v1192_v34  ;;  %v582_v55 = vmul.f32 %v923_v51, %v1192_v34  ;;  %v360_v56 = vpop.f32.mrb[27].mxu0  ;;  %v488_v57 = vpop.f32.mrb[27].mxu1 }
 0x111   :  { %v618_v58 = vadd.f32 %v1197_v36, %v547_v48  ;;  %v650_v59 = vadd.f32 %v1197_v36, %v579_v49  ;;  %v548_v60 = vmul.f32 %v1192_v34, %v360_v56  ;;  %v580_v61 = vmul.f32 %v1192_v34, %v488_v57 }
 0x112   :  { %v684_v62 = vmax.f32 %v620_v52, 0.0  ;;  %v716_v63 = vmax.f32 %v652_v53, 0.0  ;;  %v621_v0 = vadd.f32 %v1197_v36, %v550_v54  ;;  %v653_v1 = vadd.f32 %v1197_v36, %v582_v55 }
 0x113   :  { %v682_v2 = vmax.f32 %v618_v58, 0.0  ;;  %v714_v3 = vmax.f32 %v650_v59, 0.0  ;;  %v619_v4 = vadd.f32 %v1197_v36, %v548_v60  ;;  %v651_v5 = vadd.f32 %v1197_v36, %v580_v61 }
 0x114   :  { %748 = vst.msk [vmem:[%s1587_s4 + $0xd0] sm:$0xff] %vm130_vm0, %v684_v62  ;;  %780 = vst.msk [vmem:[%s1587_s4 + $0x1d0] sm:$0xff] %vm130_vm0, %v716_v63  ;;  %v685_v6 = vmax.f32 %v621_v0, 0.0  ;;  %v717_v7 = vmax.f32 %v653_v1, 0.0 }
 0x115   :  { %746 = vst.msk [vmem:[%s1587_s4 + $0xc0] sm:$0xff] %vm130_vm0, %v682_v2  ;;  %778 = vst.msk [vmem:[%s1587_s4 + $0x1c0] sm:$0xff] %vm130_vm0, %v714_v3  ;;  %v683_v8 = vmax.f32 %v619_v4, 0.0  ;;  %v715_v9 = vmax.f32 %v651_v5, 0.0  ;;  %v894_v10 = vpop.f32.mrb[28].mxu0  ;;  %v926_v11 = vpop.f32.mrb[28].mxu1 }
 0x116   :  { %749 = vst.msk [vmem:[%s1587_s4 + $0xd8] sm:$0xff] %vm130_vm0, %v685_v6  ;;  %781 = vst.msk [vmem:[%s1587_s4 + $0x1d8] sm:$0xff] %vm130_vm0, %v717_v7  ;;  %v553_v12 = vmul.f32 %v894_v10, %v1192_v34  ;;  %v585_v13 = vmul.f32 %v926_v11, %v1192_v34  ;;  %v373_v14 = vpop.f32.mrb[29].mxu0  ;;  %v501_v15 = vpop.f32.mrb[29].mxu1 }
 0x117   :  { %747 = vst.msk [vmem:[%s1587_s4 + $0xc8] sm:$0xff] %vm130_vm0, %v683_v8  ;;  %779 = vst.msk [vmem:[%s1587_s4 + $0x1c8] sm:$0xff] %vm130_vm0, %v715_v9  ;;  %v551_v16 = vmul.f32 %v1192_v34, %v373_v14  ;;  %v583_v17 = vmul.f32 %v1192_v34, %v501_v15  ;;  %v895_v18 = vpop.f32.mrb[30].mxu0  ;;  %v927_v19 = vpop.f32.mrb[30].mxu1 }
 0x118   :  { %v624_v20 = vadd.f32 %v1197_v36, %v553_v12  ;;  %v656_v21 = vadd.f32 %v1197_v36, %v585_v13  ;;  %v554_v22 = vmul.f32 %v895_v18, %v1192_v34  ;;  %v586_v23 = vmul.f32 %v927_v19, %v1192_v34  ;;  %v376_v24 = vpop.f32.mrb[31].mxu0  ;;  %v504_v25 = vpop.f32.mrb[31].mxu1 }
 0x119   :  { %v622_v26 = vadd.f32 %v1197_v36, %v551_v16  ;;  %v654_v27 = vadd.f32 %v1197_v36, %v583_v17  ;;  %v552_v28 = vmul.f32 %v1192_v34, %v376_v24  ;;  %v584_v29 = vmul.f32 %v1192_v34, %v504_v25 }
 0x11a   :  { %v688_v30 = vmax.f32 %v624_v20, 0.0  ;;  %v720_v31 = vmax.f32 %v656_v21, 0.0  ;;  %v625_v32 = vadd.f32 %v1197_v36, %v554_v22  ;;  %v657_v33 = vadd.f32 %v1197_v36, %v586_v23 }
 0x11b   :  { %v686_v35 = vmax.f32 %v622_v26, 0.0  ;;  %v718_v37 = vmax.f32 %v654_v27, 0.0  ;;  %v623_v38 = vadd.f32 %v1197_v36, %v552_v28  ;;  %v655_v39 = vadd.f32 %v1197_v36, %v584_v29 }
 0x11c   :  { %752 = vst.msk [vmem:[%s1587_s4 + $0xf0] sm:$0xff] %vm130_vm0, %v688_v30  ;;  %784 = vst.msk [vmem:[%s1587_s4 + $0x1f0] sm:$0xff] %vm130_vm0, %v720_v31  ;;  %v689_v34 = vmax.f32 %v625_v32, 0.0  ;;  %v721_v40 = vmax.f32 %v657_v33, 0.0 }
 0x11d   :  { %750 = vst.msk [vmem:[%s1587_s4 + $0xe0] sm:$0xff] %vm130_vm0, %v686_v35  ;;  %782 = vst.msk [vmem:[%s1587_s4 + $0x1e0] sm:$0xff] %vm130_vm0, %v718_v37  ;;  %v687_v36 = vmax.f32 %v623_v38, 0.0  ;;  %v719_v41 = vmax.f32 %v655_v39, 0.0 }
 0x11e   :  { %753 = vst.msk [vmem:[%s1587_s4 + $0xf8] sm:$0xff] %vm130_vm0, %v689_v34  ;;  %785 = vst.msk [vmem:[%s1587_s4 + $0x1f8] sm:$0xff] %vm130_vm0, %v721_v40 }
 0x11f   :  { %751 = vst.msk [vmem:[%s1587_s4 + $0xe8] sm:$0xff] %vm130_vm0, %v687_v36  ;;  %783 = vst.msk [vmem:[%s1587_s4 + $0x1e8] sm:$0xff] %vm130_vm0, %v719_v41 }

// kernel: simcsp_sppf_forward.9
= control target key start
LH: loop header
LB: loop body
LE: loop exit
PB: predicated region body
PF: predicated region fallthrough
CT: control target
= control target key end

     0   :  { %s4223_s15 = smov 0   ;;  %s4988_s0 = inlined_call_operand.vmem [shape: f32[2,16,16,32], index: 0, kind: input, shape index: {}]   ;;  %s4989_s1 = inlined_call_operand.vmem [shape: bf16[9,32,32], index: 1, kind: input, shape index: {}]   ;;  %s4990_s2 = inlined_call_operand.vmem [shape: f32[1,32], index: 2, kind: input, shape index: {}]   ;;  %s4991_s3 = inlined_call_operand.vmem [shape: f32[1,32], index: 3, kind: input, shape index: {}]   ;;  %s4992_s4 = inlined_call_operand.vmem [shape: f32[2,16,16,32], index: 4, kind: output, shape index: {}]  }
   0x1 LB: > { %s3207_s16 = sadd.s32 4294967295, %s4195_s15   ;;  %p3211_p0 = scmp.ge.s32.totalorder %s4195_s15, 1  ;;  %s4195_s15 = sphi %s4223_s15, %s14_s15  }
   0x2   : > { %p162_p1 = scmp.lt.s32.totalorder %s4195_s15, 3 }
   0x4   : > { %p163_p2 = pnand %p3211_p0, %p162_p1 }
   0x5   : > { %v4171_v0 = vld [vmem:[%s4989_s1 + $0x10] sm:$0xff] (!%p163_p2)   ;;  %vm199_vm0 = vcmask (!%p163_p2), 261120   ;;  %v4237_v1 = vld [vmem:[%s4989_s1 + $0x40] sm:$0xff] (!%p163_p2)   ;;  %v4242_v2 = vld [vmem:[%s4989_s1 + $0x18] sm:$0xff] (!%p163_p2)   ;;  %v4197_v3 = vmov (!%p163_p2), 0.0   ;;  %vm202_vm1 = vcmask (!%p163_p2), 254976  }
   0x6   : > { %166 = sbr.rel (%p163_p2) target bundleno = 548 (0x224), region = 36  ;;  %3578 = vmatprep.subr.bf16.mxu1 (!%p163_p2), %v4171_v0  ;;  %200 = vst.msk [vmem:[#allocation2] sm:$0xff] (!%p163_p2), %vm199_vm0, %v4197_v3  ;;  %201 = vst.msk [vmem:[#allocation2 + $0x8] sm:$0xff] (!%p163_p2), %vm199_vm0, %v4197_v3  ;;  %3722 = vmatprep.subr.bf16.mxu0 (!%p163_p2), %v4237_v1  ;;  %v4284_v4 = vld [vmem:[%s4989_s1 + $0x48] sm:$0xff] (!%p163_p2)   ;;  %p188_p3 = scmp.lt.s32.totalorder (!%p163_p2), %s3207_s16, 1  ;;  %v4311_v5 = vld [vmem:[%s4989_s1] sm:$0xff] (!%p163_p2)  }
   0x7   : > { %204 = vst.msk [vmem:[#allocation2 + $0x18] sm:$0xff] (!%p163_p2), %vm199_vm0, %v4197_v3  ;;  %205 = vst.msk [vmem:[#allocation2 + $0x20] sm:$0xff] (!%p163_p2), %vm199_vm0, %v4197_v3  ;;  %3579 = vmatpush3.bf16.msra.mxu1 (!%p163_p2), %v4171_v0  ;;  %3723 = vmatpush3.bf16.msra.mxu0 (!%p163_p2), %v4237_v1  ;;  %v4321_v6 = vld [vmem:[%s4989_s1 + $0x50] sm:$0xff] (!%p163_p2)   ;;  %v4177_v40 = vld [vmem:[%s4989_s1 + $0x58] sm:$0xff] (!%p163_p2)  }
   0x8   : > { %207 = vst.msk [vmem:[#allocation2 + $0x30] sm:$0xff] (!%p163_p2), %vm199_vm0, %v4197_v3  ;;  %208 = vst.msk [vmem:[#allocation2 + $0x38] sm:$0xff] (!%p163_p2), %vm199_vm0, %v4197_v3  ;;  %3580 = vmatprep.subr.bf16.mxu1 (!%p163_p2), %v4242_v2  ;;  %3724 = vmatprep.subr.bf16.mxu0 (!%p163_p2), %v4284_v4  ;;  %v4178_v42 = vld [vmem:[%s4989_s1 + $0x8] sm:$0xff] (!%p163_p2)   ;;  %v4403_v47 = vld [vmem:[%s4989_s1 + $0x60] sm:$0xff] (!%p163_p2)  }
   0x9   : > { %210 = vst.msk [vmem:[#allocation2 + $0x48] sm:$0xff] (!%p163_p2), %vm199_vm0, %v4197_v3  ;;  %211 = vst.msk [vmem:[#allocation2 + $0x50] sm:$0xff] (!%p163_p2), %vm199_vm0, %v4197_v3  ;;  %v4441_v0 = vld [vmem:[%s4989_s1 + $0x20] sm:$0xff] (!%p163_p2)  }
   0xa   : > { %213 = vst.msk [vmem:[#allocation2 + $0x60] sm:$0xff] (!%p163_p2), %vm199_vm0, %v4197_v3  ;;  %214 = vst.msk [vmem:[#allocation2 + $0x68] sm:$0xff] (!%p163_p2), %vm199_vm0, %v4197_v3 }
   0xb   : > { %216 = vst.msk [vmem:[#allocation2 + $0x78] sm:$0xff] (!%p163_p2), %vm199_vm0, %v4197_v3  ;;  %217 = vst.msk [vmem:[#allocation2 + $0x80] sm:$0xff] (!%p163_p2), %vm199_vm0, %v4197_v3  ;;  %3581 = vmatpush3.bf16.msra.mxu1 (!%p163_p2), %v4242_v2  ;;  %3725 = vmatpush3.bf16.msra.mxu0 (!%p163_p2), %v4284_v4 }
   0xc   : > { %219 = vst.msk [vmem:[#allocation2 + $0x90] sm:$0xff] (!%p163_p2), %vm199_vm0, %v4197_v3  ;;  %220 = vst.msk [vmem:[#allocation2 + $0x98] sm:$0xff] (!%p163_p2), %vm199_vm0, %v4197_v3  ;;  %3614 = vmatprep.subr.bf16.mxu1 (!%p163_p2), %v4311_v5  ;;  %3758 = vmatprep.subr.bf16.mxu0 (!%p163_p2), %v4321_v6 }
   0xd   : > { %222 = vst.msk [vmem:[#allocation2 + $0xa8] sm:$0xff] %vm199_vm0, %v4197_v3  ;;  %223 = vst.msk [vmem:[#allocation2 + $0xb0] sm:$0xff] %vm199_vm0, %v4197_v3  ;;  %s4994_s16 = smov (!%p188_p3, %s3207_s16), 1  ;;  %v372_v7 = vld [vmem:[#allocation2 + $0x1] sm:$0xff] }
   0xe   : > { %225 = vst.msk [vmem:[#allocation2 + $0xc0] sm:$0xff] %vm199_vm0, %v4197_v3  ;;  %226 = vst.msk [vmem:[#allocation2 + $0xc8] sm:$0xff] %vm199_vm0, %v4197_v3  ;;  %s3414_s29 = sshll.u32 %s4994_s16, 8 }
   0xf   : > { %228 = vst.msk [vmem:[#allocation2 + $0xd8] sm:$0xff] %vm199_vm0, %v4197_v3  ;;  %229 = vst.msk [vmem:[#allocation2 + $0xe0] sm:$0xff] %vm199_vm0, %v4197_v3  ;;  %s4331_s6 = scalar_lea.vmem %s4988_s0, %s3414_s29  ;;  %s4854_s14 = scalar_lea.vmem %s4992_s4, %s3414_s29 }
  0x10   : > { %231 = vst.msk [vmem:[#allocation2 + $0xf0] sm:$0xff] %vm199_vm0, %v4197_v3  ;;  %232 = vst.msk [vmem:[#allocation2 + $0xf8] sm:$0xff] %vm199_vm0, %v4197_v3  ;;  %v255_v8 = vld [vmem:[%s4331_s6] sm:$0xff]  ;;  %v256_v9 = vld [vmem:[%s4331_s6 + $0x8] sm:$0xff] }
  0x11   : > { %234 = vst.msk [vmem:[#allocation2 + $0x108] sm:$0xff] %vm199_vm0, %v4197_v3  ;;  %235 = vst.msk [vmem:[#allocation2 + $0x110] sm:$0xff] %vm199_vm0, %v4197_v3  ;;  %v257_v11 = vld [vmem:[%s4331_s6 + $0x10] sm:$0xff]  ;;  %v258_v12 = vld [vmem:[%s4331_s6 + $0x18] sm:$0xff] }
  0x12   : > { %237 = vst.msk [vmem:[#allocation2 + $0x120] sm:$0xff] %vm199_vm0, %v4197_v3  ;;  %238 = vst.msk [vmem:[#allocation2 + $0x128] sm:$0xff] %vm199_vm0, %v4197_v3  ;;  %v259_v14 = vld [vmem:[%s4331_s6 + $0x20] sm:$0xff]  ;;  %v260_v15 = vld [vmem:[%s4331_s6 + $0x28] sm:$0xff] }
  0x13   : > { %240 = vst.msk [vmem:[#allocation2 + $0x138] sm:$0xff] %vm199_vm0, %v4197_v3  ;;  %241 = vst.msk [vmem:[#allocation2 + $0x140] sm:$0xff] %vm199_vm0, %v4197_v3  ;;  %v261_v16 = vld [vmem:[%s4331_s6 + $0x30] sm:$0xff]  ;;  %v262_v17 = vld [vmem:[%s4331_s6 + $0x38] sm:$0xff] }
  0x14   : > { %243 = vst.msk [vmem:[#allocation2 + $0x150] sm:$0xff] %vm199_vm0, %v4197_v3  ;;  %244 = vst.msk [vmem:[#allocation2 + $0x158] sm:$0xff] %vm199_vm0, %v4197_v3  ;;  %v263_v18 = vld [vmem:[%s4331_s6 + $0x40] sm:$0xff]  ;;  %v264_v19 = vld [vmem:[%s4331_s6 + $0x48] sm:$0xff] }
  0x15   : > { %246 = vst.msk [vmem:[#allocation2 + $0x168] sm:$0xff] %vm199_vm0, %v4197_v3  ;;  %247 = vst.msk [vmem:[#allocation2 + $0x170] sm:$0xff] %vm199_vm0, %v4197_v3  ;;  %v265_v20 = vld [vmem:[%s4331_s6 + $0x50] sm:$0xff]  ;;  %v266_v21 = vld [vmem:[%s4331_s6 + $0x58] sm:$0xff] }
  0x16   : > { %249 = vst.msk [vmem:[#allocation2 + $0x180] sm:$0xff] %vm199_vm0, %v4197_v3  ;;  %250 = vst.msk [vmem:[#allocation2 + $0x188] sm:$0xff] %vm199_vm0, %v4197_v3  ;;  %v267_v22 = vld [vmem:[%s4331_s6 + $0x60] sm:$0xff]  ;;  %v268_v23 = vld [vmem:[%s4331_s6 + $0x68] sm:$0xff] }
  0x17   : > { %252 = vst.msk [vmem:[#allocation2 + $0x198] sm:$0xff] %vm199_vm0, %v4197_v3  ;;  %253 = vst.msk [vmem:[#allocation2 + $0x1a0] sm:$0xff] %vm199_vm0, %v4197_v3  ;;  %v269_v24 = vld [vmem:[%s4331_s6 + $0x70] sm:$0xff]  ;;  %v270_v25 = vld [vmem:[%s4331_s6 + $0x78] sm:$0xff] }
  0x18   : > { %203 = vst.msk [vmem:[#allocation2 + $0x10] sm:$0x3] %vm202_vm1, %v4197_v3  ;;  %206 = vst.msk [vmem:[#allocation2 + $0x28] sm:$0x3] %vm202_vm1, %v4197_v3  ;;  %v271_v26 = vld [vmem:[%s4331_s6 + $0x80] sm:$0xff]  ;;  %v272_v27 = vld [vmem:[%s4331_s6 + $0x88] sm:$0xff] }
  0x19   : > { %209 = vst.msk [vmem:[#allocation2 + $0x40] sm:$0x3] %vm202_vm1, %v4197_v3  ;;  %212 = vst.msk [vmem:[#allocation2 + $0x58] sm:$0x3] %vm202_vm1, %v4197_v3  ;;  %v273_v28 = vld [vmem:[%s4331_s6 + $0x90] sm:$0xff]  ;;  %v274_v29 = vld [vmem:[%s4331_s6 + $0x98] sm:$0xff] }
  0x1a   : > { %215 = vst.msk [vmem:[#allocation2 + $0x70] sm:$0x3] %vm202_vm1, %v4197_v3  ;;  %218 = vst.msk [vmem:[#allocation2 + $0x88] sm:$0x3] %vm202_vm1, %v4197_v3  ;;  %v275_v30 = vld [vmem:[%s4331_s6 + $0xa0] sm:$0xff]  ;;  %v276_v31 = vld [vmem:[%s4331_s6 + $0xa8] sm:$0xff] }
  0x1b   : > { %221 = vst.msk [vmem:[#allocation2 + $0xa0] sm:$0x3] %vm202_vm1, %v4197_v3  ;;  %224 = vst.msk [vmem:[#allocation2 + $0xb8] sm:$0x3] %vm202_vm1, %v4197_v3  ;;  %v277_v50 = vld [vmem:[%s4331_s6 + $0xb0] sm:$0xff]  ;;  %v278_v51 = vld [vmem:[%s4331_s6 + $0xb8] sm:$0xff] }
  0x1c   : > { %227 = vst.msk [vmem:[#allocation2 + $0xd0] sm:$0x3] %vm202_vm1, %v4197_v3  ;;  %230 = vst.msk [vmem:[#allocation2 + $0xe8] sm:$0x3] %vm202_vm1, %v4197_v3  ;;  %v279_v52 = vld [vmem:[%s4331_s6 + $0xc0] sm:$0xff]  ;;  %v280_v53 = vld [vmem:[%s4331_s6 + $0xc8] sm:$0xff] }
  0x1d   : > { %233 = vst.msk [vmem:[#allocation2 + $0x100] sm:$0x3] %vm202_vm1, %v4197_v3  ;;  %236 = vst.msk [vmem:[#allocation2 + $0x118] sm:$0x3] %vm202_vm1, %v4197_v3  ;;  %v281_v56 = vld [vmem:[%s4331_s6 + $0xd0] sm:$0xff]  ;;  %v282_v57 = vld [vmem:[%s4331_s6 + $0xd8] sm:$0xff] }
  0x1e   : > { %239 = vst.msk [vmem:[#allocation2 + $0x130] sm:$0x3] %vm202_vm1, %v4197_v3  ;;  %242 = vst.msk [vmem:[#allocation2 + $0x148] sm:$0x3] %vm202_vm1, %v4197_v3  ;;  %v283_v58 = vld [vmem:[%s4331_s6 + $0xe0] sm:$0xff]  ;;  %v284_v59 = vld [vmem:[%s4331_s6 + $0xe8] sm:$0xff] }
  0x1f   : > { %245 = vst.msk [vmem:[#allocation2 + $0x160] sm:$0x3] %vm202_vm1, %v4197_v3  ;;  %248 = vst.msk [vmem:[#allocation2 + $0x178] sm:$0x3] %vm202_vm1, %v4197_v3  ;;  %v373_v10 = vld [vmem:[#allocation2 + $0x9] sm:$0xff] }
  0x20   : > { %251 = vst.msk [vmem:[#allocation2 + $0x190] sm:$0x3] %vm202_vm1, %v4197_v3  ;;  %254 = vst.msk [vmem:[#allocation2 + $0x1a8] sm:$0x3] %vm202_vm1, %v4197_v3  ;;  %v404_v13 = vpack.c.bf16 %v373_v10, %v372_v7 }
  0x21   : > { %288 = vst.msk [vmem:[#allocation2 + $0x19] sm:$0xff] %vm199_vm0, %v255_v8  ;;  %289 = vst.msk [vmem:[#allocation2 + $0x21] sm:$0xff] %vm199_vm0, %v256_v9 }
  0x22   : > { %290 = vst.msk [vmem:[#allocation2 + $0x31] sm:$0xff] %vm199_vm0, %v257_v11  ;;  %291 = vst.msk [vmem:[#allocation2 + $0x39] sm:$0xff] %vm199_vm0, %v258_v12  ;;  %3582 = vmatprep.mubr.msk.bf16.mxu1 %vm199_vm0, %v404_v13 }
  0x23   : > { %292 = vst.msk [vmem:[#allocation2 + $0x49] sm:$0xff] %vm199_vm0, %v259_v14  ;;  %293 = vst.msk [vmem:[#allocation2 + $0x51] sm:$0xff] %vm199_vm0, %v260_v15 }
  0x24   : > { %294 = vst.msk [vmem:[#allocation2 + $0x61] sm:$0xff] %vm199_vm0, %v261_v16  ;;  %295 = vst.msk [vmem:[#allocation2 + $0x69] sm:$0xff] %vm199_vm0, %v262_v17  ;;  %v285_v17 = vld [vmem:[%s4331_s6 + $0xf0] sm:$0xff] }
  0x25   : > { %296 = vst.msk [vmem:[#allocation2 + $0x79] sm:$0xff] %vm199_vm0, %v263_v18  ;;  %297 = vst.msk [vmem:[#allocation2 + $0x81] sm:$0xff] %vm199_vm0, %v264_v19  ;;  %v286_v18 = vld [vmem:[%s4331_s6 + $0xf8] sm:$0xff] }
  0x26   : > { %298 = vst.msk [vmem:[#allocation2 + $0x91] sm:$0xff] %vm199_vm0, %v265_v20  ;;  %299 = vst.msk [vmem:[#allocation2 + $0x99] sm:$0xff] %vm199_vm0, %v266_v21 }
  0x27   : > { %300 = vst.msk [vmem:[#allocation2 + $0xa9] sm:$0xff] %vm199_vm0, %v267_v22  ;;  %301 = vst.msk [vmem:[#allocation2 + $0xb1] sm:$0xff] %vm199_vm0, %v268_v23  ;;  %v4181_v23 = vld [vmem:[%s4989_s1 + $0x68] sm:$0xff]  }
  0x28   : > { %302 = vst.msk [vmem:[#allocation2 + $0xc1] sm:$0xff] %vm199_vm0, %v269_v24  ;;  %303 = vst.msk [vmem:[#allocation2 + $0xc9] sm:$0xff] %vm199_vm0, %v270_v25  ;;  %v374_v32 = vld [vmem:[#allocation2 + $0x19] sm:$0xff]  ;;  %v375_v33 = vld [vmem:[#allocation2 + $0x21] sm:$0xff] }
  0x29   : > { %304 = vst.msk [vmem:[#allocation2 + $0xd9] sm:$0xff] %vm199_vm0, %v271_v26  ;;  %305 = vst.msk [vmem:[#allocation2 + $0xe1] sm:$0xff] %vm199_vm0, %v272_v27  ;;  %v405_v34 = vpack.c.bf16 %v375_v33, %v374_v32  ;;  %v1481_v35 = vld [vmem:[#allocation2 + $0x31] sm:$0xff]  ;;  %v1482_v36 = vld [vmem:[#allocation2 + $0x39] sm:$0xff] }
  0x2a   : > { %306 = vst.msk [vmem:[#allocation2 + $0xf1] sm:$0xff] %vm199_vm0, %v273_v28  ;;  %307 = vst.msk [vmem:[#allocation2 + $0xf9] sm:$0xff] %vm199_vm0, %v274_v29  ;;  %v4380_v37 = vpack.c.bf16 %v1482_v36, %v1481_v35  ;;  %v378_v38 = vld [vmem:[#allocation2 + $0x49] sm:$0xff]  ;;  %v379_v39 = vld [vmem:[#allocation2 + $0x51] sm:$0xff] }
  0x2b   : > { %308 = vst.msk [vmem:[#allocation2 + $0x109] sm:$0xff] %vm199_vm0, %v275_v30  ;;  %309 = vst.msk [vmem:[#allocation2 + $0x111] sm:$0xff] %vm199_vm0, %v276_v31  ;;  %3583 = vmatmul.mubr.msk.bf16.vlgmr.msra.gmra.mrb[0].mxu1 %vm199_vm0, %v405_v34  ;;  %3726 = vmatprep.mubr.msk.bf16.mxu0 %vm199_vm0, %v405_v34  ;;  %v4387_v41 = vpack.c.bf16 %v379_v39, %v378_v38  ;;  %v1485_v43 = vld [vmem:[#allocation2 + $0x61] sm:$0xff]  ;;  %v1486_v44 = vld [vmem:[#allocation2 + $0x69] sm:$0xff] }
  0x2c   : > { %3615 = vmatpush3.bf16.msra.mxu1 %v4311_v5  ;;  %3727 = vmatmul.mubr.msk.bf16.vlgmr.msra.gmra.mrb[0].mxu0 %vm199_vm0, %v4380_v37  ;;  %v382_v45 = vld [vmem:[#allocation2 + $0x79] sm:$0xff]  ;;  %v383_v46 = vld [vmem:[#allocation2 + $0x81] sm:$0xff]  ;;  %v4405_v48 = vpack.c.bf16 %v1486_v44, %v1485_v43  ;;  %310 = vst.msk [vmem:[#allocation2 + $0x121] sm:$0xff] %vm199_vm0, %v277_v50  ;;  %311 = vst.msk [vmem:[#allocation2 + $0x129] sm:$0xff] %vm199_vm0, %v278_v51 }
  0x2d   : > { %3759 = vmatpush3.bf16.msra.mxu0 %v4321_v6  ;;  %3586 = vmatprep.mubr.msk.bf16.mxu1 %vm199_vm0, %v4380_v37  ;;  %v4407_v49 = vpack.c.bf16 %v383_v46, %v382_v45  ;;  %312 = vst.msk [vmem:[#allocation2 + $0x139] sm:$0xff] %vm199_vm0, %v279_v52  ;;  %v1489_v54 = vld [vmem:[#allocation2 + $0x91] sm:$0xff]  ;;  %v1490_v55 = vld [vmem:[#allocation2 + $0x99] sm:$0xff]  ;;  %313 = vst.msk [vmem:[#allocation2 + $0x141] sm:$0xff] %vm199_vm0, %v280_v53 }
  0x2e   : > { %3730 = vmatprep.mubr.msk.bf16.mxu0 %vm199_vm0, %v4387_v41  ;;  %3760 = vmatprep.subr.bf16.mxu0 %v4177_v40  ;;  %314 = vst.msk [vmem:[#allocation2 + $0x151] sm:$0xff] %vm199_vm0, %v281_v56  ;;  %v386_v60 = vld [vmem:[#allocation2 + $0xa9] sm:$0xff]  ;;  %v387_v61 = vld [vmem:[#allocation2 + $0xb1] sm:$0xff]  ;;  %315 = vst.msk [vmem:[#allocation2 + $0x159] sm:$0xff] %vm199_vm0, %v282_v57  ;;  %v4434_v62 = vpack.c.bf16 %v1490_v55, %v1489_v54 }
  0x2f   : > { %3616 = vmatprep.subr.bf16.mxu1 %v4178_v42  ;;  %316 = vst.msk [vmem:[#allocation2 + $0x169] sm:$0xff] %vm199_vm0, %v283_v58  ;;  %317 = vst.msk [vmem:[#allocation2 + $0x171] sm:$0xff] %vm199_vm0, %v284_v59  ;;  %v4436_v63 = vpack.c.bf16 %v387_v61, %v386_v60  ;;  %v1493_v2 = vld [vmem:[#allocation2 + $0xc1] sm:$0xff]  ;;  %v1494_v3 = vld [vmem:[#allocation2 + $0xc9] sm:$0xff] }
  0x30   : > { %3617 = vmatpush3.bf16.msra.mxu1 %v4178_v42  ;;  %v1785_v5 = vld [vmem:[#allocation2 + $0x1a] sm:$0xff]  ;;  %v1786_v6 = vld [vmem:[#allocation2 + $0x22] sm:$0xff]  ;;  %v4452_v7 = vpack.c.bf16 %v1494_v3, %v1493_v2  ;;  %v1787_v11 = vld [vmem:[#allocation2 + $0x32] sm:$0xff]  ;;  %318 = vst.msk [vmem:[#allocation2 + $0x181] sm:$0xff] %vm199_vm0, %v285_v17 }
  0x31   : > { %3761 = vmatpush3.bf16.msra.mxu0 %v4177_v40  ;;  %3650 = vmatprep.subr.bf16.mxu1 %v4441_v0  ;;  %v4454_v8 = vpack.c.bf16 %v1786_v6, %v1785_v5  ;;  %v390_v9 = vld [vmem:[#allocation2 + $0xd9] sm:$0xff]  ;;  %v391_v10 = vld [vmem:[#allocation2 + $0xe1] sm:$0xff]  ;;  %v392_v13 = vld [vmem:[#allocation2 + $0xf1] sm:$0xff]  ;;  %319 = vst.msk [vmem:[#allocation2 + $0x189] sm:$0xff] %vm199_vm0, %v286_v18 }
  0x32   : > { %3794 = vmatprep.subr.bf16.mxu0 %v4403_v47  ;;  %v1788_v12 = vld [vmem:[#allocation2 + $0x3a] sm:$0xff]  ;;  %v1789_v15 = vld [vmem:[#allocation2 + $0x4a] sm:$0xff]  ;;  %v1790_v16 = vld [vmem:[#allocation2 + $0x52] sm:$0xff]  ;;  %v4466_v19 = vpack.c.bf16 %v391_v10, %v390_v9 }
  0x33   : > { %3587 = vmatmul.mubr.msk.bf16.gmra.mrb[4].mxu1 %vm199_vm0, %v4387_v41  ;;  %v393_v14 = vld [vmem:[#allocation2 + $0xf9] sm:$0xff]  ;;  %v4470_v20 = vpack.c.bf16 %v1788_v12, %v1787_v11  ;;  %v4474_v22 = vpack.c.bf16 %v1790_v16, %v1789_v15  ;;  %v394_v24 = vld [vmem:[#allocation2 + $0x109] sm:$0xff]  ;;  %v395_v25 = vld [vmem:[#allocation2 + $0x111] sm:$0xff] }
  0x34   : > { %3731 = vmatmul.mubr.msk.bf16.gmra.mrb[4].mxu0 %vm199_vm0, %v4405_v48  ;;  %3590 = vmatprep.mubr.msk.bf16.mxu1 %vm199_vm0, %v4405_v48  ;;  %v4472_v21 = vpack.c.bf16 %v393_v14, %v392_v13  ;;  %v1791_v26 = vld [vmem:[#allocation2 + $0x62] sm:$0xff]  ;;  %v1792_v27 = vld [vmem:[#allocation2 + $0x6a] sm:$0xff]  ;;  %v1793_v30 = vld [vmem:[#allocation2 + $0x7a] sm:$0xff]  ;;  %v4493_v33 = vpack.c.bf16 %v395_v25, %v394_v24 }
  0x35   : > { %3734 = vmatprep.mubr.msk.bf16.mxu0 %vm199_vm0, %v4407_v49  ;;  %v396_v28 = vld [vmem:[#allocation2 + $0x121] sm:$0xff]  ;;  %v397_v29 = vld [vmem:[#allocation2 + $0x129] sm:$0xff]  ;;  %v4495_v34 = vpack.c.bf16 %v1792_v27, %v1791_v26  ;;  %v398_v38 = vld [vmem:[#allocation2 + $0x139] sm:$0xff] }
  0x36   : > { %v1794_v31 = vld [vmem:[#allocation2 + $0x82] sm:$0xff]  ;;  %v4491_v32 = vld [vmem:[%s4989_s1 + $0x70] sm:$0xff]   ;;  %v4497_v35 = vpack.c.bf16 %v397_v29, %v396_v28  ;;  %v1796_v40 = vld [vmem:[#allocation2 + $0x9a] sm:$0xff] }
  0x37   : > { %v4499_v36 = vpack.c.bf16 %v1794_v31, %v1793_v30  ;;  %v1795_v39 = vld [vmem:[#allocation2 + $0x92] sm:$0xff]  ;;  %v399_v42 = vld [vmem:[#allocation2 + $0x141] sm:$0xff]  ;;  %v1797_v45 = vld [vmem:[#allocation2 + $0xaa] sm:$0xff] }
  0x38   : > { %v400_v43 = vld [vmem:[#allocation2 + $0x151] sm:$0xff]  ;;  %v401_v44 = vld [vmem:[#allocation2 + $0x159] sm:$0xff]  ;;  %v4512_v50 = vpack.c.bf16 %v1796_v40, %v1795_v39  ;;  %v402_v53 = vld [vmem:[#allocation2 + $0x169] sm:$0xff] }
  0x39   : > { %v1798_v46 = vld [vmem:[#allocation2 + $0xb2] sm:$0xff]  ;;  %v4514_v51 = vpack.c.bf16 %v401_v44, %v400_v43  ;;  %v1799_v55 = vld [vmem:[#allocation2 + $0xc2] sm:$0xff]  ;;  %v1800_v56 = vld [vmem:[#allocation2 + $0xca] sm:$0xff] }
  0x3a   : > { %v4516_v52 = vpack.c.bf16 %v1798_v46, %v1797_v45  ;;  %v403_v54 = vld [vmem:[#allocation2 + $0x171] sm:$0xff]  ;;  %v320_v57 = vld [vmem:[#allocation2] sm:$0xff]  ;;  %v321_v58 = vld [vmem:[#allocation2 + $0x8] sm:$0xff]  ;;  %v4528_v2 = vpack.c.bf16 %v1800_v56, %v1799_v55 }
  0x3b   : > { %3591 = vmatmul.mubr.msk.bf16.gmra.mrb[8].mxu1 %vm199_vm0, %v4407_v49  ;;  %v1801_v59 = vld [vmem:[#allocation2 + $0xda] sm:$0xff]  ;;  %v1802_v60 = vld [vmem:[#allocation2 + $0xe2] sm:$0xff]  ;;  %v4526_v61 = vpack.c.bf16 %v403_v54, %v402_v53  ;;  %v352_v3 = vpack.c.bf16 %v321_v58, %v320_v57  ;;  %v1803_v10 = vld [vmem:[#allocation2 + $0xf2] sm:$0xff] }
  0x3c   : > { %3735 = vmatmul.mubr.msk.bf16.gmra.mrb[8].mxu0 %vm199_vm0, %v4434_v62  ;;  %3594 = vmatprep.mubr.msk.bf16.mxu1 %vm199_vm0, %v4434_v62  ;;  %v4530_v5 = vpack.c.bf16 %v1802_v60, %v1801_v59  ;;  %v322_v6 = vld [vmem:[#allocation2 + $0x18] sm:$0xff]  ;;  %v323_v9 = vld [vmem:[#allocation2 + $0x20] sm:$0xff]  ;;  %v324_v12 = vld [vmem:[#allocation2 + $0x30] sm:$0xff] }
  0x3d   : > { %3738 = vmatprep.mubr.msk.bf16.mxu0 %vm199_vm0, %v4436_v63  ;;  %v1804_v11 = vld [vmem:[#allocation2 + $0xfa] sm:$0xff]  ;;  %v1805_v14 = vld [vmem:[#allocation2 + $0x10a] sm:$0xff]  ;;  %v1806_v15 = vld [vmem:[#allocation2 + $0x112] sm:$0xff]  ;;  %v4539_v16 = vpack.c.bf16 %v323_v9, %v322_v6 }
  0x3e   : > { %v325_v13 = vld [vmem:[#allocation2 + $0x38] sm:$0xff]  ;;  %v4541_v17 = vpack.c.bf16 %v1804_v11, %v1803_v10  ;;  %v4182_v24 = vld [vmem:[%s4989_s1 + $0x28] sm:$0xff]   ;;  %v327_v26 = vld [vmem:[#allocation2 + $0x50] sm:$0xff] }
  0x3f   : > { %v4543_v18 = vpack.c.bf16 %v325_v13, %v324_v12  ;;  %v326_v25 = vld [vmem:[#allocation2 + $0x48] sm:$0xff]  ;;  %v328_v29 = vld [vmem:[#allocation2 + $0x60] sm:$0xff]  ;;  %v4562_v31 = vld [vmem:[%s4989_s1 + $0x30] sm:$0xff]  }
  0x40   : > { %v1807_v27 = vld [vmem:[#allocation2 + $0x122] sm:$0xff]  ;;  %v1808_v28 = vld [vmem:[#allocation2 + $0x12a] sm:$0xff]  ;;  %v4564_v39 = vpack.c.bf16 %v327_v26, %v326_v25  ;;  %v330_v44 = vld [vmem:[#allocation2 + $0x78] sm:$0xff] }
  0x41   : > { %v329_v30 = vld [vmem:[#allocation2 + $0x68] sm:$0xff]  ;;  %v4566_v40 = vpack.c.bf16 %v1808_v28, %v1807_v27  ;;  %v331_v45 = vld [vmem:[#allocation2 + $0x80] sm:$0xff]  ;;  %v1811_v46 = vld [vmem:[#allocation2 + $0x152] sm:$0xff] }
  0x42   : > { %v1812_v53 = vld [vmem:[#allocation2 + $0x15a] sm:$0xff]  ;;  %v332_v54 = vld [vmem:[#allocation2 + $0x90] sm:$0xff]  ;;  %v4581_v58 = vpack.c.bf16 %v331_v45, %v330_v44  ;;  %v334_v6 = vld [vmem:[#allocation2 + $0xa8] sm:$0xff] }
  0x43   : > { %3595 = vmatmul.mubr.msk.bf16.gmra.mrb[12].mxu1 %vm199_vm0, %v4436_v63  ;;  %v333_v55 = vld [vmem:[#allocation2 + $0x98] sm:$0xff]  ;;  %v1813_v56 = vld [vmem:[#allocation2 + $0x16a] sm:$0xff]  ;;  %v4583_v59 = vpack.c.bf16 %v1812_v53, %v1811_v46  ;;  %v336_v10 = vld [vmem:[#allocation2 + $0xc0] sm:$0xff] }
  0x44   : > { %3739 = vmatmul.mubr.msk.bf16.gmra.mrb[12].mxu0 %vm199_vm0, %v4452_v7  ;;  %3598 = vmatprep.mubr.msk.bf16.mxu1 %vm199_vm0, %v4452_v7  ;;  %v1814_v57 = vld [vmem:[#allocation2 + $0x172] sm:$0xff]  ;;  %v4585_v60 = vpack.c.bf16 %v333_v55, %v332_v54  ;;  %v1815_v11 = vld [vmem:[#allocation2 + $0x182] sm:$0xff]  ;;  %v1816_v12 = vld [vmem:[#allocation2 + $0x18a] sm:$0xff] }
  0x45   : > { %3762 = vmatprep.mubr.msk.bf16.mxu0 %vm199_vm0, %v4454_v8  ;;  %v335_v9 = vld [vmem:[#allocation2 + $0xb0] sm:$0xff]  ;;  %v337_v13 = vld [vmem:[#allocation2 + $0xc8] sm:$0xff]  ;;  %v338_v25 = vld [vmem:[#allocation2 + $0xd8] sm:$0xff] }
  0x46   : > { %v339_v26 = vld [vmem:[#allocation2 + $0xe0] sm:$0xff]  ;;  %v340_v27 = vld [vmem:[#allocation2 + $0xf0] sm:$0xff]  ;;  %v341_v28 = vld [vmem:[#allocation2 + $0xf8] sm:$0xff] }
  0x47   : > { %v343_v44 = vld [vmem:[#allocation2 + $0x110] sm:$0xff]  ;;  %v344_v45 = vld [vmem:[#allocation2 + $0x120] sm:$0xff]  ;;  %v345_v46 = vld [vmem:[#allocation2 + $0x128] sm:$0xff] }
  0x48   : > { %v4187_v53 = vld [vmem:[%s4989_s1 + $0x80] sm:$0xff]   ;;  %v4632_v55 = vpack.c.bf16 %v345_v46, %v344_v45  ;;  %v4188_v46 = vld [vmem:[%s4989_s1 + $0x88] sm:$0xff]  }
  0x4b   : > { %3599 = vmatmul.mubr.msk.bf16.gmra.mrb[16].mxu1 %vm199_vm0, %v4466_v19 }
  0x4c   : > { %3763 = vmatmul.mubr.msk.bf16.vlgmr.msra.gmra.mrb[0].mxu0 %vm199_vm0, %v4470_v20  ;;  %3602 = vmatprep.mubr.msk.bf16.mxu1 %vm199_vm0, %v4472_v21 }
  0x4d   : > { %3795 = vmatpush3.bf16.msra.mxu0 %v4403_v47  ;;  %3766 = vmatprep.mubr.msk.bf16.mxu0 %vm199_vm0, %v4474_v22  ;;  %v4510_v47 = vpack.c.bf16 %v399_v42, %v398_v38  ;;  %v1810_v38 = vld [vmem:[#allocation2 + $0x142] sm:$0xff]  ;;  %v4568_v42 = vpack.c.bf16 %v329_v30, %v328_v29  ;;  %v4611_v29 = vpack.c.bf16 %v339_v26, %v338_v25  ;;  %v868_v25 = vld [vmem:[#allocation2 + $0xa] sm:$0xff] }
  0x4e   : > { %3796 = vmatprep.subr.bf16.mxu0 %v4181_v23  ;;  %v4613_v30 = vpack.c.bf16 %v341_v28, %v340_v27  ;;  %v4186_v28 = vld [vmem:[%s4989_s1 + $0x38] sm:$0xff]  }
  0x51   : > { %3797 = vmatpush3.bf16.msra.mxu0 %v4181_v23  ;;  %v4545_v23 = vpack.c.bf16 %v1806_v15, %v1805_v14  ;;  %v4597_v14 = vpack.c.bf16 %v335_v9, %v334_v6  ;;  %v4599_v15 = vpack.c.bf16 %v1816_v12, %v1815_v11  ;;  %v349_v6 = vld [vmem:[#allocation2 + $0x158] sm:$0xff]  ;;  %v350_v11 = vld [vmem:[#allocation2 + $0x168] sm:$0xff]  ;;  %v351_v12 = vld [vmem:[#allocation2 + $0x170] sm:$0xff] }
  0x52   : > { %3830 = vmatprep.subr.bf16.mxu0 %v4491_v32  ;;  %v4654_v26 = vpack.c.bf16 %v351_v12, %v350_v11 }
  0x53   : > { %3603 = vmatmul.mubr.msk.bf16.gmra.mrb[20].mxu1 %vm199_vm0, %v4493_v33 }
  0x54   : > { %3767 = vmatmul.mubr.msk.bf16.gmra.mrb[4].mxu0 %vm199_vm0, %v4495_v34  ;;  %3606 = vmatprep.mubr.msk.bf16.mxu1 %vm199_vm0, %v4497_v35 }
  0x55   : > { %3770 = vmatprep.mubr.msk.bf16.mxu0 %vm199_vm0, %v4499_v36 }
  0x5b   : > { %3607 = vmatmul.mubr.msk.bf16.gmra.mrb[24].mxu1 %vm199_vm0, %v4510_v47 }
  0x5c   : > { %3771 = vmatmul.mubr.msk.bf16.gmra.mrb[8].mxu0 %vm199_vm0, %v4512_v50  ;;  %3610 = vmatprep.mubr.msk.bf16.mxu1 %vm199_vm0, %v4514_v51 }
  0x5d   : > { %3774 = vmatprep.mubr.msk.bf16.mxu0 %vm199_vm0, %v4516_v52 }
  0x63   : > { %3611 = vmatmul.mubr.msk.bf16.gmra.mrb[28].mxu1 %vm199_vm0, %v4526_v61 }
  0x64   : > { %3775 = vmatmul.mubr.msk.bf16.gmra.mrb[12].mxu0 %vm199_vm0, %v4528_v2  ;;  %3618 = vmatprep.mubr.msk.bf16.mxu1 %vm199_vm0, %v352_v3  ;;  %v4587_v3 = vpack.c.bf16 %v1814_v57, %v1813_v56  ;;  %v347_v56 = vld [vmem:[#allocation2 + $0x140] sm:$0xff]  ;;  %v348_v57 = vld [vmem:[#allocation2 + $0x150] sm:$0xff] }
  0x65   : > { %3778 = vmatprep.mubr.msk.bf16.mxu0 %vm199_vm0, %v4530_v5 }
  0x6b   : > { %3619 = vmatmul.mubr.msk.bf16.vlgmr.msra.gmra.mrb[0].mxu1 %vm199_vm0, %v4539_v16 }
  0x6c   : > { %3651 = vmatpush3.bf16.msra.mxu1 %v4441_v0  ;;  %3779 = vmatmul.mubr.msk.bf16.gmra.mrb[16].mxu0 %vm199_vm0, %v4541_v17  ;;  %v1809_v0 = vld [vmem:[#allocation2 + $0x13a] sm:$0xff] }
  0x6d   : > { %3622 = vmatprep.mubr.msk.bf16.mxu1 %vm199_vm0, %v4543_v18  ;;  %3782 = vmatprep.mubr.msk.bf16.mxu0 %vm199_vm0, %v4545_v23  ;;  %v4570_v43 = vpack.c.bf16 %v1810_v38, %v1809_v0  ;;  %v4185_v0 = vld [vmem:[%s4989_s1 + $0x78] sm:$0xff]   ;;  %v342_v38 = vld [vmem:[#allocation2 + $0x108] sm:$0xff] }
  0x6e   : > { %3652 = vmatprep.subr.bf16.mxu1 %v4182_v24  ;;  %v4630_v54 = vpack.c.bf16 %v343_v44, %v342_v38  ;;  %v2122_v38 = vld [vmem:[#allocation2 + $0x198] sm:$0xff]  ;;  %v2123_v44 = vld [vmem:[#allocation2 + $0x1a0] sm:$0xff] }
  0x6f   : > { %v2139_v45 = vpack.c.bf16 %v2123_v44, %v2122_v38 }
  0x70   : > { %3653 = vmatpush3.bf16.msra.mxu1 %v4182_v24  ;;  %v4601_v24 = vpack.c.bf16 %v337_v13, %v336_v10  ;;  %v4644_v10 = vpack.c.bf16 %v349_v6, %v348_v57  ;;  %v867_v13 = vld [vmem:[#allocation2 + $0x2] sm:$0xff] }
  0x71   : > { %3686 = vmatprep.subr.bf16.mxu1 %v4562_v31  ;;  %v899_v27 = vpack.c.bf16 %v868_v25, %v867_v13 }
  0x73   : > { %3623 = vmatmul.mubr.msk.bf16.gmra.mrb[4].mxu1 %vm199_vm0, %v4564_v39 }
  0x74   : > { %3783 = vmatmul.mubr.msk.bf16.gmra.mrb[20].mxu0 %vm199_vm0, %v4566_v40  ;;  %3626 = vmatprep.mubr.msk.bf16.mxu1 %vm199_vm0, %v4568_v42 }
  0x75   : > { %3786 = vmatprep.mubr.msk.bf16.mxu0 %vm199_vm0, %v4570_v43 }
  0x7b   : > { %3627 = vmatmul.mubr.msk.bf16.gmra.mrb[8].mxu1 %vm199_vm0, %v4581_v58 }
  0x7c   : > { %3787 = vmatmul.mubr.msk.bf16.gmra.mrb[24].mxu0 %vm199_vm0, %v4583_v59  ;;  %3630 = vmatprep.mubr.msk.bf16.mxu1 %vm199_vm0, %v4585_v60 }
  0x7d   : > { %3790 = vmatprep.mubr.msk.bf16.mxu0 %vm199_vm0, %v4587_v3 }
  0x83   : > { %3631 = vmatmul.mubr.msk.bf16.gmra.mrb[12].mxu1 %vm199_vm0, %v4597_v14 }
  0x84   : > { %3791 = vmatmul.mubr.msk.bf16.gmra.mrb[28].mxu0 %vm199_vm0, %v4599_v15  ;;  %3634 = vmatprep.mubr.msk.bf16.mxu1 %vm199_vm0, %v4601_v24 }
  0x85   : > { %3798 = vmatprep.mubr.msk.bf16.mxu0 %vm199_vm0, %v4543_v18 }
  0x8b   : > { %3635 = vmatmul.mubr.msk.bf16.gmra.mrb[16].mxu1 %vm199_vm0, %v4611_v29 }
  0x8c   : > { %3799 = vmatmul.mubr.msk.bf16.vlgmr.msra.gmra.mrb[0].mxu0 %vm199_vm0, %v4564_v39  ;;  %3638 = vmatprep.mubr.msk.bf16.mxu1 %vm199_vm0, %v4613_v30 }
  0x8d   : > { %3831 = vmatpush3.bf16.msra.mxu0 %v4491_v32  ;;  %3802 = vmatprep.mubr.msk.bf16.mxu0 %vm199_vm0, %v4568_v42  ;;  %v346_v32 = vld [vmem:[#allocation2 + $0x138] sm:$0xff] }
  0x8e   : > { %3832 = vmatprep.subr.bf16.mxu0 %v4185_v0  ;;  %v4642_v9 = vpack.c.bf16 %v347_v56, %v346_v32 }
  0x91   : > { %3833 = vmatpush3.bf16.msra.mxu0 %v4185_v0 }
  0x92   : > { %3866 = vmatprep.subr.bf16.mxu0 %v4187_v53 }
  0x93   : > { %3639 = vmatmul.mubr.msk.bf16.gmra.mrb[20].mxu1 %vm199_vm0, %v4630_v54 }
  0x94   : > { %3803 = vmatmul.mubr.msk.bf16.gmra.mrb[4].mxu0 %vm199_vm0, %v4581_v58  ;;  %3642 = vmatprep.mubr.msk.bf16.mxu1 %vm199_vm0, %v4632_v55 }
  0x95   : > { %3806 = vmatprep.mubr.msk.bf16.mxu0 %vm199_vm0, %v4585_v60 }
  0x9b   : > { %3643 = vmatmul.mubr.msk.bf16.gmra.mrb[24].mxu1 %vm199_vm0, %v4642_v9 }
  0x9c   : > { %3807 = vmatmul.mubr.msk.bf16.gmra.mrb[8].mxu0 %vm199_vm0, %v4597_v14  ;;  %3646 = vmatprep.mubr.msk.bf16.mxu1 %vm199_vm0, %v4644_v10 }
  0x9d   : > { %3810 = vmatprep.mubr.msk.bf16.mxu0 %vm199_vm0, %v4601_v24 }
  0xa3   : > { %3647 = vmatmul.mubr.msk.bf16.gmra.mrb[28].mxu1 %vm199_vm0, %v4654_v26 }
  0xa4   : > { %3811 = vmatmul.mubr.msk.bf16.gmra.mrb[12].mxu0 %vm199_vm0, %v4611_v29  ;;  %3654 = vmatprep.mubr.msk.bf16.mxu1 %vm199_vm0, %v899_v27 }
  0xa5   : > { %3814 = vmatprep.mubr.msk.bf16.mxu0 %vm199_vm0, %v4613_v30 }
  0xab   : > { %3655 = vmatmul.mubr.msk.bf16.vlgmr.msra.gmra.mrb[0].mxu1 %vm199_vm0, %v4454_v8  ;;  %v2120_v8 = vld [vmem:[#allocation2 + $0x180] sm:$0xff] }
  0xac   : > { %3687 = vmatpush3.bf16.msra.mxu1 %v4562_v31  ;;  %3815 = vmatmul.mubr.msk.bf16.gmra.mrb[16].mxu0 %vm199_vm0, %v4630_v54  ;;  %v2121_v31 = vld [vmem:[#allocation2 + $0x188] sm:$0xff] }
  0xad   : > { %3658 = vmatprep.mubr.msk.bf16.mxu1 %vm199_vm0, %v4470_v20  ;;  %3818 = vmatprep.mubr.msk.bf16.mxu0 %vm199_vm0, %v4632_v55  ;;  %v4684_v0 = vpack.c.bf16 %v2121_v31, %v2120_v8 }
  0xae   : > { %3688 = vmatprep.subr.bf16.mxu1 %v4186_v28 }
  0xb0   : > { %3689 = vmatpush3.bf16.msra.mxu1 %v4186_v28 }
  0xb1   : > { %3902 = vmatprep.subr.bf16.mxu1 %v4237_v1 }
  0xb3   : > { %3659 = vmatmul.mubr.msk.bf16.gmra.mrb[4].mxu1 %vm199_vm0, %v4474_v22 }
  0xb4   : > { %3819 = vmatmul.mubr.msk.bf16.gmra.mrb[20].mxu0 %vm199_vm0, %v4642_v9  ;;  %3662 = vmatprep.mubr.msk.bf16.mxu1 %vm199_vm0, %v4495_v34 }
  0xb5   : > { %3822 = vmatprep.mubr.msk.bf16.mxu0 %vm199_vm0, %v4644_v10 }
  0xbb   : > { %3663 = vmatmul.mubr.msk.bf16.gmra.mrb[8].mxu1 %vm199_vm0, %v4499_v36 }
  0xbc   : > { %3823 = vmatmul.mubr.msk.bf16.gmra.mrb[24].mxu0 %vm199_vm0, %v4654_v26  ;;  %3666 = vmatprep.mubr.msk.bf16.mxu1 %vm199_vm0, %v4512_v50 }
  0xbd   : > { %3826 = vmatprep.mubr.msk.bf16.mxu0 %vm199_vm0, %v4684_v0 }
  0xc3   : > { %3667 = vmatmul.mubr.msk.bf16.gmra.mrb[12].mxu1 %vm199_vm0, %v4516_v52 }
  0xc4   : > { %3827 = vmatmul.mubr.msk.bf16.gmra.mrb[28].mxu0 %vm199_vm0, %v2139_v45  ;;  %3670 = vmatprep.mubr.msk.bf16.mxu1 %vm199_vm0, %v4528_v2 }
  0xc5   : > { %3834 = vmatprep.mubr.msk.bf16.mxu0 %vm199_vm0, %v4380_v37  ;;  %v2427_v37 = vld [vmem:[#allocation2 + $0x189] sm:$0xff] }
  0xcb   : > { %3671 = vmatmul.mubr.msk.bf16.gmra.mrb[16].mxu1 %vm199_vm0, %v4530_v5 }
  0xcc   : > { %3835 = vmatmul.mubr.msk.bf16.vlgmr.msra.gmra.mrb[0].mxu0 %vm199_vm0, %v4387_v41  ;;  %3674 = vmatprep.mubr.msk.bf16.mxu1 %vm199_vm0, %v4541_v17 }
  0xcd   : > { %3867 = vmatpush3.bf16.msra.mxu0 %v4187_v53  ;;  %3838 = vmatprep.mubr.msk.bf16.mxu0 %vm199_vm0, %v4405_v48  ;;  %v2429_v48 = vld [vmem:[#allocation2 + $0x1a1] sm:$0xff] }
  0xce   : > { %3868 = vmatprep.subr.bf16.mxu0 %v4188_v46 }
  0xd1   : > { %3869 = vmatpush3.bf16.msra.mxu0 %v4188_v46 }
  0xd3   : > { %3675 = vmatmul.mubr.msk.bf16.gmra.mrb[20].mxu1 %vm199_vm0, %v4545_v23 }
  0xd4   : > { %3839 = vmatmul.mubr.msk.bf16.gmra.mrb[4].mxu0 %vm199_vm0, %v4407_v49  ;;  %3678 = vmatprep.mubr.msk.bf16.mxu1 %vm199_vm0, %v4566_v40 }
  0xd5   : > { %3842 = vmatprep.mubr.msk.bf16.mxu0 %vm199_vm0, %v4434_v62  ;;  %v1495_v62 = vld [vmem:[#allocation2 + $0xd9] sm:$0xff] }
  0xdb   : > { %3679 = vmatmul.mubr.msk.bf16.gmra.mrb[24].mxu1 %vm199_vm0, %v4570_v43 }
  0xdc   : > { %3843 = vmatmul.mubr.msk.bf16.gmra.mrb[8].mxu0 %vm199_vm0, %v4436_v63  ;;  %3682 = vmatprep.mubr.msk.bf16.mxu1 %vm199_vm0, %v4583_v59  ;;  %v1496_v63 = vld [vmem:[#allocation2 + $0xe1] sm:$0xff] }
  0xdd   : > { %3846 = vmatprep.mubr.msk.bf16.mxu0 %vm199_vm0, %v4452_v7  ;;  %v1519_v7 = vpack.c.bf16 %v1496_v63, %v1495_v62 }
  0xe3   : > { %3683 = vmatmul.mubr.msk.bf16.gmra.mrb[28].mxu1 %vm199_vm0, %v4587_v3 }
  0xe4   : > { %3847 = vmatmul.mubr.msk.bf16.gmra.mrb[12].mxu0 %vm199_vm0, %v4466_v19  ;;  %3690 = vmatprep.mubr.msk.bf16.mxu1 %vm199_vm0, %v4539_v16  ;;  %v1499_v19 = vld [vmem:[#allocation2 + $0x109] sm:$0xff] }
  0xe5   : > { %3850 = vmatprep.mubr.msk.bf16.mxu0 %vm199_vm0, %v4472_v21 }
  0xeb   : > { %3691 = vmatmul.mubr.msk.bf16.vlgmr.msra.gmra.mrb[0].mxu1 %vm199_vm0, %v4543_v18 }
  0xec   : > { %3904 = vmatpush3.bf16.msra.mxu1 %v4237_v1  ;;  %3851 = vmatmul.mubr.msk.bf16.gmra.mrb[16].mxu0 %vm199_vm0, %v4493_v33  ;;  %v2426_v1 = vld [vmem:[#allocation2 + $0x181] sm:$0xff] }
  0xed   : > { %3694 = vmatprep.mubr.msk.bf16.mxu1 %vm199_vm0, %v4564_v39  ;;  %3854 = vmatprep.mubr.msk.bf16.mxu0 %vm199_vm0, %v4497_v35  ;;  %v2444_v41 = vpack.c.bf16 %v2427_v37, %v2426_v1  ;;  %v2735_v33 = vld [vmem:[#allocation2 + $0x1a2] sm:$0xff] }
  0xee   : > { %3903 = vmatprep.subr.bf16.mxu1 %v4284_v4 }
  0xf0   : > { %3905 = vmatpush3.bf16.msra.mxu1 %v4284_v4  ;;  %v2428_v4 = vld [vmem:[#allocation2 + $0x199] sm:$0xff] }
  0xf1   : > { %v2445_v49 = vpack.c.bf16 %v2429_v48, %v2428_v4 }
  0xf3   : > { %3695 = vmatmul.mubr.msk.bf16.gmra.mrb[4].mxu1 %vm199_vm0, %v4568_v42 }
  0xf4   : > { %3855 = vmatmul.mubr.msk.bf16.gmra.mrb[20].mxu0 %vm199_vm0, %v4510_v47  ;;  %3698 = vmatprep.mubr.msk.bf16.mxu1 %vm199_vm0, %v4581_v58  ;;  %v4838_v58 = vld [vmem:[%s4990_s2] ss:$0 sm:$0xff] }
  0xf5   : > { %3858 = vmatprep.mubr.msk.bf16.mxu0 %vm199_vm0, %v4514_v51 }
  0xfb   : > { %3699 = vmatmul.mubr.msk.bf16.gmra.mrb[8].mxu1 %vm199_vm0, %v4585_v60 }
  0xfc   : > { %3859 = vmatmul.mubr.msk.bf16.gmra.mrb[24].mxu0 %vm199_vm0, %v4526_v61  ;;  %3702 = vmatprep.mubr.msk.bf16.mxu1 %vm199_vm0, %v4597_v14 }
  0xfd   : > { %3862 = vmatprep.mubr.msk.bf16.mxu0 %vm199_vm0, %v2444_v41 }
 0x103   : > { %3703 = vmatmul.mubr.msk.bf16.gmra.mrb[12].mxu1 %vm199_vm0, %v4601_v24 }
 0x104   : > { %3863 = vmatmul.mubr.msk.bf16.gmra.mrb[28].mxu0 %vm199_vm0, %v2445_v49  ;;  %3706 = vmatprep.mubr.msk.bf16.mxu1 %vm199_vm0, %v4611_v29 }
 0x105   : > { %3870 = vmatprep.mubr.msk.bf16.mxu0 %vm199_vm0, %v4470_v20  ;;  %v1500_v20 = vld [vmem:[#allocation2 + $0x111] sm:$0xff] }
 0x10b   : > { %3707 = vmatmul.mubr.msk.bf16.gmra.mrb[16].mxu1 %vm199_vm0, %v4613_v30 }
 0x10c   : > { %3871 = vmatmul.mubr.msk.bf16.vlgmr.msra.gmra.mrb[0].mxu0 %vm199_vm0, %v4474_v22  ;;  %3710 = vmatprep.mubr.msk.bf16.mxu1 %vm199_vm0, %v4630_v54  ;;  %v1521_v22 = vpack.c.bf16 %v1500_v20, %v1499_v19 }
 0x10d   : > { %3874 = vmatprep.mubr.msk.bf16.mxu0 %vm199_vm0, %v4495_v34 }
 0x113   : > { %3711 = vmatmul.mubr.msk.bf16.gmra.mrb[20].mxu1 %vm199_vm0, %v4632_v55 }
 0x114   : > { %3875 = vmatmul.mubr.msk.bf16.gmra.mrb[4].mxu0 %vm199_vm0, %v4499_v36  ;;  %3714 = vmatprep.mubr.msk.bf16.mxu1 %vm199_vm0, %v4642_v9 }
 0x115   : > { %3878 = vmatprep.mubr.msk.bf16.mxu0 %vm199_vm0, %v4512_v50 }
 0x11b   : > { %3715 = vmatmul.mubr.msk.bf16.gmra.mrb[24].mxu1 %vm199_vm0, %v4644_v10 }
 0x11c   : > { %3879 = vmatmul.mubr.msk.bf16.gmra.mrb[8].mxu0 %vm199_vm0, %v4516_v52  ;;  %3718 = vmatprep.mubr.msk.bf16.mxu1 %vm199_vm0, %v4654_v26 }
 0x11d   : > { %3882 = vmatprep.mubr.msk.bf16.mxu0 %vm199_vm0, %v4528_v2 }
 0x123   : > { %3719 = vmatmul.mubr.msk.bf16.gmra.mrb[28].mxu1 %vm199_vm0, %v4684_v0 }
 0x124   : > { %3883 = vmatmul.mubr.msk.bf16.gmra.mrb[12].mxu0 %vm199_vm0, %v4530_v5  ;;  %3742 = vmatprep.mubr.msk.bf16.mxu1 %vm199_vm0, %v1519_v7 }
 0x125   : > { %3886 = vmatprep.mubr.msk.bf16.mxu0 %vm199_vm0, %v4541_v17 }
 0x12b   : > { %3743 = vmatmul.mubr.msk.bf16.vlgmr.msra.gmra.mrb[16].mxu1 %vm199_vm0, %v4472_v21  ;;  %v2734_v21 = vld [vmem:[#allocation2 + $0x19a] sm:$0xff] }
 0x12c   : > { %3887 = vmatmul.mubr.msk.bf16.gmra.mrb[16].mxu0 %vm199_vm0, %v4545_v23  ;;  %3746 = vmatprep.mubr.msk.bf16.mxu1 %vm199_vm0, %v1521_v22  ;;  %v2751_v34 = vpack.c.bf16 %v2735_v33, %v2734_v21 }
 0x12d   : > { %3890 = vmatprep.mubr.msk.bf16.mxu0 %vm199_vm0, %v4566_v40 }
 0x133   : > { %3747 = vmatmul.mubr.msk.bf16.gmra.mrb[20].mxu1 %vm199_vm0, %v4497_v35 }
 0x134   : > { %3891 = vmatmul.mubr.msk.bf16.gmra.mrb[20].mxu0 %vm199_vm0, %v4570_v43  ;;  %3750 = vmatprep.mubr.msk.bf16.mxu1 %vm199_vm0, %v4510_v47 }
 0x135   : > { %3894 = vmatprep.mubr.msk.bf16.mxu0 %vm199_vm0, %v4583_v59 }
 0x13b   : > { %3751 = vmatmul.mubr.msk.bf16.gmra.mrb[24].mxu1 %vm199_vm0, %v4514_v51 }
 0x13c   : > { %3895 = vmatmul.mubr.msk.bf16.gmra.mrb[24].mxu0 %vm199_vm0, %v4587_v3  ;;  %3754 = vmatprep.mubr.msk.bf16.mxu1 %vm199_vm0, %v4526_v61  ;;  %v4843_v3 = vld [vmem:[%s4991_s3] ss:$0 sm:$0xff] }
 0x13d   : > { %3898 = vmatprep.mubr.msk.bf16.mxu0 %vm199_vm0, %v4599_v15 }
 0x143   : > { %3755 = vmatmul.mubr.msk.bf16.gmra.mrb[28].mxu1 %vm199_vm0, %v2444_v41 }
 0x144   : > { %3899 = vmatmul.mubr.msk.bf16.gmra.mrb[28].mxu0 %vm199_vm0, %v2751_v34 }
 0x1be   : > { %v3692_v35 = vpop.f32.mrb[0].mxu1 }
 0x1bf   : > { %v1320_v36 = vpop.f32.mrb[1].mxu1 }
 0x1c0   : > { %v3693_v47 = vpop.f32.mrb[2].mxu1 }
 0x1c1   : > { %v1323_v50 = vpop.f32.mrb[3].mxu1 }
 0x1c6   : > { %v3696_v51 = vpop.f32.mrb[4].mxu1 }
 0x1c7   : > { %v1336_v52 = vpop.f32.mrb[5].mxu1 }
 0x1c8   : > { %v3697_v2 = vpop.f32.mrb[6].mxu1 }
 0x1c9   : > { %v1339_v5 = vpop.f32.mrb[7].mxu1 }
 0x1ce   : > { %v3700_v16 = vpop.f32.mrb[8].mxu1 }
 0x1cf   : > { %v1352_v61 = vpop.f32.mrb[9].mxu1 }
 0x1d0   : > { %v3701_v17 = vpop.f32.mrb[10].mxu1 }
 0x1d1   : > { %v4825_v18 = vpop.f32.mrb[11].mxu1 }
 0x1d6   : > { %v4827_v23 = vpop.f32.mrb[12].mxu1 }
 0x1d7   : > { %v4829_v39 = vpop.f32.mrb[13].mxu1 }
 0x1d8   : > { %v4831_v40 = vpop.f32.mrb[14].mxu1 }
 0x1d9   : > { %v4833_v42 = vpop.f32.mrb[15].mxu1 }
 0x1df   : > { %v3872_v43 = vpop.f32.mrb[0].mxu0 }
 0x1e0   : > { %v3906_v59 = vadd.f32 %v3872_v43, %v3692_v35  ;;  %v2851_v60 = vpop.f32.mrb[1].mxu0 }
 0x1e1   : > { %v3907_v14 = vadd.f32 %v2851_v60, %v1320_v36  ;;  %v3873_v15 = vpop.f32.mrb[2].mxu0 }
 0x1e2   : > { %v3019_v24 = vmul.f32 %v3906_v59, %v4838_v58  ;;  %v3908_v29 = vadd.f32 %v3873_v15, %v3693_v47  ;;  %v2854_v30 = vpop.f32.mrb[3].mxu0 }
 0x1e3   : > { %v3017_v53 = vmul.f32 %v3907_v14, %v4838_v58  ;;  %v3909_v54 = vadd.f32 %v2854_v30, %v1323_v50 }
 0x1e4   : > { %v3058_v55 = vadd.f32 %v4843_v3, %v3019_v24  ;;  %v3020_v32 = vmul.f32 %v3908_v29, %v4838_v58 }
 0x1e5   : > { %v3056_v56 = vadd.f32 %v4843_v3, %v3017_v53  ;;  %v3018_v57 = vmul.f32 %v3909_v54, %v4838_v58 }
 0x1e6   : > { %v3090_v6 = vmax.f32 %v3058_v55, 0.0  ;;  %v3059_v9 = vadd.f32 %v4843_v3, %v3020_v32 }
 0x1e7   : > { %v3088_v10 = vmax.f32 %v3056_v56, 0.0  ;;  %v3057_v11 = vadd.f32 %v4843_v3, %v3018_v57  ;;  %v3876_v12 = vpop.f32.mrb[4].mxu0 }
 0x1e8   : > { %3122 = vst.msk [vmem:[%s4854_s14 + $0x10] sm:$0xff] %vm199_vm0, %v3090_v6  ;;  %v3091_v13 = vmax.f32 %v3059_v9, 0.0  ;;  %v3910_v25 = vadd.f32 %v3876_v12, %v3696_v51  ;;  %v2867_v26 = vpop.f32.mrb[5].mxu0 }
 0x1e9   : > { %3120 = vst.msk [vmem:[%s4854_s14] sm:$0xff] %vm199_vm0, %v3088_v10  ;;  %v3089_v27 = vmax.f32 %v3057_v11, 0.0  ;;  %v3911_v28 = vadd.f32 %v2867_v26, %v1336_v52  ;;  %v3877_v8 = vpop.f32.mrb[6].mxu0 }
 0x1ea   : > { %3123 = vst.msk [vmem:[%s4854_s14 + $0x18] sm:$0xff] %vm199_vm0, %v3091_v13  ;;  %v3023_v31 = vmul.f32 %v3910_v25, %v4838_v58  ;;  %v3912_v0 = vadd.f32 %v3877_v8, %v3697_v2  ;;  %v2870_v38 = vpop.f32.mrb[7].mxu0 }
 0x1eb   : > { %3121 = vst.msk [vmem:[%s4854_s14 + $0x8] sm:$0xff] %vm199_vm0, %v3089_v27  ;;  %v3021_v44 = vmul.f32 %v3911_v28, %v4838_v58  ;;  %v3913_v45 = vadd.f32 %v2870_v38, %v1339_v5 }
 0x1ec   : > { %v3062_v46 = vadd.f32 %v4843_v3, %v3023_v31  ;;  %v3024_v1 = vmul.f32 %v3912_v0, %v4838_v58 }
 0x1ed   : > { %v3060_v37 = vadd.f32 %v4843_v3, %v3021_v44  ;;  %v3022_v41 = vmul.f32 %v3913_v45, %v4838_v58 }
 0x1ee   : > { %v3094_v4 = vmax.f32 %v3062_v46, 0.0  ;;  %v3063_v48 = vadd.f32 %v4843_v3, %v3024_v1 }
 0x1ef   : > { %v3092_v49 = vmax.f32 %v3060_v37, 0.0  ;;  %v3061_v62 = vadd.f32 %v4843_v3, %v3022_v41  ;;  %v3880_v63 = vpop.f32.mrb[8].mxu0 }
 0x1f0   : > { %3126 = vst.msk [vmem:[%s4854_s14 + $0x30] sm:$0xff] %vm199_vm0, %v3094_v4  ;;  %v3095_v7 = vmax.f32 %v3063_v48, 0.0  ;;  %v3914_v19 = vadd.f32 %v3880_v63, %v3700_v16  ;;  %v2883_v20 = vpop.f32.mrb[9].mxu0 }
 0x1f1   : > { %3124 = vst.msk [vmem:[%s4854_s14 + $0x20] sm:$0xff] %vm199_vm0, %v3092_v49  ;;  %v3093_v22 = vmax.f32 %v3061_v62, 0.0  ;;  %v3915_v21 = vadd.f32 %v2883_v20, %v1352_v61  ;;  %v3881_v33 = vpop.f32.mrb[10].mxu0 }
 0x1f2   : > { %3127 = vst.msk [vmem:[%s4854_s14 + $0x38] sm:$0xff] %vm199_vm0, %v3095_v7  ;;  %v3027_v34 = vmul.f32 %v3914_v19, %v4838_v58  ;;  %v3916_v35 = vadd.f32 %v3881_v33, %v3701_v17  ;;  %v2886_v36 = vpop.f32.mrb[11].mxu0 }
 0x1f3   : > { %3125 = vst.msk [vmem:[%s4854_s14 + $0x28] sm:$0xff] %vm199_vm0, %v3093_v22  ;;  %v3025_v47 = vmul.f32 %v3915_v21, %v4838_v58  ;;  %v3917_v50 = vadd.f32 %v2886_v36, %v4825_v18 }
 0x1f4   : > { %v3066_v51 = vadd.f32 %v4843_v3, %v3027_v34  ;;  %v3028_v52 = vmul.f32 %v3916_v35, %v4838_v58 }
 0x1f5   : > { %v3064_v2 = vadd.f32 %v4843_v3, %v3025_v47  ;;  %v3026_v5 = vmul.f32 %v3917_v50, %v4838_v58 }
 0x1f6   : > { %v3098_v16 = vmax.f32 %v3066_v51, 0.0  ;;  %v3067_v61 = vadd.f32 %v4843_v3, %v3028_v52 }
 0x1f7   : > { %v3096_v17 = vmax.f32 %v3064_v2, 0.0  ;;  %v3065_v43 = vadd.f32 %v4843_v3, %v3026_v5  ;;  %v3884_v59 = vpop.f32.mrb[12].mxu0 }
 0x1f8   : > { %3130 = vst.msk [vmem:[%s4854_s14 + $0x50] sm:$0xff] %vm199_vm0, %v3098_v16  ;;  %v3099_v18 = vmax.f32 %v3067_v61, 0.0  ;;  %v3918_v60 = vadd.f32 %v3884_v59, %v4827_v23  ;;  %v2899_v14 = vpop.f32.mrb[13].mxu0 }
 0x1f9   : > { %3128 = vst.msk [vmem:[%s4854_s14 + $0x40] sm:$0xff] %vm199_vm0, %v3096_v17  ;;  %v3097_v15 = vmax.f32 %v3065_v43, 0.0  ;;  %v3919_v24 = vadd.f32 %v2899_v14, %v4829_v39  ;;  %v3885_v29 = vpop.f32.mrb[14].mxu0 }
 0x1fa   : > { %3131 = vst.msk [vmem:[%s4854_s14 + $0x58] sm:$0xff] %vm199_vm0, %v3099_v18  ;;  %v3031_v30 = vmul.f32 %v3918_v60, %v4838_v58  ;;  %v3920_v53 = vadd.f32 %v3885_v29, %v4831_v40  ;;  %v2902_v54 = vpop.f32.mrb[15].mxu0 }
 0x1fb   : > { %3129 = vst.msk [vmem:[%s4854_s14 + $0x48] sm:$0xff] %vm199_vm0, %v3097_v15  ;;  %v3029_v55 = vmul.f32 %v3919_v24, %v4838_v58  ;;  %v3921_v23 = vadd.f32 %v2902_v54, %v4833_v42 }
 0x1fc   : > { %v3070_v32 = vadd.f32 %v4843_v3, %v3031_v30  ;;  %v3032_v39 = vmul.f32 %v3920_v53, %v4838_v58 }
 0x1fd   : > { %v3068_v56 = vadd.f32 %v4843_v3, %v3029_v55  ;;  %v3030_v57 = vmul.f32 %v3921_v23, %v4838_v58 }
 0x1fe   : > { %v3102_v6 = vmax.f32 %v3070_v32, 0.0  ;;  %v3071_v40 = vadd.f32 %v4843_v3, %v3032_v39  ;;  %v3744_v9 = vpop.f32.mrb[16].mxu1 }
 0x1ff   : > { %v3100_v10 = vmax.f32 %v3068_v56, 0.0  ;;  %v3069_v11 = vadd.f32 %v4843_v3, %v3030_v57  ;;  %v1690_v12 = vpop.f32.mrb[17].mxu1  ;;  %v3888_v42 = vpop.f32.mrb[16].mxu0 }
 0x200   : > { %3134 = vst.msk [vmem:[%s4854_s14 + $0x70] sm:$0xff] %vm199_vm0, %v3102_v6  ;;  %v3103_v13 = vmax.f32 %v3071_v40, 0.0  ;;  %v3922_v25 = vadd.f32 %v3888_v42, %v3744_v9  ;;  %v3745_v26 = vpop.f32.mrb[18].mxu1  ;;  %v2915_v27 = vpop.f32.mrb[17].mxu0 }
 0x201   : > { %3132 = vst.msk [vmem:[%s4854_s14 + $0x60] sm:$0xff] %vm199_vm0, %v3100_v10  ;;  %v3101_v28 = vmax.f32 %v3069_v11, 0.0  ;;  %v3923_v8 = vadd.f32 %v2915_v27, %v1690_v12  ;;  %v1693_v31 = vpop.f32.mrb[19].mxu1  ;;  %v3889_v0 = vpop.f32.mrb[18].mxu0 }
 0x202   : > { %3135 = vst.msk [vmem:[%s4854_s14 + $0x78] sm:$0xff] %vm199_vm0, %v3103_v13  ;;  %v3035_v38 = vmul.f32 %v3922_v25, %v4838_v58  ;;  %v3924_v44 = vadd.f32 %v3889_v0, %v3745_v26  ;;  %v2918_v45 = vpop.f32.mrb[19].mxu0 }
 0x203   : > { %3133 = vst.msk [vmem:[%s4854_s14 + $0x68] sm:$0xff] %vm199_vm0, %v3101_v28  ;;  %v3033_v46 = vmul.f32 %v3923_v8, %v4838_v58  ;;  %v3925_v1 = vadd.f32 %v2918_v45, %v1693_v31 }
 0x204   : > { %v3074_v37 = vadd.f32 %v4843_v3, %v3035_v38  ;;  %v3036_v41 = vmul.f32 %v3924_v44, %v4838_v58 }
 0x205   : > { %v3072_v4 = vadd.f32 %v4843_v3, %v3033_v46  ;;  %v3034_v48 = vmul.f32 %v3925_v1, %v4838_v58 }
 0x206   : > { %v3106_v49 = vmax.f32 %v3074_v37, 0.0  ;;  %v3075_v62 = vadd.f32 %v4843_v3, %v3036_v41  ;;  %v3748_v63 = vpop.f32.mrb[20].mxu1 }
 0x207   : > { %v3104_v7 = vmax.f32 %v3072_v4, 0.0  ;;  %v3073_v19 = vadd.f32 %v4843_v3, %v3034_v48  ;;  %v1706_v20 = vpop.f32.mrb[21].mxu1  ;;  %v3892_v22 = vpop.f32.mrb[20].mxu0 }
 0x208   : > { %3138 = vst.msk [vmem:[%s4854_s14 + $0x90] sm:$0xff] %vm199_vm0, %v3106_v49  ;;  %v3107_v21 = vmax.f32 %v3075_v62, 0.0  ;;  %v3926_v33 = vadd.f32 %v3892_v22, %v3748_v63  ;;  %v3749_v34 = vpop.f32.mrb[22].mxu1  ;;  %v2931_v35 = vpop.f32.mrb[21].mxu0 }
 0x209   : > { %3136 = vst.msk [vmem:[%s4854_s14 + $0x80] sm:$0xff] %vm199_vm0, %v3104_v7  ;;  %v3105_v36 = vmax.f32 %v3073_v19, 0.0  ;;  %v3927_v47 = vadd.f32 %v2931_v35, %v1706_v20  ;;  %v1709_v50 = vpop.f32.mrb[23].mxu1  ;;  %v3893_v51 = vpop.f32.mrb[22].mxu0 }
 0x20a   : > { %3139 = vst.msk [vmem:[%s4854_s14 + $0x98] sm:$0xff] %vm199_vm0, %v3107_v21  ;;  %v3039_v52 = vmul.f32 %v3926_v33, %v4838_v58  ;;  %v3928_v2 = vadd.f32 %v3893_v51, %v3749_v34  ;;  %v2934_v5 = vpop.f32.mrb[23].mxu0 }
 0x20b   : > { %3137 = vst.msk [vmem:[%s4854_s14 + $0x88] sm:$0xff] %vm199_vm0, %v3105_v36  ;;  %v3037_v16 = vmul.f32 %v3927_v47, %v4838_v58  ;;  %v3929_v61 = vadd.f32 %v2934_v5, %v1709_v50 }
 0x20c   : > { %v3078_v17 = vadd.f32 %v4843_v3, %v3039_v52  ;;  %v3040_v43 = vmul.f32 %v3928_v2, %v4838_v58 }
 0x20d   : > { %v3076_v59 = vadd.f32 %v4843_v3, %v3037_v16  ;;  %v3038_v18 = vmul.f32 %v3929_v61, %v4838_v58 }
 0x20e   : > { %v3110_v60 = vmax.f32 %v3078_v17, 0.0  ;;  %v3079_v14 = vadd.f32 %v4843_v3, %v3040_v43  ;;  %v3752_v15 = vpop.f32.mrb[24].mxu1 }
 0x20f   : > { %v3108_v24 = vmax.f32 %v3076_v59, 0.0  ;;  %v3077_v29 = vadd.f32 %v4843_v3, %v3038_v18  ;;  %v1722_v30 = vpop.f32.mrb[25].mxu1  ;;  %v3896_v53 = vpop.f32.mrb[24].mxu0 }
 0x210   : > { %3142 = vst.msk [vmem:[%s4854_s14 + $0xb0] sm:$0xff] %vm199_vm0, %v3110_v60  ;;  %v3111_v54 = vmax.f32 %v3079_v14, 0.0  ;;  %v3930_v55 = vadd.f32 %v3896_v53, %v3752_v15  ;;  %v3753_v23 = vpop.f32.mrb[26].mxu1  ;;  %v2947_v32 = vpop.f32.mrb[25].mxu0 }
 0x211   : > { %3140 = vst.msk [vmem:[%s4854_s14 + $0xa0] sm:$0xff] %vm199_vm0, %v3108_v24  ;;  %v3109_v39 = vmax.f32 %v3077_v29, 0.0  ;;  %v3931_v56 = vadd.f32 %v2947_v32, %v1722_v30  ;;  %v1725_v57 = vpop.f32.mrb[27].mxu1  ;;  %v3897_v6 = vpop.f32.mrb[26].mxu0 }
 0x212   : > { %3143 = vst.msk [vmem:[%s4854_s14 + $0xb8] sm:$0xff] %vm199_vm0, %v3111_v54  ;;  %v3043_v40 = vmul.f32 %v3930_v55, %v4838_v58  ;;  %v3932_v9 = vadd.f32 %v3897_v6, %v3753_v23  ;;  %v2950_v10 = vpop.f32.mrb[27].mxu0 }
 0x213   : > { %3141 = vst.msk [vmem:[%s4854_s14 + $0xa8] sm:$0xff] %vm199_vm0, %v3109_v39  ;;  %v3041_v11 = vmul.f32 %v3931_v56, %v4838_v58  ;;  %v3933_v12 = vadd.f32 %v2950_v10, %v1725_v57 }
 0x214   : > { %v3082_v42 = vadd.f32 %v4843_v3, %v3043_v40  ;;  %v3044_v13 = vmul.f32 %v3932_v9, %v4838_v58 }
 0x215   : > { %v3080_v25 = vadd.f32 %v4843_v3, %v3041_v11  ;;  %v3042_v26 = vmul.f32 %v3933_v12, %v4838_v58 }
 0x216   : > { %v3114_v27 = vmax.f32 %v3082_v42, 0.0  ;;  %v3083_v28 = vadd.f32 %v4843_v3, %v3044_v13  ;;  %v3756_v8 = vpop.f32.mrb[28].mxu1 }
 0x217   : > { %v3112_v31 = vmax.f32 %v3080_v25, 0.0  ;;  %v3081_v0 = vadd.f32 %v4843_v3, %v3042_v26  ;;  %v1738_v38 = vpop.f32.mrb[29].mxu1  ;;  %v3900_v44 = vpop.f32.mrb[28].mxu0 }
 0x218   : > { %3146 = vst.msk [vmem:[%s4854_s14 + $0xd0] sm:$0xff] %vm199_vm0, %v3114_v27  ;;  %v3115_v45 = vmax.f32 %v3083_v28, 0.0  ;;  %v3934_v46 = vadd.f32 %v3900_v44, %v3756_v8  ;;  %v3757_v1 = vpop.f32.mrb[30].mxu1  ;;  %v2963_v37 = vpop.f32.mrb[29].mxu0 }
 0x219   : > { %3144 = vst.msk [vmem:[%s4854_s14 + $0xc0] sm:$0xff] %vm199_vm0, %v3112_v31  ;;  %v3113_v41 = vmax.f32 %v3081_v0, 0.0  ;;  %v3935_v4 = vadd.f32 %v2963_v37, %v1738_v38  ;;  %v1741_v48 = vpop.f32.mrb[31].mxu1  ;;  %v3901_v49 = vpop.f32.mrb[30].mxu0 }
 0x21a   : > { %3147 = vst.msk [vmem:[%s4854_s14 + $0xd8] sm:$0xff] %vm199_vm0, %v3115_v45  ;;  %v3047_v62 = vmul.f32 %v3934_v46, %v4838_v58  ;;  %v3936_v63 = vadd.f32 %v3901_v49, %v3757_v1  ;;  %v2966_v7 = vpop.f32.mrb[31].mxu0 }
 0x21b   : > { %3145 = vst.msk [vmem:[%s4854_s14 + $0xc8] sm:$0xff] %vm199_vm0, %v3113_v41  ;;  %v3045_v19 = vmul.f32 %v3935_v4, %v4838_v58  ;;  %v3937_v20 = vadd.f32 %v2966_v7, %v1741_v48 }
 0x21c   : > { %v3086_v22 = vadd.f32 %v4843_v3, %v3047_v62  ;;  %v3048_v21 = vmul.f32 %v3936_v63, %v4838_v58 }
 0x21d   : > { %v3084_v33 = vadd.f32 %v4843_v3, %v3045_v19  ;;  %v3046_v34 = vmul.f32 %v3937_v20, %v4838_v58 }
 0x21e   : > { %v3118_v35 = vmax.f32 %v3086_v22, 0.0  ;;  %v3087_v36 = vadd.f32 %v4843_v3, %v3048_v21 }
 0x21f   : > { %v3116_v47 = vmax.f32 %v3084_v33, 0.0  ;;  %v3085_v50 = vadd.f32 %v4843_v3, %v3046_v34 }
 0x220   : > { %3150 = vst.msk [vmem:[%s4854_s14 + $0xf0] sm:$0xff] %vm199_vm0, %v3118_v35  ;;  %v3119_v51 = vmax.f32 %v3087_v36, 0.0 }
 0x221   : > { %3148 = vst.msk [vmem:[%s4854_s14 + $0xe0] sm:$0xff] %vm199_vm0, %v3116_v47  ;;  %v3117_v52 = vmax.f32 %v3085_v50, 0.0 }
 0x222   : > { %3151 = vst.msk [vmem:[%s4854_s14 + $0xf8] sm:$0xff] %vm199_vm0, %v3119_v51 }
 0x223   : > { %3149 = vst.msk [vmem:[%s4854_s14 + $0xe8] sm:$0xff] %vm199_vm0, %v3117_v52 }
 0x224 PF: > { %s14_s15 = sadd.s32 1, %s4195_s15  }
 0x225   : > { %p11_p4 = scmp.ge.s32.totalorder %s14_s15, 4  }
 0x227   :  { %13 = sbr.rel (!%p11_p4) target bundleno = 1 (0x1), region = 76 }

// kernel: simcsp_sppf_forward.15
= control target key start
LH: loop header
LB: loop body
LE: loop exit
PB: predicated region body
PF: predicated region fallthrough
CT: control target
= control target key end

     0   :  { %vm235_vm0 = vcmask 261120   ;;  %s2384_s0 = inlined_call_operand.vmem [shape: f32[512,32], index: 0, kind: input, shape index: {}]   ;;  %s2385_s1 = inlined_call_operand.vmem [shape: f32[512,32], index: 1, kind: input, shape index: {}]   ;;  %s2386_s2 = inlined_call_operand.vmem [shape: bf16[2,32,32], index: 2, kind: input, shape index: {}]   ;;  %s2387_s3 = inlined_call_operand.vmem [shape: f32[1,32], index: 3, kind: input, shape index: {}]   ;;  %s2388_s4 = inlined_call_operand.vmem [shape: f32[1,32], index: 4, kind: input, shape index: {}]   ;;  %s2389_s5 = inlined_call_operand.hbm [shape: f32[512,32], index: 5, kind: output, shape index: {}]  }
   0x1   :  { %v1649_v0 = vld [vmem:[%s2386_s2 + $0x10] sm:$0xff]   ;;  %v1650_v1 = vld [vmem:[%s2386_s2] sm:$0xff]   ;;  %v1651_v2 = vld [vmem:[%s2386_s2 + $0x18] sm:$0xff]  }
   0x2   :  { %1446 = vmatprep.subr.bf16.mxu1 %v1649_v0  ;;  %1514 = vmatprep.subr.bf16.mxu0 %v1650_v1  ;;  %v1652_v3 = vld [vmem:[%s2386_s2 + $0x8] sm:$0xff]   ;;  %v122_v4 = vld [vmem:[%s2385_s1] sm:$0xff]  ;;  %v124_v9 = vld [vmem:[%s2385_s1 + $0x10] sm:$0xff] }
   0x3   :  { %1447 = vmatpush3.bf16.msra.mxu1 %v1649_v0  ;;  %1515 = vmatpush3.bf16.msra.mxu0 %v1650_v1  ;;  %v123_v5 = vld [vmem:[%s2385_s1 + $0x8] sm:$0xff]  ;;  %v22_v6 = vld [vmem:[%s2384_s0] sm:$0xff]  ;;  %v125_v10 = vld [vmem:[%s2385_s1 + $0x18] sm:$0xff] }
   0x4   :  { %1448 = vmatprep.subr.bf16.mxu1 %v1651_v2  ;;  %1516 = vmatprep.subr.bf16.mxu0 %v1652_v3  ;;  %v186_v7 = vpack.c.bf16 %v123_v5, %v122_v4  ;;  %v23_v8 = vld [vmem:[%s2384_s0 + $0x8] sm:$0xff]  ;;  %v187_v12 = vpack.c.bf16 %v125_v10, %v124_v9  ;;  %v24_v13 = vld [vmem:[%s2384_s0 + $0x10] sm:$0xff]  ;;  %v25_v14 = vld [vmem:[%s2384_s0 + $0x18] sm:$0xff] }
   0x5   :  { %v86_v11 = vpack.c.bf16 %v23_v8, %v22_v6  ;;  %v126_v15 = vld [vmem:[%s2385_s1 + $0x20] sm:$0xff]  ;;  %v87_v16 = vpack.c.bf16 %v25_v14, %v24_v13  ;;  %v127_v17 = vld [vmem:[%s2385_s1 + $0x28] sm:$0xff]  ;;  %v128_v22 = vld [vmem:[%s2385_s1 + $0x30] sm:$0xff] }
   0x6   :  { %1450 = vmatprep.mubr.msk.bf16.mxu1 %vm235_vm0, %v186_v7  ;;  %v26_v18 = vld [vmem:[%s2384_s0 + $0x20] sm:$0xff]  ;;  %v27_v19 = vld [vmem:[%s2384_s0 + $0x28] sm:$0xff]  ;;  %v188_v20 = vpack.c.bf16 %v127_v17, %v126_v15  ;;  %v129_v23 = vld [vmem:[%s2385_s1 + $0x38] sm:$0xff] }
   0x7   :  { %1449 = vmatpush3.bf16.msra.mxu1 %v1651_v2  ;;  %1517 = vmatpush3.bf16.msra.mxu0 %v1652_v3  ;;  %v88_v21 = vpack.c.bf16 %v27_v19, %v26_v18  ;;  %v28_v24 = vld [vmem:[%s2384_s0 + $0x30] sm:$0xff]  ;;  %v29_v25 = vld [vmem:[%s2384_s0 + $0x38] sm:$0xff]  ;;  %v130_v26 = vld [vmem:[%s2385_s1 + $0x40] sm:$0xff]  ;;  %v189_v30 = vpack.c.bf16 %v129_v23, %v128_v22 }
   0x8   :  { %1518 = vmatprep.mubr.msk.bf16.mxu0 %vm235_vm0, %v86_v11  ;;  %v131_v27 = vld [vmem:[%s2385_s1 + $0x48] sm:$0xff]  ;;  %v30_v28 = vld [vmem:[%s2384_s0 + $0x40] sm:$0xff]  ;;  %v89_v31 = vpack.c.bf16 %v29_v25, %v28_v24  ;;  %v132_v34 = vld [vmem:[%s2385_s1 + $0x50] sm:$0xff] }
   0x9   :  { %v31_v29 = vld [vmem:[%s2384_s0 + $0x48] sm:$0xff]  ;;  %v190_v32 = vpack.c.bf16 %v131_v27, %v130_v26  ;;  %v133_v35 = vld [vmem:[%s2385_s1 + $0x58] sm:$0xff]  ;;  %v32_v36 = vld [vmem:[%s2384_s0 + $0x50] sm:$0xff] }
   0xa   :  { %1451 = vmatmul.mubr.msk.bf16.vlgmr.msra.gmra.mrb[0].mxu1 %vm235_vm0, %v187_v12  ;;  %1519 = vmatmul.mubr.msk.bf16.vlgmr.msra.gmra.mrb[0].mxu0 %vm235_vm0, %v87_v16  ;;  %v90_v33 = vpack.c.bf16 %v31_v29, %v30_v28  ;;  %v33_v37 = vld [vmem:[%s2384_s0 + $0x58] sm:$0xff]  ;;  %v134_v38 = vld [vmem:[%s2385_s1 + $0x60] sm:$0xff]  ;;  %v135_v39 = vld [vmem:[%s2385_s1 + $0x68] sm:$0xff]  ;;  %v191_v42 = vpack.c.bf16 %v133_v35, %v132_v34 }
   0xb   :  { %1454 = vmatprep.mubr.msk.bf16.mxu1 %vm235_vm0, %v188_v20  ;;  %1522 = vmatprep.mubr.msk.bf16.mxu0 %vm235_vm0, %v88_v21  ;;  %v34_v40 = vld [vmem:[%s2384_s0 + $0x60] sm:$0xff]  ;;  %v35_v41 = vld [vmem:[%s2384_s0 + $0x68] sm:$0xff]  ;;  %v91_v43 = vpack.c.bf16 %v33_v37, %v32_v36  ;;  %v192_v44 = vpack.c.bf16 %v135_v39, %v134_v38  ;;  %v136_v46 = vld [vmem:[%s2385_s1 + $0x70] sm:$0xff] }
   0xc   :  { %v92_v45 = vpack.c.bf16 %v35_v41, %v34_v40  ;;  %v137_v47 = vld [vmem:[%s2385_s1 + $0x78] sm:$0xff]  ;;  %v36_v48 = vld [vmem:[%s2384_s0 + $0x70] sm:$0xff]  ;;  %v138_v50 = vld [vmem:[%s2385_s1 + $0x80] sm:$0xff] }
   0xd   :  { %v37_v49 = vld [vmem:[%s2384_s0 + $0x78] sm:$0xff]  ;;  %v139_v51 = vld [vmem:[%s2385_s1 + $0x88] sm:$0xff]  ;;  %v38_v52 = vld [vmem:[%s2384_s0 + $0x80] sm:$0xff]  ;;  %v193_v54 = vpack.c.bf16 %v137_v47, %v136_v46 }
   0xe   :  { %v39_v53 = vld [vmem:[%s2384_s0 + $0x88] sm:$0xff]  ;;  %v93_v55 = vpack.c.bf16 %v37_v49, %v36_v48  ;;  %v194_v56 = vpack.c.bf16 %v139_v51, %v138_v50  ;;  %v140_v58 = vld [vmem:[%s2385_s1 + $0x90] sm:$0xff]  ;;  %v141_v59 = vld [vmem:[%s2385_s1 + $0x98] sm:$0xff] }
   0xf   :  { %v94_v57 = vpack.c.bf16 %v39_v53, %v38_v52  ;;  %v40_v60 = vld [vmem:[%s2384_s0 + $0x90] sm:$0xff]  ;;  %v41_v61 = vld [vmem:[%s2384_s0 + $0x98] sm:$0xff]  ;;  %v142_v62 = vld [vmem:[%s2385_s1 + $0xa0] sm:$0xff]  ;;  %v195_v2 = vpack.c.bf16 %v141_v59, %v140_v58 }
  0x10   :  { %v143_v63 = vld [vmem:[%s2385_s1 + $0xa8] sm:$0xff]  ;;  %v42_v0 = vld [vmem:[%s2384_s0 + $0xa0] sm:$0xff]  ;;  %v95_v3 = vpack.c.bf16 %v41_v61, %v40_v60  ;;  %v144_v6 = vld [vmem:[%s2385_s1 + $0xb0] sm:$0xff] }
  0x11   :  { %v43_v1 = vld [vmem:[%s2384_s0 + $0xa8] sm:$0xff]  ;;  %v196_v4 = vpack.c.bf16 %v143_v63, %v142_v62  ;;  %v145_v7 = vld [vmem:[%s2385_s1 + $0xb8] sm:$0xff]  ;;  %v44_v8 = vld [vmem:[%s2384_s0 + $0xb0] sm:$0xff] }
  0x12   :  { %1455 = vmatmul.mubr.msk.bf16.gmra.mrb[4].mxu1 %vm235_vm0, %v189_v30  ;;  %1523 = vmatmul.mubr.msk.bf16.gmra.mrb[4].mxu0 %vm235_vm0, %v89_v31  ;;  %v96_v5 = vpack.c.bf16 %v43_v1, %v42_v0  ;;  %v45_v9 = vld [vmem:[%s2384_s0 + $0xb8] sm:$0xff]  ;;  %v146_v10 = vld [vmem:[%s2385_s1 + $0xc0] sm:$0xff]  ;;  %v147_v11 = vld [vmem:[%s2385_s1 + $0xc8] sm:$0xff]  ;;  %v197_v14 = vpack.c.bf16 %v145_v7, %v144_v6 }
  0x13   :  { %1458 = vmatprep.mubr.msk.bf16.mxu1 %vm235_vm0, %v190_v32  ;;  %1526 = vmatprep.mubr.msk.bf16.mxu0 %vm235_vm0, %v90_v33  ;;  %v46_v12 = vld [vmem:[%s2384_s0 + $0xc0] sm:$0xff]  ;;  %v47_v13 = vld [vmem:[%s2384_s0 + $0xc8] sm:$0xff] }
  0x1a   :  { %1459 = vmatmul.mubr.msk.bf16.gmra.mrb[8].mxu1 %vm235_vm0, %v191_v42  ;;  %1527 = vmatmul.mubr.msk.bf16.gmra.mrb[8].mxu0 %vm235_vm0, %v91_v43 }
  0x1b   :  { %1462 = vmatprep.mubr.msk.bf16.mxu1 %vm235_vm0, %v192_v44  ;;  %1530 = vmatprep.mubr.msk.bf16.mxu0 %vm235_vm0, %v92_v45 }
  0x22   :  { %1463 = vmatmul.mubr.msk.bf16.gmra.mrb[12].mxu1 %vm235_vm0, %v193_v54  ;;  %1531 = vmatmul.mubr.msk.bf16.gmra.mrb[12].mxu0 %vm235_vm0, %v93_v55 }
  0x23   :  { %1466 = vmatprep.mubr.msk.bf16.mxu1 %vm235_vm0, %v194_v56  ;;  %1534 = vmatprep.mubr.msk.bf16.mxu0 %vm235_vm0, %v94_v57 }
  0x2a   :  { %1467 = vmatmul.mubr.msk.bf16.gmra.mrb[16].mxu1 %vm235_vm0, %v195_v2  ;;  %1535 = vmatmul.mubr.msk.bf16.gmra.mrb[16].mxu0 %vm235_vm0, %v95_v3 }
  0x2b   :  { %1470 = vmatprep.mubr.msk.bf16.mxu1 %vm235_vm0, %v196_v4  ;;  %1538 = vmatprep.mubr.msk.bf16.mxu0 %vm235_vm0, %v96_v5 }
  0x2c   :  { %10 = vsyncpa [#allocation3], 0  ;;  %v97_v15 = vpack.c.bf16 %v45_v9, %v44_v8  ;;  %v198_v16 = vpack.c.bf16 %v147_v11, %v146_v10  ;;  %v98_v17 = vpack.c.bf16 %v47_v13, %v46_v12  ;;  %v148_v18 = vld [vmem:[%s2385_s1 + $0xd0] sm:$0xff]  ;;  %v149_v19 = vld [vmem:[%s2385_s1 + $0xd8] sm:$0xff] }
  0x2d   :  { %v48_v20 = vld [vmem:[%s2384_s0 + $0xd0] sm:$0xff]  ;;  %v49_v21 = vld [vmem:[%s2384_s0 + $0xd8] sm:$0xff]  ;;  %v150_v22 = vld [vmem:[%s2385_s1 + $0xe0] sm:$0xff]  ;;  %v199_v26 = vpack.c.bf16 %v149_v19, %v148_v18 }
  0x2e   :  { %v151_v23 = vld [vmem:[%s2385_s1 + $0xe8] sm:$0xff]  ;;  %v50_v24 = vld [vmem:[%s2384_s0 + $0xe0] sm:$0xff]  ;;  %v99_v27 = vpack.c.bf16 %v49_v21, %v48_v20  ;;  %v152_v30 = vld [vmem:[%s2385_s1 + $0xf0] sm:$0xff] }
  0x2f   :  { %v51_v25 = vld [vmem:[%s2384_s0 + $0xe8] sm:$0xff]  ;;  %v200_v28 = vpack.c.bf16 %v151_v23, %v150_v22  ;;  %v153_v31 = vld [vmem:[%s2385_s1 + $0xf8] sm:$0xff]  ;;  %v52_v32 = vld [vmem:[%s2384_s0 + $0xf0] sm:$0xff] }
  0x30   :  { %v100_v29 = vpack.c.bf16 %v51_v25, %v50_v24  ;;  %v53_v33 = vld [vmem:[%s2384_s0 + $0xf8] sm:$0xff]  ;;  %v154_v34 = vld [vmem:[%s2385_s1 + $0x100] sm:$0xff]  ;;  %v155_v35 = vld [vmem:[%s2385_s1 + $0x108] sm:$0xff]  ;;  %v201_v38 = vpack.c.bf16 %v153_v31, %v152_v30 }
  0x31   :  { %v54_v36 = vld [vmem:[%s2384_s0 + $0x100] sm:$0xff]  ;;  %v55_v37 = vld [vmem:[%s2384_s0 + $0x108] sm:$0xff]  ;;  %v101_v39 = vpack.c.bf16 %v53_v33, %v52_v32  ;;  %v202_v40 = vpack.c.bf16 %v155_v35, %v154_v34  ;;  %v156_v42 = vld [vmem:[%s2385_s1 + $0x110] sm:$0xff] }
  0x32   :  { %1471 = vmatmul.mubr.msk.bf16.gmra.mrb[20].mxu1 %vm235_vm0, %v197_v14  ;;  %1539 = vmatmul.mubr.msk.bf16.gmra.mrb[20].mxu0 %vm235_vm0, %v97_v15  ;;  %v102_v41 = vpack.c.bf16 %v55_v37, %v54_v36  ;;  %v157_v43 = vld [vmem:[%s2385_s1 + $0x118] sm:$0xff]  ;;  %v56_v44 = vld [vmem:[%s2384_s0 + $0x110] sm:$0xff]  ;;  %v158_v46 = vld [vmem:[%s2385_s1 + $0x120] sm:$0xff] }
  0x33   :  { %1474 = vmatprep.mubr.msk.bf16.mxu1 %vm235_vm0, %v198_v16  ;;  %1542 = vmatprep.mubr.msk.bf16.mxu0 %vm235_vm0, %v98_v17  ;;  %v57_v45 = vld [vmem:[%s2384_s0 + $0x118] sm:$0xff]  ;;  %v159_v47 = vld [vmem:[%s2385_s1 + $0x128] sm:$0xff]  ;;  %v58_v48 = vld [vmem:[%s2384_s0 + $0x120] sm:$0xff]  ;;  %v203_v50 = vpack.c.bf16 %v157_v43, %v156_v42 }
  0x34   :  { %v59_v49 = vld [vmem:[%s2384_s0 + $0x128] sm:$0xff]  ;;  %v103_v51 = vpack.c.bf16 %v57_v45, %v56_v44  ;;  %v204_v52 = vpack.c.bf16 %v159_v47, %v158_v46  ;;  %v160_v54 = vld [vmem:[%s2385_s1 + $0x130] sm:$0xff]  ;;  %v161_v55 = vld [vmem:[%s2385_s1 + $0x138] sm:$0xff] }
  0x35   :  { %v104_v53 = vpack.c.bf16 %v59_v49, %v58_v48  ;;  %v60_v56 = vld [vmem:[%s2384_s0 + $0x130] sm:$0xff]  ;;  %v61_v57 = vld [vmem:[%s2384_s0 + $0x138] sm:$0xff]  ;;  %v162_v58 = vld [vmem:[%s2385_s1 + $0x140] sm:$0xff]  ;;  %v205_v62 = vpack.c.bf16 %v161_v55, %v160_v54 }
  0x36   :  { %v163_v59 = vld [vmem:[%s2385_s1 + $0x148] sm:$0xff]  ;;  %v62_v60 = vld [vmem:[%s2384_s0 + $0x140] sm:$0xff]  ;;  %v105_v63 = vpack.c.bf16 %v61_v57, %v60_v56  ;;  %v164_v2 = vld [vmem:[%s2385_s1 + $0x150] sm:$0xff] }
  0x37   :  { %v63_v61 = vld [vmem:[%s2384_s0 + $0x148] sm:$0xff]  ;;  %v206_v0 = vpack.c.bf16 %v163_v59, %v162_v58  ;;  %v165_v3 = vld [vmem:[%s2385_s1 + $0x158] sm:$0xff]  ;;  %v64_v4 = vld [vmem:[%s2384_s0 + $0x150] sm:$0xff] }
  0x38   :  { %v106_v1 = vpack.c.bf16 %v63_v61, %v62_v60  ;;  %v65_v5 = vld [vmem:[%s2384_s0 + $0x158] sm:$0xff]  ;;  %v166_v6 = vld [vmem:[%s2385_s1 + $0x160] sm:$0xff]  ;;  %v167_v7 = vld [vmem:[%s2385_s1 + $0x168] sm:$0xff]  ;;  %v207_v10 = vpack.c.bf16 %v165_v3, %v164_v2 }
  0x39   :  { %v66_v8 = vld [vmem:[%s2384_s0 + $0x160] sm:$0xff]  ;;  %v67_v9 = vld [vmem:[%s2384_s0 + $0x168] sm:$0xff]  ;;  %v107_v11 = vpack.c.bf16 %v65_v5, %v64_v4  ;;  %v208_v12 = vpack.c.bf16 %v167_v7, %v166_v6  ;;  %v168_v14 = vld [vmem:[%s2385_s1 + $0x170] sm:$0xff] }
  0x3a   :  { %1475 = vmatmul.mubr.msk.bf16.gmra.mrb[24].mxu1 %vm235_vm0, %v199_v26  ;;  %1543 = vmatmul.mubr.msk.bf16.gmra.mrb[24].mxu0 %vm235_vm0, %v99_v27  ;;  %v108_v13 = vpack.c.bf16 %v67_v9, %v66_v8  ;;  %v169_v15 = vld [vmem:[%s2385_s1 + $0x178] sm:$0xff]  ;;  %v68_v16 = vld [vmem:[%s2384_s0 + $0x170] sm:$0xff]  ;;  %v170_v18 = vld [vmem:[%s2385_s1 + $0x180] sm:$0xff] }
  0x3b   :  { %1478 = vmatprep.mubr.msk.bf16.mxu1 %vm235_vm0, %v200_v28  ;;  %1546 = vmatprep.mubr.msk.bf16.mxu0 %vm235_vm0, %v100_v29  ;;  %v69_v17 = vld [vmem:[%s2384_s0 + $0x178] sm:$0xff]  ;;  %v171_v19 = vld [vmem:[%s2385_s1 + $0x188] sm:$0xff]  ;;  %v70_v20 = vld [vmem:[%s2384_s0 + $0x180] sm:$0xff]  ;;  %v209_v22 = vpack.c.bf16 %v169_v15, %v168_v14 }
  0x3c   :  { %v71_v21 = vld [vmem:[%s2384_s0 + $0x188] sm:$0xff]  ;;  %v109_v23 = vpack.c.bf16 %v69_v17, %v68_v16  ;;  %v210_v24 = vpack.c.bf16 %v171_v19, %v170_v18  ;;  %v172_v26 = vld [vmem:[%s2385_s1 + $0x190] sm:$0xff]  ;;  %v173_v27 = vld [vmem:[%s2385_s1 + $0x198] sm:$0xff] }
  0x3d   :  { %v110_v25 = vpack.c.bf16 %v71_v21, %v70_v20  ;;  %v72_v28 = vld [vmem:[%s2384_s0 + $0x190] sm:$0xff]  ;;  %v73_v29 = vld [vmem:[%s2384_s0 + $0x198] sm:$0xff]  ;;  %v174_v30 = vld [vmem:[%s2385_s1 + $0x1a0] sm:$0xff]  ;;  %v211_v34 = vpack.c.bf16 %v173_v27, %v172_v26 }
  0x3e   :  { %v175_v31 = vld [vmem:[%s2385_s1 + $0x1a8] sm:$0xff]  ;;  %v74_v32 = vld [vmem:[%s2384_s0 + $0x1a0] sm:$0xff]  ;;  %v111_v35 = vpack.c.bf16 %v73_v29, %v72_v28 }
  0x3f   :  { %v75_v33 = vld [vmem:[%s2384_s0 + $0x1a8] sm:$0xff]  ;;  %v212_v36 = vpack.c.bf16 %v175_v31, %v174_v30  ;;  %v178_v42 = vld [vmem:[%s2385_s1 + $0x1c0] sm:$0xff] }
  0x40   :  { %v112_v37 = vpack.c.bf16 %v75_v33, %v74_v32  ;;  %v179_v43 = vld [vmem:[%s2385_s1 + $0x1c8] sm:$0xff]  ;;  %v78_v44 = vld [vmem:[%s2384_s0 + $0x1c0] sm:$0xff] }
  0x41   :  { %v79_v45 = vld [vmem:[%s2384_s0 + $0x1c8] sm:$0xff]  ;;  %v214_v48 = vpack.c.bf16 %v179_v43, %v178_v42  ;;  %v182_v54 = vld [vmem:[%s2385_s1 + $0x1e0] sm:$0xff] }
  0x42   :  { %1479 = vmatmul.mubr.msk.bf16.gmra.mrb[28].mxu1 %vm235_vm0, %v201_v38  ;;  %1547 = vmatmul.mubr.msk.bf16.gmra.mrb[28].mxu0 %vm235_vm0, %v101_v39  ;;  %v176_v38 = vld [vmem:[%s2385_s1 + $0x1b0] sm:$0xff]  ;;  %v177_v39 = vld [vmem:[%s2385_s1 + $0x1b8] sm:$0xff]  ;;  %v114_v49 = vpack.c.bf16 %v79_v45, %v78_v44  ;;  %v183_v55 = vld [vmem:[%s2385_s1 + $0x1e8] sm:$0xff] }
  0x43   :  { %1482 = vmatprep.mubr.msk.bf16.mxu1 %vm235_vm0, %v202_v40  ;;  %1550 = vmatprep.mubr.msk.bf16.mxu0 %vm235_vm0, %v102_v41  ;;  %v76_v40 = vld [vmem:[%s2384_s0 + $0x1b0] sm:$0xff]  ;;  %v77_v41 = vld [vmem:[%s2384_s0 + $0x1b8] sm:$0xff]  ;;  %v213_v46 = vpack.c.bf16 %v177_v39, %v176_v38  ;;  %v82_v56 = vld [vmem:[%s2384_s0 + $0x1e0] sm:$0xff]  ;;  %v216_v60 = vpack.c.bf16 %v183_v55, %v182_v54 }
  0x44   :  { %v113_v47 = vpack.c.bf16 %v77_v41, %v76_v40  ;;  %v83_v57 = vld [vmem:[%s2384_s0 + $0x1e8] sm:$0xff]  ;;  %v2173_v6 = vld [vmem:[%s2387_s3] ss:$0 sm:$0xff] }
  0x45   :  { %v116_v61 = vpack.c.bf16 %v83_v57, %v82_v56 }
  0x4a   :  { %1483 = vmatmul.mubr.msk.bf16.gmra.mrb[32].mxu1 %vm235_vm0, %v203_v50  ;;  %1551 = vmatmul.mubr.msk.bf16.gmra.mrb[32].mxu0 %vm235_vm0, %v103_v51  ;;  %v180_v50 = vld [vmem:[%s2385_s1 + $0x1d0] sm:$0xff]  ;;  %v181_v51 = vld [vmem:[%s2385_s1 + $0x1d8] sm:$0xff] }
  0x4b   :  { %1486 = vmatprep.mubr.msk.bf16.mxu1 %vm235_vm0, %v204_v52  ;;  %1554 = vmatprep.mubr.msk.bf16.mxu0 %vm235_vm0, %v104_v53  ;;  %v80_v52 = vld [vmem:[%s2384_s0 + $0x1d0] sm:$0xff]  ;;  %v81_v53 = vld [vmem:[%s2384_s0 + $0x1d8] sm:$0xff]  ;;  %v215_v58 = vpack.c.bf16 %v181_v51, %v180_v50 }
  0x4c   :  { %v115_v59 = vpack.c.bf16 %v81_v53, %v80_v52 }
  0x52   :  { %1487 = vmatmul.mubr.msk.bf16.gmra.mrb[36].mxu1 %vm235_vm0, %v205_v62  ;;  %1555 = vmatmul.mubr.msk.bf16.gmra.mrb[36].mxu0 %vm235_vm0, %v105_v63  ;;  %v184_v62 = vld [vmem:[%s2385_s1 + $0x1f0] sm:$0xff]  ;;  %v185_v63 = vld [vmem:[%s2385_s1 + $0x1f8] sm:$0xff] }
  0x53   :  { %1490 = vmatprep.mubr.msk.bf16.mxu1 %vm235_vm0, %v206_v0  ;;  %1558 = vmatprep.mubr.msk.bf16.mxu0 %vm235_vm0, %v106_v1  ;;  %v84_v0 = vld [vmem:[%s2384_s0 + $0x1f0] sm:$0xff]  ;;  %v85_v1 = vld [vmem:[%s2384_s0 + $0x1f8] sm:$0xff]  ;;  %v217_v2 = vpack.c.bf16 %v185_v63, %v184_v62  ;;  %s1677_s0 = smov [#allocation2]  }
  0x54   :  { %v117_v3 = vpack.c.bf16 %v85_v1, %v84_v0  ;;  %s1293_s3 = sshll.u32 %s1677_s0, 4  ;;  %s1294_s3 = int_to_ptr.vmem [resolvable:$true] %s1293_s3 }
  0x55   :  { %p1658_p1 = scmp.lt.s32.totalorder %s1294_s3, %s1294_s3 }
  0x5a   :  { %1491 = vmatmul.mubr.msk.bf16.gmra.mrb[40].mxu1 %vm235_vm0, %v207_v10  ;;  %1559 = vmatmul.mubr.msk.bf16.gmra.mrb[40].mxu0 %vm235_vm0, %v107_v11  ;;  %v2178_v11 = vld [vmem:[%s2388_s4] ss:$0 sm:$0xff]  ;;  %s1653_s4 = scalar_lea.vmem %s1294_s3, 8192 }
  0x5b   :  { %1494 = vmatprep.mubr.msk.bf16.mxu1 %vm235_vm0, %v208_v12  ;;  %1562 = vmatprep.mubr.msk.bf16.mxu0 %vm235_vm0, %v108_v13  ;;  %p1654_p0 = scmp.ne.s32.totalorder %s1294_s3, %s1653_s4  ;;  %p1659_p2 = scmp.lt.s32.totalorder %s1653_s4, %s1653_s4 }
  0x5d   :  { %p1660_p3 = por %p1659_p2, %p1658_p1 }
  0x5f   :  { %p1661_p4 = pnand %p1660_p3, %p1654_p0 }
  0x62   :  { %1495 = vmatmul.mubr.msk.bf16.gmra.mrb[44].mxu1 %vm235_vm0, %v209_v22  ;;  %1563 = vmatmul.mubr.msk.bf16.gmra.mrb[44].mxu0 %vm235_vm0, %v109_v23 }
  0x63   :  { %1498 = vmatprep.mubr.msk.bf16.mxu1 %vm235_vm0, %v210_v24  ;;  %1566 = vmatprep.mubr.msk.bf16.mxu0 %vm235_vm0, %v110_v25 }
  0x6a   :  { %1499 = vmatmul.mubr.msk.bf16.gmra.mrb[48].mxu1 %vm235_vm0, %v211_v34  ;;  %1567 = vmatmul.mubr.msk.bf16.gmra.mrb[48].mxu0 %vm235_vm0, %v111_v35 }
  0x6b   :  { %1502 = vmatprep.mubr.msk.bf16.mxu1 %vm235_vm0, %v212_v36  ;;  %1570 = vmatprep.mubr.msk.bf16.mxu0 %vm235_vm0, %v112_v37 }
  0x72   :  { %1503 = vmatmul.mubr.msk.bf16.gmra.mrb[52].mxu1 %vm235_vm0, %v213_v46  ;;  %1571 = vmatmul.mubr.msk.bf16.gmra.mrb[52].mxu0 %vm235_vm0, %v113_v47 }
  0x73   :  { %1506 = vmatprep.mubr.msk.bf16.mxu1 %vm235_vm0, %v214_v48  ;;  %1574 = vmatprep.mubr.msk.bf16.mxu0 %vm235_vm0, %v114_v49 }
  0x7a   :  { %1507 = vmatmul.mubr.msk.bf16.gmra.mrb[56].mxu1 %vm235_vm0, %v215_v58  ;;  %1575 = vmatmul.mubr.msk.bf16.gmra.mrb[56].mxu0 %vm235_vm0, %v115_v59 }
  0x7b   :  { %1510 = vmatprep.mubr.msk.bf16.mxu1 %vm235_vm0, %v216_v60  ;;  %1578 = vmatprep.mubr.msk.bf16.mxu0 %vm235_vm0, %v116_v61 }
  0x82   :  { %1511 = vmatmul.mubr.msk.bf16.gmra.mrb[60].mxu1 %vm235_vm0, %v217_v2  ;;  %1579 = vmatmul.mubr.msk.bf16.gmra.mrb[60].mxu0 %vm235_vm0, %v117_v3 }
  0xdd   :  { %v1452_v4 = vpop.f32.mrb[0].mxu1  ;;  %v1520_v5 = vpop.f32.mrb[0].mxu0 }
  0xde   :  { %v366_v7 = vpop.f32.mrb[1].mxu1  ;;  %v772_v8 = vadd.f32 %v1520_v5, %v1452_v4  ;;  %v763_v9 = vpop.f32.mrb[1].mxu0 }
  0xdf   :  { %v1453_v10 = vpop.f32.mrb[2].mxu1  ;;  %v764_v12 = vadd.f32 %v763_v9, %v366_v7  ;;  %v1521_v13 = vpop.f32.mrb[2].mxu0 }
  0xe0   :  { %v369_v14 = vpop.f32.mrb[3].mxu1  ;;  %v1027_v15 = vmul.f32 %v2173_v6, %v772_v8  ;;  %v775_v16 = vadd.f32 %v1521_v13, %v1453_v10  ;;  %v766_v17 = vpop.f32.mrb[3].mxu0 }
  0xe1   :  { %v1025_v18 = vmul.f32 %v2173_v6, %v764_v12  ;;  %v767_v19 = vadd.f32 %v766_v17, %v369_v14 }
  0xe2   :  { %v1098_v20 = vadd.f32 %v2178_v11, %v1027_v15  ;;  %v1028_v21 = vmul.f32 %v2173_v6, %v775_v16 }
  0xe3   :  { %v1096_v22 = vadd.f32 %v2178_v11, %v1025_v18  ;;  %v1026_v23 = vmul.f32 %v2173_v6, %v767_v19 }
  0xe4   :  { %v1162_v24 = vmax.f32 %v1098_v20, 0.0  ;;  %v1099_v25 = vadd.f32 %v2178_v11, %v1028_v21 }
  0xe5   :  { %v1456_v26 = vpop.f32.mrb[4].mxu1  ;;  %v1160_v27 = vmax.f32 %v1096_v22, 0.0  ;;  %v1097_v28 = vadd.f32 %v2178_v11, %v1026_v23  ;;  %v1524_v29 = vpop.f32.mrb[4].mxu0 }
  0xe6   :  { %v382_v30 = vpop.f32.mrb[5].mxu1  ;;  %1226 = vst.msk [vmem:[#allocation2 + $0x10] sm:$0xff] %vm235_vm0, %v1162_v24  ;;  %v1163_v31 = vmax.f32 %v1099_v25, 0.0  ;;  %v788_v32 = vadd.f32 %v1524_v29, %v1456_v26  ;;  %v779_v33 = vpop.f32.mrb[5].mxu0 }
  0xe7   :  { %v1457_v34 = vpop.f32.mrb[6].mxu1  ;;  %1224 = vst.msk [vmem:[#allocation2] sm:$0xff] %vm235_vm0, %v1160_v27  ;;  %v1161_v35 = vmax.f32 %v1097_v28, 0.0  ;;  %v780_v36 = vadd.f32 %v779_v33, %v382_v30  ;;  %v1525_v37 = vpop.f32.mrb[6].mxu0 }
  0xe8   :  { %v385_v38 = vpop.f32.mrb[7].mxu1  ;;  %1227 = vst.msk [vmem:[#allocation2 + $0x18] sm:$0xff] %vm235_vm0, %v1163_v31  ;;  %v1031_v39 = vmul.f32 %v2173_v6, %v788_v32  ;;  %v791_v40 = vadd.f32 %v1525_v37, %v1457_v34  ;;  %v782_v41 = vpop.f32.mrb[7].mxu0 }
  0xe9   :  { %1225 = vst.msk [vmem:[#allocation2 + $0x8] sm:$0xff] %vm235_vm0, %v1161_v35  ;;  %v1029_v42 = vmul.f32 %v2173_v6, %v780_v36  ;;  %v783_v43 = vadd.f32 %v782_v41, %v385_v38 }
  0xea   :  { %v1102_v44 = vadd.f32 %v2178_v11, %v1031_v39  ;;  %v1032_v45 = vmul.f32 %v2173_v6, %v791_v40 }
  0xeb   :  { %v1100_v46 = vadd.f32 %v2178_v11, %v1029_v42  ;;  %v1030_v47 = vmul.f32 %v2173_v6, %v783_v43 }
  0xec   :  { %v1166_v48 = vmax.f32 %v1102_v44, 0.0  ;;  %v1103_v49 = vadd.f32 %v2178_v11, %v1032_v45 }
  0xed   :  { %v1460_v50 = vpop.f32.mrb[8].mxu1  ;;  %v1164_v51 = vmax.f32 %v1100_v46, 0.0  ;;  %v1101_v52 = vadd.f32 %v2178_v11, %v1030_v47  ;;  %v1528_v53 = vpop.f32.mrb[8].mxu0 }
  0xee   :  { %v398_v54 = vpop.f32.mrb[9].mxu1  ;;  %1230 = vst.msk [vmem:[#allocation2 + $0x30] sm:$0xff] %vm235_vm0, %v1166_v48  ;;  %v1167_v55 = vmax.f32 %v1103_v49, 0.0  ;;  %v804_v56 = vadd.f32 %v1528_v53, %v1460_v50  ;;  %v795_v57 = vpop.f32.mrb[9].mxu0 }
  0xef   :  { %v1461_v58 = vpop.f32.mrb[10].mxu1  ;;  %1228 = vst.msk [vmem:[#allocation2 + $0x20] sm:$0xff] %vm235_vm0, %v1164_v51  ;;  %v1165_v59 = vmax.f32 %v1101_v52, 0.0  ;;  %v796_v60 = vadd.f32 %v795_v57, %v398_v54  ;;  %v1529_v61 = vpop.f32.mrb[10].mxu0 }
  0xf0   :  { %v401_v62 = vpop.f32.mrb[11].mxu1  ;;  %1231 = vst.msk [vmem:[#allocation2 + $0x38] sm:$0xff] %vm235_vm0, %v1167_v55  ;;  %v1035_v63 = vmul.f32 %v2173_v6, %v804_v56  ;;  %v807_v0 = vadd.f32 %v1529_v61, %v1461_v58  ;;  %v798_v1 = vpop.f32.mrb[11].mxu0 }
  0xf1   :  { %1229 = vst.msk [vmem:[#allocation2 + $0x28] sm:$0xff] %vm235_vm0, %v1165_v59  ;;  %v1033_v2 = vmul.f32 %v2173_v6, %v796_v60  ;;  %v799_v3 = vadd.f32 %v798_v1, %v401_v62 }
  0xf2   :  { %v1106_v4 = vadd.f32 %v2178_v11, %v1035_v63  ;;  %v1036_v5 = vmul.f32 %v2173_v6, %v807_v0 }
  0xf3   :  { %v1104_v7 = vadd.f32 %v2178_v11, %v1033_v2  ;;  %v1034_v8 = vmul.f32 %v2173_v6, %v799_v3 }
  0xf4   :  { %v1170_v9 = vmax.f32 %v1106_v4, 0.0  ;;  %v1107_v10 = vadd.f32 %v2178_v11, %v1036_v5 }
  0xf5   :  { %v1464_v12 = vpop.f32.mrb[12].mxu1  ;;  %v1168_v13 = vmax.f32 %v1104_v7, 0.0  ;;  %v1105_v14 = vadd.f32 %v2178_v11, %v1034_v8  ;;  %v1532_v15 = vpop.f32.mrb[12].mxu0 }
  0xf6   :  { %v414_v16 = vpop.f32.mrb[13].mxu1  ;;  %1234 = vst.msk [vmem:[#allocation2 + $0x50] sm:$0xff] %vm235_vm0, %v1170_v9  ;;  %v1171_v17 = vmax.f32 %v1107_v10, 0.0  ;;  %v820_v18 = vadd.f32 %v1532_v15, %v1464_v12  ;;  %v811_v19 = vpop.f32.mrb[13].mxu0 }
  0xf7   :  { %v1465_v20 = vpop.f32.mrb[14].mxu1  ;;  %1232 = vst.msk [vmem:[#allocation2 + $0x40] sm:$0xff] %vm235_vm0, %v1168_v13  ;;  %v1169_v21 = vmax.f32 %v1105_v14, 0.0  ;;  %v812_v22 = vadd.f32 %v811_v19, %v414_v16  ;;  %v1533_v23 = vpop.f32.mrb[14].mxu0 }
  0xf8   :  { %v417_v24 = vpop.f32.mrb[15].mxu1  ;;  %1235 = vst.msk [vmem:[#allocation2 + $0x58] sm:$0xff] %vm235_vm0, %v1171_v17  ;;  %v1039_v25 = vmul.f32 %v2173_v6, %v820_v18  ;;  %v823_v26 = vadd.f32 %v1533_v23, %v1465_v20  ;;  %v814_v27 = vpop.f32.mrb[15].mxu0 }
  0xf9   :  { %1233 = vst.msk [vmem:[#allocation2 + $0x48] sm:$0xff] %vm235_vm0, %v1169_v21  ;;  %v1037_v28 = vmul.f32 %v2173_v6, %v812_v22  ;;  %v815_v29 = vadd.f32 %v814_v27, %v417_v24 }
  0xfa   :  { %v1110_v30 = vadd.f32 %v2178_v11, %v1039_v25  ;;  %v1040_v31 = vmul.f32 %v2173_v6, %v823_v26 }
  0xfb   :  { %v1108_v32 = vadd.f32 %v2178_v11, %v1037_v28  ;;  %v1038_v33 = vmul.f32 %v2173_v6, %v815_v29 }
  0xfc   :  { %v1174_v34 = vmax.f32 %v1110_v30, 0.0  ;;  %v1111_v35 = vadd.f32 %v2178_v11, %v1040_v31 }
  0xfd   :  { %v1468_v36 = vpop.f32.mrb[16].mxu1  ;;  %v1172_v37 = vmax.f32 %v1108_v32, 0.0  ;;  %v1109_v38 = vadd.f32 %v2178_v11, %v1038_v33  ;;  %v1536_v39 = vpop.f32.mrb[16].mxu0 }
  0xfe   :  { %v430_v40 = vpop.f32.mrb[17].mxu1  ;;  %1238 = vst.msk [vmem:[#allocation2 + $0x70] sm:$0xff] %vm235_vm0, %v1174_v34  ;;  %v1175_v41 = vmax.f32 %v1111_v35, 0.0  ;;  %v836_v42 = vadd.f32 %v1536_v39, %v1468_v36  ;;  %v827_v43 = vpop.f32.mrb[17].mxu0 }
  0xff   :  { %v1469_v44 = vpop.f32.mrb[18].mxu1  ;;  %1236 = vst.msk [vmem:[#allocation2 + $0x60] sm:$0xff] %vm235_vm0, %v1172_v37  ;;  %v1173_v45 = vmax.f32 %v1109_v38, 0.0  ;;  %v828_v46 = vadd.f32 %v827_v43, %v430_v40  ;;  %v1537_v47 = vpop.f32.mrb[18].mxu0 }
 0x100   :  { %v433_v48 = vpop.f32.mrb[19].mxu1  ;;  %1239 = vst.msk [vmem:[#allocation2 + $0x78] sm:$0xff] %vm235_vm0, %v1175_v41  ;;  %v1043_v49 = vmul.f32 %v2173_v6, %v836_v42  ;;  %v839_v50 = vadd.f32 %v1537_v47, %v1469_v44  ;;  %v830_v51 = vpop.f32.mrb[19].mxu0 }
 0x101   :  { %1237 = vst.msk [vmem:[#allocation2 + $0x68] sm:$0xff] %vm235_vm0, %v1173_v45  ;;  %v1041_v52 = vmul.f32 %v2173_v6, %v828_v46  ;;  %v831_v53 = vadd.f32 %v830_v51, %v433_v48 }
 0x102   :  { %v1114_v54 = vadd.f32 %v2178_v11, %v1043_v49  ;;  %v1044_v55 = vmul.f32 %v2173_v6, %v839_v50 }
 0x103   :  { %v1112_v56 = vadd.f32 %v2178_v11, %v1041_v52  ;;  %v1042_v57 = vmul.f32 %v2173_v6, %v831_v53 }
 0x104   :  { %v1178_v58 = vmax.f32 %v1114_v54, 0.0  ;;  %v1115_v59 = vadd.f32 %v2178_v11, %v1044_v55 }
 0x105   :  { %v1472_v60 = vpop.f32.mrb[20].mxu1  ;;  %v1176_v61 = vmax.f32 %v1112_v56, 0.0  ;;  %v1113_v62 = vadd.f32 %v2178_v11, %v1042_v57  ;;  %v1540_v63 = vpop.f32.mrb[20].mxu0 }
 0x106   :  { %v446_v0 = vpop.f32.mrb[21].mxu1  ;;  %1242 = vst.msk [vmem:[#allocation2 + $0x90] sm:$0xff] %vm235_vm0, %v1178_v58  ;;  %v1179_v1 = vmax.f32 %v1115_v59, 0.0  ;;  %v852_v2 = vadd.f32 %v1540_v63, %v1472_v60  ;;  %v843_v3 = vpop.f32.mrb[21].mxu0 }
 0x107   :  { %v1473_v4 = vpop.f32.mrb[22].mxu1  ;;  %1240 = vst.msk [vmem:[#allocation2 + $0x80] sm:$0xff] %vm235_vm0, %v1176_v61  ;;  %v1177_v5 = vmax.f32 %v1113_v62, 0.0  ;;  %v844_v7 = vadd.f32 %v843_v3, %v446_v0  ;;  %v1541_v8 = vpop.f32.mrb[22].mxu0 }
 0x108   :  { %v449_v9 = vpop.f32.mrb[23].mxu1  ;;  %1243 = vst.msk [vmem:[#allocation2 + $0x98] sm:$0xff] %vm235_vm0, %v1179_v1  ;;  %v1047_v10 = vmul.f32 %v2173_v6, %v852_v2  ;;  %v855_v12 = vadd.f32 %v1541_v8, %v1473_v4  ;;  %v846_v13 = vpop.f32.mrb[23].mxu0 }
 0x109   :  { %1241 = vst.msk [vmem:[#allocation2 + $0x88] sm:$0xff] %vm235_vm0, %v1177_v5  ;;  %v1045_v14 = vmul.f32 %v2173_v6, %v844_v7  ;;  %v847_v15 = vadd.f32 %v846_v13, %v449_v9 }
 0x10a   :  { %v1118_v16 = vadd.f32 %v2178_v11, %v1047_v10  ;;  %v1048_v17 = vmul.f32 %v2173_v6, %v855_v12 }
 0x10b   :  { %v1116_v18 = vadd.f32 %v2178_v11, %v1045_v14  ;;  %v1046_v19 = vmul.f32 %v2173_v6, %v847_v15 }
 0x10c   :  { %v1182_v20 = vmax.f32 %v1118_v16, 0.0  ;;  %v1119_v21 = vadd.f32 %v2178_v11, %v1048_v17 }
 0x10d   :  { %v1476_v22 = vpop.f32.mrb[24].mxu1  ;;  %v1180_v23 = vmax.f32 %v1116_v18, 0.0  ;;  %v1117_v24 = vadd.f32 %v2178_v11, %v1046_v19  ;;  %v1544_v25 = vpop.f32.mrb[24].mxu0 }
 0x10e   :  { %v462_v26 = vpop.f32.mrb[25].mxu1  ;;  %1246 = vst.msk [vmem:[#allocation2 + $0xb0] sm:$0xff] %vm235_vm0, %v1182_v20  ;;  %v1183_v27 = vmax.f32 %v1119_v21, 0.0  ;;  %v868_v28 = vadd.f32 %v1544_v25, %v1476_v22  ;;  %v859_v29 = vpop.f32.mrb[25].mxu0 }
 0x10f   :  { %v1477_v30 = vpop.f32.mrb[26].mxu1  ;;  %1244 = vst.msk [vmem:[#allocation2 + $0xa0] sm:$0xff] %vm235_vm0, %v1180_v23  ;;  %v1181_v31 = vmax.f32 %v1117_v24, 0.0  ;;  %v860_v32 = vadd.f32 %v859_v29, %v462_v26  ;;  %v1545_v33 = vpop.f32.mrb[26].mxu0 }
 0x110   :  { %v465_v34 = vpop.f32.mrb[27].mxu1  ;;  %1247 = vst.msk [vmem:[#allocation2 + $0xb8] sm:$0xff] %vm235_vm0, %v1183_v27  ;;  %v1051_v35 = vmul.f32 %v2173_v6, %v868_v28  ;;  %v871_v36 = vadd.f32 %v1545_v33, %v1477_v30  ;;  %v862_v37 = vpop.f32.mrb[27].mxu0 }
 0x111   :  { %1245 = vst.msk [vmem:[#allocation2 + $0xa8] sm:$0xff] %vm235_vm0, %v1181_v31  ;;  %v1049_v38 = vmul.f32 %v2173_v6, %v860_v32  ;;  %v863_v39 = vadd.f32 %v862_v37, %v465_v34 }
 0x112   :  { %v1122_v40 = vadd.f32 %v2178_v11, %v1051_v35  ;;  %v1052_v41 = vmul.f32 %v2173_v6, %v871_v36 }
 0x113   :  { %v1120_v42 = vadd.f32 %v2178_v11, %v1049_v38  ;;  %v1050_v43 = vmul.f32 %v2173_v6, %v863_v39 }
 0x114   :  { %v1186_v44 = vmax.f32 %v1122_v40, 0.0  ;;  %v1123_v45 = vadd.f32 %v2178_v11, %v1052_v41 }
 0x115   :  { %v1480_v46 = vpop.f32.mrb[28].mxu1  ;;  %v1184_v47 = vmax.f32 %v1120_v42, 0.0  ;;  %v1121_v48 = vadd.f32 %v2178_v11, %v1050_v43  ;;  %v1548_v49 = vpop.f32.mrb[28].mxu0 }
 0x116   :  { %v478_v50 = vpop.f32.mrb[29].mxu1  ;;  %1250 = vst.msk [vmem:[#allocation2 + $0xd0] sm:$0xff] %vm235_vm0, %v1186_v44  ;;  %v1187_v51 = vmax.f32 %v1123_v45, 0.0  ;;  %v884_v52 = vadd.f32 %v1548_v49, %v1480_v46  ;;  %v875_v53 = vpop.f32.mrb[29].mxu0 }
 0x117   :  { %v1481_v54 = vpop.f32.mrb[30].mxu1  ;;  %1248 = vst.msk [vmem:[#allocation2 + $0xc0] sm:$0xff] %vm235_vm0, %v1184_v47  ;;  %v1185_v55 = vmax.f32 %v1121_v48, 0.0  ;;  %v876_v56 = vadd.f32 %v875_v53, %v478_v50  ;;  %v1549_v57 = vpop.f32.mrb[30].mxu0 }
 0x118   :  { %v481_v58 = vpop.f32.mrb[31].mxu1  ;;  %1251 = vst.msk [vmem:[#allocation2 + $0xd8] sm:$0xff] %vm235_vm0, %v1187_v51  ;;  %v1055_v59 = vmul.f32 %v2173_v6, %v884_v52  ;;  %v887_v60 = vadd.f32 %v1549_v57, %v1481_v54  ;;  %v878_v61 = vpop.f32.mrb[31].mxu0 }
 0x119   :  { %1249 = vst.msk [vmem:[#allocation2 + $0xc8] sm:$0xff] %vm235_vm0, %v1185_v55  ;;  %v1053_v62 = vmul.f32 %v2173_v6, %v876_v56  ;;  %v879_v63 = vadd.f32 %v878_v61, %v481_v58 }
 0x11a   :  { %v1126_v0 = vadd.f32 %v2178_v11, %v1055_v59  ;;  %v1056_v1 = vmul.f32 %v2173_v6, %v887_v60 }
 0x11b   :  { %v1124_v2 = vadd.f32 %v2178_v11, %v1053_v62  ;;  %v1054_v3 = vmul.f32 %v2173_v6, %v879_v63 }
 0x11c   :  { %v1190_v4 = vmax.f32 %v1126_v0, 0.0  ;;  %v1127_v5 = vadd.f32 %v2178_v11, %v1056_v1 }
 0x11d   :  { %v1484_v7 = vpop.f32.mrb[32].mxu1  ;;  %v1188_v8 = vmax.f32 %v1124_v2, 0.0  ;;  %v1125_v9 = vadd.f32 %v2178_v11, %v1054_v3  ;;  %v1552_v10 = vpop.f32.mrb[32].mxu0 }
 0x11e   :  { %v494_v12 = vpop.f32.mrb[33].mxu1  ;;  %1254 = vst.msk [vmem:[#allocation2 + $0xf0] sm:$0xff] %vm235_vm0, %v1190_v4  ;;  %v1191_v13 = vmax.f32 %v1127_v5, 0.0  ;;  %v900_v14 = vadd.f32 %v1552_v10, %v1484_v7  ;;  %v891_v15 = vpop.f32.mrb[33].mxu0 }
 0x11f   :  { %v1485_v16 = vpop.f32.mrb[34].mxu1  ;;  %1252 = vst.msk [vmem:[#allocation2 + $0xe0] sm:$0xff] %vm235_vm0, %v1188_v8  ;;  %v1189_v17 = vmax.f32 %v1125_v9, 0.0  ;;  %v892_v18 = vadd.f32 %v891_v15, %v494_v12  ;;  %v1553_v19 = vpop.f32.mrb[34].mxu0 }
 0x120   :  { %v497_v20 = vpop.f32.mrb[35].mxu1  ;;  %1255 = vst.msk [vmem:[#allocation2 + $0xf8] sm:$0xff] %vm235_vm0, %v1191_v13  ;;  %v1059_v21 = vmul.f32 %v2173_v6, %v900_v14  ;;  %v903_v22 = vadd.f32 %v1553_v19, %v1485_v16  ;;  %v894_v23 = vpop.f32.mrb[35].mxu0 }
 0x121   :  { %1253 = vst.msk [vmem:[#allocation2 + $0xe8] sm:$0xff] %vm235_vm0, %v1189_v17  ;;  %v1057_v24 = vmul.f32 %v2173_v6, %v892_v18  ;;  %v895_v25 = vadd.f32 %v894_v23, %v497_v20 }
 0x122   :  { %v1130_v26 = vadd.f32 %v2178_v11, %v1059_v21  ;;  %v1060_v27 = vmul.f32 %v2173_v6, %v903_v22 }
 0x123   :  { %v1128_v28 = vadd.f32 %v2178_v11, %v1057_v24  ;;  %v1058_v29 = vmul.f32 %v2173_v6, %v895_v25 }
 0x124   :  { %v1194_v30 = vmax.f32 %v1130_v26, 0.0  ;;  %v1131_v31 = vadd.f32 %v2178_v11, %v1060_v27 }
 0x125   :  { %v1488_v32 = vpop.f32.mrb[36].mxu1  ;;  %v1192_v33 = vmax.f32 %v1128_v28, 0.0  ;;  %v1129_v34 = vadd.f32 %v2178_v11, %v1058_v29  ;;  %v1556_v35 = vpop.f32.mrb[36].mxu0 }
 0x126   :  { %v510_v36 = vpop.f32.mrb[37].mxu1  ;;  %1258 = vst.msk [vmem:[#allocation2 + $0x110] sm:$0xff] %vm235_vm0, %v1194_v30  ;;  %v1195_v37 = vmax.f32 %v1131_v31, 0.0  ;;  %v916_v38 = vadd.f32 %v1556_v35, %v1488_v32  ;;  %v907_v39 = vpop.f32.mrb[37].mxu0 }
 0x127   :  { %v1489_v40 = vpop.f32.mrb[38].mxu1  ;;  %1256 = vst.msk [vmem:[#allocation2 + $0x100] sm:$0xff] %vm235_vm0, %v1192_v33  ;;  %v1193_v41 = vmax.f32 %v1129_v34, 0.0  ;;  %v908_v42 = vadd.f32 %v907_v39, %v510_v36  ;;  %v1557_v43 = vpop.f32.mrb[38].mxu0 }
 0x128   :  { %v513_v44 = vpop.f32.mrb[39].mxu1  ;;  %1259 = vst.msk [vmem:[#allocation2 + $0x118] sm:$0xff] %vm235_vm0, %v1195_v37  ;;  %v1063_v45 = vmul.f32 %v2173_v6, %v916_v38  ;;  %v919_v46 = vadd.f32 %v1557_v43, %v1489_v40  ;;  %v910_v47 = vpop.f32.mrb[39].mxu0 }
 0x129   :  { %1257 = vst.msk [vmem:[#allocation2 + $0x108] sm:$0xff] %vm235_vm0, %v1193_v41  ;;  %v1061_v48 = vmul.f32 %v2173_v6, %v908_v42  ;;  %v911_v49 = vadd.f32 %v910_v47, %v513_v44 }
 0x12a   :  { %v1134_v50 = vadd.f32 %v2178_v11, %v1063_v45  ;;  %v1064_v51 = vmul.f32 %v2173_v6, %v919_v46 }
 0x12b   :  { %v1132_v52 = vadd.f32 %v2178_v11, %v1061_v48  ;;  %v1062_v53 = vmul.f32 %v2173_v6, %v911_v49 }
 0x12c   :  { %v1198_v54 = vmax.f32 %v1134_v50, 0.0  ;;  %v1135_v55 = vadd.f32 %v2178_v11, %v1064_v51 }
 0x12d   :  { %v1492_v56 = vpop.f32.mrb[40].mxu1  ;;  %v1196_v57 = vmax.f32 %v1132_v52, 0.0  ;;  %v1133_v58 = vadd.f32 %v2178_v11, %v1062_v53  ;;  %v1560_v59 = vpop.f32.mrb[40].mxu0 }
 0x12e   :  { %v526_v60 = vpop.f32.mrb[41].mxu1  ;;  %1262 = vst.msk [vmem:[#allocation2 + $0x130] sm:$0xff] %vm235_vm0, %v1198_v54  ;;  %v1199_v61 = vmax.f32 %v1135_v55, 0.0  ;;  %v932_v62 = vadd.f32 %v1560_v59, %v1492_v56  ;;  %v923_v63 = vpop.f32.mrb[41].mxu0 }
 0x12f   :  { %v1493_v0 = vpop.f32.mrb[42].mxu1  ;;  %1260 = vst.msk [vmem:[#allocation2 + $0x120] sm:$0xff] %vm235_vm0, %v1196_v57  ;;  %v1197_v1 = vmax.f32 %v1133_v58, 0.0  ;;  %v924_v2 = vadd.f32 %v923_v63, %v526_v60  ;;  %v1561_v3 = vpop.f32.mrb[42].mxu0 }
 0x130   :  { %v529_v4 = vpop.f32.mrb[43].mxu1  ;;  %1263 = vst.msk [vmem:[#allocation2 + $0x138] sm:$0xff] %vm235_vm0, %v1199_v61  ;;  %v1067_v5 = vmul.f32 %v2173_v6, %v932_v62  ;;  %v935_v7 = vadd.f32 %v1561_v3, %v1493_v0  ;;  %v926_v8 = vpop.f32.mrb[43].mxu0 }
 0x131   :  { %1261 = vst.msk [vmem:[#allocation2 + $0x128] sm:$0xff] %vm235_vm0, %v1197_v1  ;;  %v1065_v9 = vmul.f32 %v2173_v6, %v924_v2  ;;  %v927_v10 = vadd.f32 %v926_v8, %v529_v4 }
 0x132   :  { %v1138_v12 = vadd.f32 %v2178_v11, %v1067_v5  ;;  %v1068_v13 = vmul.f32 %v2173_v6, %v935_v7 }
 0x133   :  { %v1136_v14 = vadd.f32 %v2178_v11, %v1065_v9  ;;  %v1066_v15 = vmul.f32 %v2173_v6, %v927_v10 }
 0x134   :  { %v1202_v16 = vmax.f32 %v1138_v12, 0.0  ;;  %v1139_v17 = vadd.f32 %v2178_v11, %v1068_v13 }
 0x135   :  { %v1496_v18 = vpop.f32.mrb[44].mxu1  ;;  %v1200_v19 = vmax.f32 %v1136_v14, 0.0  ;;  %v1137_v20 = vadd.f32 %v2178_v11, %v1066_v15  ;;  %v1564_v21 = vpop.f32.mrb[44].mxu0 }
 0x136   :  { %v542_v22 = vpop.f32.mrb[45].mxu1  ;;  %1266 = vst.msk [vmem:[#allocation2 + $0x150] sm:$0xff] %vm235_vm0, %v1202_v16  ;;  %v1203_v23 = vmax.f32 %v1139_v17, 0.0  ;;  %v948_v24 = vadd.f32 %v1564_v21, %v1496_v18  ;;  %v939_v25 = vpop.f32.mrb[45].mxu0 }
 0x137   :  { %v1497_v26 = vpop.f32.mrb[46].mxu1  ;;  %1264 = vst.msk [vmem:[#allocation2 + $0x140] sm:$0xff] %vm235_vm0, %v1200_v19  ;;  %v1201_v27 = vmax.f32 %v1137_v20, 0.0  ;;  %v940_v28 = vadd.f32 %v939_v25, %v542_v22  ;;  %v1565_v29 = vpop.f32.mrb[46].mxu0 }
 0x138   :  { %v545_v30 = vpop.f32.mrb[47].mxu1  ;;  %1267 = vst.msk [vmem:[#allocation2 + $0x158] sm:$0xff] %vm235_vm0, %v1203_v23  ;;  %v1071_v31 = vmul.f32 %v2173_v6, %v948_v24  ;;  %v951_v32 = vadd.f32 %v1565_v29, %v1497_v26  ;;  %v942_v33 = vpop.f32.mrb[47].mxu0 }
 0x139   :  { %1265 = vst.msk [vmem:[#allocation2 + $0x148] sm:$0xff] %vm235_vm0, %v1201_v27  ;;  %v1069_v34 = vmul.f32 %v2173_v6, %v940_v28  ;;  %v943_v35 = vadd.f32 %v942_v33, %v545_v30 }
 0x13a   :  { %v1142_v36 = vadd.f32 %v2178_v11, %v1071_v31  ;;  %v1072_v37 = vmul.f32 %v2173_v6, %v951_v32 }
 0x13b   :  { %v1140_v38 = vadd.f32 %v2178_v11, %v1069_v34  ;;  %v1070_v39 = vmul.f32 %v2173_v6, %v943_v35 }
 0x13c   :  { %v1206_v40 = vmax.f32 %v1142_v36, 0.0  ;;  %v1143_v41 = vadd.f32 %v2178_v11, %v1072_v37 }
 0x13d   :  { %v1500_v42 = vpop.f32.mrb[48].mxu1  ;;  %v1204_v43 = vmax.f32 %v1140_v38, 0.0  ;;  %v1141_v44 = vadd.f32 %v2178_v11, %v1070_v39  ;;  %v1568_v45 = vpop.f32.mrb[48].mxu0 }
 0x13e   :  { %v558_v46 = vpop.f32.mrb[49].mxu1  ;;  %1270 = vst.msk [vmem:[#allocation2 + $0x170] sm:$0xff] %vm235_vm0, %v1206_v40  ;;  %v1207_v47 = vmax.f32 %v1143_v41, 0.0  ;;  %v964_v48 = vadd.f32 %v1568_v45, %v1500_v42  ;;  %v955_v49 = vpop.f32.mrb[49].mxu0 }
 0x13f   :  { %v1501_v50 = vpop.f32.mrb[50].mxu1  ;;  %1268 = vst.msk [vmem:[#allocation2 + $0x160] sm:$0xff] %vm235_vm0, %v1204_v43  ;;  %v1205_v51 = vmax.f32 %v1141_v44, 0.0  ;;  %v956_v52 = vadd.f32 %v955_v49, %v558_v46  ;;  %v1569_v53 = vpop.f32.mrb[50].mxu0 }
 0x140   :  { %v561_v54 = vpop.f32.mrb[51].mxu1  ;;  %1271 = vst.msk [vmem:[#allocation2 + $0x178] sm:$0xff] %vm235_vm0, %v1207_v47  ;;  %v1075_v55 = vmul.f32 %v2173_v6, %v964_v48  ;;  %v967_v56 = vadd.f32 %v1569_v53, %v1501_v50  ;;  %v958_v57 = vpop.f32.mrb[51].mxu0 }
 0x141   :  { %1269 = vst.msk [vmem:[#allocation2 + $0x168] sm:$0xff] %vm235_vm0, %v1205_v51  ;;  %v1073_v58 = vmul.f32 %v2173_v6, %v956_v52  ;;  %v959_v59 = vadd.f32 %v958_v57, %v561_v54 }
 0x142   :  { %v1146_v60 = vadd.f32 %v2178_v11, %v1075_v55  ;;  %v1076_v61 = vmul.f32 %v2173_v6, %v967_v56 }
 0x143   :  { %v1144_v62 = vadd.f32 %v2178_v11, %v1073_v58  ;;  %v1074_v63 = vmul.f32 %v2173_v6, %v959_v59 }
 0x144   :  { %v1210_v0 = vmax.f32 %v1146_v60, 0.0  ;;  %v1147_v1 = vadd.f32 %v2178_v11, %v1076_v61 }
 0x145   :  { %v1504_v2 = vpop.f32.mrb[52].mxu1  ;;  %v1208_v3 = vmax.f32 %v1144_v62, 0.0  ;;  %v1145_v4 = vadd.f32 %v2178_v11, %v1074_v63  ;;  %v1572_v5 = vpop.f32.mrb[52].mxu0 }
 0x146   :  { %v574_v7 = vpop.f32.mrb[53].mxu1  ;;  %1274 = vst.msk [vmem:[#allocation2 + $0x190] sm:$0xff] %vm235_vm0, %v1210_v0  ;;  %v1211_v8 = vmax.f32 %v1147_v1, 0.0  ;;  %v980_v9 = vadd.f32 %v1572_v5, %v1504_v2  ;;  %v971_v10 = vpop.f32.mrb[53].mxu0 }
 0x147   :  { %v1505_v12 = vpop.f32.mrb[54].mxu1  ;;  %1272 = vst.msk [vmem:[#allocation2 + $0x180] sm:$0xff] %vm235_vm0, %v1208_v3  ;;  %v1209_v13 = vmax.f32 %v1145_v4, 0.0  ;;  %v972_v14 = vadd.f32 %v971_v10, %v574_v7  ;;  %v1573_v15 = vpop.f32.mrb[54].mxu0 }
 0x148   :  { %v577_v16 = vpop.f32.mrb[55].mxu1  ;;  %1275 = vst.msk [vmem:[#allocation2 + $0x198] sm:$0xff] %vm235_vm0, %v1211_v8  ;;  %v1079_v17 = vmul.f32 %v2173_v6, %v980_v9  ;;  %v983_v18 = vadd.f32 %v1573_v15, %v1505_v12  ;;  %v974_v19 = vpop.f32.mrb[55].mxu0 }
 0x149   :  { %1273 = vst.msk [vmem:[#allocation2 + $0x188] sm:$0xff] %vm235_vm0, %v1209_v13  ;;  %v1077_v20 = vmul.f32 %v2173_v6, %v972_v14  ;;  %v975_v21 = vadd.f32 %v974_v19, %v577_v16 }
 0x14a   :  { %v1150_v22 = vadd.f32 %v2178_v11, %v1079_v17  ;;  %v1080_v23 = vmul.f32 %v2173_v6, %v983_v18 }
 0x14b   :  { %v1148_v24 = vadd.f32 %v2178_v11, %v1077_v20  ;;  %v1078_v25 = vmul.f32 %v2173_v6, %v975_v21 }
 0x14c   :  { %v1214_v26 = vmax.f32 %v1150_v22, 0.0  ;;  %v1151_v27 = vadd.f32 %v2178_v11, %v1080_v23 }
 0x14d   :  { %v1508_v28 = vpop.f32.mrb[56].mxu1  ;;  %v1212_v29 = vmax.f32 %v1148_v24, 0.0  ;;  %v1149_v30 = vadd.f32 %v2178_v11, %v1078_v25  ;;  %v1576_v31 = vpop.f32.mrb[56].mxu0 }
 0x14e   :  { %v590_v32 = vpop.f32.mrb[57].mxu1  ;;  %1278 = vst.msk [vmem:[#allocation2 + $0x1b0] sm:$0xff] %vm235_vm0, %v1214_v26  ;;  %v1215_v33 = vmax.f32 %v1151_v27, 0.0  ;;  %v996_v34 = vadd.f32 %v1576_v31, %v1508_v28  ;;  %v987_v35 = vpop.f32.mrb[57].mxu0 }
 0x14f   :  { %v1509_v36 = vpop.f32.mrb[58].mxu1  ;;  %1276 = vst.msk [vmem:[#allocation2 + $0x1a0] sm:$0xff] %vm235_vm0, %v1212_v29  ;;  %v1213_v37 = vmax.f32 %v1149_v30, 0.0  ;;  %v988_v38 = vadd.f32 %v987_v35, %v590_v32  ;;  %v1577_v39 = vpop.f32.mrb[58].mxu0 }
 0x150   :  { %v593_v40 = vpop.f32.mrb[59].mxu1  ;;  %1279 = vst.msk [vmem:[#allocation2 + $0x1b8] sm:$0xff] %vm235_vm0, %v1215_v33  ;;  %v1083_v41 = vmul.f32 %v2173_v6, %v996_v34  ;;  %v999_v42 = vadd.f32 %v1577_v39, %v1509_v36  ;;  %v990_v43 = vpop.f32.mrb[59].mxu0 }
 0x151   :  { %1277 = vst.msk [vmem:[#allocation2 + $0x1a8] sm:$0xff] %vm235_vm0, %v1213_v37  ;;  %v1081_v44 = vmul.f32 %v2173_v6, %v988_v38  ;;  %v991_v45 = vadd.f32 %v990_v43, %v593_v40 }
 0x152   :  { %v1154_v46 = vadd.f32 %v2178_v11, %v1083_v41  ;;  %v1084_v47 = vmul.f32 %v2173_v6, %v999_v42 }
 0x153   :  { %v1152_v48 = vadd.f32 %v2178_v11, %v1081_v44  ;;  %v1082_v49 = vmul.f32 %v2173_v6, %v991_v45 }
 0x154   :  { %v1218_v50 = vmax.f32 %v1154_v46, 0.0  ;;  %v1155_v51 = vadd.f32 %v2178_v11, %v1084_v47 }
 0x155   :  { %v1512_v52 = vpop.f32.mrb[60].mxu1  ;;  %v1216_v53 = vmax.f32 %v1152_v48, 0.0  ;;  %v1153_v54 = vadd.f32 %v2178_v11, %v1082_v49  ;;  %v1580_v55 = vpop.f32.mrb[60].mxu0 }
 0x156   :  { %v606_v56 = vpop.f32.mrb[61].mxu1  ;;  %1282 = vst.msk [vmem:[#allocation2 + $0x1d0] sm:$0xff] %vm235_vm0, %v1218_v50  ;;  %v1219_v57 = vmax.f32 %v1155_v51, 0.0  ;;  %v1012_v58 = vadd.f32 %v1580_v55, %v1512_v52  ;;  %v1003_v59 = vpop.f32.mrb[61].mxu0 }
 0x157   :  { %v1513_v60 = vpop.f32.mrb[62].mxu1  ;;  %1280 = vst.msk [vmem:[#allocation2 + $0x1c0] sm:$0xff] %vm235_vm0, %v1216_v53  ;;  %v1217_v61 = vmax.f32 %v1153_v54, 0.0  ;;  %v1004_v62 = vadd.f32 %v1003_v59, %v606_v56  ;;  %v1581_v63 = vpop.f32.mrb[62].mxu0 }
 0x158   :  { %v609_v0 = vpop.f32.mrb[63].mxu1  ;;  %1283 = vst.msk [vmem:[#allocation2 + $0x1d8] sm:$0xff] %vm235_vm0, %v1219_v57  ;;  %v1087_v1 = vmul.f32 %v2173_v6, %v1012_v58  ;;  %v1015_v2 = vadd.f32 %v1581_v63, %v1513_v60  ;;  %v1006_v3 = vpop.f32.mrb[63].mxu0 }
 0x159   :  { %1281 = vst.msk [vmem:[#allocation2 + $0x1c8] sm:$0xff] %vm235_vm0, %v1217_v61  ;;  %v1085_v4 = vmul.f32 %v2173_v6, %v1004_v62  ;;  %v1007_v5 = vadd.f32 %v1006_v3, %v609_v0 }
 0x15a   :  { %v1158_v7 = vadd.f32 %v2178_v11, %v1087_v1  ;;  %v1088_v8 = vmul.f32 %v2173_v6, %v1015_v2 }
 0x15b   :  { %v1156_v9 = vadd.f32 %v2178_v11, %v1085_v4  ;;  %v1086_v10 = vmul.f32 %v2173_v6, %v1007_v5 }
 0x15c   :  { %v1222_v12 = vmax.f32 %v1158_v7, 0.0  ;;  %v1159_v13 = vadd.f32 %v2178_v11, %v1088_v8 }
 0x15d   :  { %v1220_v14 = vmax.f32 %v1156_v9, 0.0  ;;  %v1157_v15 = vadd.f32 %v2178_v11, %v1086_v10 }
 0x15e   :  { %1286 = vst.msk [vmem:[#allocation2 + $0x1f0] sm:$0xff] %vm235_vm0, %v1222_v12  ;;  %v1223_v16 = vmax.f32 %v1159_v13, 0.0 }
 0x15f   :  { %1284 = vst.msk [vmem:[#allocation2 + $0x1e0] sm:$0xff] %vm235_vm0, %v1220_v14  ;;  %v1221_v17 = vmax.f32 %v1157_v15, 0.0 }
 0x160   :  { %1287 = vst.msk [vmem:[#allocation2 + $0x1f8] sm:$0xff] %vm235_vm0, %v1223_v16 }
 0x161   :  { %1285 = vst.msk [vmem:[#allocation2 + $0x1e8] sm:$0xff] %vm235_vm0, %v1221_v17 }
 0x162   :  { %1664 = shalt.err (!%p1661_p4)
}
 0x163   :  { %s1665_s27 = scalar_lea.hbm %s2389_s5, 8192 }
 0x164   :  { %p1666_p5 = scmp.ne.s32.totalorder %s2389_s5, %s1665_s27  ;;  %p1669_p6 = scmp.lt.u32.totalorder %s1665_s27, %s2389_s5 }
 0x166   :  { %p1671_p7 = pnand %p1669_p6, %p1666_p5 }
 0x168   :  { %1674 = shalt.err (!%p1671_p7)
}
 0x169   :  { %s1678_s7 = smov 128   ;;  %s1679_s8 = smov 8  }
 0x16a   :  { %1299 = dma.vmem_to_hbm [thread:$0]  %s1294_s3, 8192, %s2389_s5, [#allocation3], %s1678_s7, %s1678_s7, %s1679_s8  }
 0x16b   :  { %1675 = dma.done.wait [#allocation3], 8192  }
 0x16c   :  { %1676 = vsyncadd [#allocation3], 4294959104 }
 0x16d   :  { %1303 = vsyncpa [#allocation3], 1 }

// kernel: simcsp_sppf_forward.11
= control target key start
LH: loop header
LB: loop body
LE: loop exit
PB: predicated region body
PF: predicated region fallthrough
CT: control target
= control target key end

     0   :  { %s2651_s12 = smov 0   ;;  %s2653_s13 = smov 0   ;;  %s4132_s0 = inlined_call_operand.vmem [shape: f32[2,16,16,32], index: 0, kind: input, shape index: {}]   ;;  %s4133_s1 = inlined_call_operand.vmem [shape: f32[2,16,16,32], index: 1, kind: output, shape index: {0}]   ;;  %s4134_s2 = inlined_call_operand.vmem [shape: f32[2,16,16,32], index: 2, kind: output, shape index: {1}]   ;;  %s4135_s3 = inlined_call_operand.vmem [shape: f32[2,16,16,32], index: 3, kind: output, shape index: {2}]  }
   0x1   :  { %s2655_s14 = smov 0  }
   0x2 LB: > { %s26_s15 = sadd.s32 1, %s2624_s13  ;;  %p2566_p0 = scmp.ge.s32.totalorder %s2628_s14, 1  ;;  %s2628_s14 = sphi %s2655_s14, %s14_s14   ;;  %s2624_s13 = sphi %s2653_s13, %s4145_s13   ;;  %s2620_s12 = sphi %s2651_s12, %s4144_s12  }
   0x3   : > { %p28_p1 = scmp.ge.s32.totalorder %s26_s15, 2  ;;  %p165_p2 = scmp.lt.s32.totalorder %s2628_s14, 3 }
   0x5   : > { %s4147_s15 = smov (%p28_p1, %s26_s15), 0  ;;  %p166_p3 = pnand %p2566_p0, %p165_p2 }
   0x6   : > { %vm243_vm0 = vcmask (!%p166_p3), 261120   ;;  %vm246_vm1 = vcmask (!%p166_p3), 257024   ;;  %p211_p4 = scmp.lt.s32.totalorder (!%p166_p3), %s2620_s12, 1  ;;  %v2630_v0 = vmov (!%p166_p3), 0.0  }
   0x7   : > { %169 = sbr.rel (%p166_p3) target bundleno = 337 (0x151), region = 24  ;;  %244 = vst.msk [vmem:[#allocation2] sm:$0xff] (!%p166_p3), %vm243_vm0, %v2630_v0  ;;  %245 = vst.msk [vmem:[#allocation2 + $0x8] sm:$0xff] (!%p166_p3), %vm243_vm0, %v2630_v0 }
   0x8   : > { %248 = vst.msk [vmem:[#allocation2 + $0x18] sm:$0xff] (!%p166_p3), %vm243_vm0, %v2630_v0  ;;  %249 = vst.msk [vmem:[#allocation2 + $0x20] sm:$0xff] (!%p166_p3), %vm243_vm0, %v2630_v0 }
   0x9   : > { %251 = vst.msk [vmem:[#allocation2 + $0x30] sm:$0xff] (!%p166_p3), %vm243_vm0, %v2630_v0  ;;  %252 = vst.msk [vmem:[#allocation2 + $0x38] sm:$0xff] (!%p166_p3), %vm243_vm0, %v2630_v0 }
   0xa   : > { %254 = vst.msk [vmem:[#allocation2 + $0x48] sm:$0xff] (!%p166_p3), %vm243_vm0, %v2630_v0  ;;  %255 = vst.msk [vmem:[#allocation2 + $0x50] sm:$0xff] (!%p166_p3), %vm243_vm0, %v2630_v0 }
   0xb   : > { %257 = vst.msk [vmem:[#allocation2 + $0x60] sm:$0xff] (!%p166_p3), %vm243_vm0, %v2630_v0  ;;  %258 = vst.msk [vmem:[#allocation2 + $0x68] sm:$0xff] (!%p166_p3), %vm243_vm0, %v2630_v0 }
   0xc   : > { %260 = vst.msk [vmem:[#allocation2 + $0x78] sm:$0xff] (!%p166_p3), %vm243_vm0, %v2630_v0  ;;  %261 = vst.msk [vmem:[#allocation2 + $0x80] sm:$0xff] (!%p166_p3), %vm243_vm0, %v2630_v0 }
   0xd   : > { %263 = vst.msk [vmem:[#allocation2 + $0x90] sm:$0xff] (!%p166_p3), %vm243_vm0, %v2630_v0  ;;  %264 = vst.msk [vmem:[#allocation2 + $0x98] sm:$0xff] (!%p166_p3), %vm243_vm0, %v2630_v0 }
   0xe   : > { %266 = vst.msk [vmem:[#allocation2 + $0xa8] sm:$0xff] %vm243_vm0, %v2630_v0  ;;  %267 = vst.msk [vmem:[#allocation2 + $0xb0] sm:$0xff] %vm243_vm0, %v2630_v0  ;;  %s4149_s12 = smov (!%p211_p4, %s2620_s12), 1 }
   0xf   : > { %269 = vst.msk [vmem:[#allocation2 + $0xc0] sm:$0xff] %vm243_vm0, %v2630_v0  ;;  %270 = vst.msk [vmem:[#allocation2 + $0xc8] sm:$0xff] %vm243_vm0, %v2630_v0  ;;  %s2851_s16 = sshll.u32 %s4149_s12, 8 }
  0x10   : > { %272 = vst.msk [vmem:[#allocation2 + $0xd8] sm:$0xff] %vm243_vm0, %v2630_v0  ;;  %273 = vst.msk [vmem:[#allocation2 + $0xe0] sm:$0xff] %vm243_vm0, %v2630_v0  ;;  %s2857_s19 = scalar_lea.vmem %s4132_s0, %s2851_s16  ;;  %s2963_s22 = scalar_lea.vmem %s4133_s1, %s2851_s16 }
  0x11   : > { %275 = vst.msk [vmem:[#allocation2 + $0xf0] sm:$0xff] %vm243_vm0, %v2630_v0  ;;  %276 = vst.msk [vmem:[#allocation2 + $0xf8] sm:$0xff] %vm243_vm0, %v2630_v0  ;;  %v333_v1 = vld [vmem:[%s2857_s19] sm:$0xff]  ;;  %v334_v2 = vld [vmem:[%s2857_s19 + $0x8] sm:$0xff]  ;;  %s3482_s25 = scalar_lea.vmem %s4134_s2, %s2851_s16  ;;  %s4026_s28 = scalar_lea.vmem %s4135_s3, %s2851_s16 }
  0x12   : > { %278 = vst.msk [vmem:[#allocation2 + $0x108] sm:$0xff] %vm243_vm0, %v2630_v0  ;;  %279 = vst.msk [vmem:[#allocation2 + $0x110] sm:$0xff] %vm243_vm0, %v2630_v0  ;;  %v335_v3 = vld [vmem:[%s2857_s19 + $0x10] sm:$0xff]  ;;  %v336_v4 = vld [vmem:[%s2857_s19 + $0x18] sm:$0xff] }
  0x13   : > { %281 = vst.msk [vmem:[#allocation2 + $0x120] sm:$0xff] %vm243_vm0, %v2630_v0  ;;  %282 = vst.msk [vmem:[#allocation2 + $0x128] sm:$0xff] %vm243_vm0, %v2630_v0  ;;  %v337_v5 = vld [vmem:[%s2857_s19 + $0x20] sm:$0xff]  ;;  %v338_v6 = vld [vmem:[%s2857_s19 + $0x28] sm:$0xff] }
  0x14   : > { %284 = vst.msk [vmem:[#allocation2 + $0x138] sm:$0xff] %vm243_vm0, %v2630_v0  ;;  %285 = vst.msk [vmem:[#allocation2 + $0x140] sm:$0xff] %vm243_vm0, %v2630_v0  ;;  %v339_v7 = vld [vmem:[%s2857_s19 + $0x30] sm:$0xff]  ;;  %v340_v8 = vld [vmem:[%s2857_s19 + $0x38] sm:$0xff] }
  0x15   : > { %287 = vst.msk [vmem:[#allocation2 + $0x150] sm:$0xff] %vm243_vm0, %v2630_v0  ;;  %288 = vst.msk [vmem:[#allocation2 + $0x158] sm:$0xff] %vm243_vm0, %v2630_v0  ;;  %v341_v9 = vld [vmem:[%s2857_s19 + $0x40] sm:$0xff]  ;;  %v342_v10 = vld [vmem:[%s2857_s19 + $0x48] sm:$0xff] }
  0x16   : > { %290 = vst.msk [vmem:[#allocation2 + $0x168] sm:$0xff] %vm243_vm0, %v2630_v0  ;;  %291 = vst.msk [vmem:[#allocation2 + $0x170] sm:$0xff] %vm243_vm0, %v2630_v0  ;;  %v343_v11 = vld [vmem:[%s2857_s19 + $0x50] sm:$0xff]  ;;  %v344_v12 = vld [vmem:[%s2857_s19 + $0x58] sm:$0xff] }
  0x17   : > { %293 = vst.msk [vmem:[#allocation3] sm:$0xff] %vm243_vm0, %v2630_v0  ;;  %294 = vst.msk [vmem:[#allocation3 + $0x8] sm:$0xff] %vm243_vm0, %v2630_v0  ;;  %v345_v13 = vld [vmem:[%s2857_s19 + $0x60] sm:$0xff]  ;;  %v346_v14 = vld [vmem:[%s2857_s19 + $0x68] sm:$0xff] }
  0x18   : > { %295 = vst.msk [vmem:[#allocation3 + $0x10] sm:$0xff] %vm243_vm0, %v2630_v0  ;;  %296 = vst.msk [vmem:[#allocation3 + $0x18] sm:$0xff] %vm243_vm0, %v2630_v0  ;;  %v347_v15 = vld [vmem:[%s2857_s19 + $0x70] sm:$0xff]  ;;  %v348_v16 = vld [vmem:[%s2857_s19 + $0x78] sm:$0xff] }
  0x19   : > { %297 = vst.msk [vmem:[#allocation3 + $0x20] sm:$0xff] %vm243_vm0, %v2630_v0  ;;  %298 = vst.msk [vmem:[#allocation3 + $0x28] sm:$0xff] %vm243_vm0, %v2630_v0  ;;  %v349_v17 = vld [vmem:[%s2857_s19 + $0x80] sm:$0xff]  ;;  %v350_v18 = vld [vmem:[%s2857_s19 + $0x88] sm:$0xff] }
  0x1a   : > { %299 = vst.msk [vmem:[#allocation3 + $0x30] sm:$0xff] %vm243_vm0, %v2630_v0  ;;  %300 = vst.msk [vmem:[#allocation3 + $0x38] sm:$0xff] %vm243_vm0, %v2630_v0  ;;  %v351_v19 = vld [vmem:[%s2857_s19 + $0x90] sm:$0xff]  ;;  %v352_v20 = vld [vmem:[%s2857_s19 + $0x98] sm:$0xff] }
  0x1b   : > { %301 = vst.msk [vmem:[#allocation3 + $0x40] sm:$0xff] %vm243_vm0, %v2630_v0  ;;  %302 = vst.msk [vmem:[#allocation3 + $0x48] sm:$0xff] %vm243_vm0, %v2630_v0  ;;  %v353_v21 = vld [vmem:[%s2857_s19 + $0xa0] sm:$0xff]  ;;  %v354_v22 = vld [vmem:[%s2857_s19 + $0xa8] sm:$0xff] }
  0x1c   : > { %303 = vst.msk [vmem:[#allocation3 + $0x50] sm:$0xff] %vm243_vm0, %v2630_v0  ;;  %304 = vst.msk [vmem:[#allocation3 + $0x58] sm:$0xff] %vm243_vm0, %v2630_v0  ;;  %v355_v23 = vld [vmem:[%s2857_s19 + $0xb0] sm:$0xff]  ;;  %v356_v24 = vld [vmem:[%s2857_s19 + $0xb8] sm:$0xff] }
  0x1d   : > { %305 = vst.msk [vmem:[#allocation3 + $0x60] sm:$0xff] %vm243_vm0, %v2630_v0  ;;  %306 = vst.msk [vmem:[#allocation3 + $0x68] sm:$0xff] %vm243_vm0, %v2630_v0  ;;  %v357_v25 = vld [vmem:[%s2857_s19 + $0xc0] sm:$0xff]  ;;  %v358_v26 = vld [vmem:[%s2857_s19 + $0xc8] sm:$0xff] }
  0x1e   : > { %307 = vst.msk [vmem:[#allocation3 + $0x70] sm:$0xff] %vm243_vm0, %v2630_v0  ;;  %308 = vst.msk [vmem:[#allocation3 + $0x78] sm:$0xff] %vm243_vm0, %v2630_v0  ;;  %v359_v27 = vld [vmem:[%s2857_s19 + $0xd0] sm:$0xff]  ;;  %v360_v28 = vld [vmem:[%s2857_s19 + $0xd8] sm:$0xff] }
  0x1f   : > { %309 = vst.msk [vmem:[#allocation3 + $0x80] sm:$0xff] %vm243_vm0, %v2630_v0  ;;  %310 = vst.msk [vmem:[#allocation3 + $0x88] sm:$0xff] %vm243_vm0, %v2630_v0  ;;  %v361_v29 = vld [vmem:[%s2857_s19 + $0xe0] sm:$0xff]  ;;  %v362_v30 = vld [vmem:[%s2857_s19 + $0xe8] sm:$0xff] }
  0x20   : > { %311 = vst.msk [vmem:[#allocation3 + $0x90] sm:$0xff] %vm243_vm0, %v2630_v0  ;;  %312 = vst.msk [vmem:[#allocation3 + $0x98] sm:$0xff] %vm243_vm0, %v2630_v0  ;;  %v363_v31 = vld [vmem:[%s2857_s19 + $0xf0] sm:$0xff]  ;;  %v364_v32 = vld [vmem:[%s2857_s19 + $0xf8] sm:$0xff] }
  0x21   : > { %313 = vst.msk [vmem:[#allocation3 + $0xa0] sm:$0xff] %vm243_vm0, %v2630_v0  ;;  %314 = vst.msk [vmem:[#allocation3 + $0xa8] sm:$0xff] %vm243_vm0, %v2630_v0 }
  0x22   : > { %315 = vst.msk [vmem:[#allocation3 + $0xb0] sm:$0xff] %vm243_vm0, %v2630_v0  ;;  %316 = vst.msk [vmem:[#allocation3 + $0xb8] sm:$0xff] %vm243_vm0, %v2630_v0 }
  0x23   : > { %317 = vst.msk [vmem:[#allocation3 + $0xc0] sm:$0xff] %vm243_vm0, %v2630_v0  ;;  %318 = vst.msk [vmem:[#allocation3 + $0xc8] sm:$0xff] %vm243_vm0, %v2630_v0 }
  0x24   : > { %319 = vst.msk [vmem:[#allocation3 + $0xd0] sm:$0xff] %vm243_vm0, %v2630_v0  ;;  %320 = vst.msk [vmem:[#allocation3 + $0xd8] sm:$0xff] %vm243_vm0, %v2630_v0 }
  0x25   : > { %321 = vst.msk [vmem:[#allocation3 + $0xe0] sm:$0xff] %vm243_vm0, %v2630_v0  ;;  %322 = vst.msk [vmem:[#allocation3 + $0xe8] sm:$0xff] %vm243_vm0, %v2630_v0 }
  0x26   : > { %323 = vst.msk [vmem:[#allocation3 + $0xf0] sm:$0xff] %vm243_vm0, %v2630_v0  ;;  %324 = vst.msk [vmem:[#allocation3 + $0xf8] sm:$0xff] %vm243_vm0, %v2630_v0 }
  0x27   : > { %325 = vst.msk [vmem:[#allocation3 + $0x100] sm:$0xff] %vm243_vm0, %v2630_v0  ;;  %326 = vst.msk [vmem:[#allocation3 + $0x108] sm:$0xff] %vm243_vm0, %v2630_v0 }
  0x28   : > { %327 = vst.msk [vmem:[#allocation3 + $0x110] sm:$0xff] %vm243_vm0, %v2630_v0  ;;  %328 = vst.msk [vmem:[#allocation3 + $0x118] sm:$0xff] %vm243_vm0, %v2630_v0 }
  0x29   : > { %329 = vst.msk [vmem:[#allocation3 + $0x120] sm:$0xff] %vm243_vm0, %v2630_v0  ;;  %330 = vst.msk [vmem:[#allocation3 + $0x128] sm:$0xff] %vm243_vm0, %v2630_v0 }
  0x2a   : > { %331 = vst.msk [vmem:[#allocation3 + $0x130] sm:$0xff] %vm243_vm0, %v2630_v0  ;;  %332 = vst.msk [vmem:[#allocation3 + $0x138] sm:$0xff] %vm243_vm0, %v2630_v0 }
  0x2b   : > { %247 = vst.msk [vmem:[#allocation2 + $0x10] sm:$0xf] %vm246_vm1, %v2630_v0  ;;  %250 = vst.msk [vmem:[#allocation2 + $0x28] sm:$0xf] %vm246_vm1, %v2630_v0 }
  0x2c   : > { %253 = vst.msk [vmem:[#allocation2 + $0x40] sm:$0xf] %vm246_vm1, %v2630_v0  ;;  %256 = vst.msk [vmem:[#allocation2 + $0x58] sm:$0xf] %vm246_vm1, %v2630_v0 }
  0x2d   : > { %259 = vst.msk [vmem:[#allocation2 + $0x70] sm:$0xf] %vm246_vm1, %v2630_v0  ;;  %262 = vst.msk [vmem:[#allocation2 + $0x88] sm:$0xf] %vm246_vm1, %v2630_v0 }
  0x2e   : > { %265 = vst.msk [vmem:[#allocation2 + $0xa0] sm:$0xf] %vm246_vm1, %v2630_v0  ;;  %268 = vst.msk [vmem:[#allocation2 + $0xb8] sm:$0xf] %vm246_vm1, %v2630_v0 }
  0x2f   : > { %271 = vst.msk [vmem:[#allocation2 + $0xd0] sm:$0xf] %vm246_vm1, %v2630_v0  ;;  %274 = vst.msk [vmem:[#allocation2 + $0xe8] sm:$0xf] %vm246_vm1, %v2630_v0 }
  0x30   : > { %277 = vst.msk [vmem:[#allocation2 + $0x100] sm:$0xf] %vm246_vm1, %v2630_v0  ;;  %280 = vst.msk [vmem:[#allocation2 + $0x118] sm:$0xf] %vm246_vm1, %v2630_v0 }
  0x31   : > { %283 = vst.msk [vmem:[#allocation2 + $0x130] sm:$0xf] %vm246_vm1, %v2630_v0  ;;  %286 = vst.msk [vmem:[#allocation2 + $0x148] sm:$0xf] %vm246_vm1, %v2630_v0 }
  0x32   : > { %289 = vst.msk [vmem:[#allocation2 + $0x160] sm:$0xf] %vm246_vm1, %v2630_v0  ;;  %292 = vst.msk [vmem:[#allocation2 + $0x178] sm:$0xf] %vm246_vm1, %v2630_v0 }
  0x33   : > { %365 = vst.msk [vmem:[#allocation2 + $0x2] sm:$0xff] %vm243_vm0, %v333_v1  ;;  %366 = vst.msk [vmem:[#allocation2 + $0xa] sm:$0xff] %vm243_vm0, %v334_v2 }
  0x34   : > { %367 = vst.msk [vmem:[#allocation2 + $0x1a] sm:$0xff] %vm243_vm0, %v335_v3  ;;  %368 = vst.msk [vmem:[#allocation2 + $0x22] sm:$0xff] %vm243_vm0, %v336_v4 }
  0x35   : > { %369 = vst.msk [vmem:[#allocation2 + $0x32] sm:$0xff] %vm243_vm0, %v337_v5  ;;  %370 = vst.msk [vmem:[#allocation2 + $0x3a] sm:$0xff] %vm243_vm0, %v338_v6 }
  0x36   : > { %371 = vst.msk [vmem:[#allocation2 + $0x4a] sm:$0xff] %vm243_vm0, %v339_v7  ;;  %372 = vst.msk [vmem:[#allocation2 + $0x52] sm:$0xff] %vm243_vm0, %v340_v8 }
  0x37   : > { %373 = vst.msk [vmem:[#allocation2 + $0x62] sm:$0xff] %vm243_vm0, %v341_v9  ;;  %374 = vst.msk [vmem:[#allocation2 + $0x6a] sm:$0xff] %vm243_vm0, %v342_v10 }
  0x38   : > { %375 = vst.msk [vmem:[#allocation2 + $0x7a] sm:$0xff] %vm243_vm0, %v343_v11  ;;  %376 = vst.msk [vmem:[#allocation2 + $0x82] sm:$0xff] %vm243_vm0, %v344_v12 }
  0x39   : > { %377 = vst.msk [vmem:[#allocation2 + $0x92] sm:$0xff] %vm243_vm0, %v345_v13  ;;  %378 = vst.msk [vmem:[#allocation2 + $0x9a] sm:$0xff] %vm243_vm0, %v346_v14 }
  0x3a   : > { %379 = vst.msk [vmem:[#allocation2 + $0xaa] sm:$0xff] %vm243_vm0, %v347_v15  ;;  %380 = vst.msk [vmem:[#allocation2 + $0xb2] sm:$0xff] %vm243_vm0, %v348_v16  ;;  %v397_v33 = vld [vmem:[#allocation2] sm:$0xff]  ;;  %v398_v36 = vld [vmem:[#allocation2 + $0x8] sm:$0xff] }
  0x3b   : > { %381 = vst.msk [vmem:[#allocation2 + $0xc2] sm:$0xff] %vm243_vm0, %v349_v17  ;;  %382 = vst.msk [vmem:[#allocation2 + $0xca] sm:$0xff] %vm243_vm0, %v350_v18  ;;  %v429_v34 = vld [vmem:[#allocation2 + $0x1] sm:$0xff]  ;;  %v430_v37 = vld [vmem:[#allocation2 + $0x9] sm:$0xff] }
  0x3c   : > { %383 = vst.msk [vmem:[#allocation2 + $0xda] sm:$0xff] %vm243_vm0, %v351_v19  ;;  %384 = vst.msk [vmem:[#allocation2 + $0xe2] sm:$0xff] %vm243_vm0, %v352_v20  ;;  %v461_v35 = vmax.f32 %v397_v33, %v429_v34  ;;  %v493_v38 = vld [vmem:[#allocation2 + $0x2] sm:$0xff]  ;;  %v462_v40 = vmax.f32 %v398_v36, %v430_v37  ;;  %v494_v42 = vld [vmem:[#allocation2 + $0xa] sm:$0xff] }
  0x3d   : > { %385 = vst.msk [vmem:[#allocation2 + $0xf2] sm:$0xff] %vm243_vm0, %v353_v21  ;;  %386 = vst.msk [vmem:[#allocation2 + $0xfa] sm:$0xff] %vm243_vm0, %v354_v22  ;;  %v557_v39 = vld [vmem:[#allocation2 + $0x3] sm:$0xff]  ;;  %v399_v43 = vld [vmem:[#allocation2 + $0x18] sm:$0xff] }
  0x3e   : > { %387 = vst.msk [vmem:[#allocation2 + $0x10a] sm:$0xff] %vm243_vm0, %v355_v23  ;;  %388 = vst.msk [vmem:[#allocation2 + $0x112] sm:$0xff] %vm243_vm0, %v356_v24  ;;  %v525_v41 = vmax.f32 %v461_v35, %v493_v38  ;;  %v431_v44 = vld [vmem:[#allocation2 + $0x19] sm:$0xff]  ;;  %v621_v45 = vld [vmem:[#allocation2 + $0x4] sm:$0xff]  ;;  %v526_v46 = vmax.f32 %v462_v40, %v494_v42 }
  0x3f   : > { %389 = vst.msk [vmem:[#allocation2 + $0x122] sm:$0xff] %vm243_vm0, %v357_v25  ;;  %390 = vst.msk [vmem:[#allocation2 + $0x12a] sm:$0xff] %vm243_vm0, %v358_v26  ;;  %v558_v47 = vld [vmem:[#allocation2 + $0xb] sm:$0xff]  ;;  %v463_v48 = vmax.f32 %v399_v43, %v431_v44  ;;  %v400_v49 = vld [vmem:[#allocation2 + $0x20] sm:$0xff] }
  0x40   : > { %391 = vst.msk [vmem:[#allocation2 + $0x13a] sm:$0xff] %vm243_vm0, %v359_v27  ;;  %392 = vst.msk [vmem:[#allocation2 + $0x142] sm:$0xff] %vm243_vm0, %v360_v28  ;;  %v589_v50 = vmax.f32 %v525_v41, %v557_v39  ;;  %v622_v51 = vld [vmem:[#allocation2 + $0xc] sm:$0xff]  ;;  %v495_v52 = vld [vmem:[#allocation2 + $0x1a] sm:$0xff]  ;;  %v590_v54 = vmax.f32 %v526_v46, %v558_v47 }
  0x41   : > { %393 = vst.msk [vmem:[#allocation2 + $0x152] sm:$0xff] %vm243_vm0, %v361_v29  ;;  %394 = vst.msk [vmem:[#allocation2 + $0x15a] sm:$0xff] %vm243_vm0, %v362_v30  ;;  %v432_v53 = vld [vmem:[#allocation2 + $0x21] sm:$0xff]  ;;  %v527_v55 = vmax.f32 %v463_v48, %v495_v52  ;;  %v401_v58 = vld [vmem:[#allocation2 + $0x30] sm:$0xff] }
  0x42   : > { %395 = vst.msk [vmem:[#allocation2 + $0x16a] sm:$0xff] %vm243_vm0, %v363_v31  ;;  %396 = vst.msk [vmem:[#allocation2 + $0x172] sm:$0xff] %vm243_vm0, %v364_v32  ;;  %v559_v56 = vld [vmem:[#allocation2 + $0x1b] sm:$0xff]  ;;  %v464_v57 = vmax.f32 %v400_v49, %v432_v53  ;;  %v433_v59 = vld [vmem:[#allocation2 + $0x31] sm:$0xff]  ;;  %v653_v60 = vmax.f32 %v589_v50, %v621_v45  ;;  %v654_v1 = vmax.f32 %v590_v54, %v622_v51 }
  0x43   : > { %v623_v61 = vld [vmem:[#allocation2 + $0x1c] sm:$0xff]  ;;  %v465_v0 = vmax.f32 %v401_v58, %v433_v59  ;;  %v591_v2 = vmax.f32 %v527_v55, %v559_v56  ;;  %v497_v4 = vld [vmem:[#allocation2 + $0x32] sm:$0xff]  ;;  %v624_v7 = vld [vmem:[#allocation2 + $0x24] sm:$0xff] }
  0x44   : > { %v496_v62 = vld [vmem:[#allocation2 + $0x22] sm:$0xff]  ;;  %v402_v5 = vld [vmem:[#allocation2 + $0x38] sm:$0xff]  ;;  %686 = vst.msk [vmem:[#allocation3 + $0x20] sm:$0xff] %vm243_vm0, %v653_v60  ;;  %687 = vst.msk [vmem:[#allocation3 + $0x28] sm:$0xff] %vm243_vm0, %v654_v1 }
  0x45   : > { %v560_v63 = vld [vmem:[#allocation2 + $0x23] sm:$0xff]  ;;  %v528_v3 = vmax.f32 %v464_v57, %v496_v62  ;;  %v434_v6 = vld [vmem:[#allocation2 + $0x39] sm:$0xff]  ;;  %v529_v8 = vmax.f32 %v465_v0, %v497_v4  ;;  %v655_v12 = vmax.f32 %v591_v2, %v623_v61  ;;  %v404_v21 = vld [vmem:[#allocation2 + $0x50] sm:$0xff] }
  0x46   : > { %v561_v9 = vld [vmem:[#allocation2 + $0x33] sm:$0xff]  ;;  %v466_v10 = vmax.f32 %v402_v5, %v434_v6  ;;  %v403_v11 = vld [vmem:[#allocation2 + $0x48] sm:$0xff]  ;;  %v562_v19 = vld [vmem:[#allocation2 + $0x3b] sm:$0xff] }
  0x47   : > { %v592_v13 = vmax.f32 %v528_v3, %v560_v63  ;;  %v625_v14 = vld [vmem:[#allocation2 + $0x34] sm:$0xff]  ;;  %v435_v16 = vld [vmem:[#allocation2 + $0x49] sm:$0xff]  ;;  %v593_v17 = vmax.f32 %v529_v8, %v561_v9  ;;  %688 = vst.msk [vmem:[#allocation3 + $0x30] sm:$0xff] %vm243_vm0, %v655_v12  ;;  %v626_v24 = vld [vmem:[#allocation2 + $0x3c] sm:$0xff] }
  0x48   : > { %v498_v15 = vld [vmem:[#allocation2 + $0x3a] sm:$0xff]  ;;  %v467_v20 = vmax.f32 %v403_v11, %v435_v16  ;;  %v436_v22 = vld [vmem:[#allocation2 + $0x51] sm:$0xff]  ;;  %v406_v38 = vld [vmem:[#allocation2 + $0x68] sm:$0xff] }
  0x49   : > { %v530_v18 = vmax.f32 %v466_v10, %v498_v15  ;;  %v656_v23 = vmax.f32 %v592_v13, %v624_v7  ;;  %v499_v25 = vld [vmem:[#allocation2 + $0x4a] sm:$0xff]  ;;  %v468_v27 = vmax.f32 %v404_v21, %v436_v22  ;;  %v657_v28 = vmax.f32 %v593_v17, %v625_v14  ;;  %v500_v31 = vld [vmem:[#allocation2 + $0x52] sm:$0xff]  ;;  %v405_v32 = vld [vmem:[#allocation2 + $0x60] sm:$0xff] }
  0x4a   : > { %v563_v26 = vld [vmem:[#allocation2 + $0x4b] sm:$0xff]  ;;  %v531_v30 = vmax.f32 %v467_v20, %v499_v25  ;;  %v437_v33 = vld [vmem:[#allocation2 + $0x61] sm:$0xff]  ;;  %v564_v36 = vld [vmem:[#allocation2 + $0x53] sm:$0xff] }
  0x4b   : > { %v594_v29 = vmax.f32 %v530_v18, %v562_v19  ;;  %689 = vst.msk [vmem:[#allocation3 + $0x38] sm:$0xff] %vm243_vm0, %v656_v23  ;;  %v627_v34 = vld [vmem:[#allocation2 + $0x4c] sm:$0xff]  ;;  %v532_v35 = vmax.f32 %v468_v27, %v500_v31  ;;  %v469_v37 = vmax.f32 %v405_v32, %v437_v33  ;;  %690 = vst.msk [vmem:[#allocation3 + $0x40] sm:$0xff] %vm243_vm0, %v657_v28  ;;  %v628_v41 = vld [vmem:[#allocation2 + $0x54] sm:$0xff] }
  0x4c   : > { %v595_v40 = vmax.f32 %v531_v30, %v563_v26  ;;  %v501_v42 = vld [vmem:[#allocation2 + $0x62] sm:$0xff]  ;;  %v407_v48 = vld [vmem:[#allocation2 + $0x78] sm:$0xff]  ;;  %v502_v52 = vld [vmem:[#allocation2 + $0x6a] sm:$0xff] }
  0x4d   : > { %v658_v39 = vmax.f32 %v594_v29, %v626_v24  ;;  %v438_v43 = vld [vmem:[#allocation2 + $0x69] sm:$0xff]  ;;  %v596_v44 = vmax.f32 %v532_v35, %v564_v36  ;;  %v533_v45 = vmax.f32 %v469_v37, %v501_v42  ;;  %v439_v49 = vld [vmem:[#allocation2 + $0x79] sm:$0xff]  ;;  %v440_v60 = vld [vmem:[#allocation2 + $0x81] sm:$0xff] }
  0x4e   : > { %v565_v46 = vld [vmem:[#allocation2 + $0x63] sm:$0xff]  ;;  %v470_v47 = vmax.f32 %v406_v38, %v438_v43  ;;  %v659_v50 = vmax.f32 %v595_v40, %v627_v34  ;;  %v566_v53 = vld [vmem:[#allocation2 + $0x6b] sm:$0xff]  ;;  %v471_v54 = vmax.f32 %v407_v48, %v439_v49  ;;  %v503_v58 = vld [vmem:[#allocation2 + $0x7a] sm:$0xff] }
  0x4f   : > { %691 = vst.msk [vmem:[#allocation3 + $0x48] sm:$0xff] %vm243_vm0, %v658_v39  ;;  %v629_v51 = vld [vmem:[#allocation2 + $0x64] sm:$0xff]  ;;  %v660_v55 = vmax.f32 %v596_v44, %v628_v41  ;;  %v597_v56 = vmax.f32 %v533_v45, %v565_v46  ;;  %v630_v61 = vld [vmem:[#allocation2 + $0x6c] sm:$0xff]  ;;  %v567_v63 = vld [vmem:[#allocation2 + $0x7b] sm:$0xff] }
  0x50   : > { %v534_v57 = vmax.f32 %v470_v47, %v502_v52  ;;  %v408_v59 = vld [vmem:[#allocation2 + $0x80] sm:$0xff]  ;;  %692 = vst.msk [vmem:[#allocation3 + $0x50] sm:$0xff] %vm243_vm0, %v659_v50  ;;  %v535_v62 = vmax.f32 %v471_v54, %v503_v58  ;;  %v409_v1 = vld [vmem:[#allocation2 + $0x90] sm:$0xff]  ;;  %v410_v11 = vld [vmem:[#allocation2 + $0x98] sm:$0xff] }
  0x51   : > { %v472_v0 = vmax.f32 %v408_v59, %v440_v60  ;;  %693 = vst.msk [vmem:[#allocation3 + $0x58] sm:$0xff] %vm243_vm0, %v660_v55  ;;  %v661_v2 = vmax.f32 %v597_v56, %v629_v51  ;;  %v631_v4 = vld [vmem:[#allocation2 + $0x7c] sm:$0xff]  ;;  %v441_v6 = vld [vmem:[#allocation2 + $0x91] sm:$0xff]  ;;  %v632_v14 = vld [vmem:[#allocation2 + $0x84] sm:$0xff] }
  0x52   : > { %v598_v3 = vmax.f32 %v534_v57, %v566_v53  ;;  %v504_v5 = vld [vmem:[#allocation2 + $0x82] sm:$0xff]  ;;  %v599_v7 = vmax.f32 %v535_v62, %v567_v63  ;;  %v473_v10 = vmax.f32 %v409_v1, %v441_v6  ;;  %v442_v12 = vld [vmem:[#allocation2 + $0x99] sm:$0xff]  ;;  %v412_v28 = vld [vmem:[#allocation2 + $0xb0] sm:$0xff] }
  0x53   : > { %v536_v8 = vmax.f32 %v472_v0, %v504_v5  ;;  %v568_v9 = vld [vmem:[#allocation2 + $0x83] sm:$0xff]  ;;  %694 = vst.msk [vmem:[#allocation3 + $0x60] sm:$0xff] %vm243_vm0, %v661_v2  ;;  %v505_v15 = vld [vmem:[#allocation2 + $0x92] sm:$0xff]  ;;  %v474_v17 = vmax.f32 %v410_v11, %v442_v12  ;;  %v506_v21 = vld [vmem:[#allocation2 + $0x9a] sm:$0xff] }
  0x54   : > { %v662_v13 = vmax.f32 %v598_v3, %v630_v61  ;;  %v569_v16 = vld [vmem:[#allocation2 + $0x93] sm:$0xff]  ;;  %v663_v18 = vmax.f32 %v599_v7, %v631_v4  ;;  %v537_v20 = vmax.f32 %v473_v10, %v505_v15  ;;  %v411_v22 = vld [vmem:[#allocation2 + $0xa8] sm:$0xff]  ;;  %v570_v26 = vld [vmem:[#allocation2 + $0x9b] sm:$0xff] }
  0x55   : > { %v600_v19 = vmax.f32 %v536_v8, %v568_v9  ;;  %v443_v23 = vld [vmem:[#allocation2 + $0xa9] sm:$0xff]  ;;  %v633_v24 = vld [vmem:[#allocation2 + $0x94] sm:$0xff]  ;;  %v538_v25 = vmax.f32 %v474_v17, %v506_v21  ;;  %v634_v31 = vld [vmem:[#allocation2 + $0x9c] sm:$0xff] }
  0x56   : > { %695 = vst.msk [vmem:[#allocation3 + $0x68] sm:$0xff] %vm243_vm0, %v662_v13  ;;  %v475_v27 = vmax.f32 %v411_v22, %v443_v23  ;;  %696 = vst.msk [vmem:[#allocation3 + $0x70] sm:$0xff] %vm243_vm0, %v663_v18  ;;  %v601_v30 = vmax.f32 %v537_v20, %v569_v16  ;;  %v507_v32 = vld [vmem:[#allocation2 + $0xaa] sm:$0xff]  ;;  %v413_v38 = vld [vmem:[#allocation2 + $0xc0] sm:$0xff] }
  0x57   : > { %v664_v29 = vmax.f32 %v600_v19, %v632_v14  ;;  %v444_v33 = vld [vmem:[#allocation2 + $0xb1] sm:$0xff]  ;;  %v602_v34 = vmax.f32 %v538_v25, %v570_v26  ;;  %v445_v39 = vld [vmem:[#allocation2 + $0xc1] sm:$0xff]  ;;  %v446_v50 = vld [vmem:[#allocation2 + $0xc9] sm:$0xff] }
  0x58   : > { %v539_v35 = vmax.f32 %v475_v27, %v507_v32  ;;  %v571_v36 = vld [vmem:[#allocation2 + $0xab] sm:$0xff]  ;;  %v476_v37 = vmax.f32 %v412_v28, %v444_v33  ;;  %v665_v40 = vmax.f32 %v601_v30, %v633_v24  ;;  %v572_v43 = vld [vmem:[#allocation2 + $0xb3] sm:$0xff]  ;;  %v477_v44 = vmax.f32 %v413_v38, %v445_v39  ;;  %v509_v48 = vld [vmem:[#allocation2 + $0xc2] sm:$0xff] }
  0x59   : > { %697 = vst.msk [vmem:[#allocation3 + $0x78] sm:$0xff] %vm243_vm0, %v664_v29  ;;  %v635_v41 = vld [vmem:[#allocation2 + $0xac] sm:$0xff]  ;;  %v666_v45 = vmax.f32 %v602_v34, %v634_v31  ;;  %v636_v51 = vld [vmem:[#allocation2 + $0xb4] sm:$0xff]  ;;  %v573_v53 = vld [vmem:[#allocation2 + $0xc3] sm:$0xff] }
  0x5a   : > { %v508_v42 = vld [vmem:[#allocation2 + $0xb2] sm:$0xff]  ;;  %v603_v46 = vmax.f32 %v539_v35, %v571_v36  ;;  %v414_v49 = vld [vmem:[#allocation2 + $0xc8] sm:$0xff]  ;;  %698 = vst.msk [vmem:[#allocation3 + $0x80] sm:$0xff] %vm243_vm0, %v665_v40  ;;  %v541_v52 = vmax.f32 %v477_v44, %v509_v48  ;;  %v416_v1 = vld [vmem:[#allocation2 + $0xe0] sm:$0xff] }
  0x5b   : > { %v540_v47 = vmax.f32 %v476_v37, %v508_v42  ;;  %v478_v54 = vmax.f32 %v414_v49, %v446_v50  ;;  %v415_v55 = vld [vmem:[#allocation2 + $0xd8] sm:$0xff]  ;;  %699 = vst.msk [vmem:[#allocation3 + $0x88] sm:$0xff] %vm243_vm0, %v666_v45  ;;  %v637_v58 = vld [vmem:[#allocation2 + $0xc4] sm:$0xff]  ;;  %v638_v4 = vld [vmem:[#allocation2 + $0xcc] sm:$0xff] }
  0x5c   : > { %v667_v56 = vmax.f32 %v603_v46, %v635_v41  ;;  %v510_v59 = vld [vmem:[#allocation2 + $0xca] sm:$0xff]  ;;  %v447_v60 = vld [vmem:[#allocation2 + $0xd9] sm:$0xff]  ;;  %v605_v61 = vmax.f32 %v541_v52, %v573_v53  ;;  %v448_v2 = vld [vmem:[#allocation2 + $0xe1] sm:$0xff] }
  0x5d   : > { %v604_v57 = vmax.f32 %v540_v47, %v572_v43  ;;  %v542_v62 = vmax.f32 %v478_v54, %v510_v59  ;;  %v574_v63 = vld [vmem:[#allocation2 + $0xcb] sm:$0xff]  ;;  %v479_v0 = vmax.f32 %v415_v55, %v447_v60  ;;  %v511_v5 = vld [vmem:[#allocation2 + $0xda] sm:$0xff]  ;;  %v480_v7 = vmax.f32 %v416_v1, %v448_v2  ;;  %v512_v11 = vld [vmem:[#allocation2 + $0xe2] sm:$0xff] }
  0x5e   : > { %700 = vst.msk [vmem:[#allocation3 + $0x90] sm:$0xff] %vm243_vm0, %v667_v56  ;;  %v575_v6 = vld [vmem:[#allocation2 + $0xdb] sm:$0xff]  ;;  %v669_v8 = vmax.f32 %v605_v61, %v637_v58  ;;  %v417_v12 = vld [vmem:[#allocation2 + $0xf0] sm:$0xff]  ;;  %v576_v16 = vld [vmem:[#allocation2 + $0xe3] sm:$0xff] }
  0x5f   : > { %v668_v3 = vmax.f32 %v604_v57, %v636_v51  ;;  %v606_v9 = vmax.f32 %v542_v62, %v574_v63  ;;  %v543_v10 = vmax.f32 %v479_v0, %v511_v5  ;;  %v449_v13 = vld [vmem:[#allocation2 + $0xf1] sm:$0xff]  ;;  %v639_v14 = vld [vmem:[#allocation2 + $0xdc] sm:$0xff]  ;;  %v544_v15 = vmax.f32 %v480_v7, %v512_v11  ;;  %v640_v21 = vld [vmem:[#allocation2 + $0xe4] sm:$0xff] }
  0x60   : > { %v481_v17 = vmax.f32 %v417_v12, %v449_v13  ;;  %v418_v18 = vld [vmem:[#allocation2 + $0xf8] sm:$0xff]  ;;  %702 = vst.msk [vmem:[#allocation3 + $0xa0] sm:$0xff] %vm243_vm0, %v669_v8  ;;  %v419_v28 = vld [vmem:[#allocation2 + $0x108] sm:$0xff]  ;;  %v420_v39 = vld [vmem:[#allocation2 + $0x110] sm:$0xff] }
  0x61   : > { %701 = vst.msk [vmem:[#allocation3 + $0x98] sm:$0xff] %vm243_vm0, %v668_v3  ;;  %v670_v19 = vmax.f32 %v606_v9, %v638_v4  ;;  %v607_v20 = vmax.f32 %v543_v10, %v575_v6  ;;  %v513_v22 = vld [vmem:[#allocation2 + $0xf2] sm:$0xff]  ;;  %v608_v24 = vmax.f32 %v544_v15, %v576_v16  ;;  %v451_v29 = vld [vmem:[#allocation2 + $0x109] sm:$0xff]  ;;  %v514_v32 = vld [vmem:[#allocation2 + $0xfa] sm:$0xff] }
  0x62   : > { %v450_v23 = vld [vmem:[#allocation2 + $0xf9] sm:$0xff]  ;;  %v545_v25 = vmax.f32 %v481_v17, %v513_v22  ;;  %v483_v34 = vmax.f32 %v419_v28, %v451_v29  ;;  %v515_v38 = vld [vmem:[#allocation2 + $0x10a] sm:$0xff]  ;;  %v453_v50 = vld [vmem:[#allocation2 + $0x121] sm:$0xff] }
  0x63   : > { %v577_v26 = vld [vmem:[#allocation2 + $0xf3] sm:$0xff]  ;;  %v482_v27 = vmax.f32 %v418_v18, %v450_v23  ;;  %703 = vst.msk [vmem:[#allocation3 + $0xa8] sm:$0xff] %vm243_vm0, %v670_v19  ;;  %v671_v30 = vmax.f32 %v607_v20, %v639_v14  ;;  %v578_v33 = vld [vmem:[#allocation2 + $0xfb] sm:$0xff]  ;;  %v672_v35 = vmax.f32 %v608_v24, %v640_v21  ;;  %v579_v43 = vld [vmem:[#allocation2 + $0x10b] sm:$0xff] }
  0x64   : > { %v641_v31 = vld [vmem:[#allocation2 + $0xf4] sm:$0xff]  ;;  %v609_v36 = vmax.f32 %v545_v25, %v577_v26  ;;  %v642_v41 = vld [vmem:[#allocation2 + $0xfc] sm:$0xff]  ;;  %v547_v42 = vmax.f32 %v483_v34, %v515_v38  ;;  %v643_v48 = vld [vmem:[#allocation2 + $0x10c] sm:$0xff] }
  0x65   : > { %v546_v37 = vmax.f32 %v482_v27, %v514_v32  ;;  %v452_v40 = vld [vmem:[#allocation2 + $0x111] sm:$0xff]  ;;  %704 = vst.msk [vmem:[#allocation3 + $0xb0] sm:$0xff] %vm243_vm0, %v671_v30  ;;  %v421_v45 = vld [vmem:[#allocation2 + $0x120] sm:$0xff]  ;;  %705 = vst.msk [vmem:[#allocation3 + $0xb8] sm:$0xff] %vm243_vm0, %v672_v35 }
  0x66   : > { %v484_v44 = vmax.f32 %v420_v39, %v452_v40  ;;  %v673_v46 = vmax.f32 %v609_v36, %v641_v31  ;;  %v516_v49 = vld [vmem:[#allocation2 + $0x112] sm:$0xff]  ;;  %v611_v51 = vmax.f32 %v547_v42, %v579_v43  ;;  %v485_v54 = vmax.f32 %v421_v45, %v453_v50  ;;  %v422_v55 = vld [vmem:[#allocation2 + $0x128] sm:$0xff]  ;;  %v519_v4 = vld [vmem:[#allocation2 + $0x13a] sm:$0xff] }
  0x67   : > { %v610_v47 = vmax.f32 %v546_v37, %v578_v33  ;;  %v580_v53 = vld [vmem:[#allocation2 + $0x113] sm:$0xff]  ;;  %v454_v56 = vld [vmem:[#allocation2 + $0x129] sm:$0xff]  ;;  %v424_v9 = vld [vmem:[#allocation2 + $0x140] sm:$0xff] }
  0x68   : > { %v548_v52 = vmax.f32 %v484_v44, %v516_v49  ;;  %706 = vst.msk [vmem:[#allocation3 + $0xc0] sm:$0xff] %vm243_vm0, %v673_v46  ;;  %v644_v58 = vld [vmem:[#allocation2 + $0x114] sm:$0xff]  ;;  %v517_v59 = vld [vmem:[#allocation2 + $0x122] sm:$0xff]  ;;  %v486_v61 = vmax.f32 %v422_v55, %v454_v56  ;;  %v518_v62 = vld [vmem:[#allocation2 + $0x12a] sm:$0xff]  ;;  %v675_v63 = vmax.f32 %v611_v51, %v643_v48 }
  0x69   : > { %v674_v57 = vmax.f32 %v610_v47, %v642_v41  ;;  %v581_v60 = vld [vmem:[#allocation2 + $0x123] sm:$0xff]  ;;  %v549_v1 = vmax.f32 %v485_v54, %v517_v59  ;;  %v423_v2 = vld [vmem:[#allocation2 + $0x138] sm:$0xff]  ;;  %v582_v7 = vld [vmem:[#allocation2 + $0x12b] sm:$0xff] }
  0x6a   : > { %v612_v0 = vmax.f32 %v548_v52, %v580_v53  ;;  %v455_v3 = vld [vmem:[#allocation2 + $0x139] sm:$0xff]  ;;  %v645_v5 = vld [vmem:[#allocation2 + $0x124] sm:$0xff]  ;;  %v550_v6 = vmax.f32 %v486_v61, %v518_v62  ;;  %708 = vst.msk [vmem:[#allocation3 + $0xd0] sm:$0xff] %vm243_vm0, %v675_v63  ;;  %v646_v12 = vld [vmem:[#allocation2 + $0x12c] sm:$0xff] }
  0x6b   : > { %707 = vst.msk [vmem:[#allocation3 + $0xc8] sm:$0xff] %vm243_vm0, %v674_v57  ;;  %v487_v8 = vmax.f32 %v423_v2, %v455_v3  ;;  %v613_v11 = vmax.f32 %v549_v1, %v581_v60  ;;  %v456_v13 = vld [vmem:[#allocation2 + $0x141] sm:$0xff]  ;;  %v425_v19 = vld [vmem:[#allocation2 + $0x150] sm:$0xff]  ;;  %v426_v29 = vld [vmem:[#allocation2 + $0x158] sm:$0xff] }
  0x6c   : > { %v676_v10 = vmax.f32 %v612_v0, %v644_v58  ;;  %v520_v14 = vld [vmem:[#allocation2 + $0x142] sm:$0xff]  ;;  %v614_v15 = vmax.f32 %v550_v6, %v582_v7  ;;  %v488_v18 = vmax.f32 %v424_v9, %v456_v13  ;;  %v457_v20 = vld [vmem:[#allocation2 + $0x151] sm:$0xff]  ;;  %v458_v30 = vld [vmem:[#allocation2 + $0x159] sm:$0xff] }
  0x6d   : > { %v551_v16 = vmax.f32 %v487_v8, %v519_v4  ;;  %v583_v17 = vld [vmem:[#allocation2 + $0x13b] sm:$0xff]  ;;  %v677_v21 = vmax.f32 %v613_v11, %v645_v5  ;;  %v489_v23 = vmax.f32 %v425_v19, %v457_v20  ;;  %v521_v24 = vld [vmem:[#allocation2 + $0x152] sm:$0xff]  ;;  %v584_v32 = vld [vmem:[#allocation2 + $0x143] sm:$0xff]  ;;  %v490_v35 = vmax.f32 %v426_v29, %v458_v30 }
  0x6e   : > { %709 = vst.msk [vmem:[#allocation3 + $0xd8] sm:$0xff] %vm243_vm0, %v676_v10  ;;  %v647_v22 = vld [vmem:[#allocation2 + $0x13c] sm:$0xff]  ;;  %v585_v25 = vld [vmem:[#allocation2 + $0x153] sm:$0xff]  ;;  %v678_v26 = vmax.f32 %v614_v15, %v646_v12  ;;  %v552_v28 = vmax.f32 %v488_v18, %v520_v14  ;;  %v648_v33 = vld [vmem:[#allocation2 + $0x144] sm:$0xff] }
  0x6f   : > { %v615_v27 = vmax.f32 %v551_v16, %v583_v17  ;;  %v522_v31 = vld [vmem:[#allocation2 + $0x15a] sm:$0xff]  ;;  %710 = vst.msk [vmem:[#allocation3 + $0xe0] sm:$0xff] %vm243_vm0, %v677_v21  ;;  %v553_v34 = vmax.f32 %v489_v23, %v521_v24  ;;  %v427_v36 = vld [vmem:[#allocation2 + $0x168] sm:$0xff]  ;;  %v428_v47 = vld [vmem:[#allocation2 + $0x170] sm:$0xff] }
  0x70   : > { %711 = vst.msk [vmem:[#allocation3 + $0xe8] sm:$0xff] %vm243_vm0, %v678_v26  ;;  %v616_v38 = vmax.f32 %v552_v28, %v584_v32  ;;  %v649_v39 = vld [vmem:[#allocation2 + $0x154] sm:$0xff]  ;;  %v459_v41 = vld [vmem:[#allocation2 + $0x169] sm:$0xff]  ;;  %v554_v44 = vmax.f32 %v490_v35, %v522_v31  ;;  %v650_v50 = vld [vmem:[#allocation2 + $0x15c] sm:$0xff] }
  0x71   : > { %v679_v37 = vmax.f32 %v615_v27, %v647_v22  ;;  %v586_v40 = vld [vmem:[#allocation2 + $0x15b] sm:$0xff]  ;;  %v523_v42 = vld [vmem:[#allocation2 + $0x16a] sm:$0xff]  ;;  %v617_v43 = vmax.f32 %v553_v34, %v585_v25  ;;  %v491_v45 = vmax.f32 %v427_v36, %v459_v41  ;;  %v524_v53 = vld [vmem:[#allocation2 + $0x172] sm:$0xff] }
  0x72   : > { %v587_v46 = vld [vmem:[#allocation2 + $0x16b] sm:$0xff]  ;;  %v680_v49 = vmax.f32 %v616_v38, %v648_v33  ;;  %v588_v54 = vld [vmem:[#allocation2 + $0x173] sm:$0xff]  ;;  %v618_v56 = vmax.f32 %v554_v44, %v586_v40  ;;  %v718_v59 = vld [vmem:[#allocation3] sm:$0xff] }
  0x73   : > { %v460_v48 = vld [vmem:[#allocation2 + $0x171] sm:$0xff]  ;;  %712 = vst.msk [vmem:[#allocation3 + $0xf0] sm:$0xff] %vm243_vm0, %v679_v37  ;;  %v681_v55 = vmax.f32 %v617_v43, %v649_v39  ;;  %v555_v57 = vmax.f32 %v491_v45, %v523_v42  ;;  %v815_v61 = vld [vmem:[#allocation3 + $0x20] sm:$0xff]  ;;  %v719_v2 = vld [vmem:[#allocation3 + $0x8] sm:$0xff] }
  0x74   : > { %v651_v51 = vld [vmem:[#allocation2 + $0x16c] sm:$0xff]  ;;  %v492_v52 = vmax.f32 %v428_v47, %v460_v48  ;;  %v652_v58 = vld [vmem:[#allocation2 + $0x174] sm:$0xff]  ;;  %713 = vst.msk [vmem:[#allocation3 + $0xf8] sm:$0xff] %vm243_vm0, %v680_v49  ;;  %v2951_v1 = vld [vmem:[#allocation3 + $0x40] sm:$0xff]  ;;  %v682_v4 = vmax.f32 %v618_v56, %v650_v50 }
  0x75   : > { %v751_v60 = vld [vmem:[#allocation3 + $0x10] sm:$0xff]  ;;  %714 = vst.msk [vmem:[#allocation3 + $0x100] sm:$0xff] %vm243_vm0, %v681_v55  ;;  %v619_v5 = vmax.f32 %v555_v57, %v587_v46  ;;  %v752_v6 = vld [vmem:[#allocation3 + $0x18] sm:$0xff]  ;;  %v816_v7 = vld [vmem:[#allocation3 + $0x28] sm:$0xff] }
  0x76   : > { %v556_v62 = vmax.f32 %v492_v52, %v524_v53  ;;  %v783_v63 = vmax.f32 %v718_v59, %v751_v60  ;;  %v880_v0 = vld [vmem:[#allocation3 + $0x30] sm:$0xff]  ;;  %v785_v3 = vmax.f32 %v751_v60, %v815_v61  ;;  %v881_v8 = vld [vmem:[#allocation3 + $0x38] sm:$0xff]  ;;  %v784_v13 = vmax.f32 %v719_v2, %v752_v6  ;;  %715 = vst.msk [vmem:[#allocation3 + $0x108] sm:$0xff] %vm243_vm0, %v682_v4  ;;  %v946_v16 = vld [vmem:[#allocation3 + $0x48] sm:$0xff] }
  0x77   : > { %v787_v9 = vmax.f32 %v815_v61, %v880_v0  ;;  %v789_v10 = vmax.f32 %v880_v0, %v2951_v1  ;;  %v683_v15 = vmax.f32 %v619_v5, %v651_v51  ;;  %v786_v17 = vmax.f32 %v752_v6, %v816_v7  ;;  %v947_v24 = vld [vmem:[#allocation3 + $0x50] sm:$0xff]  ;;  %v948_v26 = vld [vmem:[#allocation3 + $0x58] sm:$0xff]  ;;  %v949_v33 = vld [vmem:[#allocation3 + $0x60] sm:$0xff] }
  0x78   : > { %v620_v11 = vmax.f32 %v556_v62, %v588_v54  ;;  %v847_v12 = vmax.f32 %v783_v63, %v815_v61  ;;  %v849_v14 = vmax.f32 %v785_v3, %v880_v0  ;;  %v788_v19 = vmax.f32 %v816_v7, %v881_v8  ;;  %v950_v38 = vld [vmem:[#allocation3 + $0x68] sm:$0xff]  ;;  %v951_v41 = vld [vmem:[#allocation3 + $0x70] sm:$0xff]  ;;  %v952_v43 = vld [vmem:[#allocation3 + $0x78] sm:$0xff] }
  0x79   : > { %v851_v18 = vmax.f32 %v787_v9, %v2951_v1  ;;  %v848_v22 = vmax.f32 %v784_v13, %v816_v7  ;;  %716 = vst.msk [vmem:[#allocation3 + $0x110] sm:$0xff] %vm243_vm0, %v683_v15  ;;  %v850_v25 = vmax.f32 %v786_v17, %v881_v8  ;;  %v853_v29 = vmax.f32 %v789_v10, %v947_v24  ;;  %v2974_v45 = vld [vmem:[#allocation3 + $0x80] sm:$0xff]  ;;  %v954_v55 = vld [vmem:[#allocation3 + $0x88] sm:$0xff]  ;;  %v955_v63 = vld [vmem:[#allocation3 + $0x90] sm:$0xff] }
  0x7a   : > { %v684_v20 = vmax.f32 %v620_v11, %v652_v58  ;;  %v912_v21 = vmax.f32 %v847_v12, %v880_v0  ;;  %v914_v23 = vmax.f32 %v849_v14, %v2951_v1  ;;  %v852_v28 = vmax.f32 %v788_v19, %v946_v16  ;;  %v956_v2 = vld [vmem:[#allocation3 + $0x98] sm:$0xff]  ;;  %v957_v9 = vld [vmem:[#allocation3 + $0xa0] sm:$0xff]  ;;  %v958_v14 = vld [vmem:[#allocation3 + $0xa8] sm:$0xff] }
  0x7b   : > { %v916_v27 = vmax.f32 %v851_v18, %v947_v24  ;;  %v913_v31 = vmax.f32 %v848_v22, %v881_v8  ;;  %v790_v34 = vmax.f32 %v881_v8, %v946_v16  ;;  %v915_v35 = vmax.f32 %v850_v25, %v946_v16  ;;  %v959_v17 = vld [vmem:[#allocation3 + $0xb0] sm:$0xff]  ;;  %v960_v19 = vld [vmem:[#allocation3 + $0xb8] sm:$0xff] }
  0x7c   : > { %717 = vst.msk [vmem:[#allocation3 + $0x118] sm:$0xff] %vm243_vm0, %v684_v20  ;;  %v977_v30 = vmax.f32 %v912_v21, %v2951_v1  ;;  %v979_v32 = vmax.f32 %v914_v23, %v947_v24  ;;  %v917_v37 = vmax.f32 %v852_v28, %v948_v26  ;;  %v918_v39 = vmax.f32 %v853_v29, %v949_v33  ;;  %v3005_v21 = vld [vmem:[#allocation3 + $0xc0] sm:$0xff] }
  0x7d   : > { %v981_v36 = vmax.f32 %v916_v27, %v949_v33  ;;  %v978_v40 = vmax.f32 %v913_v31, %v946_v16  ;;  %v854_v42 = vmax.f32 %v790_v34, %v948_v26  ;;  %v791_v44 = vmax.f32 %v2951_v1, %v947_v24  ;;  %v962_v31 = vld [vmem:[#allocation3 + $0xc8] sm:$0xff] }
  0x7e   : > { %1009 = vst.msk [vmem:[%s2963_s22] sm:$0xff] %vm243_vm0, %v977_v30  ;;  %1041 = vst.msk [vmem:[#allocation2 + $0x2] sm:$0xff] %vm243_vm0, %v977_v30  ;;  %v792_v46 = vmax.f32 %v946_v16, %v948_v26  ;;  %v980_v47 = vmax.f32 %v915_v35, %v948_v26  ;;  %v982_v48 = vmax.f32 %v917_v37, %v950_v38 }
  0x7f   : > { %1011 = vst.msk [vmem:[%s2963_s22 + $0x10] sm:$0xff] %vm243_vm0, %v979_v32  ;;  %1043 = vst.msk [vmem:[#allocation2 + $0x1a] sm:$0xff] %vm243_vm0, %v979_v32  ;;  %v983_v49 = vmax.f32 %v918_v39, %v951_v41  ;;  %v793_v50 = vmax.f32 %v947_v24, %v949_v33  ;;  %v919_v51 = vmax.f32 %v854_v42, %v950_v38  ;;  %v963_v39 = vld [vmem:[#allocation3 + $0xd0] sm:$0xff]  ;;  %v964_v42 = vld [vmem:[#allocation3 + $0xd8] sm:$0xff] }
  0x80   : > { %1013 = vst.msk [vmem:[%s2963_s22 + $0x20] sm:$0xff] %vm243_vm0, %v981_v36  ;;  %1045 = vst.msk [vmem:[#allocation2 + $0x32] sm:$0xff] %vm243_vm0, %v981_v36  ;;  %v855_v52 = vmax.f32 %v791_v44, %v949_v33  ;;  %v856_v53 = vmax.f32 %v792_v46, %v950_v38  ;;  %v794_v54 = vmax.f32 %v948_v26, %v950_v38 }
  0x81   : > { %1010 = vst.msk [vmem:[%s2963_s22 + $0x8] sm:$0xff] %vm243_vm0, %v978_v40  ;;  %1042 = vst.msk [vmem:[#allocation2 + $0xa] sm:$0xff] %vm243_vm0, %v978_v40  ;;  %v857_v56 = vmax.f32 %v793_v50, %v951_v41  ;;  %v795_v57 = vmax.f32 %v949_v33, %v951_v41  ;;  %v796_v58 = vmax.f32 %v950_v38, %v952_v43 }
  0x82   : > { %1012 = vst.msk [vmem:[%s2963_s22 + $0x18] sm:$0xff] %vm243_vm0, %v980_v47  ;;  %1044 = vst.msk [vmem:[#allocation2 + $0x22] sm:$0xff] %vm243_vm0, %v980_v47  ;;  %v797_v59 = vmax.f32 %v951_v41, %v2974_v45  ;;  %v984_v60 = vmax.f32 %v919_v51, %v952_v43  ;;  %v920_v61 = vmax.f32 %v855_v52, %v951_v41 }
  0x83   : > { %1014 = vst.msk [vmem:[%s2963_s22 + $0x28] sm:$0xff] %vm243_vm0, %v982_v48  ;;  %1046 = vst.msk [vmem:[#allocation2 + $0x3a] sm:$0xff] %vm243_vm0, %v982_v48  ;;  %v921_v62 = vmax.f32 %v856_v53, %v952_v43  ;;  %v858_v0 = vmax.f32 %v794_v54, %v952_v43  ;;  %v922_v1 = vmax.f32 %v857_v56, %v2974_v45  ;;  %v966_v54 = vld [vmem:[#allocation3 + $0xe8] sm:$0xff] }
  0x84   : > { %1015 = vst.msk [vmem:[%s2963_s22 + $0x30] sm:$0xff] %vm243_vm0, %v983_v49  ;;  %1047 = vst.msk [vmem:[#allocation2 + $0x4a] sm:$0xff] %vm243_vm0, %v983_v49  ;;  %v859_v3 = vmax.f32 %v795_v57, %v2974_v45  ;;  %v860_v4 = vmax.f32 %v796_v58, %v954_v55  ;;  %v861_v5 = vmax.f32 %v797_v59, %v955_v63  ;;  %v965_v49 = vld [vmem:[#allocation3 + $0xe0] sm:$0xff]  ;;  %v967_v57 = vld [vmem:[#allocation3 + $0xf0] sm:$0xff] }
  0x85   : > { %1016 = vst.msk [vmem:[%s2963_s22 + $0x38] sm:$0xff] %vm243_vm0, %v984_v60  ;;  %1048 = vst.msk [vmem:[#allocation2 + $0x52] sm:$0xff] %vm243_vm0, %v984_v60  ;;  %v985_v6 = vmax.f32 %v920_v61, %v2974_v45  ;;  %v986_v7 = vmax.f32 %v921_v62, %v954_v55  ;;  %v923_v8 = vmax.f32 %v858_v0, %v954_v55  ;;  %v3035_v59 = vld [vmem:[#allocation3 + $0xf8] sm:$0xff]  ;;  %v3038_v61 = vld [vmem:[#allocation3 + $0x100] sm:$0xff] }
  0x86   : > { %v798_v10 = vmax.f32 %v952_v43, %v954_v55  ;;  %v987_v11 = vmax.f32 %v922_v1, %v955_v63  ;;  %v924_v12 = vmax.f32 %v859_v3, %v955_v63  ;;  %v925_v13 = vmax.f32 %v860_v4, %v956_v2 }
  0x87   : > { %v926_v15 = vmax.f32 %v861_v5, %v957_v9  ;;  %1017 = vst.msk [vmem:[%s2963_s22 + $0x40] sm:$0xff] %vm243_vm0, %v985_v6  ;;  %1049 = vst.msk [vmem:[#allocation2 + $0x62] sm:$0xff] %vm243_vm0, %v985_v6  ;;  %v988_v16 = vmax.f32 %v923_v8, %v956_v2  ;;  %v799_v20 = vmax.f32 %v2974_v45, %v955_v63  ;;  %v3046_v6 = vld [vmem:[#allocation3 + $0x108] sm:$0xff] }
  0x88   : > { %1018 = vst.msk [vmem:[%s2963_s22 + $0x48] sm:$0xff] %vm243_vm0, %v986_v7  ;;  %1050 = vst.msk [vmem:[#allocation2 + $0x6a] sm:$0xff] %vm243_vm0, %v986_v7  ;;  %v862_v18 = vmax.f32 %v798_v10, %v956_v2  ;;  %v800_v22 = vmax.f32 %v954_v55, %v956_v2  ;;  %v989_v23 = vmax.f32 %v924_v12, %v957_v9 }
  0x89   : > { %1019 = vst.msk [vmem:[%s2963_s22 + $0x50] sm:$0xff] %vm243_vm0, %v987_v11  ;;  %1051 = vst.msk [vmem:[#allocation2 + $0x7a] sm:$0xff] %vm243_vm0, %v987_v11  ;;  %v990_v24 = vmax.f32 %v925_v13, %v958_v14  ;;  %v991_v25 = vmax.f32 %v926_v15, %v959_v17  ;;  %v801_v26 = vmax.f32 %v955_v63, %v957_v9  ;;  %v3059_v11 = vld [vmem:[#allocation3 + $0x120] sm:$0xff] }
  0x8a   : > { %1020 = vst.msk [vmem:[%s2963_s22 + $0x58] sm:$0xff] %vm243_vm0, %v988_v16  ;;  %1052 = vst.msk [vmem:[#allocation2 + $0x82] sm:$0xff] %vm243_vm0, %v988_v16  ;;  %v927_v27 = vmax.f32 %v862_v18, %v958_v14  ;;  %v863_v28 = vmax.f32 %v799_v20, %v957_v9  ;;  %v864_v29 = vmax.f32 %v800_v22, %v958_v14  ;;  %v975_v20 = vld [vmem:[#allocation3 + $0x130] sm:$0xff] }
  0x8b   : > { %v802_v30 = vmax.f32 %v956_v2, %v958_v14  ;;  %1021 = vst.msk [vmem:[%s2963_s22 + $0x60] sm:$0xff] %vm243_vm0, %v989_v23  ;;  %1053 = vst.msk [vmem:[#allocation2 + $0x92] sm:$0xff] %vm243_vm0, %v989_v23  ;;  %v865_v32 = vmax.f32 %v801_v26, %v959_v17  ;;  %v803_v33 = vmax.f32 %v957_v9, %v959_v17  ;;  %v3057_v9 = vld [vmem:[#allocation3 + $0x110] sm:$0xff]  ;;  %v3072_v23 = vld [vmem:[#allocation2 + $0x39] sm:$0xff] }
  0x8c   : > { %1022 = vst.msk [vmem:[%s2963_s22 + $0x68] sm:$0xff] %vm243_vm0, %v990_v24  ;;  %1054 = vst.msk [vmem:[#allocation2 + $0x9a] sm:$0xff] %vm243_vm0, %v990_v24  ;;  %v804_v34 = vmax.f32 %v958_v14, %v960_v19  ;;  %v805_v35 = vmax.f32 %v959_v17, %v3005_v21  ;;  %v992_v36 = vmax.f32 %v927_v27, %v960_v19  ;;  %v3063_v14 = vld [vmem:[#allocation2 + $0x30] sm:$0xff]  ;;  %v3077_v27 = vld [vmem:[#allocation3 + $0x128] sm:$0xff] }
  0x8d   : > { %1023 = vst.msk [vmem:[%s2963_s22 + $0x70] sm:$0xff] %vm243_vm0, %v991_v25  ;;  %1055 = vst.msk [vmem:[#allocation2 + $0xaa] sm:$0xff] %vm243_vm0, %v991_v25  ;;  %v928_v37 = vmax.f32 %v863_v28, %v959_v17  ;;  %v929_v38 = vmax.f32 %v864_v29, %v960_v19  ;;  %v866_v40 = vmax.f32 %v802_v30, %v960_v19  ;;  %v3070_v22 = vld [vmem:[#allocation2 + $0x31] sm:$0xff]  ;;  %v3080_v29 = vld [vmem:[#allocation2 + $0x48] sm:$0xff] }
  0x8e   : > { %v930_v41 = vmax.f32 %v865_v32, %v3005_v21  ;;  %v867_v43 = vmax.f32 %v803_v33, %v3005_v21  ;;  %v868_v44 = vmax.f32 %v804_v34, %v962_v31  ;;  %v869_v45 = vmax.f32 %v805_v35, %v963_v39  ;;  %1024 = vst.msk [vmem:[%s2963_s22 + $0x78] sm:$0xff] %vm243_vm0, %v992_v36  ;;  %v3082_v30 = vld [vmem:[#allocation2 + $0x50] sm:$0xff]  ;;  %v3090_v34 = vld [vmem:[#allocation2 + $0x61] sm:$0xff] }
  0x8f   : > { %1056 = vst.msk [vmem:[#allocation2 + $0xb2] sm:$0xff] %vm243_vm0, %v992_v36  ;;  %v993_v46 = vmax.f32 %v928_v37, %v3005_v21  ;;  %v994_v47 = vmax.f32 %v929_v38, %v962_v31  ;;  %v931_v48 = vmax.f32 %v866_v40, %v962_v31  ;;  %v806_v50 = vmax.f32 %v960_v19, %v962_v31  ;;  %v972_v19 = vld [vmem:[#allocation3 + $0x118] sm:$0xff]  ;;  %v3086_v32 = vld [vmem:[#allocation2 + $0x49] sm:$0xff] }
  0x90   : > { %v995_v51 = vmax.f32 %v930_v41, %v963_v39  ;;  %v932_v52 = vmax.f32 %v867_v43, %v963_v39  ;;  %v933_v53 = vmax.f32 %v868_v44, %v964_v42  ;;  %v934_v55 = vmax.f32 %v869_v45, %v965_v49  ;;  %v3088_v33 = vld [vmem:[#allocation2 + $0x51] sm:$0xff]  ;;  %v3108_v43 = vld [vmem:[#allocation2 + $0x69] sm:$0xff]  ;;  %v3110_v44 = vld [vmem:[#allocation2 + $0x79] sm:$0xff] }
  0x91   : > { %1025 = vst.msk [vmem:[%s2963_s22 + $0x80] sm:$0xff] %vm243_vm0, %v993_v46  ;;  %1057 = vst.msk [vmem:[#allocation2 + $0xc2] sm:$0xff] %vm243_vm0, %v993_v46  ;;  %v996_v56 = vmax.f32 %v931_v48, %v964_v42  ;;  %v870_v58 = vmax.f32 %v806_v50, %v964_v42  ;;  %v807_v60 = vmax.f32 %v3005_v21, %v963_v39  ;;  %v3068_v21 = vld [vmem:[#allocation2 + $0x38] sm:$0xff]  ;;  %v3104_v41 = vld [vmem:[#allocation2 + $0x80] sm:$0xff] }
  0x92   : > { %1026 = vst.msk [vmem:[%s2963_s22 + $0x88] sm:$0xff] %vm243_vm0, %v994_v47  ;;  %1058 = vst.msk [vmem:[#allocation2 + $0xca] sm:$0xff] %vm243_vm0, %v994_v47  ;;  %v808_v62 = vmax.f32 %v962_v31, %v964_v42  ;;  %v997_v63 = vmax.f32 %v932_v52, %v965_v49  ;;  %v998_v0 = vmax.f32 %v933_v53, %v966_v54  ;;  %v3084_v31 = vld [vmem:[#allocation2 + $0x60] sm:$0xff]  ;;  %v3102_v40 = vld [vmem:[#allocation2 + $0x78] sm:$0xff] }
  0x93   : > { %1027 = vst.msk [vmem:[%s2963_s22 + $0x90] sm:$0xff] %vm243_vm0, %v995_v51  ;;  %1059 = vst.msk [vmem:[#allocation2 + $0xda] sm:$0xff] %vm243_vm0, %v995_v51  ;;  %v999_v1 = vmax.f32 %v934_v55, %v967_v57  ;;  %v809_v2 = vmax.f32 %v963_v39, %v965_v49  ;;  %v935_v3 = vmax.f32 %v870_v58, %v966_v54  ;;  %v3100_v39 = vld [vmem:[#allocation2 + $0x68] sm:$0xff]  ;;  %v3114_v46 = vld [vmem:[#allocation2 + $0x91] sm:$0xff] }
  0x94   : > { %1028 = vst.msk [vmem:[%s2963_s22 + $0x98] sm:$0xff] %vm243_vm0, %v996_v56  ;;  %1060 = vst.msk [vmem:[#allocation2 + $0xe2] sm:$0xff] %vm243_vm0, %v996_v56  ;;  %v871_v4 = vmax.f32 %v807_v60, %v965_v49  ;;  %v872_v5 = vmax.f32 %v808_v62, %v966_v54  ;;  %v810_v7 = vmax.f32 %v964_v42, %v966_v54  ;;  %v3106_v42 = vld [vmem:[#allocation2 + $0x90] sm:$0xff]  ;;  %v3112_v45 = vld [vmem:[#allocation2 + $0x81] sm:$0xff] }
  0x95   : > { %1029 = vst.msk [vmem:[%s2963_s22 + $0xa0] sm:$0xff] %vm243_vm0, %v997_v63  ;;  %1061 = vst.msk [vmem:[#allocation2 + $0xf2] sm:$0xff] %vm243_vm0, %v997_v63  ;;  %v873_v8 = vmax.f32 %v809_v2, %v967_v57  ;;  %v811_v10 = vmax.f32 %v965_v49, %v967_v57  ;;  %v812_v12 = vmax.f32 %v966_v54, %v3035_v59  ;;  %v976_v51 = vld [vmem:[#allocation3 + $0x138] sm:$0xff]  ;;  %v3121_v53 = vld [vmem:[#allocation2 + $0xa8] sm:$0xff] }
  0x96   : > { %1030 = vst.msk [vmem:[%s2963_s22 + $0xa8] sm:$0xff] %vm243_vm0, %v998_v0  ;;  %1062 = vst.msk [vmem:[#allocation2 + $0xfa] sm:$0xff] %vm243_vm0, %v998_v0  ;;  %v813_v13 = vmax.f32 %v967_v57, %v3038_v61  ;;  %v1000_v15 = vmax.f32 %v935_v3, %v3035_v59  ;;  %v936_v16 = vmax.f32 %v871_v4, %v967_v57  ;;  %v3119_v52 = vld [vmem:[#allocation2 + $0x98] sm:$0xff]  ;;  %v3123_v54 = vld [vmem:[#allocation2 + $0xb0] sm:$0xff] }
  0x97   : > { %1031 = vst.msk [vmem:[%s2963_s22 + $0xb0] sm:$0xff] %vm243_vm0, %v999_v1  ;;  %1063 = vst.msk [vmem:[#allocation2 + $0x10a] sm:$0xff] %vm243_vm0, %v999_v1  ;;  %v937_v17 = vmax.f32 %v872_v5, %v3035_v59  ;;  %v874_v18 = vmax.f32 %v810_v7, %v3035_v59  ;;  %v938_v24 = vmax.f32 %v873_v8, %v3038_v61  ;;  %v3125_v55 = vld [vmem:[#allocation2 + $0x99] sm:$0xff]  ;;  %v3127_v56 = vld [vmem:[#allocation2 + $0xa9] sm:$0xff] }
  0x98   : > { %v875_v25 = vmax.f32 %v811_v10, %v3038_v61  ;;  %v876_v26 = vmax.f32 %v812_v12, %v3046_v6  ;;  %v877_v28 = vmax.f32 %v813_v13, %v3057_v9  ;;  %1032 = vst.msk [vmem:[%s2963_s22 + $0xb8] sm:$0xff] %vm243_vm0, %v1000_v15  ;;  %1064 = vst.msk [vmem:[#allocation2 + $0x112] sm:$0xff] %vm243_vm0, %v1000_v15  ;;  %v3129_v57 = vld [vmem:[#allocation2 + $0xb1] sm:$0xff]  ;;  %v3137_v60 = vld [vmem:[#allocation2 + $0xc0] sm:$0xff] }
  0x99   : > { %v1001_v35 = vmax.f32 %v936_v16, %v3038_v61  ;;  %v1002_v36 = vmax.f32 %v937_v17, %v3046_v6  ;;  %v939_v37 = vmax.f32 %v874_v18, %v3046_v6  ;;  %v814_v38 = vmax.f32 %v3035_v59, %v3046_v6  ;;  %v3139_v61 = vld [vmem:[#allocation2 + $0xc8] sm:$0xff] }
  0x9a   : > { %v1003_v47 = vmax.f32 %v938_v24, %v3057_v9  ;;  %v940_v48 = vmax.f32 %v875_v25, %v3057_v9  ;;  %v941_v49 = vmax.f32 %v876_v26, %v972_v19  ;;  %v942_v50 = vmax.f32 %v877_v28, %v3059_v11  ;;  %v3141_v62 = vld [vmem:[#allocation2 + $0xd8] sm:$0xff]  ;;  %v3143_v63 = vld [vmem:[#allocation2 + $0xc1] sm:$0xff]  ;;  %v3145_v0 = vld [vmem:[#allocation2 + $0xc9] sm:$0xff] }
  0x9b   : > { %1033 = vst.msk [vmem:[%s2963_s22 + $0xc0] sm:$0xff] %vm243_vm0, %v1001_v35  ;;  %1065 = vst.msk [vmem:[#allocation2 + $0x122] sm:$0xff] %vm243_vm0, %v1001_v35  ;;  %v1004_v58 = vmax.f32 %v939_v37, %v972_v19  ;;  %v878_v59 = vmax.f32 %v814_v38, %v972_v19  ;;  %v1141_v1 = vmax.f32 %v3063_v14, %v3070_v22  ;;  %v3154_v5 = vld [vmem:[#allocation2 + $0xe0] sm:$0xff] }
  0x9c   : > { %1034 = vst.msk [vmem:[%s2963_s22 + $0xc8] sm:$0xff] %vm243_vm0, %v1002_v36  ;;  %1066 = vst.msk [vmem:[#allocation2 + $0x12a] sm:$0xff] %vm243_vm0, %v1002_v36  ;;  %v1005_v2 = vmax.f32 %v940_v48, %v3059_v11  ;;  %v1006_v3 = vmax.f32 %v941_v49, %v3077_v27  ;;  %v1007_v4 = vmax.f32 %v942_v50, %v975_v20  ;;  %v3156_v6 = vld [vmem:[#allocation2 + $0xd9] sm:$0xff]  ;;  %v3158_v7 = vld [vmem:[#allocation2 + $0xe1] sm:$0xff] }
  0x9d   : > { %1035 = vst.msk [vmem:[%s2963_s22 + $0xd0] sm:$0xff] %vm243_vm0, %v1003_v47  ;;  %1067 = vst.msk [vmem:[#allocation2 + $0x13a] sm:$0xff] %vm243_vm0, %v1003_v47  ;;  %v1142_v8 = vmax.f32 %v3068_v21, %v3072_v23  ;;  %v943_v9 = vmax.f32 %v878_v59, %v3077_v27  ;;  %v3166_v10 = vld [vmem:[#allocation2 + $0xf0] sm:$0xff]  ;;  %v3168_v11 = vld [vmem:[#allocation2 + $0xf8] sm:$0xff]  ;;  %v1143_v13 = vmax.f32 %v3080_v29, %v3086_v32 }
  0x9e   : > { %1036 = vst.msk [vmem:[%s2963_s22 + $0xd8] sm:$0xff] %vm243_vm0, %v1004_v58  ;;  %1068 = vst.msk [vmem:[#allocation2 + $0x142] sm:$0xff] %vm243_vm0, %v1004_v58  ;;  %v3170_v12 = vld [vmem:[#allocation2 + $0x108] sm:$0xff]  ;;  %v1144_v15 = vmax.f32 %v3082_v30, %v3088_v33  ;;  %v1145_v16 = vmax.f32 %v3084_v31, %v3090_v34  ;;  %v3187_v17 = vld [vmem:[#allocation2 + $0xf1] sm:$0xff]  ;;  %v1146_v20 = vmax.f32 %v3100_v39, %v3108_v43 }
  0x9f   : > { %1037 = vst.msk [vmem:[%s2963_s22 + $0xe0] sm:$0xff] %vm243_vm0, %v1005_v2  ;;  %1069 = vst.msk [vmem:[#allocation2 + $0x152] sm:$0xff] %vm243_vm0, %v1005_v2  ;;  %v3189_v18 = vld [vmem:[#allocation2 + $0xf9] sm:$0xff]  ;;  %v3191_v19 = vld [vmem:[#allocation2 + $0x109] sm:$0xff]  ;;  %v1147_v21 = vmax.f32 %v3102_v40, %v3110_v44  ;;  %v1148_v23 = vmax.f32 %v3104_v41, %v3112_v45  ;;  %v1149_v24 = vmax.f32 %v3106_v42, %v3114_v46 }
  0xa0   : > { %1038 = vst.msk [vmem:[%s2963_s22 + $0xe8] sm:$0xff] %vm243_vm0, %v1006_v3  ;;  %1070 = vst.msk [vmem:[#allocation2 + $0x15a] sm:$0xff] %vm243_vm0, %v1006_v3  ;;  %v1008_v25 = vmax.f32 %v943_v9, %v976_v51  ;;  %v1150_v26 = vmax.f32 %v3119_v52, %v3125_v55  ;;  %v1151_v27 = vmax.f32 %v3121_v53, %v3127_v56  ;;  %v1173_v29 = vld [vmem:[#allocation2 + $0x32] sm:$0xff]  ;;  %v1174_v30 = vld [vmem:[#allocation2 + $0x3a] sm:$0xff] }
  0xa1   : > { %1039 = vst.msk [vmem:[%s2963_s22 + $0xf0] sm:$0xff] %vm243_vm0, %v1007_v4  ;;  %1071 = vst.msk [vmem:[#allocation2 + $0x16a] sm:$0xff] %vm243_vm0, %v1007_v4  ;;  %v1152_v28 = vmax.f32 %v3123_v54, %v3129_v57  ;;  %v1175_v31 = vld [vmem:[#allocation2 + $0x4a] sm:$0xff]  ;;  %v1176_v32 = vld [vmem:[#allocation2 + $0x52] sm:$0xff]  ;;  %v1153_v35 = vmax.f32 %v3137_v60, %v3143_v63  ;;  %v1154_v36 = vmax.f32 %v3139_v61, %v3145_v0 }
  0xa2   : > { %v3207_v33 = vld [vmem:[#allocation2 + $0x110] sm:$0xff]  ;;  %v1155_v37 = vmax.f32 %v3141_v62, %v3156_v6  ;;  %v1156_v38 = vmax.f32 %v3154_v5, %v3158_v7  ;;  %v1177_v39 = vld [vmem:[#allocation2 + $0x62] sm:$0xff]  ;;  %1040 = vst.msk [vmem:[%s2963_s22 + $0xf8] sm:$0xff] %vm243_vm0, %v1008_v25  ;;  %1072 = vst.msk [vmem:[#allocation2 + $0x172] sm:$0xff] %vm243_vm0, %v1008_v25  ;;  %v1157_v41 = vmax.f32 %v3166_v10, %v3187_v17 }
  0xa3   : > { %v3209_v34 = vld [vmem:[#allocation2 + $0x111] sm:$0xff]  ;;  %v1158_v42 = vmax.f32 %v3168_v11, %v3189_v18  ;;  %v1159_v43 = vmax.f32 %v3170_v12, %v3191_v19  ;;  %v1179_v45 = vld [vmem:[#allocation2 + $0x7a] sm:$0xff]  ;;  %v1180_v46 = vld [vmem:[#allocation2 + $0x82] sm:$0xff]  ;;  %v3233_v54 = vmax.f32 %v1141_v1, %v1173_v29  ;;  %v3235_v55 = vmax.f32 %v1142_v8, %v1174_v30 }
  0xa4   : > { %v1178_v40 = vld [vmem:[#allocation2 + $0x6a] sm:$0xff]  ;;  %v1160_v44 = vmax.f32 %v3207_v33, %v3209_v34  ;;  %v1181_v47 = vld [vmem:[#allocation2 + $0x92] sm:$0xff]  ;;  %v1097_v48 = vld [vmem:[#allocation2 + $0x120] sm:$0xff]  ;;  %v3237_v56 = vmax.f32 %v1143_v13, %v1175_v31  ;;  %v3239_v57 = vmax.f32 %v1144_v15, %v1176_v32  ;;  %v3241_v0 = vmax.f32 %v1145_v16, %v1177_v39 }
  0xa5   : > { %v1098_v49 = vld [vmem:[#allocation2 + $0x128] sm:$0xff]  ;;  %v1182_v51 = vld [vmem:[#allocation2 + $0x9a] sm:$0xff]  ;;  %v1184_v53 = vld [vmem:[#allocation2 + $0xb2] sm:$0xff]  ;;  %v3243_v2 = vmax.f32 %v1146_v20, %v1178_v40  ;;  %v3245_v3 = vmax.f32 %v1147_v21, %v1179_v45  ;;  %v3247_v6 = vmax.f32 %v1148_v23, %v1180_v46  ;;  %v3249_v7 = vmax.f32 %v1149_v24, %v1181_v47 }
  0xa6   : > { %v1129_v50 = vld [vmem:[#allocation2 + $0x121] sm:$0xff]  ;;  %v1183_v52 = vld [vmem:[#allocation2 + $0xaa] sm:$0xff]  ;;  %v1099_v58 = vld [vmem:[#allocation2 + $0x138] sm:$0xff]  ;;  %v3251_v12 = vmax.f32 %v1150_v26, %v1182_v51  ;;  %v3255_v15 = vmax.f32 %v1152_v28, %v1184_v53 }
  0xa7   : > { %v1130_v59 = vld [vmem:[#allocation2 + $0x129] sm:$0xff]  ;;  %v1131_v60 = vld [vmem:[#allocation2 + $0x139] sm:$0xff]  ;;  %v1161_v61 = vmax.f32 %v1097_v48, %v1129_v50  ;;  %v1132_v22 = vld [vmem:[#allocation2 + $0x141] sm:$0xff]  ;;  %v3253_v13 = vmax.f32 %v1151_v27, %v1183_v52 }
  0xa8   : > { %v1185_v62 = vld [vmem:[#allocation2 + $0xc2] sm:$0xff]  ;;  %v1186_v63 = vld [vmem:[#allocation2 + $0xca] sm:$0xff]  ;;  %v1162_v1 = vmax.f32 %v1098_v49, %v1130_v59  ;;  %v1163_v4 = vmax.f32 %v1099_v58, %v1131_v60  ;;  %v1187_v5 = vld [vmem:[#allocation2 + $0xda] sm:$0xff] }
  0xa9   : > { %v1100_v14 = vld [vmem:[#allocation2 + $0x140] sm:$0xff]  ;;  %v1189_v10 = vld [vmem:[#allocation2 + $0xf2] sm:$0xff]  ;;  %v1191_v18 = vld [vmem:[#allocation2 + $0x10a] sm:$0xff]  ;;  %v3257_v21 = vmax.f32 %v1153_v35, %v1185_v62  ;;  %v3259_v23 = vmax.f32 %v1154_v36, %v1186_v63  ;;  %v3261_v24 = vmax.f32 %v1155_v37, %v1187_v5 }
  0xaa   : > { %v1164_v8 = vmax.f32 %v1100_v14, %v1132_v22  ;;  %v1188_v9 = vld [vmem:[#allocation2 + $0xe2] sm:$0xff]  ;;  %v1190_v11 = vld [vmem:[#allocation2 + $0xfa] sm:$0xff]  ;;  %v1192_v19 = vld [vmem:[#allocation2 + $0x112] sm:$0xff]  ;;  %v3269_v31 = vmax.f32 %v1157_v41, %v1189_v10  ;;  %v3273_v33 = vmax.f32 %v1159_v43, %v1191_v18 }
  0xab   : > { %v1073_v16 = vld [vmem:[#allocation2] sm:$0xff]  ;;  %v3263_v25 = vmax.f32 %v1156_v38, %v1188_v9  ;;  %v3267_v26 = vld [vmem:[#allocation2 + $0x53] sm:$0xff]  ;;  %v1194_v27 = vld [vmem:[#allocation2 + $0x12a] sm:$0xff]  ;;  %v3271_v32 = vmax.f32 %v1158_v42, %v1190_v11  ;;  %v3275_v34 = vmax.f32 %v1160_v44, %v1192_v19 }
  0xac   : > { %v1105_v17 = vld [vmem:[#allocation2 + $0x1] sm:$0xff]  ;;  %v3279_v36 = vmax.f32 %v1162_v1, %v1194_v27  ;;  %v1237_v39 = vld [vmem:[#allocation2 + $0x33] sm:$0xff]  ;;  %v1239_v40 = vld [vmem:[#allocation2 + $0x4b] sm:$0xff]  ;;  %v1272_v48 = vmax.f32 %v3239_v57, %v3267_v26 }
  0xad   : > { %v1193_v20 = vld [vmem:[#allocation2 + $0x122] sm:$0xff]  ;;  %v1195_v28 = vld [vmem:[#allocation2 + $0x13a] sm:$0xff]  ;;  %v3285_v46 = vld [vmem:[#allocation2 + $0x6b] sm:$0xff]  ;;  %v1137_v60 = vmax.f32 %v1073_v16, %v1105_v17  ;;  %v1269_v22 = vmax.f32 %v3233_v54, %v1237_v39  ;;  %v1271_v1 = vmax.f32 %v3237_v56, %v1239_v40 }
  0xae   : > { %v3265_v29 = vld [vmem:[#allocation2 + $0x3b] sm:$0xff]  ;;  %v3277_v35 = vmax.f32 %v1161_v61, %v1193_v20  ;;  %v3281_v37 = vmax.f32 %v1163_v4, %v1195_v28  ;;  %v1241_v45 = vld [vmem:[#allocation2 + $0x63] sm:$0xff]  ;;  %v3291_v43 = vld [vmem:[#allocation2 + $0xb3] sm:$0xff]  ;;  %v1274_v49 = vmax.f32 %v3243_v2, %v3285_v46 }
  0xaf   : > { %v1196_v30 = vld [vmem:[#allocation2 + $0x142] sm:$0xff]  ;;  %v3293_v44 = vld [vmem:[#allocation2 + $0xcb] sm:$0xff]  ;;  %v1270_v47 = vmax.f32 %v3235_v55, %v3265_v29  ;;  %v3303_v53 = vld [vmem:[#allocation2 + $0x93] sm:$0xff]  ;;  %v1280_v55 = vmax.f32 %v3255_v15, %v3291_v43  ;;  %v1273_v4 = vmax.f32 %v3241_v0, %v1241_v45 }
  0xb0   : > { %v3283_v38 = vmax.f32 %v1164_v8, %v1196_v30  ;;  %v3287_v41 = vld [vmem:[#allocation2 + $0x83] sm:$0xff]  ;;  %v3289_v42 = vld [vmem:[#allocation2 + $0x9b] sm:$0xff]  ;;  %v1282_v57 = vmax.f32 %v3259_v23, %v3293_v44  ;;  %v1247_v61 = vld [vmem:[#allocation2 + $0xab] sm:$0xff]  ;;  %v1277_v19 = vmax.f32 %v3249_v7, %v3303_v53 }
  0xb1   : > { %v1276_v50 = vmax.f32 %v3247_v6, %v3287_v41  ;;  %v1169_v51 = vld [vmem:[#allocation2 + $0x2] sm:$0xff]  ;;  %v1278_v59 = vmax.f32 %v3251_v12, %v3289_v42  ;;  %v3315_v63 = vld [vmem:[#allocation2 + $0x113] sm:$0xff]  ;;  %v3326_v8 = vld [vmem:[#allocation2 + $0x12b] sm:$0xff]  ;;  %v1279_v20 = vmax.f32 %v3253_v13, %v1247_v61 }
  0xb2   : > { %v1243_v52 = vld [vmem:[#allocation2 + $0x7b] sm:$0xff]  ;;  %v3305_v58 = vld [vmem:[#allocation2 + $0xe3] sm:$0xff]  ;;  %v1288_v10 = vmax.f32 %v3275_v34, %v3315_v63  ;;  %v1201_v11 = vmax.f32 %v1137_v60, %v1169_v51  ;;  %v1253_v26 = vld [vmem:[#allocation2 + $0xf3] sm:$0xff] }
  0xb3   : > { %v3313_v62 = vld [vmem:[#allocation2 + $0xfb] sm:$0xff]  ;;  %v1284_v2 = vmax.f32 %v3263_v25, %v3305_v58  ;;  %v1233_v14 = vld [vmem:[#allocation2 + $0x3] sm:$0xff]  ;;  %v1275_v16 = vmax.f32 %v3245_v3, %v1243_v52  ;;  %v1303_v27 = vld [vmem:[#allocation2 + $0x4c] sm:$0xff] }
  0xb4   : > { %v3322_v5 = vld [vmem:[#allocation2 + $0xc3] sm:$0xff]  ;;  %v3324_v6 = vld [vmem:[#allocation2 + $0xdb] sm:$0xff]  ;;  %v1286_v9 = vmax.f32 %v3271_v32, %v3313_v62  ;;  %v1265_v39 = vmax.f32 %v1201_v11, %v1233_v14  ;;  %v1255_v46 = vld [vmem:[#allocation2 + $0x10b] sm:$0xff]  ;;  %v1335_v7 = vmax.f32 %v1271_v1, %v1303_v27  ;;  %v4136_v62 = vmax.f32 %v3279_v36, %v3326_v8 }
  0xb5   : > { %v3333_v54 = vld [vmem:[#allocation2 + $0x143] sm:$0xff]  ;;  %v1301_v0 = vld [vmem:[#allocation2 + $0x34] sm:$0xff]  ;;  %v1281_v29 = vmax.f32 %v3257_v21, %v3322_v5  ;;  %v1306_v41 = vld [vmem:[#allocation2 + $0x6c] sm:$0xff]  ;;  %v1283_v21 = vmax.f32 %v3261_v24, %v3324_v6  ;;  %v1287_v42 = vmax.f32 %v3273_v33, %v1255_v46 }
  0xb6   : > { %v1302_v17 = vld [vmem:[#allocation2 + $0x3c] sm:$0xff]  ;;  %v1297_v18 = vld [vmem:[#allocation2 + $0x4] sm:$0xff]  ;;  %v1304_v28 = vld [vmem:[#allocation2 + $0x54] sm:$0xff]  ;;  %v1333_v40 = vmax.f32 %v1269_v22, %v1301_v0  ;;  %1367 = vst.msk [vmem:[#allocation3 + $0x50] sm:$0xff] %vm243_vm0, %v1335_v7 }
  0xb7   : > { %v1305_v30 = vld [vmem:[#allocation2 + $0x64] sm:$0xff]  ;;  %v1334_v45 = vmax.f32 %v1270_v47, %v1302_v17  ;;  %v1307_v51 = vld [vmem:[#allocation2 + $0x7c] sm:$0xff]  ;;  %v1336_v53 = vmax.f32 %v1272_v48, %v1304_v28  ;;  %v1309_v3 = vld [vmem:[#allocation2 + $0x94] sm:$0xff]  ;;  %v1329_v22 = vmax.f32 %v1265_v39, %v1297_v18  ;;  %v1338_v47 = vmax.f32 %v1274_v49, %v1306_v41 }
  0xb8   : > { %v1308_v52 = vld [vmem:[#allocation2 + $0x84] sm:$0xff]  ;;  %v1337_v13 = vmax.f32 %v1273_v4, %v1305_v30  ;;  %v1310_v56 = vld [vmem:[#allocation2 + $0x9c] sm:$0xff]  ;;  %v1311_v14 = vld [vmem:[#allocation2 + $0xac] sm:$0xff]  ;;  %1365 = vst.msk [vmem:[#allocation3 + $0x40] sm:$0xff] %vm243_vm0, %v1333_v40  ;;  %v1339_v1 = vmax.f32 %v1275_v16, %v1307_v51  ;;  %v1341_v17 = vmax.f32 %v1277_v19, %v1309_v3  ;;  %v1285_v49 = vmax.f32 %v3269_v31, %v1253_v26 }
  0xb9   : > { %v3346_v60 = vld [vmem:[#allocation2 + $0x20] sm:$0xff]  ;;  %1366 = vst.msk [vmem:[#allocation3 + $0x48] sm:$0xff] %vm243_vm0, %v1334_v45  ;;  %v1340_v48 = vmax.f32 %v1276_v50, %v1308_v52  ;;  %v1312_v11 = vld [vmem:[#allocation2 + $0xb4] sm:$0xff]  ;;  %v1314_v24 = vld [vmem:[#allocation2 + $0xcc] sm:$0xff]  ;;  %v1342_v18 = vmax.f32 %v1278_v59, %v1310_v56  ;;  %v1343_v27 = vmax.f32 %v1279_v20, %v1311_v14 }
  0xba   : > { %v3348_v61 = vld [vmem:[#allocation2 + $0x21] sm:$0xff]  ;;  %1368 = vst.msk [vmem:[#allocation3 + $0x58] sm:$0xff] %vm243_vm0, %v1336_v53  ;;  %1369 = vst.msk [vmem:[#allocation3 + $0x60] sm:$0xff] %vm243_vm0, %v1337_v13  ;;  %v1317_v28 = vld [vmem:[#allocation2 + $0xf4] sm:$0xff]  ;;  %v1344_v19 = vmax.f32 %v1280_v55, %v1312_v11  ;;  %v1346_v31 = vmax.f32 %v1282_v57, %v1314_v24 }
  0xbb   : > { %v1257_v5 = vld [vmem:[#allocation2 + $0x123] sm:$0xff]  ;;  %v1259_v4 = vld [vmem:[#allocation2 + $0x13b] sm:$0xff]  ;;  %1361 = vst.msk [vmem:[#allocation3 + $0x20] sm:$0xff] %vm243_vm0, %v1329_v22  ;;  %1370 = vst.msk [vmem:[#allocation3 + $0x68] sm:$0xff] %vm243_vm0, %v1338_v47  ;;  %v1349_v23 = vmax.f32 %v1285_v49, %v1317_v28  ;;  %v1140_v39 = vmax.f32 %v3346_v60, %v3348_v61 }
  0xbc   : > { %v1313_v0 = vld [vmem:[#allocation2 + $0xc4] sm:$0xff]  ;;  %v1315_v50 = vld [vmem:[#allocation2 + $0xdc] sm:$0xff]  ;;  %1371 = vst.msk [vmem:[#allocation3 + $0x70] sm:$0xff] %vm243_vm0, %v1339_v1  ;;  %1372 = vst.msk [vmem:[#allocation3 + $0x78] sm:$0xff] %vm243_vm0, %v1340_v48  ;;  %v1289_v44 = vmax.f32 %v3277_v35, %v1257_v5  ;;  %v1291_v35 = vmax.f32 %v3281_v37, %v1259_v4 }
  0xbd   : > { %v1074_v6 = vld [vmem:[#allocation2 + $0x8] sm:$0xff]  ;;  %v1345_v12 = vmax.f32 %v1281_v29, %v1313_v0  ;;  %v3370_v59 = vld [vmem:[#allocation2 + $0x158] sm:$0xff]  ;;  %1373 = vst.msk [vmem:[#allocation3 + $0x80] sm:$0xff] %vm243_vm0, %v1341_v17  ;;  %1374 = vst.msk [vmem:[#allocation3 + $0x88] sm:$0xff] %vm243_vm0, %v1342_v18  ;;  %v1347_v15 = vmax.f32 %v1283_v21, %v1315_v50 }
  0xbe   : > { %v1316_v16 = vld [vmem:[#allocation2 + $0xe4] sm:$0xff]  ;;  %v1318_v56 = vld [vmem:[#allocation2 + $0xfc] sm:$0xff]  ;;  %v1319_v20 = vld [vmem:[#allocation2 + $0x10c] sm:$0xff]  ;;  %1375 = vst.msk [vmem:[#allocation3 + $0x90] sm:$0xff] %vm243_vm0, %v1343_v27 }
  0xbf   : > { %v1320_v26 = vld [vmem:[#allocation2 + $0x114] sm:$0xff]  ;;  %v1348_v43 = vmax.f32 %v1284_v2, %v1316_v16  ;;  %v1321_v55 = vld [vmem:[#allocation2 + $0x124] sm:$0xff]  ;;  %v1322_v57 = vld [vmem:[#allocation2 + $0x12c] sm:$0xff]  ;;  %1376 = vst.msk [vmem:[#allocation3 + $0x98] sm:$0xff] %vm243_vm0, %v1344_v19  ;;  %v1350_v29 = vmax.f32 %v1286_v9, %v1318_v56  ;;  %v1351_v3 = vmax.f32 %v1287_v42, %v1319_v20 }
  0xc0   : > { %v1134_v33 = vld [vmem:[#allocation2 + $0x159] sm:$0xff]  ;;  %1377 = vst.msk [vmem:[#allocation3 + $0xa0] sm:$0xff] %vm243_vm0, %v1345_v12  ;;  %1378 = vst.msk [vmem:[#allocation3 + $0xa8] sm:$0xff] %vm243_vm0, %v1346_v31  ;;  %v1352_v25 = vmax.f32 %v1288_v10, %v1320_v26  ;;  %v1324_v2 = vld [vmem:[#allocation2 + $0x144] sm:$0xff]  ;;  %v1353_v32 = vmax.f32 %v1289_v44, %v1321_v55  ;;  %v1354_v34 = vmax.f32 %v4136_v62, %v1322_v57 }
  0xc1   : > { %v1323_v58 = vld [vmem:[#allocation2 + $0x13c] sm:$0xff]  ;;  %v1106_v30 = vld [vmem:[#allocation2 + $0x9] sm:$0xff]  ;;  %1379 = vst.msk [vmem:[#allocation3 + $0xb0] sm:$0xff] %vm243_vm0, %v1347_v15  ;;  %1380 = vst.msk [vmem:[#allocation3 + $0xb8] sm:$0xff] %vm243_vm0, %v1348_v43  ;;  %v4137_v10 = vmax.f32 %v3283_v38, %v3333_v54  ;;  %v1166_v52 = vmax.f32 %v3370_v59, %v1134_v33 }
  0xc2   : > { %1381 = vst.msk [vmem:[#allocation3 + $0xc0] sm:$0xff] %vm243_vm0, %v1349_v23  ;;  %v1138_v63 = vmax.f32 %v1074_v6, %v1106_v30  ;;  %v1075_v9 = vld [vmem:[#allocation2 + $0x18] sm:$0xff]  ;;  %1382 = vst.msk [vmem:[#allocation3 + $0xc8] sm:$0xff] %vm243_vm0, %v1350_v29  ;;  %v1355_v37 = vmax.f32 %v1291_v35, %v1323_v58  ;;  %v1170_v45 = vld [vmem:[#allocation2 + $0xa] sm:$0xff] }
  0xc3   : > { %1383 = vst.msk [vmem:[#allocation3 + $0xd0] sm:$0xff] %vm243_vm0, %v1351_v3  ;;  %1384 = vst.msk [vmem:[#allocation3 + $0xd8] sm:$0xff] %vm243_vm0, %v1352_v25  ;;  %v1356_v40 = vmax.f32 %v4137_v10, %v1324_v2  ;;  %v1107_v46 = vld [vmem:[#allocation2 + $0x19] sm:$0xff]  ;;  %v1234_v8 = vld [vmem:[#allocation2 + $0xb] sm:$0xff] }
  0xc4   : > { %1385 = vst.msk [vmem:[#allocation3 + $0xe0] sm:$0xff] %vm243_vm0, %v1353_v32  ;;  %1386 = vst.msk [vmem:[#allocation3 + $0xe8] sm:$0xff] %vm243_vm0, %v1354_v34  ;;  %v1202_v36 = vmax.f32 %v1138_v63, %v1170_v45  ;;  %v1139_v41 = vmax.f32 %v1075_v9, %v1107_v46  ;;  %v1172_v51 = vld [vmem:[#allocation2 + $0x22] sm:$0xff]  ;;  %v1171_v7 = vld [vmem:[#allocation2 + $0x1a] sm:$0xff] }
  0xc5   : > { %1387 = vst.msk [vmem:[#allocation3 + $0xf0] sm:$0xff] %vm243_vm0, %v1355_v37  ;;  %1388 = vst.msk [vmem:[#allocation3 + $0xf8] sm:$0xff] %vm243_vm0, %v1356_v40  ;;  %v1204_v53 = vmax.f32 %v1140_v39, %v1172_v51  ;;  %v1101_v38 = vld [vmem:[#allocation2 + $0x150] sm:$0xff]  ;;  %v1393_v13 = vld [vmem:[#allocation3] sm:$0xff] }
  0xc6   : > { %v1133_v54 = vld [vmem:[#allocation2 + $0x151] sm:$0xff]  ;;  %v1266_v60 = vmax.f32 %v1202_v36, %v1234_v8  ;;  %v1203_v5 = vmax.f32 %v1139_v41, %v1171_v7  ;;  %v1235_v14 = vld [vmem:[#allocation2 + $0x1b] sm:$0xff]  ;;  %v1236_v22 = vld [vmem:[#allocation2 + $0x23] sm:$0xff] }
  0xc7   : > { %v3408_v21 = vld [vmem:[#allocation3 + $0x10] sm:$0xff]  ;;  %v1165_v47 = vmax.f32 %v1101_v38, %v1133_v54  ;;  %v1299_v1 = vld [vmem:[#allocation2 + $0x1c] sm:$0xff]  ;;  %v1268_v48 = vmax.f32 %v1204_v53, %v1236_v22  ;;  %v1300_v4 = vld [vmem:[#allocation2 + $0x24] sm:$0xff] }
  0xc8   : > { %v1298_v61 = vld [vmem:[#allocation2 + $0xc] sm:$0xff]  ;;  %v1198_v0 = vld [vmem:[#allocation2 + $0x15a] sm:$0xff]  ;;  %v1267_v18 = vmax.f32 %v1203_v5, %v1235_v14  ;;  %v1457_v33 = vmax.f32 %v1393_v13, %v3408_v21 }
  0xc9   : > { %v1197_v11 = vld [vmem:[#allocation2 + $0x152] sm:$0xff]  ;;  %v3410_v24 = vld [vmem:[#allocation3 + $0x8] sm:$0xff]  ;;  %v1330_v17 = vmax.f32 %v1266_v60, %v1298_v61  ;;  %v1230_v50 = vmax.f32 %v1166_v52, %v1198_v0  ;;  %v1332_v19 = vmax.f32 %v1268_v48, %v1300_v4  ;;  %v1262_v31 = vld [vmem:[#allocation2 + $0x15b] sm:$0xff] }
  0xca   : > { %v3412_v6 = vld [vmem:[#allocation3 + $0x18] sm:$0xff]  ;;  %v1229_v27 = vmax.f32 %v1165_v47, %v1197_v11  ;;  %v1103_v16 = vld [vmem:[#allocation2 + $0x168] sm:$0xff]  ;;  %v1104_v56 = vld [vmem:[#allocation2 + $0x170] sm:$0xff]  ;;  %v1331_v20 = vmax.f32 %v1267_v18, %v1299_v1 }
  0xcb   : > { %v1261_v49 = vld [vmem:[#allocation2 + $0x153] sm:$0xff]  ;;  %v1135_v28 = vld [vmem:[#allocation2 + $0x169] sm:$0xff]  ;;  %v1326_v42 = vld [vmem:[#allocation2 + $0x15c] sm:$0xff]  ;;  %1362 = vst.msk [vmem:[#allocation3 + $0x28] sm:$0xff] %vm243_vm0, %v1330_v17  ;;  %v1294_v15 = vmax.f32 %v1230_v50, %v1262_v31  ;;  %v1458_v39 = vmax.f32 %v3410_v24, %v3412_v6 }
  0xcc   : > { %v1325_v12 = vld [vmem:[#allocation2 + $0x154] sm:$0xff]  ;;  %v1167_v59 = vmax.f32 %v1103_v16, %v1135_v28  ;;  %v1293_v26 = vmax.f32 %v1229_v27, %v1261_v49  ;;  %v1199_v43 = vld [vmem:[#allocation2 + $0x16a] sm:$0xff]  ;;  %1364 = vst.msk [vmem:[#allocation3 + $0x38] sm:$0xff] %vm243_vm0, %v1332_v19  ;;  %v3417_v3 = vld [vmem:[#allocation3 + $0x20] sm:$0xff] }
  0xcd   : > { %v1263_v23 = vld [vmem:[#allocation2 + $0x16b] sm:$0xff]  ;;  %v3419_v25 = vld [vmem:[#allocation3 + $0x40] sm:$0xff]  ;;  %1363 = vst.msk [vmem:[#allocation3 + $0x30] sm:$0xff] %vm243_vm0, %v1331_v20  ;;  %v1358_v58 = vmax.f32 %v1294_v15, %v1326_v42  ;;  %v1521_v30 = vmax.f32 %v1457_v33, %v3417_v3  ;;  %v3429_v34 = vld [vmem:[#allocation3 + $0x58] sm:$0xff]  ;;  %v1459_v8 = vmax.f32 %v3408_v21, %v3417_v3 }
  0xce   : > { %v1136_v44 = vld [vmem:[#allocation2 + $0x171] sm:$0xff]  ;;  %v1231_v55 = vmax.f32 %v1167_v59, %v1199_v43  ;;  %v1357_v35 = vmax.f32 %v1293_v26, %v1325_v12  ;;  %v3425_v32 = vld [vmem:[#allocation3 + $0x48] sm:$0xff]  ;;  %v3431_v37 = vld [vmem:[#allocation3 + $0x60] sm:$0xff] }
  0xcf   : > { %v1168_v57 = vmax.f32 %v1104_v56, %v1136_v44  ;;  %v1200_v29 = vld [vmem:[#allocation2 + $0x172] sm:$0xff]  ;;  %v3433_v10 = vld [vmem:[#allocation3 + $0x68] sm:$0xff]  ;;  %v1466_v46 = vmax.f32 %v3425_v32, %v3429_v34  ;;  %1390 = vst.msk [vmem:[#allocation3 + $0x108] sm:$0xff] %vm243_vm0, %v1358_v58  ;;  %v3447_v51 = vld [vmem:[#allocation3 + $0x80] sm:$0xff] }
  0xd0   : > { %v1327_v2 = vld [vmem:[#allocation2 + $0x16c] sm:$0xff]  ;;  %v1295_v63 = vmax.f32 %v1231_v55, %v1263_v23  ;;  %1389 = vst.msk [vmem:[#allocation3 + $0x100] sm:$0xff] %vm243_vm0, %v1357_v35  ;;  %v3445_v41 = vld [vmem:[#allocation3 + $0x78] sm:$0xff]  ;;  %v1468_v7 = vmax.f32 %v3429_v34, %v3433_v10 }
  0xd1   : > { %v3427_v62 = vld [vmem:[#allocation3 + $0x50] sm:$0xff]  ;;  %v1232_v9 = vmax.f32 %v1168_v57, %v1200_v29  ;;  %v1530_v60 = vmax.f32 %v1466_v46, %v3433_v10  ;;  %v1470_v22 = vmax.f32 %v3433_v10, %v3445_v41  ;;  %v3467_v11 = vld [vmem:[#allocation3 + $0x88] sm:$0xff]  ;;  %v1628_v58 = vld [vmem:[#allocation3 + $0x98] sm:$0xff] }
  0xd2   : > { %v3435_v40 = vld [vmem:[#allocation3 + $0x70] sm:$0xff]  ;;  %v1465_v45 = vmax.f32 %v3419_v25, %v3427_v62  ;;  %v1467_v52 = vmax.f32 %v3427_v62, %v3431_v37  ;;  %v1359_v38 = vmax.f32 %v1295_v63, %v1327_v2  ;;  %v1532_v5 = vmax.f32 %v1468_v7, %v3445_v41  ;;  %v1490_v1 = vld [vmem:[#allocation3 + $0x28] sm:$0xff] }
  0xd3   : > { %v1264_v36 = vld [vmem:[#allocation2 + $0x173] sm:$0xff]  ;;  %v1469_v53 = vmax.f32 %v3431_v37, %v3435_v40  ;;  %v1594_v4 = vmax.f32 %v1530_v60, %v3445_v41  ;;  %v1471_v0 = vmax.f32 %v3435_v40, %v3447_v51  ;;  %v1522_v24 = vmax.f32 %v1458_v39, %v1490_v1 }
  0xd4   : > { %v1296_v54 = vmax.f32 %v1232_v9, %v1264_v36  ;;  %v1529_v13 = vmax.f32 %v1465_v45, %v3431_v37  ;;  %v1328_v21 = vld [vmem:[#allocation2 + $0x174] sm:$0xff]  ;;  %v1531_v61 = vmax.f32 %v1467_v52, %v3435_v40  ;;  %1391 = vst.msk [vmem:[#allocation3 + $0x110] sm:$0xff] %vm243_vm0, %v1359_v38  ;;  %v1460_v18 = vmax.f32 %v3412_v6, %v1490_v1  ;;  %v1630_v36 = vld [vmem:[#allocation3 + $0xa8] sm:$0xff] }
  0xd5   : > { %v3460_v14 = vmax.f32 %v1469_v53, %v3447_v51  ;;  %v1554_v17 = vld [vmem:[#allocation3 + $0x38] sm:$0xff]  ;;  %v1596_v49 = vmax.f32 %v1532_v5, %v3467_v11  ;;  %v1553_v50 = vld [vmem:[#allocation3 + $0x30] sm:$0xff]  ;;  %v1658_v12 = vmax.f32 %v1594_v4, %v3467_v11  ;;  %v1534_v46 = vmax.f32 %v1470_v22, %v3467_v11 }
  0xd6   : > { %v1360_v47 = vmax.f32 %v1296_v54, %v1328_v21  ;;  %v1593_v48 = vmax.f32 %v1529_v13, %v3435_v40  ;;  %v1595_v27 = vmax.f32 %v1531_v61, %v3447_v51  ;;  %v1462_v16 = vmax.f32 %v1490_v1, %v1554_v17  ;;  %v1627_v35 = vld [vmem:[#allocation3 + $0x90] sm:$0xff]  ;;  %v1633_v61 = vld [vmem:[#allocation3 + $0xc0] sm:$0xff] }
  0xd7   : > { %v1464_v28 = vmax.f32 %v1554_v17, %v3425_v32  ;;  %v1585_v6 = vmax.f32 %v1521_v30, %v1553_v50  ;;  %v1586_v31 = vmax.f32 %v1522_v24, %v1554_v17  ;;  %v1523_v42 = vmax.f32 %v1459_v8, %v1553_v50  ;;  %1690 = vst.msk [vmem:[%s3482_s25 + $0x48] sm:$0xff] %vm243_vm0, %v1658_v12 }
  0xd8   : > { %1392 = vst.msk [vmem:[#allocation3 + $0x118] sm:$0xff] %vm243_vm0, %v1360_v47  ;;  %v1657_v19 = vmax.f32 %v1593_v48, %v3447_v51  ;;  %v1524_v59 = vmax.f32 %v1460_v18, %v1554_v17  ;;  %v1461_v56 = vmax.f32 %v3417_v3, %v1553_v50  ;;  %v1526_v20 = vmax.f32 %v1462_v16, %v3425_v32 }
  0xd9   : > { %v1463_v26 = vmax.f32 %v1553_v50, %v3419_v25  ;;  %v1528_v15 = vmax.f32 %v1464_v28, %v3429_v34  ;;  %1722 = vst.msk [vmem:[#allocation2 + $0x6a] sm:$0xff] %vm243_vm0, %v1658_v12  ;;  %v1649_v43 = vmax.f32 %v1585_v6, %v3419_v25  ;;  %v1650_v23 = vmax.f32 %v1586_v31, %v3425_v32 }
  0xda   : > { %1689 = vst.msk [vmem:[%s3482_s25 + $0x40] sm:$0xff] %vm243_vm0, %v1657_v19  ;;  %1721 = vst.msk [vmem:[#allocation2 + $0x62] sm:$0xff] %vm243_vm0, %v1657_v19  ;;  %v1587_v44 = vmax.f32 %v1523_v42, %v3419_v25  ;;  %v1588_v33 = vmax.f32 %v1524_v59, %v3425_v32  ;;  %v1525_v55 = vmax.f32 %v1461_v56, %v3419_v25  ;;  %v1637_v59 = vld [vmem:[#allocation3 + $0xe0] sm:$0xff] }
  0xdb   : > { %v1590_v57 = vmax.f32 %v1526_v20, %v3429_v34  ;;  %v1527_v29 = vmax.f32 %v1463_v26, %v3427_v62  ;;  %v1592_v3 = vmax.f32 %v1528_v15, %v3433_v10  ;;  %1681 = vst.msk [vmem:[%s3482_s25] sm:$0xff] %vm243_vm0, %v1649_v43  ;;  %1713 = vst.msk [vmem:[#allocation2 + $0x2] sm:$0xff] %vm243_vm0, %v1649_v43  ;;  %v3561_v20 = vld [vmem:[#allocation3 + $0xe8] sm:$0xff] }
  0xdc   : > { %1682 = vst.msk [vmem:[%s3482_s25 + $0x8] sm:$0xff] %vm243_vm0, %v1650_v23  ;;  %1714 = vst.msk [vmem:[#allocation2 + $0xa] sm:$0xff] %vm243_vm0, %v1650_v23  ;;  %v1651_v25 = vmax.f32 %v1587_v44, %v3427_v62  ;;  %v1652_v2 = vmax.f32 %v1588_v33, %v3429_v34  ;;  %v1659_v30 = vmax.f32 %v1595_v27, %v1627_v35  ;;  %v1629_v34 = vld [vmem:[#allocation3 + $0xa0] sm:$0xff]  ;;  %v1635_v27 = vld [vmem:[#allocation3 + $0xd0] sm:$0xff] }
  0xdd   : > { %v1660_v39 = vmax.f32 %v1596_v49, %v1628_v58  ;;  %v1589_v32 = vmax.f32 %v1525_v55, %v3427_v62  ;;  %v1654_v63 = vmax.f32 %v1590_v57, %v3433_v10  ;;  %v1591_v9 = vmax.f32 %v1527_v29, %v3431_v37  ;;  %v1631_v10 = vld [vmem:[#allocation3 + $0xb0] sm:$0xff]  ;;  %v1636_v49 = vld [vmem:[#allocation3 + $0xd8] sm:$0xff] }
  0xde   : > { %v1656_v45 = vmax.f32 %v1592_v3, %v3445_v41  ;;  %1683 = vst.msk [vmem:[%s3482_s25 + $0x10] sm:$0xff] %vm243_vm0, %v1651_v25  ;;  %1715 = vst.msk [vmem:[#allocation2 + $0x1a] sm:$0xff] %vm243_vm0, %v1651_v25  ;;  %v1597_v62 = vmax.f32 %v3460_v14, %v1627_v35  ;;  %v1535_v8 = vmax.f32 %v1471_v0, %v1627_v35  ;;  %v1634_v0 = vld [vmem:[#allocation3 + $0xc8] sm:$0xff]  ;;  %v1639_v44 = vld [vmem:[#allocation3 + $0xf0] sm:$0xff] }
  0xdf   : > { %1684 = vst.msk [vmem:[%s3482_s25 + $0x18] sm:$0xff] %vm243_vm0, %v1652_v2  ;;  %1716 = vst.msk [vmem:[#allocation2 + $0x22] sm:$0xff] %vm243_vm0, %v1652_v2  ;;  %v1472_v52 = vmax.f32 %v3445_v41, %v3467_v11  ;;  %v1653_v7 = vmax.f32 %v1589_v32, %v3431_v37  ;;  %v1655_v53 = vmax.f32 %v1591_v9, %v3435_v40  ;;  %v1632_v40 = vld [vmem:[#allocation3 + $0xb8] sm:$0xff]  ;;  %v3577_v2 = vld [vmem:[#allocation3 + $0x100] sm:$0xff] }
  0xe0   : > { %1691 = vst.msk [vmem:[%s3482_s25 + $0x50] sm:$0xff] %vm243_vm0, %v1659_v30  ;;  %1723 = vst.msk [vmem:[#allocation2 + $0x7a] sm:$0xff] %vm243_vm0, %v1659_v30  ;;  %v1473_v38 = vmax.f32 %v3447_v51, %v1627_v35  ;;  %v1474_v54 = vmax.f32 %v3467_v11, %v1628_v58  ;;  %v1661_v41 = vmax.f32 %v1597_v62, %v1629_v34  ;;  %v3586_v62 = vld [vmem:[#allocation3 + $0x108] sm:$0xff] }
  0xe1   : > { %1692 = vst.msk [vmem:[%s3482_s25 + $0x58] sm:$0xff] %vm243_vm0, %v1660_v39  ;;  %1724 = vst.msk [vmem:[#allocation2 + $0x82] sm:$0xff] %vm243_vm0, %v1660_v39  ;;  %v1598_v13 = vmax.f32 %v1534_v46, %v1628_v58  ;;  %v1599_v60 = vmax.f32 %v1535_v8, %v1629_v34  ;;  %v1536_v37 = vmax.f32 %v1472_v52, %v1628_v58  ;;  %v1643_v52 = vld [vmem:[#allocation3 + $0x110] sm:$0xff] }
  0xe2   : > { %1686 = vst.msk [vmem:[%s3482_s25 + $0x28] sm:$0xff] %vm243_vm0, %v1654_v63  ;;  %1718 = vst.msk [vmem:[#allocation2 + $0x3a] sm:$0xff] %vm243_vm0, %v1654_v63  ;;  %v1537_v21 = vmax.f32 %v1473_v38, %v1629_v34  ;;  %v1538_v51 = vmax.f32 %v1474_v54, %v1630_v36  ;;  %v1475_v5 = vmax.f32 %v1627_v35, %v1629_v34  ;;  %v3601_v54 = vld [vmem:[#allocation3 + $0x118] sm:$0xff] }
  0xe3   : > { %1688 = vst.msk [vmem:[%s3482_s25 + $0x38] sm:$0xff] %vm243_vm0, %v1656_v45  ;;  %1720 = vst.msk [vmem:[#allocation2 + $0x52] sm:$0xff] %vm243_vm0, %v1656_v45  ;;  %v1476_v14 = vmax.f32 %v1628_v58, %v1630_v36  ;;  %v1662_v22 = vmax.f32 %v1598_v13, %v1630_v36  ;;  %v1663_v47 = vmax.f32 %v1599_v60, %v1631_v10  ;;  %v3575_v58 = vld [vmem:[#allocation3 + $0xf8] sm:$0xff] }
  0xe4   : > { %1685 = vst.msk [vmem:[%s3482_s25 + $0x20] sm:$0xff] %vm243_vm0, %v1653_v7  ;;  %1717 = vst.msk [vmem:[#allocation2 + $0x32] sm:$0xff] %vm243_vm0, %v1653_v7  ;;  %v1600_v1 = vmax.f32 %v1536_v37, %v1630_v36  ;;  %v1477_v48 = vmax.f32 %v1629_v34, %v1631_v10  ;;  %v1601_v4 = vmax.f32 %v1537_v21, %v1631_v10  ;;  %v3611_v21 = vld [vmem:[#allocation2 + $0x68] sm:$0xff] }
  0xe5   : > { %1687 = vst.msk [vmem:[%s3482_s25 + $0x30] sm:$0xff] %vm243_vm0, %v1655_v53  ;;  %1719 = vst.msk [vmem:[#allocation2 + $0x4a] sm:$0xff] %vm243_vm0, %v1655_v53  ;;  %v1602_v11 = vmax.f32 %v1538_v51, %v1632_v40  ;;  %v1539_v24 = vmax.f32 %v1475_v5, %v1631_v10  ;;  %v1540_v17 = vmax.f32 %v1476_v14, %v1632_v40  ;;  %v3617_v5 = vld [vmem:[#allocation2 + $0x61] sm:$0xff]  ;;  %v3619_v14 = vld [vmem:[#allocation2 + $0x69] sm:$0xff] }
  0xe6   : > { %1693 = vst.msk [vmem:[%s3482_s25 + $0x60] sm:$0xff] %vm243_vm0, %v1661_v41  ;;  %1725 = vst.msk [vmem:[#allocation2 + $0x92] sm:$0xff] %vm243_vm0, %v1661_v41  ;;  %v1664_v18 = vmax.f32 %v1600_v1, %v1632_v40  ;;  %v1541_v50 = vmax.f32 %v1477_v48, %v1633_v61  ;;  %v1478_v16 = vmax.f32 %v1630_v36, %v1632_v40 }
  0xe7   : > { %1694 = vst.msk [vmem:[%s3482_s25 + $0x68] sm:$0xff] %vm243_vm0, %v1662_v22  ;;  %1726 = vst.msk [vmem:[#allocation2 + $0x9a] sm:$0xff] %vm243_vm0, %v1662_v22  ;;  %v1479_v28 = vmax.f32 %v1631_v10, %v1633_v61  ;;  %v1665_v19 = vmax.f32 %v1601_v4, %v1633_v61  ;;  %v1666_v12 = vmax.f32 %v1602_v11, %v1634_v0  ;;  %v1645_v4 = vld [vmem:[#allocation3 + $0x120] sm:$0xff] }
  0xe8   : > { %1695 = vst.msk [vmem:[%s3482_s25 + $0x70] sm:$0xff] %vm243_vm0, %v1663_v47  ;;  %1727 = vst.msk [vmem:[#allocation2 + $0xaa] sm:$0xff] %vm243_vm0, %v1663_v47  ;;  %v1603_v6 = vmax.f32 %v1539_v24, %v1633_v61  ;;  %v1604_v31 = vmax.f32 %v1540_v17, %v1634_v0  ;;  %v1605_v42 = vmax.f32 %v1541_v50, %v1635_v27 }
  0xe9   : > { %1696 = vst.msk [vmem:[%s3482_s25 + $0x78] sm:$0xff] %vm243_vm0, %v1664_v18  ;;  %1728 = vst.msk [vmem:[#allocation2 + $0xb2] sm:$0xff] %vm243_vm0, %v1664_v18  ;;  %v1542_v56 = vmax.f32 %v1478_v16, %v1634_v0  ;;  %v1543_v26 = vmax.f32 %v1479_v28, %v1635_v27  ;;  %v1480_v15 = vmax.f32 %v1632_v40, %v1634_v0  ;;  %v3609_v40 = vld [vmem:[#allocation2 + $0x60] sm:$0xff] }
  0xea   : > { %1697 = vst.msk [vmem:[%s3482_s25 + $0x80] sm:$0xff] %vm243_vm0, %v1665_v19  ;;  %1729 = vst.msk [vmem:[#allocation2 + $0xc2] sm:$0xff] %vm243_vm0, %v1665_v19  ;;  %v1667_v43 = vmax.f32 %v1603_v6, %v1635_v27  ;;  %v1668_v23 = vmax.f32 %v1604_v31, %v1636_v49  ;;  %v1481_v33 = vmax.f32 %v1633_v61, %v1635_v27  ;;  %v3633_v18 = vld [vmem:[#allocation2 + $0x79] sm:$0xff]  ;;  %v3649_v31 = vld [vmem:[#allocation2 + $0x81] sm:$0xff] }
  0xeb   : > { %1698 = vst.msk [vmem:[%s3482_s25 + $0x88] sm:$0xff] %vm243_vm0, %v1666_v12  ;;  %1730 = vst.msk [vmem:[#allocation2 + $0xca] sm:$0xff] %vm243_vm0, %v1666_v12  ;;  %v1482_v55 = vmax.f32 %v1634_v0, %v1636_v49  ;;  %v1669_v57 = vmax.f32 %v1605_v42, %v1637_v59  ;;  %v1606_v29 = vmax.f32 %v1542_v56, %v1636_v49  ;;  %v3590_v53 = vld [vmem:[#allocation2 + $0x30] sm:$0xff]  ;;  %v3592_v10 = vld [vmem:[#allocation2 + $0x38] sm:$0xff] }
  0xec   : > { %v1607_v3 = vmax.f32 %v1543_v26, %v1637_v59  ;;  %v1544_v35 = vmax.f32 %v1480_v15, %v1636_v49  ;;  %1699 = vst.msk [vmem:[%s3482_s25 + $0x90] sm:$0xff] %vm243_vm0, %v1667_v43  ;;  %1731 = vst.msk [vmem:[#allocation2 + $0xda] sm:$0xff] %vm243_vm0, %v1667_v43  ;;  %v1545_v25 = vmax.f32 %v1481_v33, %v1637_v59  ;;  %v3607_v37 = vld [vmem:[#allocation2 + $0x48] sm:$0xff]  ;;  %v3613_v61 = vld [vmem:[#allocation2 + $0x31] sm:$0xff] }
  0xed   : > { %1700 = vst.msk [vmem:[%s3482_s25 + $0x98] sm:$0xff] %vm243_vm0, %v1668_v23  ;;  %1732 = vst.msk [vmem:[#allocation2 + $0xe2] sm:$0xff] %vm243_vm0, %v1668_v23  ;;  %v1546_v30 = vmax.f32 %v1482_v55, %v3561_v20  ;;  %v1483_v39 = vmax.f32 %v1635_v27, %v1637_v59  ;;  %v1484_v32 = vmax.f32 %v1636_v49, %v3561_v20  ;;  %v3615_v51 = vld [vmem:[#allocation2 + $0x39] sm:$0xff]  ;;  %v3625_v11 = vld [vmem:[#allocation2 + $0x50] sm:$0xff] }
  0xee   : > { %1701 = vst.msk [vmem:[%s3482_s25 + $0xa0] sm:$0xff] %vm243_vm0, %v1669_v57  ;;  %1733 = vst.msk [vmem:[#allocation2 + $0xf2] sm:$0xff] %vm243_vm0, %v1669_v57  ;;  %v1670_v63 = vmax.f32 %v1606_v29, %v3561_v20  ;;  %v1671_v9 = vmax.f32 %v1607_v3, %v1639_v44  ;;  %v1608_v45 = vmax.f32 %v1544_v35, %v3561_v20  ;;  %v3627_v0 = vld [vmem:[#allocation2 + $0x78] sm:$0xff]  ;;  %v3629_v24 = vld [vmem:[#allocation2 + $0x49] sm:$0xff] }
  0xef   : > { %v1485_v34 = vmax.f32 %v1637_v59, %v1639_v44  ;;  %v1609_v46 = vmax.f32 %v1545_v25, %v1639_v44  ;;  %v1610_v36 = vmax.f32 %v1546_v30, %v3575_v58  ;;  %v1547_v8 = vmax.f32 %v1483_v39, %v1639_v44  ;;  %v3631_v17 = vld [vmem:[#allocation2 + $0x51] sm:$0xff]  ;;  %v3641_v28 = vld [vmem:[#allocation2 + $0x80] sm:$0xff]  ;;  %v3647_v6 = vld [vmem:[#allocation2 + $0xa8] sm:$0xff] }
  0xf0   : > { %v1548_v7 = vmax.f32 %v1484_v32, %v3575_v58  ;;  %1702 = vst.msk [vmem:[%s3482_s25 + $0xa8] sm:$0xff] %vm243_vm0, %v1670_v63  ;;  %1734 = vst.msk [vmem:[#allocation2 + $0xfa] sm:$0xff] %vm243_vm0, %v1670_v63  ;;  %v1672_v38 = vmax.f32 %v1608_v45, %v3575_v58  ;;  %v1486_v13 = vmax.f32 %v3561_v20, %v3575_v58  ;;  %v3643_v19 = vld [vmem:[#allocation2 + $0x90] sm:$0xff]  ;;  %v3645_v12 = vld [vmem:[#allocation2 + $0x98] sm:$0xff] }
  0xf1   : > { %1703 = vst.msk [vmem:[%s3482_s25 + $0xb0] sm:$0xff] %vm243_vm0, %v1671_v9  ;;  %1735 = vst.msk [vmem:[#allocation2 + $0x10a] sm:$0xff] %vm243_vm0, %v1671_v9  ;;  %v1549_v41 = vmax.f32 %v1485_v34, %v3577_v2  ;;  %v1487_v60 = vmax.f32 %v1639_v44, %v3577_v2  ;;  %v1673_v22 = vmax.f32 %v1609_v46, %v3577_v2  ;;  %v3651_v42 = vld [vmem:[#allocation2 + $0x91] sm:$0xff]  ;;  %v3653_v59 = vld [vmem:[#allocation2 + $0x99] sm:$0xff] }
  0xf2   : > { %v1674_v47 = vmax.f32 %v1610_v36, %v3586_v62  ;;  %v1611_v1 = vmax.f32 %v1547_v8, %v3577_v2  ;;  %v1612_v48 = vmax.f32 %v1548_v7, %v3586_v62  ;;  %1704 = vst.msk [vmem:[%s3482_s25 + $0xb8] sm:$0xff] %vm243_vm0, %v1672_v38  ;;  %1736 = vst.msk [vmem:[#allocation2 + $0x112] sm:$0xff] %vm243_vm0, %v1672_v38  ;;  %v3655_v56 = vld [vmem:[#allocation2 + $0xa9] sm:$0xff]  ;;  %v3666_v44 = vld [vmem:[#allocation2 + $0xc0] sm:$0xff] }
  0xf3   : > { %v1613_v27 = vmax.f32 %v1549_v41, %v1643_v52  ;;  %v1550_v49 = vmax.f32 %v1486_v13, %v3586_v62  ;;  %v1551_v50 = vmax.f32 %v1487_v60, %v1643_v52  ;;  %v1488_v16 = vmax.f32 %v3575_v58, %v3586_v62  ;;  %1705 = vst.msk [vmem:[%s3482_s25 + $0xc0] sm:$0xff] %vm243_vm0, %v1673_v22  ;;  %v1646_v15 = vld [vmem:[#allocation3 + $0x128] sm:$0xff]  ;;  %v1647_v43 = vld [vmem:[#allocation3 + $0x130] sm:$0xff]  ;;  %v1648_v39 = vld [vmem:[#allocation3 + $0x138] sm:$0xff] }
  0xf4   : > { %1737 = vst.msk [vmem:[#allocation2 + $0x122] sm:$0xff] %vm243_vm0, %v1673_v22  ;;  %1706 = vst.msk [vmem:[%s3482_s25 + $0xc8] sm:$0xff] %vm243_vm0, %v1674_v47  ;;  %v1675_v20 = vmax.f32 %v1611_v1, %v1643_v52  ;;  %v1676_v26 = vmax.f32 %v1612_v48, %v3601_v54  ;;  %v3664_v23 = vld [vmem:[#allocation2 + $0xb0] sm:$0xff]  ;;  %v1813_v55 = vmax.f32 %v3590_v53, %v3613_v61  ;;  %v3676_v25 = vld [vmem:[#allocation2 + $0xc8] sm:$0xff] }
  0xf5   : > { %1738 = vst.msk [vmem:[#allocation2 + $0x12a] sm:$0xff] %vm243_vm0, %v1674_v47  ;;  %v3668_v33 = vld [vmem:[#allocation2 + $0xb1] sm:$0xff]  ;;  %v1814_v57 = vmax.f32 %v3592_v10, %v3615_v51  ;;  %v1677_v29 = vmax.f32 %v1613_v27, %v1645_v4  ;;  %v1614_v3 = vmax.f32 %v1550_v49, %v3601_v54  ;;  %v1615_v35 = vmax.f32 %v1551_v50, %v1645_v4  ;;  %v3678_v2 = vld [vmem:[#allocation2 + $0xc1] sm:$0xff]  ;;  %v3680_v30 = vld [vmem:[#allocation2 + $0xc9] sm:$0xff] }
  0xf6   : > { %v1552_v58 = vmax.f32 %v1488_v16, %v3601_v54  ;;  %1707 = vst.msk [vmem:[%s3482_s25 + $0xd0] sm:$0xff] %vm243_vm0, %v1675_v20  ;;  %1739 = vst.msk [vmem:[#allocation2 + $0x13a] sm:$0xff] %vm243_vm0, %v1675_v20  ;;  %v3688_v32 = vld [vmem:[#allocation2 + $0xd8] sm:$0xff]  ;;  %v3690_v63 = vld [vmem:[#allocation2 + $0xe0] sm:$0xff]  ;;  %v1815_v45 = vmax.f32 %v3607_v37, %v3629_v24  ;;  %v1816_v62 = vmax.f32 %v3625_v11, %v3631_v17 }
  0xf7   : > { %1708 = vst.msk [vmem:[%s3482_s25 + $0xd8] sm:$0xff] %vm243_vm0, %v1676_v26  ;;  %1740 = vst.msk [vmem:[#allocation2 + $0x142] sm:$0xff] %vm243_vm0, %v1676_v26  ;;  %v3692_v9 = vld [vmem:[#allocation2 + $0xd9] sm:$0xff]  ;;  %v1817_v34 = vmax.f32 %v3609_v40, %v3617_v5  ;;  %v1818_v46 = vmax.f32 %v3611_v21, %v3619_v14  ;;  %v1678_v36 = vmax.f32 %v1614_v3, %v1646_v15  ;;  %v3705_v7 = vld [vmem:[#allocation2 + $0xf0] sm:$0xff] }
  0xf8   : > { %1709 = vst.msk [vmem:[%s3482_s25 + $0xe0] sm:$0xff] %vm243_vm0, %v1677_v29  ;;  %1741 = vst.msk [vmem:[#allocation2 + $0x152] sm:$0xff] %vm243_vm0, %v1677_v29  ;;  %v1679_v8 = vmax.f32 %v1615_v35, %v1647_v43  ;;  %v1616_v52 = vmax.f32 %v1552_v58, %v1646_v15  ;;  %v3707_v38 = vld [vmem:[#allocation2 + $0xe1] sm:$0xff]  ;;  %v3709_v54 = vld [vmem:[#allocation2 + $0xf1] sm:$0xff]  ;;  %v1819_v41 = vmax.f32 %v3627_v0, %v3633_v18 }
  0xf9   : > { %v3713_v13 = vld [vmem:[#allocation2 + $0xf8] sm:$0xff]  ;;  %v3715_v60 = vld [vmem:[#allocation2 + $0x108] sm:$0xff]  ;;  %v1820_v40 = vmax.f32 %v3641_v28, %v3649_v31  ;;  %v1821_v5 = vmax.f32 %v3643_v19, %v3651_v42  ;;  %v1822_v22 = vmax.f32 %v3645_v12, %v3653_v59  ;;  %v1823_v47 = vmax.f32 %v3647_v6, %v3655_v56  ;;  %1710 = vst.msk [vmem:[%s3482_s25 + $0xe8] sm:$0xff] %vm243_vm0, %v1678_v36  ;;  %v3741_v49 = vld [vmem:[#allocation2 + $0x110] sm:$0xff] }
  0xfa   : > { %v3717_v37 = vld [vmem:[#allocation2 + $0xf9] sm:$0xff]  ;;  %1742 = vst.msk [vmem:[#allocation2 + $0x15a] sm:$0xff] %vm243_vm0, %v1678_v36  ;;  %1711 = vst.msk [vmem:[%s3482_s25 + $0xf0] sm:$0xff] %vm243_vm0, %v1679_v8  ;;  %v1680_v48 = vmax.f32 %v1616_v52, %v1648_v39  ;;  %v3733_v4 = vld [vmem:[#allocation2 + $0x109] sm:$0xff]  ;;  %v1824_v11 = vmax.f32 %v3664_v23, %v3668_v33  ;;  %v1825_v0 = vmax.f32 %v3666_v44, %v3678_v2 }
  0xfb   : > { %v1846_v1 = vld [vmem:[#allocation2 + $0x3a] sm:$0xff]  ;;  %1743 = vst.msk [vmem:[#allocation2 + $0x16a] sm:$0xff] %vm243_vm0, %v1679_v8  ;;  %v1826_v24 = vmax.f32 %v3676_v25, %v3680_v30  ;;  %v1845_v17 = vld [vmem:[#allocation2 + $0x32] sm:$0xff]  ;;  %v1849_v27 = vld [vmem:[#allocation2 + $0x62] sm:$0xff]  ;;  %v1827_v16 = vmax.f32 %v3688_v32, %v3692_v9  ;;  %v1828_v28 = vmax.f32 %v3690_v63, %v3707_v38  ;;  %v1829_v19 = vmax.f32 %v3705_v7, %v3709_v54 }
  0xfc   : > { %v1848_v18 = vld [vmem:[#allocation2 + $0x52] sm:$0xff]  ;;  %v1830_v12 = vmax.f32 %v3713_v13, %v3717_v37  ;;  %v1847_v6 = vld [vmem:[#allocation2 + $0x4a] sm:$0xff]  ;;  %v1851_v42 = vld [vmem:[#allocation2 + $0x7a] sm:$0xff]  ;;  %1712 = vst.msk [vmem:[%s3482_s25 + $0xf8] sm:$0xff] %vm243_vm0, %v1680_v48  ;;  %v1831_v15 = vmax.f32 %v3715_v60, %v3733_v4  ;;  %v3763_v29 = vmax.f32 %v1813_v55, %v1845_v17  ;;  %v3768_v3 = vmax.f32 %v1814_v57, %v1846_v1 }
  0xfd   : > { %v3743_v50 = vld [vmem:[#allocation2 + $0x111] sm:$0xff]  ;;  %v1852_v59 = vld [vmem:[#allocation2 + $0x82] sm:$0xff]  ;;  %1744 = vst.msk [vmem:[#allocation2 + $0x172] sm:$0xff] %vm243_vm0, %v1680_v48  ;;  %v1854_v44 = vld [vmem:[#allocation2 + $0x9a] sm:$0xff]  ;;  %v3770_v39 = vmax.f32 %v1815_v45, %v1847_v6  ;;  %v3772_v32 = vmax.f32 %v1816_v62, %v1848_v18  ;;  %v3774_v63 = vmax.f32 %v1817_v34, %v1849_v27  ;;  %v3781_v52 = vmax.f32 %v1819_v41, %v1851_v42 }
  0xfe   : > { %v1850_v31 = vld [vmem:[#allocation2 + $0x6a] sm:$0xff]  ;;  %v1769_v56 = vld [vmem:[#allocation2 + $0x120] sm:$0xff]  ;;  %v1832_v43 = vmax.f32 %v3741_v49, %v3743_v50  ;;  %v1853_v23 = vld [vmem:[#allocation2 + $0x92] sm:$0xff]  ;;  %v3783_v45 = vmax.f32 %v1820_v40, %v1852_v59  ;;  %v3787_v13 = vmax.f32 %v1822_v22, %v1854_v44 }
  0xff   : > { %v1770_v20 = vld [vmem:[#allocation2 + $0x128] sm:$0xff]  ;;  %v1856_v25 = vld [vmem:[#allocation2 + $0xb2] sm:$0xff]  ;;  %v1772_v53 = vld [vmem:[#allocation2 + $0x140] sm:$0xff]  ;;  %v3779_v57 = vmax.f32 %v1818_v46, %v1850_v31  ;;  %v3785_v54 = vmax.f32 %v1821_v5, %v1853_v23 }
 0x100   : > { %v1801_v26 = vld [vmem:[#allocation2 + $0x121] sm:$0xff]  ;;  %v1855_v33 = vld [vmem:[#allocation2 + $0xaa] sm:$0xff]  ;;  %v1771_v9 = vld [vmem:[#allocation2 + $0x138] sm:$0xff]  ;;  %v3791_v14 = vmax.f32 %v1824_v11, %v1856_v25 }
 0x101   : > { %v1802_v35 = vld [vmem:[#allocation2 + $0x129] sm:$0xff]  ;;  %v1833_v58 = vmax.f32 %v1769_v56, %v1801_v26  ;;  %v1803_v61 = vld [vmem:[#allocation2 + $0x139] sm:$0xff]  ;;  %v1804_v62 = vld [vmem:[#allocation2 + $0x141] sm:$0xff]  ;;  %v3789_v60 = vmax.f32 %v1823_v47, %v1855_v33 }
 0x102   : > { %v1857_v2 = vld [vmem:[#allocation2 + $0xc2] sm:$0xff]  ;;  %v1858_v30 = vld [vmem:[#allocation2 + $0xca] sm:$0xff]  ;;  %v1834_v55 = vmax.f32 %v1770_v20, %v1802_v35  ;;  %v1859_v36 = vld [vmem:[#allocation2 + $0xda] sm:$0xff]  ;;  %v1835_v34 = vmax.f32 %v1771_v9, %v1803_v61  ;;  %v1836_v37 = vmax.f32 %v1772_v53, %v1804_v62 }
 0x103   : > { %v1860_v8 = vld [vmem:[#allocation2 + $0xe2] sm:$0xff]  ;;  %v1861_v10 = vld [vmem:[#allocation2 + $0xf2] sm:$0xff]  ;;  %v1862_v51 = vld [vmem:[#allocation2 + $0xfa] sm:$0xff]  ;;  %v3793_v46 = vmax.f32 %v1825_v0, %v1857_v2  ;;  %v3795_v41 = vmax.f32 %v1826_v24, %v1858_v30  ;;  %v3799_v17 = vmax.f32 %v1827_v16, %v1859_v36 }
 0x104   : > { %v1863_v7 = vld [vmem:[#allocation2 + $0x10a] sm:$0xff]  ;;  %v1864_v38 = vld [vmem:[#allocation2 + $0x112] sm:$0xff]  ;;  %v1865_v1 = vld [vmem:[#allocation2 + $0x122] sm:$0xff]  ;;  %v3801_v5 = vmax.f32 %v1828_v28, %v1860_v8  ;;  %v3803_v22 = vmax.f32 %v1829_v19, %v1861_v10  ;;  %v3805_v47 = vmax.f32 %v1830_v12, %v1862_v51 }
 0x105   : > { %v1866_v48 = vld [vmem:[#allocation2 + $0x12a] sm:$0xff]  ;;  %v1867_v21 = vld [vmem:[#allocation2 + $0x13a] sm:$0xff]  ;;  %v1868_v4 = vld [vmem:[#allocation2 + $0x142] sm:$0xff]  ;;  %v3815_v24 = vmax.f32 %v1831_v15, %v1863_v7  ;;  %v3817_v49 = vmax.f32 %v1832_v43, %v1864_v38  ;;  %v3819_v50 = vmax.f32 %v1833_v58, %v1865_v1 }
 0x106   : > { %v3797_v40 = vld [vmem:[#allocation2 + $0x3b] sm:$0xff]  ;;  %v3807_v18 = vld [vmem:[#allocation2 + $0x33] sm:$0xff]  ;;  %v3809_v27 = vld [vmem:[#allocation2 + $0x4b] sm:$0xff]  ;;  %v3821_v16 = vmax.f32 %v1834_v55, %v1866_v48  ;;  %v3829_v6 = vmax.f32 %v1835_v34, %v1867_v21  ;;  %v3831_v31 = vmax.f32 %v1836_v37, %v1868_v4 }
 0x107   : > { %v3811_v11 = vld [vmem:[#allocation2 + $0x63] sm:$0xff]  ;;  %v3813_v0 = vld [vmem:[#allocation2 + $0x6b] sm:$0xff]  ;;  %v3823_v28 = vld [vmem:[#allocation2 + $0x53] sm:$0xff]  ;;  %v1941_v20 = vmax.f32 %v3763_v29, %v3807_v18  ;;  %v1942_v26 = vmax.f32 %v3768_v3, %v3797_v40  ;;  %v1943_v44 = vmax.f32 %v3770_v39, %v3809_v27 }
 0x108   : > { %v3825_v19 = vld [vmem:[#allocation2 + $0x7b] sm:$0xff]  ;;  %v3827_v12 = vld [vmem:[#allocation2 + $0x83] sm:$0xff]  ;;  %v3833_v42 = vld [vmem:[#allocation2 + $0x93] sm:$0xff]  ;;  %v1944_v33 = vmax.f32 %v3772_v32, %v3823_v28  ;;  %v1945_v35 = vmax.f32 %v3774_v63, %v3811_v11  ;;  %v1946_v29 = vmax.f32 %v3779_v57, %v3813_v0 }
 0x109   : > { %v3835_v59 = vld [vmem:[#allocation2 + $0x9b] sm:$0xff]  ;;  %v3837_v56 = vld [vmem:[#allocation2 + $0xab] sm:$0xff]  ;;  %v3843_v15 = vld [vmem:[#allocation2 + $0xb3] sm:$0xff]  ;;  %v1947_v39 = vmax.f32 %v3781_v52, %v3825_v19  ;;  %v1948_v32 = vmax.f32 %v3783_v45, %v3827_v12  ;;  %v1949_v63 = vmax.f32 %v3785_v54, %v3833_v42 }
 0x10a   : > { %v3845_v43 = vld [vmem:[#allocation2 + $0xc3] sm:$0xff]  ;;  %v3847_v23 = vld [vmem:[#allocation2 + $0xcb] sm:$0xff]  ;;  %v3857_v25 = vld [vmem:[#allocation2 + $0xdb] sm:$0xff]  ;;  %v1950_v9 = vmax.f32 %v3787_v13, %v3835_v59  ;;  %v1951_v36 = vmax.f32 %v3789_v60, %v3837_v56  ;;  %v1952_v8 = vmax.f32 %v3791_v14, %v3843_v15 }
 0x10b   : > { %v1745_v58 = vld [vmem:[#allocation2] sm:$0xff]  ;;  %v3861_v30 = vld [vmem:[#allocation2 + $0xf3] sm:$0xff]  ;;  %v3873_v61 = vld [vmem:[#allocation2 + $0x10b] sm:$0xff]  ;;  %v1953_v10 = vmax.f32 %v3793_v46, %v3845_v43  ;;  %v1954_v51 = vmax.f32 %v3795_v41, %v3847_v23  ;;  %v1955_v62 = vmax.f32 %v3799_v17, %v3857_v25 }
 0x10c   : > { %v1777_v3 = vld [vmem:[#allocation2 + $0x1] sm:$0xff]  ;;  %v3875_v55 = vld [vmem:[#allocation2 + $0x113] sm:$0xff]  ;;  %v3887_v52 = vld [vmem:[#allocation2 + $0x12b] sm:$0xff]  ;;  %v1957_v7 = vmax.f32 %v3803_v22, %v3861_v30 }
 0x10d   : > { %v3859_v2 = vld [vmem:[#allocation2 + $0xe3] sm:$0xff]  ;;  %v3871_v53 = vld [vmem:[#allocation2 + $0xfb] sm:$0xff]  ;;  %v1978_v46 = vld [vmem:[#allocation2 + $0x6c] sm:$0xff]  ;;  %v1809_v11 = vmax.f32 %v1745_v58, %v1777_v3 }
 0x10e   : > { %v3885_v57 = vld [vmem:[#allocation2 + $0x123] sm:$0xff]  ;;  %v3889_v45 = vld [vmem:[#allocation2 + $0x13b] sm:$0xff]  ;;  %v1956_v34 = vmax.f32 %v3801_v5, %v3859_v2  ;;  %v1958_v38 = vmax.f32 %v3805_v47, %v3871_v53  ;;  %v1975_v17 = vld [vmem:[#allocation2 + $0x4c] sm:$0xff]  ;;  %v2010_v4 = vmax.f32 %v1946_v29, %v1978_v46  ;;  %v4139_v5 = vmax.f32 %v3817_v49, %v3875_v55 }
 0x10f   : > { %v1977_v54 = vld [vmem:[#allocation2 + $0x64] sm:$0xff]  ;;  %v1973_v21 = vld [vmem:[#allocation2 + $0x34] sm:$0xff]  ;;  %v1974_v14 = vld [vmem:[#allocation2 + $0x3c] sm:$0xff]  ;;  %v2007_v56 = vmax.f32 %v1943_v44, %v1975_v17  ;;  %v4140_v47 = vmax.f32 %v3819_v50, %v3885_v57  ;;  %v4142_v49 = vmax.f32 %v3829_v6, %v3889_v45 }
 0x110   : > { %v3899_v13 = vld [vmem:[#allocation2 + $0x143] sm:$0xff]  ;;  %v1976_v18 = vld [vmem:[#allocation2 + $0x54] sm:$0xff]  ;;  %v2005_v0 = vmax.f32 %v1941_v20, %v1973_v21  ;;  %v2006_v59 = vmax.f32 %v1942_v26, %v1974_v14  ;;  %v2009_v43 = vmax.f32 %v1945_v35, %v1977_v54  ;;  %v1983_v23 = vld [vmem:[#allocation2 + $0xac] sm:$0xff]  ;;  %2042 = vst.msk [vmem:[#allocation3 + $0x68] sm:$0xff] %vm243_vm0, %v2010_v4 }
 0x111   : > { %v1841_v41 = vld [vmem:[#allocation2 + $0x2] sm:$0xff]  ;;  %v1981_v19 = vld [vmem:[#allocation2 + $0x94] sm:$0xff]  ;;  %v2008_v15 = vmax.f32 %v1944_v33, %v1976_v18  ;;  %v1986_v60 = vld [vmem:[#allocation2 + $0xcc] sm:$0xff]  ;;  %2039 = vst.msk [vmem:[#allocation3 + $0x50] sm:$0xff] %vm243_vm0, %v2007_v56  ;;  %v2015_v33 = vmax.f32 %v1951_v36, %v1983_v23  ;;  %v4143_v50 = vmax.f32 %v3831_v31, %v3899_v13 }
 0x112   : > { %v1979_v27 = vld [vmem:[#allocation2 + $0x7c] sm:$0xff]  ;;  %v1980_v28 = vld [vmem:[#allocation2 + $0x84] sm:$0xff]  ;;  %v1984_v25 = vld [vmem:[#allocation2 + $0xb4] sm:$0xff]  ;;  %v1873_v40 = vmax.f32 %v1809_v11, %v1841_v41  ;;  %2037 = vst.msk [vmem:[#allocation3 + $0x40] sm:$0xff] %vm243_vm0, %v2005_v0  ;;  %v2013_v26 = vmax.f32 %v1949_v63, %v1981_v19  ;;  %v2018_v14 = vmax.f32 %v1954_v51, %v1986_v60 }
 0x113   : > { %v1982_v12 = vld [vmem:[#allocation2 + $0x9c] sm:$0xff]  ;;  %v1985_v48 = vld [vmem:[#allocation2 + $0xc4] sm:$0xff]  ;;  %v2011_v1 = vmax.f32 %v1947_v39, %v1979_v27  ;;  %v2012_v37 = vmax.f32 %v1948_v32, %v1980_v28  ;;  %2038 = vst.msk [vmem:[#allocation3 + $0x48] sm:$0xff] %vm243_vm0, %v2006_v59  ;;  %2040 = vst.msk [vmem:[#allocation3 + $0x58] sm:$0xff] %vm243_vm0, %v2008_v15  ;;  %v2016_v35 = vmax.f32 %v1952_v8, %v1984_v25 }
 0x114   : > { %v1905_v42 = vld [vmem:[#allocation2 + $0x3] sm:$0xff]  ;;  %2041 = vst.msk [vmem:[#allocation3 + $0x60] sm:$0xff] %vm243_vm0, %v2009_v43  ;;  %v2014_v44 = vmax.f32 %v1950_v9, %v1982_v12  ;;  %v1989_v54 = vld [vmem:[#allocation2 + $0xf4] sm:$0xff]  ;;  %v1991_v39 = vld [vmem:[#allocation2 + $0x10c] sm:$0xff]  ;;  %v2017_v21 = vmax.f32 %v1953_v10, %v1985_v48  ;;  %v4138_v8 = vmax.f32 %v3815_v24, %v3873_v61  ;;  %v4141_v24 = vmax.f32 %v3821_v16, %v3887_v52 }
 0x115   : > { %v1987_v58 = vld [vmem:[#allocation2 + $0xdc] sm:$0xff]  ;;  %v1988_v20 = vld [vmem:[#allocation2 + $0xe4] sm:$0xff]  ;;  %v1937_v32 = vmax.f32 %v1873_v40, %v1905_v42  ;;  %2043 = vst.msk [vmem:[#allocation3 + $0x70] sm:$0xff] %vm243_vm0, %v2011_v1  ;;  %2044 = vst.msk [vmem:[#allocation3 + $0x78] sm:$0xff] %vm243_vm0, %v2012_v37  ;;  %v2021_v9 = vmax.f32 %v1957_v7, %v1989_v54 }
 0x116   : > { %v1969_v3 = vld [vmem:[#allocation2 + $0x4] sm:$0xff]  ;;  %v1990_v29 = vld [vmem:[#allocation2 + $0xfc] sm:$0xff]  ;;  %v2019_v46 = vmax.f32 %v1955_v62, %v1987_v58  ;;  %v1992_v41 = vld [vmem:[#allocation2 + $0x114] sm:$0xff]  ;;  %2045 = vst.msk [vmem:[#allocation3 + $0x80] sm:$0xff] %vm243_vm0, %v2013_v26  ;;  %v2020_v63 = vmax.f32 %v1956_v34, %v1988_v20  ;;  %v2023_v10 = vmax.f32 %v4138_v8, %v1991_v39 }
 0x117   : > { %v1993_v17 = vld [vmem:[#allocation2 + $0x124] sm:$0xff]  ;;  %v1994_v18 = vld [vmem:[#allocation2 + $0x12c] sm:$0xff]  ;;  %2046 = vst.msk [vmem:[#allocation3 + $0x88] sm:$0xff] %vm243_vm0, %v2014_v44  ;;  %2047 = vst.msk [vmem:[#allocation3 + $0x90] sm:$0xff] %vm243_vm0, %v2015_v33  ;;  %v2022_v36 = vmax.f32 %v1958_v38, %v1990_v29  ;;  %v2001_v60 = vmax.f32 %v1937_v32, %v1969_v3  ;;  %v2024_v22 = vmax.f32 %v4139_v5, %v1992_v41 }
 0x118   : > { %2048 = vst.msk [vmem:[#allocation3 + $0x98] sm:$0xff] %vm243_vm0, %v2016_v35  ;;  %v1995_v51 = vld [vmem:[#allocation2 + $0x13c] sm:$0xff]  ;;  %v1996_v62 = vld [vmem:[#allocation2 + $0x144] sm:$0xff]  ;;  %2049 = vst.msk [vmem:[#allocation3 + $0xa0] sm:$0xff] %vm243_vm0, %v2017_v21  ;;  %v2025_v2 = vmax.f32 %v4140_v47, %v1993_v17  ;;  %v2026_v30 = vmax.f32 %v4141_v24, %v1994_v18 }
 0x119   : > { %v1746_v37 = vld [vmem:[#allocation2 + $0x8] sm:$0xff]  ;;  %2050 = vst.msk [vmem:[#allocation3 + $0xa8] sm:$0xff] %vm243_vm0, %v2018_v14  ;;  %2051 = vst.msk [vmem:[#allocation3 + $0xb0] sm:$0xff] %vm243_vm0, %v2019_v46  ;;  %v2027_v61 = vmax.f32 %v4142_v49, %v1995_v51  ;;  %v2028_v55 = vmax.f32 %v4143_v50, %v1996_v62  ;;  %v1747_v57 = vld [vmem:[#allocation2 + $0x18] sm:$0xff] }
 0x11a   : > { %v1778_v53 = vld [vmem:[#allocation2 + $0x9] sm:$0xff]  ;;  %2052 = vst.msk [vmem:[#allocation3 + $0xb8] sm:$0xff] %vm243_vm0, %v2020_v63  ;;  %2053 = vst.msk [vmem:[#allocation3 + $0xc0] sm:$0xff] %vm243_vm0, %v2021_v9  ;;  %v1779_v52 = vld [vmem:[#allocation2 + $0x19] sm:$0xff] }
 0x11b   : > { %2054 = vst.msk [vmem:[#allocation3 + $0xc8] sm:$0xff] %vm243_vm0, %v2022_v36  ;;  %2055 = vst.msk [vmem:[#allocation3 + $0xd0] sm:$0xff] %vm243_vm0, %v2023_v10  ;;  %v1810_v16 = vmax.f32 %v1746_v37, %v1778_v53  ;;  %v1842_v34 = vld [vmem:[#allocation2 + $0xa] sm:$0xff]  ;;  %v1811_v38 = vmax.f32 %v1747_v57, %v1779_v52  ;;  %v1843_v31 = vld [vmem:[#allocation2 + $0x1a] sm:$0xff] }
 0x11c   : > { %2033 = vst.msk [vmem:[#allocation3 + $0x20] sm:$0xff] %vm243_vm0, %v2001_v60  ;;  %2056 = vst.msk [vmem:[#allocation3 + $0xd8] sm:$0xff] %vm243_vm0, %v2024_v22  ;;  %v1906_v7 = vld [vmem:[#allocation2 + $0xb] sm:$0xff]  ;;  %v1748_v45 = vld [vmem:[#allocation2 + $0x20] sm:$0xff] }
 0x11d   : > { %2057 = vst.msk [vmem:[#allocation3 + $0xe0] sm:$0xff] %vm243_vm0, %v2025_v2  ;;  %2058 = vst.msk [vmem:[#allocation3 + $0xe8] sm:$0xff] %vm243_vm0, %v2026_v30  ;;  %v1874_v6 = vmax.f32 %v1810_v16, %v1842_v34  ;;  %v1780_v13 = vld [vmem:[#allocation2 + $0x21] sm:$0xff]  ;;  %v1970_v1 = vld [vmem:[#allocation2 + $0xc] sm:$0xff]  ;;  %v1875_v48 = vmax.f32 %v1811_v38, %v1843_v31 }
 0x11e   : > { %2059 = vst.msk [vmem:[#allocation3 + $0xf0] sm:$0xff] %vm243_vm0, %v2027_v61  ;;  %2060 = vst.msk [vmem:[#allocation3 + $0xf8] sm:$0xff] %vm243_vm0, %v2028_v55  ;;  %v1907_v40 = vld [vmem:[#allocation2 + $0x1b] sm:$0xff]  ;;  %v1812_v4 = vmax.f32 %v1748_v45, %v1780_v13  ;;  %v1773_v27 = vld [vmem:[#allocation2 + $0x150] sm:$0xff] }
 0x11f   : > { %v1938_v11 = vmax.f32 %v1874_v6, %v1906_v7  ;;  %v1971_v0 = vld [vmem:[#allocation2 + $0x1c] sm:$0xff]  ;;  %v1805_v19 = vld [vmem:[#allocation2 + $0x151] sm:$0xff]  ;;  %v1939_v59 = vmax.f32 %v1875_v48, %v1907_v40  ;;  %v1972_v20 = vld [vmem:[#allocation2 + $0x24] sm:$0xff] }
 0x120   : > { %v1844_v28 = vld [vmem:[#allocation2 + $0x22] sm:$0xff]  ;;  %v3965_v42 = vld [vmem:[#allocation3 + $0x10] sm:$0xff]  ;;  %v1837_v43 = vmax.f32 %v1773_v27, %v1805_v19  ;;  %v1774_v23 = vld [vmem:[#allocation2 + $0x158] sm:$0xff] }
 0x121   : > { %v2065_v12 = vld [vmem:[#allocation3] sm:$0xff]  ;;  %v1876_v56 = vmax.f32 %v1812_v4, %v1844_v28  ;;  %v2002_v58 = vmax.f32 %v1938_v11, %v1970_v1  ;;  %v1869_v3 = vld [vmem:[#allocation2 + $0x152] sm:$0xff]  ;;  %v3967_v33 = vld [vmem:[#allocation3 + $0x8] sm:$0xff]  ;;  %v2003_v54 = vmax.f32 %v1939_v59, %v1971_v0 }
 0x122   : > { %v1908_v15 = vld [vmem:[#allocation2 + $0x23] sm:$0xff]  ;;  %v1806_v25 = vld [vmem:[#allocation2 + $0x159] sm:$0xff]  ;;  %v1901_v39 = vmax.f32 %v1837_v43, %v1869_v3  ;;  %v1776_v63 = vld [vmem:[#allocation2 + $0x170] sm:$0xff]  ;;  %v2129_v60 = vmax.f32 %v2065_v12, %v3965_v42 }
 0x123   : > { %v1933_v26 = vld [vmem:[#allocation2 + $0x153] sm:$0xff]  ;;  %v1838_v44 = vmax.f32 %v1774_v23, %v1806_v25  ;;  %v1940_v29 = vmax.f32 %v1876_v56, %v1908_v15  ;;  %v1775_v21 = vld [vmem:[#allocation2 + $0x168] sm:$0xff]  ;;  %2034 = vst.msk [vmem:[#allocation3 + $0x28] sm:$0xff] %vm243_vm0, %v2002_v58  ;;  %v1934_v17 = vld [vmem:[#allocation2 + $0x15b] sm:$0xff] }
 0x124   : > { %v3969_v35 = vld [vmem:[#allocation3 + $0x18] sm:$0xff]  ;;  %v1807_v14 = vld [vmem:[#allocation2 + $0x169] sm:$0xff]  ;;  %2035 = vst.msk [vmem:[#allocation3 + $0x30] sm:$0xff] %vm243_vm0, %v2003_v54  ;;  %v1965_v36 = vmax.f32 %v1901_v39, %v1933_v26  ;;  %v2161_v2 = vld [vmem:[#allocation3 + $0x20] sm:$0xff] }
 0x125   : > { %v1870_v32 = vld [vmem:[#allocation2 + $0x15a] sm:$0xff]  ;;  %v1839_v18 = vmax.f32 %v1775_v21, %v1807_v14  ;;  %v2004_v9 = vmax.f32 %v1940_v29, %v1972_v20  ;;  %v1871_v10 = vld [vmem:[#allocation2 + $0x16a] sm:$0xff]  ;;  %v1872_v47 = vld [vmem:[#allocation2 + $0x172] sm:$0xff]  ;;  %v2193_v53 = vmax.f32 %v2129_v60, %v2161_v2  ;;  %v2130_v49 = vmax.f32 %v3967_v33, %v3969_v35 }
 0x126   : > { %v1997_v46 = vld [vmem:[#allocation2 + $0x154] sm:$0xff]  ;;  %v1902_v41 = vmax.f32 %v1838_v44, %v1870_v32  ;;  %v1998_v8 = vld [vmem:[#allocation2 + $0x15c] sm:$0xff]  ;;  %v1935_v51 = vld [vmem:[#allocation2 + $0x16b] sm:$0xff]  ;;  %v2131_v50 = vmax.f32 %v3965_v42, %v2161_v2 }
 0x127   : > { %v1808_v62 = vld [vmem:[#allocation2 + $0x171] sm:$0xff]  ;;  %v1903_v5 = vmax.f32 %v1839_v18, %v1871_v10  ;;  %v3974_v24 = vld [vmem:[#allocation3 + $0x40] sm:$0xff]  ;;  %2036 = vst.msk [vmem:[#allocation3 + $0x38] sm:$0xff] %vm243_vm0, %v2004_v9  ;;  %v2029_v30 = vmax.f32 %v1965_v36, %v1997_v46  ;;  %v3979_v61 = vld [vmem:[#allocation3 + $0x48] sm:$0xff] }
 0x128   : > { %v1966_v37 = vmax.f32 %v1902_v41, %v1934_v17  ;;  %v1840_v22 = vmax.f32 %v1776_v63, %v1808_v62  ;;  %v3982_v55 = vld [vmem:[#allocation3 + $0x50] sm:$0xff]  ;;  %v3984_v16 = vld [vmem:[#allocation3 + $0x58] sm:$0xff]  ;;  %v3986_v7 = vld [vmem:[#allocation3 + $0x60] sm:$0xff] }
 0x129   : > { %v1967_v52 = vmax.f32 %v1903_v5, %v1935_v51  ;;  %v3988_v38 = vld [vmem:[#allocation3 + $0x68] sm:$0xff]  ;;  %v3990_v6 = vld [vmem:[#allocation3 + $0x70] sm:$0xff]  ;;  %v2137_v31 = vmax.f32 %v3974_v24, %v3982_v55  ;;  %2061 = vst.msk [vmem:[#allocation3 + $0x100] sm:$0xff] %vm243_vm0, %v2029_v30  ;;  %v3995_v1 = vld [vmem:[#allocation3 + $0x78] sm:$0xff]  ;;  %v2138_v48 = vmax.f32 %v3979_v61, %v3984_v16  ;;  %v2139_v40 = vmax.f32 %v3982_v55, %v3986_v7 }
 0x12a   : > { %v2030_v57 = vmax.f32 %v1966_v37, %v1998_v8  ;;  %v1904_v34 = vmax.f32 %v1840_v22, %v1872_v47  ;;  %v1999_v45 = vld [vmem:[#allocation2 + $0x16c] sm:$0xff]  ;;  %v2140_v4 = vmax.f32 %v3984_v16, %v3988_v38  ;;  %v2141_v27 = vmax.f32 %v3986_v7, %v3990_v6  ;;  %v4007_v19 = vld [vmem:[#allocation3 + $0x80] sm:$0xff]  ;;  %v2000_v42 = vld [vmem:[#allocation2 + $0x174] sm:$0xff] }
 0x12b   : > { %v1936_v13 = vld [vmem:[#allocation2 + $0x173] sm:$0xff]  ;;  %v2031_v11 = vmax.f32 %v1967_v52, %v1999_v45  ;;  %v2201_v28 = vmax.f32 %v2137_v31, %v3986_v7  ;;  %v2142_v12 = vmax.f32 %v3988_v38, %v3995_v1  ;;  %v2162_v59 = vld [vmem:[#allocation3 + $0x28] sm:$0xff]  ;;  %v2202_v56 = vmax.f32 %v2138_v48, %v3988_v38  ;;  %v2301_v31 = vld [vmem:[#allocation3 + $0xa0] sm:$0xff] }
 0x12c   : > { %2062 = vst.msk [vmem:[#allocation3 + $0x108] sm:$0xff] %vm243_vm0, %v2030_v57  ;;  %v1968_v0 = vmax.f32 %v1904_v34, %v1936_v13  ;;  %v2203_v15 = vmax.f32 %v2139_v40, %v3990_v6  ;;  %v2204_v43 = vmax.f32 %v2140_v4, %v3995_v1  ;;  %v2205_v23 = vmax.f32 %v2141_v27, %v4007_v19  ;;  %v2225_v58 = vld [vmem:[#allocation3 + $0x30] sm:$0xff]  ;;  %v4019_v39 = vld [vmem:[#allocation3 + $0x88] sm:$0xff]  ;;  %v2300_v30 = vld [vmem:[#allocation3 + $0x98] sm:$0xff] }
 0x12d   : > { %2063 = vst.msk [vmem:[#allocation3 + $0x110] sm:$0xff] %vm243_vm0, %v2031_v11  ;;  %v2194_v20 = vmax.f32 %v2130_v49, %v2162_v59  ;;  %v2132_v3 = vmax.f32 %v3969_v35, %v2162_v59  ;;  %v2265_v26 = vmax.f32 %v2201_v28, %v3990_v6  ;;  %v2257_v44 = vmax.f32 %v2193_v53, %v2225_v58  ;;  %v2303_v48 = vld [vmem:[#allocation3 + $0xb0] sm:$0xff] }
 0x12e   : > { %v2032_v25 = vmax.f32 %v1968_v0, %v2000_v42  ;;  %v2195_v33 = vmax.f32 %v2131_v50, %v2225_v58  ;;  %v2133_v54 = vmax.f32 %v2161_v2, %v2225_v58  ;;  %v2135_v29 = vmax.f32 %v2225_v58, %v3974_v24  ;;  %v2226_v32 = vld [vmem:[#allocation3 + $0x38] sm:$0xff] }
 0x12f   : > { %v2329_v35 = vmax.f32 %v2265_v26, %v4007_v19  ;;  %v2266_v21 = vmax.f32 %v2202_v56, %v3995_v1  ;;  %v2267_v14 = vmax.f32 %v2203_v15, %v4007_v19  ;;  %v2268_v46 = vmax.f32 %v2204_v43, %v4019_v39  ;;  %v2306_v26 = vld [vmem:[#allocation3 + $0xc8] sm:$0xff] }
 0x130   : > { %2064 = vst.msk [vmem:[#allocation3 + $0x118] sm:$0xff] %vm243_vm0, %v2032_v25  ;;  %v2321_v41 = vmax.f32 %v2257_v44, %v3974_v24  ;;  %v2258_v17 = vmax.f32 %v2194_v20, %v2226_v32  ;;  %v2259_v18 = vmax.f32 %v2195_v33, %v3974_v24  ;;  %v2196_v63 = vmax.f32 %v2132_v3, %v2226_v32  ;;  %v2305_v25 = vld [vmem:[#allocation3 + $0xc0] sm:$0xff] }
 0x131   : > { %v2197_v9 = vmax.f32 %v2133_v54, %v3974_v24  ;;  %v2134_v36 = vmax.f32 %v2162_v59, %v2226_v32  ;;  %v2199_v8 = vmax.f32 %v2135_v29, %v3982_v55  ;;  %v2136_v10 = vmax.f32 %v2226_v32, %v3979_v61  ;;  %2361 = vst.msk [vmem:[%s4026_s28 + $0x40] sm:$0xff] %vm243_vm0, %v2329_v35  ;;  %v2299_v24 = vld [vmem:[#allocation3 + $0x90] sm:$0xff]  ;;  %v2308_v35 = vld [vmem:[#allocation3 + $0xd8] sm:$0xff] }
 0x132   : > { %2353 = vst.msk [vmem:[%s4026_s28] sm:$0xff] %vm243_vm0, %v2321_v41  ;;  %v2322_v51 = vmax.f32 %v2258_v17, %v3979_v61  ;;  %v2323_v62 = vmax.f32 %v2259_v18, %v3982_v55  ;;  %v2260_v60 = vmax.f32 %v2196_v63, %v3979_v61  ;;  %v2330_v37 = vmax.f32 %v2266_v21, %v4019_v39  ;;  %v2307_v32 = vld [vmem:[#allocation3 + $0xd0] sm:$0xff]  ;;  %v2309_v18 = vld [vmem:[#allocation3 + $0xe0] sm:$0xff] }
 0x133   : > { %v2261_v5 = vmax.f32 %v2197_v9, %v3982_v55  ;;  %v2198_v22 = vmax.f32 %v2134_v36, %v3979_v61  ;;  %v2263_v47 = vmax.f32 %v2199_v8, %v3986_v7  ;;  %v2200_v2 = vmax.f32 %v2136_v10, %v3984_v16  ;;  %v2310_v36 = vld [vmem:[#allocation3 + $0xe8] sm:$0xff]  ;;  %v2311_v10 = vld [vmem:[#allocation3 + $0xf0] sm:$0xff] }
 0x134   : > { %2354 = vst.msk [vmem:[%s4026_s28 + $0x8] sm:$0xff] %vm243_vm0, %v2322_v51  ;;  %2355 = vst.msk [vmem:[%s4026_s28 + $0x10] sm:$0xff] %vm243_vm0, %v2323_v62  ;;  %v2324_v53 = vmax.f32 %v2260_v60, %v3984_v16  ;;  %v2331_v49 = vmax.f32 %v2267_v14, %v2299_v24  ;;  %v2332_v50 = vmax.f32 %v2268_v46, %v2300_v30 }
 0x135   : > { %2362 = vst.msk [vmem:[%s4026_s28 + $0x48] sm:$0xff] %vm243_vm0, %v2330_v37  ;;  %v2269_v61 = vmax.f32 %v2205_v23, %v2299_v24  ;;  %v2325_v55 = vmax.f32 %v2261_v5, %v3986_v7  ;;  %v2262_v57 = vmax.f32 %v2198_v22, %v3984_v16  ;;  %v2327_v52 = vmax.f32 %v2263_v47, %v3990_v6  ;;  %v2302_v7 = vld [vmem:[#allocation3 + $0xa8] sm:$0xff] }
 0x136   : > { %v2264_v34 = vmax.f32 %v2200_v2, %v3988_v38  ;;  %2356 = vst.msk [vmem:[%s4026_s28 + $0x18] sm:$0xff] %vm243_vm0, %v2324_v53  ;;  %2363 = vst.msk [vmem:[%s4026_s28 + $0x50] sm:$0xff] %vm243_vm0, %v2331_v49  ;;  %v2206_v13 = vmax.f32 %v2142_v12, %v4019_v39  ;;  %v2143_v16 = vmax.f32 %v3990_v6, %v4007_v19 }
 0x137   : > { %2364 = vst.msk [vmem:[%s4026_s28 + $0x58] sm:$0xff] %vm243_vm0, %v2332_v50  ;;  %v2333_v45 = vmax.f32 %v2269_v61, %v2301_v31  ;;  %v2144_v40 = vmax.f32 %v3995_v1, %v4019_v39  ;;  %2357 = vst.msk [vmem:[%s4026_s28 + $0x20] sm:$0xff] %vm243_vm0, %v2325_v55  ;;  %v2326_v4 = vmax.f32 %v2262_v57, %v3988_v38  ;;  %v2304_v38 = vld [vmem:[#allocation3 + $0xb8] sm:$0xff] }
 0x138   : > { %2359 = vst.msk [vmem:[%s4026_s28 + $0x30] sm:$0xff] %vm243_vm0, %v2327_v52  ;;  %v2328_v27 = vmax.f32 %v2264_v34, %v3995_v1  ;;  %v2145_v11 = vmax.f32 %v4007_v19, %v2299_v24  ;;  %v2146_v0 = vmax.f32 %v4019_v39, %v2300_v30  ;;  %v2270_v28 = vmax.f32 %v2206_v13, %v2300_v30  ;;  %v2313_v34 = vld [vmem:[#allocation3 + $0x100] sm:$0xff] }
 0x139   : > { %2365 = vst.msk [vmem:[%s4026_s28 + $0x60] sm:$0xff] %vm243_vm0, %v2333_v45  ;;  %v2207_v6 = vmax.f32 %v2143_v16, %v2299_v24  ;;  %v2208_v12 = vmax.f32 %v2144_v40, %v2300_v30  ;;  %v2147_v42 = vmax.f32 %v2299_v24, %v2301_v31  ;;  %2358 = vst.msk [vmem:[%s4026_s28 + $0x28] sm:$0xff] %vm243_vm0, %v2326_v4 }
 0x13a   : > { %2360 = vst.msk [vmem:[%s4026_s28 + $0x38] sm:$0xff] %vm243_vm0, %v2328_v27  ;;  %v2209_v59 = vmax.f32 %v2145_v11, %v2301_v31  ;;  %v2210_v56 = vmax.f32 %v2146_v0, %v2302_v7  ;;  %v2148_v15 = vmax.f32 %v2300_v30, %v2302_v7  ;;  %v2149_v1 = vmax.f32 %v2301_v31, %v2303_v48  ;;  %v2312_v30 = vld [vmem:[#allocation3 + $0xf8] sm:$0xff]  ;;  %v2315_v11 = vld [vmem:[#allocation3 + $0x110] sm:$0xff] }
 0x13b   : > { %v2334_v43 = vmax.f32 %v2270_v28, %v2302_v7  ;;  %v2271_v19 = vmax.f32 %v2207_v6, %v2301_v31  ;;  %v2272_v23 = vmax.f32 %v2208_v12, %v2302_v7  ;;  %v2211_v58 = vmax.f32 %v2147_v42, %v2303_v48 }
 0x13c   : > { %v2273_v20 = vmax.f32 %v2209_v59, %v2303_v48  ;;  %v2274_v3 = vmax.f32 %v2210_v56, %v2304_v38  ;;  %v2212_v44 = vmax.f32 %v2148_v15, %v2304_v38  ;;  %v2213_v33 = vmax.f32 %v2149_v1, %v2305_v25  ;;  %v2316_v59 = vld [vmem:[#allocation3 + $0x118] sm:$0xff]  ;;  %v2317_v56 = vld [vmem:[#allocation3 + $0x120] sm:$0xff] }
 0x13d   : > { %2366 = vst.msk [vmem:[%s4026_s28 + $0x68] sm:$0xff] %vm243_vm0, %v2334_v43  ;;  %v2335_v54 = vmax.f32 %v2271_v19, %v2303_v48  ;;  %v2336_v29 = vmax.f32 %v2272_v23, %v2304_v38  ;;  %v2275_v39 = vmax.f32 %v2211_v58, %v2305_v25  ;;  %v2150_v21 = vmax.f32 %v2302_v7, %v2304_v38  ;;  %v2314_v7 = vld [vmem:[#allocation3 + $0x108] sm:$0xff] }
 0x13e   : > { %v2337_v14 = vmax.f32 %v2273_v20, %v2305_v25  ;;  %v2338_v46 = vmax.f32 %v2274_v3, %v2306_v26  ;;  %v2276_v41 = vmax.f32 %v2212_v44, %v2306_v26  ;;  %v2277_v17 = vmax.f32 %v2213_v33, %v2307_v32  ;;  %v2318_v3 = vld [vmem:[#allocation3 + $0x128] sm:$0xff] }
 0x13f   : > { %2367 = vst.msk [vmem:[%s4026_s28 + $0x70] sm:$0xff] %vm243_vm0, %v2335_v54  ;;  %2368 = vst.msk [vmem:[%s4026_s28 + $0x78] sm:$0xff] %vm243_vm0, %v2336_v29  ;;  %v2339_v63 = vmax.f32 %v2275_v39, %v2307_v32  ;;  %v2214_v9 = vmax.f32 %v2150_v21, %v2306_v26  ;;  %v2151_v8 = vmax.f32 %v2303_v48, %v2305_v25  ;;  %v2319_v54 = vld [vmem:[#allocation3 + $0x130] sm:$0xff]  ;;  %v2320_v29 = vld [vmem:[#allocation3 + $0x138] sm:$0xff] }
 0x140   : > { %v2152_v51 = vmax.f32 %v2304_v38, %v2306_v26  ;;  %2369 = vst.msk [vmem:[%s4026_s28 + $0x80] sm:$0xff] %vm243_vm0, %v2337_v14  ;;  %2370 = vst.msk [vmem:[%s4026_s28 + $0x88] sm:$0xff] %vm243_vm0, %v2338_v46  ;;  %v2340_v62 = vmax.f32 %v2276_v41, %v2308_v35  ;;  %v2341_v60 = vmax.f32 %v2277_v17, %v2309_v18 }
 0x141   : > { %v2153_v37 = vmax.f32 %v2305_v25, %v2307_v32  ;;  %v2154_v5 = vmax.f32 %v2306_v26, %v2308_v35  ;;  %2371 = vst.msk [vmem:[%s4026_s28 + $0x90] sm:$0xff] %vm243_vm0, %v2339_v63  ;;  %v2278_v22 = vmax.f32 %v2214_v9, %v2308_v35  ;;  %v2215_v47 = vmax.f32 %v2151_v8, %v2307_v32 }
 0x142   : > { %v2216_v2 = vmax.f32 %v2152_v51, %v2308_v35  ;;  %v2155_v24 = vmax.f32 %v2307_v32, %v2309_v18  ;;  %2372 = vst.msk [vmem:[%s4026_s28 + $0x98] sm:$0xff] %vm243_vm0, %v2340_v62  ;;  %2373 = vst.msk [vmem:[%s4026_s28 + $0xa0] sm:$0xff] %vm243_vm0, %v2341_v60  ;;  %v2156_v50 = vmax.f32 %v2308_v35, %v2310_v36 }
 0x143   : > { %v2217_v53 = vmax.f32 %v2153_v37, %v2309_v18  ;;  %v2218_v49 = vmax.f32 %v2154_v5, %v2310_v36  ;;  %v2157_v61 = vmax.f32 %v2309_v18, %v2311_v10  ;;  %v2342_v55 = vmax.f32 %v2278_v22, %v2310_v36 }
 0x144   : > { %v2279_v57 = vmax.f32 %v2215_v47, %v2309_v18  ;;  %v2280_v52 = vmax.f32 %v2216_v2, %v2310_v36  ;;  %v2219_v31 = vmax.f32 %v2155_v24, %v2311_v10  ;;  %v2220_v16 = vmax.f32 %v2156_v50, %v2312_v30 }
 0x145   : > { %v2281_v45 = vmax.f32 %v2217_v53, %v2311_v10  ;;  %v2282_v13 = vmax.f32 %v2218_v49, %v2312_v30  ;;  %v2221_v48 = vmax.f32 %v2157_v61, %v2313_v34  ;;  %2374 = vst.msk [vmem:[%s4026_s28 + $0xa8] sm:$0xff] %vm243_vm0, %v2342_v55  ;;  %v2158_v0 = vmax.f32 %v2310_v36, %v2312_v30 }
 0x146   : > { %v2343_v40 = vmax.f32 %v2279_v57, %v2311_v10  ;;  %v2344_v4 = vmax.f32 %v2280_v52, %v2312_v30  ;;  %v2283_v27 = vmax.f32 %v2219_v31, %v2313_v34  ;;  %v2284_v12 = vmax.f32 %v2220_v16, %v2314_v7 }
 0x147   : > { %v2345_v28 = vmax.f32 %v2281_v45, %v2313_v34  ;;  %v2346_v6 = vmax.f32 %v2282_v13, %v2314_v7  ;;  %v2285_v42 = vmax.f32 %v2221_v48, %v2315_v11  ;;  %v2222_v15 = vmax.f32 %v2158_v0, %v2314_v7 }
 0x148   : > { %2375 = vst.msk [vmem:[%s4026_s28 + $0xb0] sm:$0xff] %vm243_vm0, %v2343_v40  ;;  %2376 = vst.msk [vmem:[%s4026_s28 + $0xb8] sm:$0xff] %vm243_vm0, %v2344_v4  ;;  %v2347_v38 = vmax.f32 %v2283_v27, %v2315_v11  ;;  %v2159_v1 = vmax.f32 %v2311_v10, %v2313_v34  ;;  %v2160_v43 = vmax.f32 %v2312_v30, %v2314_v7 }
 0x149   : > { %2377 = vst.msk [vmem:[%s4026_s28 + $0xc0] sm:$0xff] %vm243_vm0, %v2345_v28  ;;  %2378 = vst.msk [vmem:[%s4026_s28 + $0xc8] sm:$0xff] %vm243_vm0, %v2346_v6  ;;  %v2348_v19 = vmax.f32 %v2284_v12, %v2316_v59  ;;  %v2349_v23 = vmax.f32 %v2285_v42, %v2317_v56  ;;  %v2286_v25 = vmax.f32 %v2222_v15, %v2316_v59 }
 0x14a   : > { %2379 = vst.msk [vmem:[%s4026_s28 + $0xd0] sm:$0xff] %vm243_vm0, %v2347_v38  ;;  %v2223_v58 = vmax.f32 %v2159_v1, %v2315_v11  ;;  %v2224_v20 = vmax.f32 %v2160_v43, %v2316_v59 }
 0x14b   : > { %2380 = vst.msk [vmem:[%s4026_s28 + $0xd8] sm:$0xff] %vm243_vm0, %v2348_v19  ;;  %2381 = vst.msk [vmem:[%s4026_s28 + $0xe0] sm:$0xff] %vm243_vm0, %v2349_v23  ;;  %v2350_v26 = vmax.f32 %v2286_v25, %v2318_v3 }
 0x14c   : > { %v2287_v44 = vmax.f32 %v2223_v58, %v2317_v56  ;;  %v2288_v33 = vmax.f32 %v2224_v20, %v2318_v3 }
 0x14d   : > { %2382 = vst.msk [vmem:[%s4026_s28 + $0xe8] sm:$0xff] %vm243_vm0, %v2350_v26 }
 0x14e   : > { %v2351_v39 = vmax.f32 %v2287_v44, %v2319_v54  ;;  %v2352_v32 = vmax.f32 %v2288_v33, %v2320_v29 }
 0x150   : > { %2383 = vst.msk [vmem:[%s4026_s28 + $0xf0] sm:$0xff] %vm243_vm0, %v2351_v39  ;;  %2384 = vst.msk [vmem:[%s4026_s28 + $0xf8] sm:$0xff] %vm243_vm0, %v2352_v32 }
 0x151 PF: > { %s14_s14 = sadd.s32 1, %s2628_s14   ;;  %s4144_s12 = smov %s2624_s13 }
 0x152   : > { %p11_p5 = scmp.ge.s32.totalorder %s14_s14, 4   ;;  %s4145_s13 = smov %s4147_s15 }
 0x154   :  { %13 = sbr.rel (!%p11_p5) target bundleno = 2 (0x2), region = 82 }

// kernel: simcsp_sppf_forward.12
= control target key start
LH: loop header
LB: loop body
LE: loop exit
PB: predicated region body
PF: predicated region fallthrough
CT: control target
= control target key end

     0   :  { %vm240_vm0 = vcmask 261120   ;;  %s4533_s4 = inlined_call_operand.vmem [shape: bf16[4,32,32], index: 4, kind: input, shape index: {}]   ;;  %s4534_s1 = inlined_call_operand.vmem [shape: f32[512,32], index: 1, kind: input, shape index: {}]   ;;  %s4535_s2 = inlined_call_operand.vmem [shape: f32[512,32], index: 2, kind: input, shape index: {}]   ;;  %s4536_s0 = inlined_call_operand.vmem [shape: f32[512,32], index: 0, kind: input, shape index: {}]   ;;  %s4537_s3 = inlined_call_operand.vmem [shape: f32[512,32], index: 3, kind: input, shape index: {}]   ;;  %s4538_s5 = inlined_call_operand.vmem [shape: f32[1,32], index: 5, kind: input, shape index: {}]   ;;  %s4539_s6 = inlined_call_operand.vmem [shape: f32[1,32], index: 6, kind: input, shape index: {}]   ;;  %s4540_s7 = inlined_call_operand.vmem [shape: f32[512,32], index: 7, kind: output, shape index: {}]  }
   0x1   :  { %v3171_v0 = vld [vmem:[%s4533_s4 + $0x10] sm:$0xff]   ;;  %v3172_v1 = vld [vmem:[%s4533_s4 + $0x20] sm:$0xff]   ;;  %v3173_v2 = vld [vmem:[%s4533_s4 + $0x18] sm:$0xff]  }
   0x2   :  { %2707 = vmatprep.subr.bf16.mxu1 %v3171_v0  ;;  %2843 = vmatprep.subr.bf16.mxu0 %v3172_v1  ;;  %v3174_v3 = vld [vmem:[%s4533_s4 + $0x28] sm:$0xff]   ;;  %v127_v4 = vld [vmem:[%s4534_s1] sm:$0xff]  ;;  %v129_v9 = vld [vmem:[%s4534_s1 + $0x10] sm:$0xff] }
   0x3   :  { %2708 = vmatpush3.bf16.msra.mxu1 %v3171_v0  ;;  %2844 = vmatpush3.bf16.msra.mxu0 %v3172_v1  ;;  %v128_v5 = vld [vmem:[%s4534_s1 + $0x8] sm:$0xff]  ;;  %v1023_v6 = vld [vmem:[%s4535_s2] sm:$0xff]  ;;  %v130_v10 = vld [vmem:[%s4534_s1 + $0x18] sm:$0xff] }
   0x4   :  { %2709 = vmatprep.subr.bf16.mxu1 %v3173_v2  ;;  %2845 = vmatprep.subr.bf16.mxu0 %v3174_v3  ;;  %v191_v7 = vpack.c.bf16 %v128_v5, %v127_v4  ;;  %v1024_v8 = vld [vmem:[%s4535_s2 + $0x8] sm:$0xff]  ;;  %v192_v12 = vpack.c.bf16 %v130_v10, %v129_v9  ;;  %v3175_v13 = vld [vmem:[%s4533_s4] sm:$0xff]   ;;  %v1025_v14 = vld [vmem:[%s4535_s2 + $0x10] sm:$0xff] }
   0x5   :  { %v1087_v11 = vpack.c.bf16 %v1024_v8, %v1023_v6  ;;  %v1026_v15 = vld [vmem:[%s4535_s2 + $0x18] sm:$0xff]  ;;  %v3176_v17 = vld [vmem:[%s4533_s4 + $0x30] sm:$0xff]   ;;  %v131_v18 = vld [vmem:[%s4534_s1 + $0x20] sm:$0xff] }
   0x6   :  { %2711 = vmatprep.mubr.msk.bf16.mxu1 %vm240_vm0, %v191_v7  ;;  %v1088_v16 = vpack.c.bf16 %v1026_v15, %v1025_v14  ;;  %v132_v19 = vld [vmem:[%s4534_s1 + $0x28] sm:$0xff]  ;;  %v1027_v20 = vld [vmem:[%s4535_s2 + $0x20] sm:$0xff]  ;;  %v133_v24 = vld [vmem:[%s4534_s1 + $0x30] sm:$0xff] }
   0x7   :  { %2710 = vmatpush3.bf16.msra.mxu1 %v3173_v2  ;;  %2846 = vmatpush3.bf16.msra.mxu0 %v3174_v3  ;;  %v1028_v21 = vld [vmem:[%s4535_s2 + $0x28] sm:$0xff]  ;;  %v193_v22 = vpack.c.bf16 %v132_v19, %v131_v18  ;;  %v134_v25 = vld [vmem:[%s4534_s1 + $0x38] sm:$0xff]  ;;  %v1029_v26 = vld [vmem:[%s4535_s2 + $0x30] sm:$0xff] }
   0x8   :  { %2847 = vmatprep.mubr.msk.bf16.mxu0 %vm240_vm0, %v1087_v11  ;;  %2775 = vmatprep.subr.bf16.mxu1 %v3175_v13  ;;  %v1089_v23 = vpack.c.bf16 %v1028_v21, %v1027_v20  ;;  %v1030_v27 = vld [vmem:[%s4535_s2 + $0x38] sm:$0xff]  ;;  %v135_v28 = vld [vmem:[%s4534_s1 + $0x40] sm:$0xff]  ;;  %v136_v29 = vld [vmem:[%s4534_s1 + $0x48] sm:$0xff]  ;;  %v194_v32 = vpack.c.bf16 %v134_v25, %v133_v24 }
   0x9   :  { %2911 = vmatprep.subr.bf16.mxu0 %v3176_v17  ;;  %v1031_v30 = vld [vmem:[%s4535_s2 + $0x40] sm:$0xff]  ;;  %v1032_v31 = vld [vmem:[%s4535_s2 + $0x48] sm:$0xff]  ;;  %v1090_v33 = vpack.c.bf16 %v1030_v27, %v1029_v26  ;;  %v195_v34 = vpack.c.bf16 %v136_v29, %v135_v28  ;;  %v137_v36 = vld [vmem:[%s4534_s1 + $0x50] sm:$0xff] }
   0xa   :  { %2712 = vmatmul.mubr.msk.bf16.vlgmr.msra.gmra.mrb[0].mxu1 %vm240_vm0, %v192_v12  ;;  %2848 = vmatmul.mubr.msk.bf16.vlgmr.msra.gmra.mrb[0].mxu0 %vm240_vm0, %v1088_v16  ;;  %v1091_v35 = vpack.c.bf16 %v1032_v31, %v1031_v30  ;;  %v138_v37 = vld [vmem:[%s4534_s1 + $0x58] sm:$0xff]  ;;  %v1033_v38 = vld [vmem:[%s4535_s2 + $0x50] sm:$0xff]  ;;  %v139_v40 = vld [vmem:[%s4534_s1 + $0x60] sm:$0xff] }
   0xb   :  { %2776 = vmatpush3.bf16.msra.mxu1 %v3175_v13  ;;  %2912 = vmatpush3.bf16.msra.mxu0 %v3176_v17  ;;  %v1034_v39 = vld [vmem:[%s4535_s2 + $0x58] sm:$0xff]  ;;  %v140_v41 = vld [vmem:[%s4534_s1 + $0x68] sm:$0xff]  ;;  %v1035_v42 = vld [vmem:[%s4535_s2 + $0x60] sm:$0xff]  ;;  %v196_v44 = vpack.c.bf16 %v138_v37, %v137_v36 }
   0xc   :  { %2715 = vmatprep.mubr.msk.bf16.mxu1 %vm240_vm0, %v193_v22  ;;  %2851 = vmatprep.mubr.msk.bf16.mxu0 %vm240_vm0, %v1089_v23  ;;  %v1036_v43 = vld [vmem:[%s4535_s2 + $0x68] sm:$0xff]  ;;  %v1092_v45 = vpack.c.bf16 %v1034_v39, %v1033_v38  ;;  %v197_v46 = vpack.c.bf16 %v140_v41, %v139_v40  ;;  %v141_v48 = vld [vmem:[%s4534_s1 + $0x70] sm:$0xff]  ;;  %v142_v49 = vld [vmem:[%s4534_s1 + $0x78] sm:$0xff] }
   0xd   :  { %v1093_v47 = vpack.c.bf16 %v1036_v43, %v1035_v42  ;;  %v1037_v50 = vld [vmem:[%s4535_s2 + $0x70] sm:$0xff]  ;;  %v1038_v51 = vld [vmem:[%s4535_s2 + $0x78] sm:$0xff]  ;;  %v143_v52 = vld [vmem:[%s4534_s1 + $0x80] sm:$0xff]  ;;  %v198_v56 = vpack.c.bf16 %v142_v49, %v141_v48 }
   0xe   :  { %v144_v53 = vld [vmem:[%s4534_s1 + $0x88] sm:$0xff]  ;;  %v1039_v54 = vld [vmem:[%s4535_s2 + $0x80] sm:$0xff]  ;;  %v1094_v58 = vpack.c.bf16 %v1038_v51, %v1037_v50  ;;  %v3178_v60 = vld [vmem:[%s4533_s4 + $0x38] sm:$0xff]  }
   0xf   :  { %v1040_v55 = vld [vmem:[%s4535_s2 + $0x88] sm:$0xff]  ;;  %v199_v59 = vpack.c.bf16 %v144_v53, %v143_v52  ;;  %2913 = vmatprep.subr.bf16.mxu0 %v3178_v60  ;;  %v145_v62 = vld [vmem:[%s4534_s1 + $0x90] sm:$0xff]  ;;  %v146_v63 = vld [vmem:[%s4534_s1 + $0x98] sm:$0xff] }
  0x10   :  { %v3177_v57 = vld [vmem:[%s4533_s4 + $0x8] sm:$0xff]   ;;  %v1095_v61 = vpack.c.bf16 %v1040_v55, %v1039_v54  ;;  %2914 = vmatpush3.bf16.msra.mxu0 %v3178_v60  ;;  %v1041_v0 = vld [vmem:[%s4535_s2 + $0x90] sm:$0xff]  ;;  %v1042_v1 = vld [vmem:[%s4535_s2 + $0x98] sm:$0xff]  ;;  %v200_v6 = vpack.c.bf16 %v146_v63, %v145_v62 }
  0x11   :  { %2777 = vmatprep.subr.bf16.mxu1 %v3177_v57  ;;  %v147_v2 = vld [vmem:[%s4534_s1 + $0xa0] sm:$0xff]  ;;  %v148_v3 = vld [vmem:[%s4534_s1 + $0xa8] sm:$0xff]  ;;  %v1096_v7 = vpack.c.bf16 %v1042_v1, %v1041_v0  ;;  %v149_v10 = vld [vmem:[%s4534_s1 + $0xb0] sm:$0xff] }
  0x12   :  { %2716 = vmatmul.mubr.msk.bf16.gmra.mrb[4].mxu1 %vm240_vm0, %v194_v32  ;;  %2852 = vmatmul.mubr.msk.bf16.gmra.mrb[4].mxu0 %vm240_vm0, %v1090_v33  ;;  %v1043_v4 = vld [vmem:[%s4535_s2 + $0xa0] sm:$0xff]  ;;  %v1044_v5 = vld [vmem:[%s4535_s2 + $0xa8] sm:$0xff]  ;;  %v201_v8 = vpack.c.bf16 %v148_v3, %v147_v2  ;;  %v150_v11 = vld [vmem:[%s4534_s1 + $0xb8] sm:$0xff] }
  0x13   :  { %2719 = vmatprep.mubr.msk.bf16.mxu1 %vm240_vm0, %v195_v34  ;;  %2855 = vmatprep.mubr.msk.bf16.mxu0 %vm240_vm0, %v1091_v35  ;;  %v1097_v9 = vpack.c.bf16 %v1044_v5, %v1043_v4  ;;  %v1045_v12 = vld [vmem:[%s4535_s2 + $0xb0] sm:$0xff]  ;;  %v1046_v13 = vld [vmem:[%s4535_s2 + $0xb8] sm:$0xff]  ;;  %v151_v14 = vld [vmem:[%s4534_s1 + $0xc0] sm:$0xff]  ;;  %v202_v18 = vpack.c.bf16 %v150_v11, %v149_v10 }
  0x14   :  { %2778 = vmatpush3.bf16.msra.mxu1 %v3177_v57  ;;  %v152_v15 = vld [vmem:[%s4534_s1 + $0xc8] sm:$0xff]  ;;  %v1047_v16 = vld [vmem:[%s4535_s2 + $0xc0] sm:$0xff]  ;;  %v1098_v19 = vpack.c.bf16 %v1046_v13, %v1045_v12  ;;  %v153_v22 = vld [vmem:[%s4534_s1 + $0xd0] sm:$0xff] }
  0x15   :  { %v1048_v17 = vld [vmem:[%s4535_s2 + $0xc8] sm:$0xff]  ;;  %v203_v20 = vpack.c.bf16 %v152_v15, %v151_v14  ;;  %v154_v23 = vld [vmem:[%s4534_s1 + $0xd8] sm:$0xff]  ;;  %v1049_v24 = vld [vmem:[%s4535_s2 + $0xd0] sm:$0xff] }
  0x16   :  { %v1099_v21 = vpack.c.bf16 %v1048_v17, %v1047_v16  ;;  %v1050_v25 = vld [vmem:[%s4535_s2 + $0xd8] sm:$0xff]  ;;  %v155_v26 = vld [vmem:[%s4534_s1 + $0xe0] sm:$0xff]  ;;  %v156_v27 = vld [vmem:[%s4534_s1 + $0xe8] sm:$0xff]  ;;  %v204_v30 = vpack.c.bf16 %v154_v23, %v153_v22 }
  0x17   :  { %v1051_v28 = vld [vmem:[%s4535_s2 + $0xe0] sm:$0xff]  ;;  %v1052_v29 = vld [vmem:[%s4535_s2 + $0xe8] sm:$0xff]  ;;  %v1100_v31 = vpack.c.bf16 %v1050_v25, %v1049_v24  ;;  %v205_v32 = vpack.c.bf16 %v156_v27, %v155_v26  ;;  %v157_v34 = vld [vmem:[%s4534_s1 + $0xf0] sm:$0xff] }
  0x18   :  { %v1101_v33 = vpack.c.bf16 %v1052_v29, %v1051_v28  ;;  %v158_v35 = vld [vmem:[%s4534_s1 + $0xf8] sm:$0xff]  ;;  %v1053_v36 = vld [vmem:[%s4535_s2 + $0xf0] sm:$0xff]  ;;  %v159_v38 = vld [vmem:[%s4534_s1 + $0x100] sm:$0xff] }
  0x19   :  { %v1054_v37 = vld [vmem:[%s4535_s2 + $0xf8] sm:$0xff]  ;;  %v160_v39 = vld [vmem:[%s4534_s1 + $0x108] sm:$0xff]  ;;  %v1055_v40 = vld [vmem:[%s4535_s2 + $0x100] sm:$0xff]  ;;  %v206_v42 = vpack.c.bf16 %v158_v35, %v157_v34 }
  0x1a   :  { %2720 = vmatmul.mubr.msk.bf16.gmra.mrb[8].mxu1 %vm240_vm0, %v196_v44  ;;  %2856 = vmatmul.mubr.msk.bf16.gmra.mrb[8].mxu0 %vm240_vm0, %v1092_v45  ;;  %v1056_v41 = vld [vmem:[%s4535_s2 + $0x108] sm:$0xff]  ;;  %v1102_v43 = vpack.c.bf16 %v1054_v37, %v1053_v36  ;;  %v207_v44 = vpack.c.bf16 %v160_v39, %v159_v38  ;;  %v1057_v48 = vld [vmem:[%s4535_s2 + $0x110] sm:$0xff]  ;;  %v1058_v49 = vld [vmem:[%s4535_s2 + $0x118] sm:$0xff] }
  0x1b   :  { %2723 = vmatprep.mubr.msk.bf16.mxu1 %vm240_vm0, %v197_v46  ;;  %2859 = vmatprep.mubr.msk.bf16.mxu0 %vm240_vm0, %v1093_v47  ;;  %v1103_v45 = vpack.c.bf16 %v1056_v41, %v1055_v40  ;;  %v161_v46 = vld [vmem:[%s4534_s1 + $0x110] sm:$0xff]  ;;  %v162_v47 = vld [vmem:[%s4534_s1 + $0x118] sm:$0xff]  ;;  %v163_v50 = vld [vmem:[%s4534_s1 + $0x120] sm:$0xff]  ;;  %v1104_v55 = vpack.c.bf16 %v1058_v49, %v1057_v48 }
  0x1c   :  { %v164_v51 = vld [vmem:[%s4534_s1 + $0x128] sm:$0xff]  ;;  %v1059_v52 = vld [vmem:[%s4535_s2 + $0x120] sm:$0xff]  ;;  %v208_v54 = vpack.c.bf16 %v162_v47, %v161_v46  ;;  %v1061_v60 = vld [vmem:[%s4535_s2 + $0x130] sm:$0xff] }
  0x1d   :  { %v1060_v53 = vld [vmem:[%s4535_s2 + $0x128] sm:$0xff]  ;;  %v167_v62 = vld [vmem:[%s4534_s1 + $0x140] sm:$0xff] }
  0x1e   :  { %v1105_v57 = vpack.c.bf16 %v1060_v53, %v1059_v52  ;;  %v168_v63 = vld [vmem:[%s4534_s1 + $0x148] sm:$0xff]  ;;  %v1063_v0 = vld [vmem:[%s4535_s2 + $0x140] sm:$0xff] }
  0x1f   :  { %v1064_v1 = vld [vmem:[%s4535_s2 + $0x148] sm:$0xff]  ;;  %v211_v4 = vpack.c.bf16 %v168_v63, %v167_v62  ;;  %v171_v10 = vld [vmem:[%s4534_s1 + $0x160] sm:$0xff] }
  0x20   :  { %v1107_v5 = vpack.c.bf16 %v1064_v1, %v1063_v0  ;;  %v172_v11 = vld [vmem:[%s4534_s1 + $0x168] sm:$0xff]  ;;  %v1067_v12 = vld [vmem:[%s4535_s2 + $0x160] sm:$0xff] }
  0x21   :  { %v1068_v13 = vld [vmem:[%s4535_s2 + $0x168] sm:$0xff]  ;;  %v213_v16 = vpack.c.bf16 %v172_v11, %v171_v10  ;;  %v175_v22 = vld [vmem:[%s4534_s1 + $0x180] sm:$0xff] }
  0x22   :  { %2724 = vmatmul.mubr.msk.bf16.gmra.mrb[12].mxu1 %vm240_vm0, %v198_v56  ;;  %2860 = vmatmul.mubr.msk.bf16.gmra.mrb[12].mxu0 %vm240_vm0, %v1094_v58  ;;  %v209_v56 = vpack.c.bf16 %v164_v51, %v163_v50  ;;  %v165_v58 = vld [vmem:[%s4534_s1 + $0x130] sm:$0xff]  ;;  %v1109_v17 = vpack.c.bf16 %v1068_v13, %v1067_v12  ;;  %v176_v23 = vld [vmem:[%s4534_s1 + $0x188] sm:$0xff]  ;;  %v1071_v24 = vld [vmem:[%s4535_s2 + $0x180] sm:$0xff] }
  0x23   :  { %2727 = vmatprep.mubr.msk.bf16.mxu1 %vm240_vm0, %v199_v59  ;;  %2863 = vmatprep.mubr.msk.bf16.mxu0 %vm240_vm0, %v1095_v61  ;;  %v166_v59 = vld [vmem:[%s4534_s1 + $0x138] sm:$0xff]  ;;  %v1072_v25 = vld [vmem:[%s4535_s2 + $0x188] sm:$0xff]  ;;  %v215_v28 = vpack.c.bf16 %v176_v23, %v175_v22  ;;  %v179_v34 = vld [vmem:[%s4534_s1 + $0x1a0] sm:$0xff] }
  0x24   :  { %v1062_v61 = vld [vmem:[%s4535_s2 + $0x138] sm:$0xff]  ;;  %v210_v2 = vpack.c.bf16 %v166_v59, %v165_v58  ;;  %v1111_v29 = vpack.c.bf16 %v1072_v25, %v1071_v24  ;;  %v180_v35 = vld [vmem:[%s4534_s1 + $0x1a8] sm:$0xff]  ;;  %v1075_v36 = vld [vmem:[%s4535_s2 + $0x1a0] sm:$0xff] }
  0x25   :  { %v1106_v3 = vpack.c.bf16 %v1062_v61, %v1061_v60  ;;  %v1076_v37 = vld [vmem:[%s4535_s2 + $0x1a8] sm:$0xff]  ;;  %v217_v40 = vpack.c.bf16 %v180_v35, %v179_v34  ;;  %v183_v46 = vld [vmem:[%s4534_s1 + $0x1c0] sm:$0xff] }
  0x26   :  { %v1113_v41 = vpack.c.bf16 %v1076_v37, %v1075_v36  ;;  %v184_v47 = vld [vmem:[%s4534_s1 + $0x1c8] sm:$0xff]  ;;  %v1079_v48 = vld [vmem:[%s4535_s2 + $0x1c0] sm:$0xff] }
  0x27   :  { %v1080_v49 = vld [vmem:[%s4535_s2 + $0x1c8] sm:$0xff]  ;;  %v219_v52 = vpack.c.bf16 %v184_v47, %v183_v46  ;;  %v187_v58 = vld [vmem:[%s4534_s1 + $0x1e0] sm:$0xff] }
  0x28   :  { %v1115_v53 = vpack.c.bf16 %v1080_v49, %v1079_v48  ;;  %v188_v59 = vld [vmem:[%s4534_s1 + $0x1e8] sm:$0xff]  ;;  %v1083_v60 = vld [vmem:[%s4535_s2 + $0x1e0] sm:$0xff] }
  0x29   :  { %v1084_v61 = vld [vmem:[%s4535_s2 + $0x1e8] sm:$0xff]  ;;  %v221_v0 = vpack.c.bf16 %v188_v59, %v187_v58 }
  0x2a   :  { %2728 = vmatmul.mubr.msk.bf16.gmra.mrb[16].mxu1 %vm240_vm0, %v200_v6  ;;  %2864 = vmatmul.mubr.msk.bf16.gmra.mrb[16].mxu0 %vm240_vm0, %v1096_v7  ;;  %v169_v6 = vld [vmem:[%s4534_s1 + $0x150] sm:$0xff]  ;;  %v170_v7 = vld [vmem:[%s4534_s1 + $0x158] sm:$0xff]  ;;  %v1117_v1 = vpack.c.bf16 %v1084_v61, %v1083_v60 }
  0x2b   :  { %2731 = vmatprep.mubr.msk.bf16.mxu1 %vm240_vm0, %v201_v8  ;;  %2867 = vmatprep.mubr.msk.bf16.mxu0 %vm240_vm0, %v1097_v9  ;;  %v1065_v8 = vld [vmem:[%s4535_s2 + $0x150] sm:$0xff]  ;;  %v1066_v9 = vld [vmem:[%s4535_s2 + $0x158] sm:$0xff]  ;;  %v212_v14 = vpack.c.bf16 %v170_v7, %v169_v6  ;;  %v27_v6 = vld [vmem:[%s4536_s0] sm:$0xff] }
  0x2c   :  { %v1108_v15 = vpack.c.bf16 %v1066_v9, %v1065_v8  ;;  %v28_v7 = vld [vmem:[%s4536_s0 + $0x8] sm:$0xff]  ;;  %v1585_v8 = vld [vmem:[%s4537_s3] sm:$0xff] }
  0x2d   :  { %v1586_v9 = vld [vmem:[%s4537_s3 + $0x8] sm:$0xff]  ;;  %v91_v12 = vpack.c.bf16 %v28_v7, %v27_v6 }
  0x2e   :  { %v1649_v13 = vpack.c.bf16 %v1586_v9, %v1585_v8 }
  0x32   :  { %2732 = vmatmul.mubr.msk.bf16.gmra.mrb[20].mxu1 %vm240_vm0, %v202_v18  ;;  %2868 = vmatmul.mubr.msk.bf16.gmra.mrb[20].mxu0 %vm240_vm0, %v1098_v19  ;;  %v173_v18 = vld [vmem:[%s4534_s1 + $0x170] sm:$0xff]  ;;  %v174_v19 = vld [vmem:[%s4534_s1 + $0x178] sm:$0xff] }
  0x33   :  { %2735 = vmatprep.mubr.msk.bf16.mxu1 %vm240_vm0, %v203_v20  ;;  %2871 = vmatprep.mubr.msk.bf16.mxu0 %vm240_vm0, %v1099_v21  ;;  %v1069_v20 = vld [vmem:[%s4535_s2 + $0x170] sm:$0xff]  ;;  %v1070_v21 = vld [vmem:[%s4535_s2 + $0x178] sm:$0xff]  ;;  %v214_v26 = vpack.c.bf16 %v174_v19, %v173_v18  ;;  %v31_v18 = vld [vmem:[%s4536_s0 + $0x20] sm:$0xff] }
  0x34   :  { %v1110_v27 = vpack.c.bf16 %v1070_v21, %v1069_v20  ;;  %v32_v19 = vld [vmem:[%s4536_s0 + $0x28] sm:$0xff]  ;;  %v1589_v20 = vld [vmem:[%s4537_s3 + $0x20] sm:$0xff] }
  0x35   :  { %v1590_v21 = vld [vmem:[%s4537_s3 + $0x28] sm:$0xff]  ;;  %v93_v24 = vpack.c.bf16 %v32_v19, %v31_v18 }
  0x36   :  { %v1651_v25 = vpack.c.bf16 %v1590_v21, %v1589_v20 }
  0x3a   :  { %2736 = vmatmul.mubr.msk.bf16.gmra.mrb[24].mxu1 %vm240_vm0, %v204_v30  ;;  %2872 = vmatmul.mubr.msk.bf16.gmra.mrb[24].mxu0 %vm240_vm0, %v1100_v31  ;;  %v177_v30 = vld [vmem:[%s4534_s1 + $0x190] sm:$0xff]  ;;  %v178_v31 = vld [vmem:[%s4534_s1 + $0x198] sm:$0xff] }
  0x3b   :  { %2739 = vmatprep.mubr.msk.bf16.mxu1 %vm240_vm0, %v205_v32  ;;  %2875 = vmatprep.mubr.msk.bf16.mxu0 %vm240_vm0, %v1101_v33  ;;  %v1073_v32 = vld [vmem:[%s4535_s2 + $0x190] sm:$0xff]  ;;  %v1074_v33 = vld [vmem:[%s4535_s2 + $0x198] sm:$0xff]  ;;  %v216_v38 = vpack.c.bf16 %v178_v31, %v177_v30  ;;  %v35_v30 = vld [vmem:[%s4536_s0 + $0x40] sm:$0xff] }
  0x3c   :  { %v1112_v39 = vpack.c.bf16 %v1074_v33, %v1073_v32  ;;  %v36_v31 = vld [vmem:[%s4536_s0 + $0x48] sm:$0xff]  ;;  %v1593_v32 = vld [vmem:[%s4537_s3 + $0x40] sm:$0xff] }
  0x3d   :  { %v1594_v33 = vld [vmem:[%s4537_s3 + $0x48] sm:$0xff]  ;;  %v95_v36 = vpack.c.bf16 %v36_v31, %v35_v30 }
  0x3e   :  { %v1653_v37 = vpack.c.bf16 %v1594_v33, %v1593_v32 }
  0x42   :  { %2740 = vmatmul.mubr.msk.bf16.gmra.mrb[28].mxu1 %vm240_vm0, %v206_v42  ;;  %2876 = vmatmul.mubr.msk.bf16.gmra.mrb[28].mxu0 %vm240_vm0, %v1102_v43  ;;  %v181_v42 = vld [vmem:[%s4534_s1 + $0x1b0] sm:$0xff]  ;;  %v182_v43 = vld [vmem:[%s4534_s1 + $0x1b8] sm:$0xff] }
  0x43   :  { %2743 = vmatprep.mubr.msk.bf16.mxu1 %vm240_vm0, %v207_v44  ;;  %2879 = vmatprep.mubr.msk.bf16.mxu0 %vm240_vm0, %v1103_v45  ;;  %v1077_v44 = vld [vmem:[%s4535_s2 + $0x1b0] sm:$0xff]  ;;  %v1078_v45 = vld [vmem:[%s4535_s2 + $0x1b8] sm:$0xff]  ;;  %v218_v50 = vpack.c.bf16 %v182_v43, %v181_v42  ;;  %v39_v42 = vld [vmem:[%s4536_s0 + $0x60] sm:$0xff] }
  0x44   :  { %v1114_v51 = vpack.c.bf16 %v1078_v45, %v1077_v44  ;;  %v40_v43 = vld [vmem:[%s4536_s0 + $0x68] sm:$0xff]  ;;  %v1597_v44 = vld [vmem:[%s4537_s3 + $0x60] sm:$0xff] }
  0x45   :  { %v1598_v45 = vld [vmem:[%s4537_s3 + $0x68] sm:$0xff]  ;;  %v97_v48 = vpack.c.bf16 %v40_v43, %v39_v42 }
  0x46   :  { %v1655_v49 = vpack.c.bf16 %v1598_v45, %v1597_v44 }
  0x4a   :  { %2744 = vmatmul.mubr.msk.bf16.gmra.mrb[32].mxu1 %vm240_vm0, %v208_v54  ;;  %2880 = vmatmul.mubr.msk.bf16.gmra.mrb[32].mxu0 %vm240_vm0, %v1104_v55  ;;  %v185_v54 = vld [vmem:[%s4534_s1 + $0x1d0] sm:$0xff]  ;;  %v186_v55 = vld [vmem:[%s4534_s1 + $0x1d8] sm:$0xff] }
  0x4b   :  { %2747 = vmatprep.mubr.msk.bf16.mxu1 %vm240_vm0, %v209_v56  ;;  %2883 = vmatprep.mubr.msk.bf16.mxu0 %vm240_vm0, %v1105_v57  ;;  %v1081_v56 = vld [vmem:[%s4535_s2 + $0x1d0] sm:$0xff]  ;;  %v1082_v57 = vld [vmem:[%s4535_s2 + $0x1d8] sm:$0xff]  ;;  %v220_v62 = vpack.c.bf16 %v186_v55, %v185_v54  ;;  %v43_v54 = vld [vmem:[%s4536_s0 + $0x80] sm:$0xff] }
  0x4c   :  { %v1116_v63 = vpack.c.bf16 %v1082_v57, %v1081_v56  ;;  %v44_v55 = vld [vmem:[%s4536_s0 + $0x88] sm:$0xff]  ;;  %v1601_v56 = vld [vmem:[%s4537_s3 + $0x80] sm:$0xff] }
  0x4d   :  { %v1602_v57 = vld [vmem:[%s4537_s3 + $0x88] sm:$0xff]  ;;  %v99_v60 = vpack.c.bf16 %v44_v55, %v43_v54 }
  0x4e   :  { %v1657_v61 = vpack.c.bf16 %v1602_v57, %v1601_v56 }
  0x52   :  { %2748 = vmatmul.mubr.msk.bf16.gmra.mrb[36].mxu1 %vm240_vm0, %v210_v2  ;;  %2884 = vmatmul.mubr.msk.bf16.gmra.mrb[36].mxu0 %vm240_vm0, %v1106_v3  ;;  %v189_v2 = vld [vmem:[%s4534_s1 + $0x1f0] sm:$0xff]  ;;  %v190_v3 = vld [vmem:[%s4534_s1 + $0x1f8] sm:$0xff] }
  0x53   :  { %2751 = vmatprep.mubr.msk.bf16.mxu1 %vm240_vm0, %v211_v4  ;;  %2887 = vmatprep.mubr.msk.bf16.mxu0 %vm240_vm0, %v1107_v5  ;;  %v1085_v4 = vld [vmem:[%s4535_s2 + $0x1f0] sm:$0xff]  ;;  %v1086_v5 = vld [vmem:[%s4535_s2 + $0x1f8] sm:$0xff]  ;;  %v222_v10 = vpack.c.bf16 %v190_v3, %v189_v2  ;;  %v47_v2 = vld [vmem:[%s4536_s0 + $0xa0] sm:$0xff] }
  0x54   :  { %v1118_v11 = vpack.c.bf16 %v1086_v5, %v1085_v4  ;;  %v48_v3 = vld [vmem:[%s4536_s0 + $0xa8] sm:$0xff]  ;;  %v1605_v4 = vld [vmem:[%s4537_s3 + $0xa0] sm:$0xff] }
  0x55   :  { %v1606_v5 = vld [vmem:[%s4537_s3 + $0xa8] sm:$0xff]  ;;  %v101_v8 = vpack.c.bf16 %v48_v3, %v47_v2 }
  0x56   :  { %v1659_v9 = vpack.c.bf16 %v1606_v5, %v1605_v4 }
  0x5a   :  { %2752 = vmatmul.mubr.msk.bf16.gmra.mrb[40].mxu1 %vm240_vm0, %v212_v14  ;;  %2888 = vmatmul.mubr.msk.bf16.gmra.mrb[40].mxu0 %vm240_vm0, %v1108_v15  ;;  %v29_v14 = vld [vmem:[%s4536_s0 + $0x10] sm:$0xff]  ;;  %v30_v15 = vld [vmem:[%s4536_s0 + $0x18] sm:$0xff] }
  0x5b   :  { %2755 = vmatprep.mubr.msk.bf16.mxu1 %vm240_vm0, %v213_v16  ;;  %2891 = vmatprep.mubr.msk.bf16.mxu0 %vm240_vm0, %v1109_v17  ;;  %v1587_v16 = vld [vmem:[%s4537_s3 + $0x10] sm:$0xff]  ;;  %v1588_v17 = vld [vmem:[%s4537_s3 + $0x18] sm:$0xff]  ;;  %v92_v22 = vpack.c.bf16 %v30_v15, %v29_v14  ;;  %v51_v14 = vld [vmem:[%s4536_s0 + $0xc0] sm:$0xff] }
  0x5c   :  { %v1650_v23 = vpack.c.bf16 %v1588_v17, %v1587_v16  ;;  %v52_v15 = vld [vmem:[%s4536_s0 + $0xc8] sm:$0xff]  ;;  %v1609_v16 = vld [vmem:[%s4537_s3 + $0xc0] sm:$0xff] }
  0x5d   :  { %v1610_v17 = vld [vmem:[%s4537_s3 + $0xc8] sm:$0xff]  ;;  %v103_v20 = vpack.c.bf16 %v52_v15, %v51_v14 }
  0x5e   :  { %v1661_v21 = vpack.c.bf16 %v1610_v17, %v1609_v16 }
  0x62   :  { %2756 = vmatmul.mubr.msk.bf16.gmra.mrb[44].mxu1 %vm240_vm0, %v214_v26  ;;  %2892 = vmatmul.mubr.msk.bf16.gmra.mrb[44].mxu0 %vm240_vm0, %v1110_v27  ;;  %v33_v26 = vld [vmem:[%s4536_s0 + $0x30] sm:$0xff]  ;;  %v34_v27 = vld [vmem:[%s4536_s0 + $0x38] sm:$0xff] }
  0x63   :  { %2759 = vmatprep.mubr.msk.bf16.mxu1 %vm240_vm0, %v215_v28  ;;  %2895 = vmatprep.mubr.msk.bf16.mxu0 %vm240_vm0, %v1111_v29  ;;  %v1591_v28 = vld [vmem:[%s4537_s3 + $0x30] sm:$0xff]  ;;  %v1592_v29 = vld [vmem:[%s4537_s3 + $0x38] sm:$0xff]  ;;  %v94_v34 = vpack.c.bf16 %v34_v27, %v33_v26  ;;  %v55_v26 = vld [vmem:[%s4536_s0 + $0xe0] sm:$0xff] }
  0x64   :  { %v1652_v35 = vpack.c.bf16 %v1592_v29, %v1591_v28  ;;  %v56_v27 = vld [vmem:[%s4536_s0 + $0xe8] sm:$0xff]  ;;  %v1613_v28 = vld [vmem:[%s4537_s3 + $0xe0] sm:$0xff] }
  0x65   :  { %v1614_v29 = vld [vmem:[%s4537_s3 + $0xe8] sm:$0xff]  ;;  %v105_v32 = vpack.c.bf16 %v56_v27, %v55_v26 }
  0x66   :  { %v1663_v33 = vpack.c.bf16 %v1614_v29, %v1613_v28 }
  0x6a   :  { %2760 = vmatmul.mubr.msk.bf16.gmra.mrb[48].mxu1 %vm240_vm0, %v216_v38  ;;  %2896 = vmatmul.mubr.msk.bf16.gmra.mrb[48].mxu0 %vm240_vm0, %v1112_v39  ;;  %v37_v38 = vld [vmem:[%s4536_s0 + $0x50] sm:$0xff]  ;;  %v38_v39 = vld [vmem:[%s4536_s0 + $0x58] sm:$0xff] }
  0x6b   :  { %2763 = vmatprep.mubr.msk.bf16.mxu1 %vm240_vm0, %v217_v40  ;;  %2899 = vmatprep.mubr.msk.bf16.mxu0 %vm240_vm0, %v1113_v41  ;;  %v1595_v40 = vld [vmem:[%s4537_s3 + $0x50] sm:$0xff]  ;;  %v1596_v41 = vld [vmem:[%s4537_s3 + $0x58] sm:$0xff]  ;;  %v96_v46 = vpack.c.bf16 %v38_v39, %v37_v38  ;;  %v59_v38 = vld [vmem:[%s4536_s0 + $0x100] sm:$0xff] }
  0x6c   :  { %v1654_v47 = vpack.c.bf16 %v1596_v41, %v1595_v40  ;;  %v60_v39 = vld [vmem:[%s4536_s0 + $0x108] sm:$0xff]  ;;  %v1617_v40 = vld [vmem:[%s4537_s3 + $0x100] sm:$0xff] }
  0x6d   :  { %v1618_v41 = vld [vmem:[%s4537_s3 + $0x108] sm:$0xff]  ;;  %v107_v44 = vpack.c.bf16 %v60_v39, %v59_v38 }
  0x6e   :  { %v1665_v45 = vpack.c.bf16 %v1618_v41, %v1617_v40 }
  0x72   :  { %2764 = vmatmul.mubr.msk.bf16.gmra.mrb[52].mxu1 %vm240_vm0, %v218_v50  ;;  %2900 = vmatmul.mubr.msk.bf16.gmra.mrb[52].mxu0 %vm240_vm0, %v1114_v51  ;;  %v41_v50 = vld [vmem:[%s4536_s0 + $0x70] sm:$0xff]  ;;  %v42_v51 = vld [vmem:[%s4536_s0 + $0x78] sm:$0xff] }
  0x73   :  { %2767 = vmatprep.mubr.msk.bf16.mxu1 %vm240_vm0, %v219_v52  ;;  %2903 = vmatprep.mubr.msk.bf16.mxu0 %vm240_vm0, %v1115_v53  ;;  %v1599_v52 = vld [vmem:[%s4537_s3 + $0x70] sm:$0xff]  ;;  %v1600_v53 = vld [vmem:[%s4537_s3 + $0x78] sm:$0xff]  ;;  %v98_v58 = vpack.c.bf16 %v42_v51, %v41_v50  ;;  %v63_v50 = vld [vmem:[%s4536_s0 + $0x120] sm:$0xff] }
  0x74   :  { %v1656_v59 = vpack.c.bf16 %v1600_v53, %v1599_v52  ;;  %v64_v51 = vld [vmem:[%s4536_s0 + $0x128] sm:$0xff]  ;;  %v1621_v52 = vld [vmem:[%s4537_s3 + $0x120] sm:$0xff] }
  0x75   :  { %v1622_v53 = vld [vmem:[%s4537_s3 + $0x128] sm:$0xff]  ;;  %v109_v56 = vpack.c.bf16 %v64_v51, %v63_v50 }
  0x76   :  { %v1667_v57 = vpack.c.bf16 %v1622_v53, %v1621_v52 }
  0x7a   :  { %2768 = vmatmul.mubr.msk.bf16.gmra.mrb[56].mxu1 %vm240_vm0, %v220_v62  ;;  %2904 = vmatmul.mubr.msk.bf16.gmra.mrb[56].mxu0 %vm240_vm0, %v1116_v63  ;;  %v45_v62 = vld [vmem:[%s4536_s0 + $0x90] sm:$0xff]  ;;  %v46_v63 = vld [vmem:[%s4536_s0 + $0x98] sm:$0xff] }
  0x7b   :  { %2771 = vmatprep.mubr.msk.bf16.mxu1 %vm240_vm0, %v221_v0  ;;  %2907 = vmatprep.mubr.msk.bf16.mxu0 %vm240_vm0, %v1117_v1  ;;  %v1603_v0 = vld [vmem:[%s4537_s3 + $0x90] sm:$0xff]  ;;  %v1604_v1 = vld [vmem:[%s4537_s3 + $0x98] sm:$0xff]  ;;  %v100_v6 = vpack.c.bf16 %v46_v63, %v45_v62  ;;  %v67_v62 = vld [vmem:[%s4536_s0 + $0x140] sm:$0xff] }
  0x7c   :  { %v1658_v7 = vpack.c.bf16 %v1604_v1, %v1603_v0  ;;  %v68_v63 = vld [vmem:[%s4536_s0 + $0x148] sm:$0xff]  ;;  %v1625_v0 = vld [vmem:[%s4537_s3 + $0x140] sm:$0xff] }
  0x7d   :  { %v1626_v1 = vld [vmem:[%s4537_s3 + $0x148] sm:$0xff]  ;;  %v111_v4 = vpack.c.bf16 %v68_v63, %v67_v62 }
  0x7e   :  { %v1669_v5 = vpack.c.bf16 %v1626_v1, %v1625_v0 }
  0x82   :  { %2772 = vmatmul.mubr.msk.bf16.gmra.mrb[60].mxu1 %vm240_vm0, %v222_v10  ;;  %2908 = vmatmul.mubr.msk.bf16.gmra.mrb[60].mxu0 %vm240_vm0, %v1118_v11  ;;  %v49_v10 = vld [vmem:[%s4536_s0 + $0xb0] sm:$0xff]  ;;  %v50_v11 = vld [vmem:[%s4536_s0 + $0xb8] sm:$0xff] }
  0x83   :  { %2779 = vmatprep.mubr.msk.bf16.mxu1 %vm240_vm0, %v91_v12  ;;  %2915 = vmatprep.mubr.msk.bf16.mxu0 %vm240_vm0, %v1649_v13  ;;  %v1607_v12 = vld [vmem:[%s4537_s3 + $0xb0] sm:$0xff]  ;;  %v1608_v13 = vld [vmem:[%s4537_s3 + $0xb8] sm:$0xff]  ;;  %v102_v18 = vpack.c.bf16 %v50_v11, %v49_v10  ;;  %v71_v10 = vld [vmem:[%s4536_s0 + $0x160] sm:$0xff] }
  0x84   :  { %v1660_v19 = vpack.c.bf16 %v1608_v13, %v1607_v12  ;;  %v72_v11 = vld [vmem:[%s4536_s0 + $0x168] sm:$0xff]  ;;  %v1629_v12 = vld [vmem:[%s4537_s3 + $0x160] sm:$0xff] }
  0x85   :  { %v1630_v13 = vld [vmem:[%s4537_s3 + $0x168] sm:$0xff]  ;;  %v113_v16 = vpack.c.bf16 %v72_v11, %v71_v10  ;;  %v4142_v10 = vld [vmem:[%s4538_s5] ss:$0 sm:$0xff] }
  0x86   :  { %v1671_v17 = vpack.c.bf16 %v1630_v13, %v1629_v12 }
  0x8a   :  { %2780 = vmatmul.mubr.msk.bf16.vlgmr.msra.gmra.mrb[0].mxu1 %vm240_vm0, %v92_v22  ;;  %2916 = vmatmul.mubr.msk.bf16.vlgmr.msra.gmra.mrb[0].mxu0 %vm240_vm0, %v1650_v23  ;;  %v53_v22 = vld [vmem:[%s4536_s0 + $0xd0] sm:$0xff]  ;;  %v54_v23 = vld [vmem:[%s4536_s0 + $0xd8] sm:$0xff] }
  0x8b   :  { %2783 = vmatprep.mubr.msk.bf16.mxu1 %vm240_vm0, %v93_v24  ;;  %2919 = vmatprep.mubr.msk.bf16.mxu0 %vm240_vm0, %v1651_v25  ;;  %v1611_v24 = vld [vmem:[%s4537_s3 + $0xd0] sm:$0xff]  ;;  %v1612_v25 = vld [vmem:[%s4537_s3 + $0xd8] sm:$0xff]  ;;  %v104_v30 = vpack.c.bf16 %v54_v23, %v53_v22  ;;  %v75_v22 = vld [vmem:[%s4536_s0 + $0x180] sm:$0xff] }
  0x8c   :  { %v1662_v31 = vpack.c.bf16 %v1612_v25, %v1611_v24  ;;  %v76_v23 = vld [vmem:[%s4536_s0 + $0x188] sm:$0xff]  ;;  %v1633_v24 = vld [vmem:[%s4537_s3 + $0x180] sm:$0xff] }
  0x8d   :  { %v1634_v25 = vld [vmem:[%s4537_s3 + $0x188] sm:$0xff]  ;;  %v115_v28 = vpack.c.bf16 %v76_v23, %v75_v22 }
  0x8e   :  { %v1673_v29 = vpack.c.bf16 %v1634_v25, %v1633_v24 }
  0x92   :  { %2784 = vmatmul.mubr.msk.bf16.gmra.mrb[4].mxu1 %vm240_vm0, %v94_v34  ;;  %2920 = vmatmul.mubr.msk.bf16.gmra.mrb[4].mxu0 %vm240_vm0, %v1652_v35  ;;  %v57_v34 = vld [vmem:[%s4536_s0 + $0xf0] sm:$0xff]  ;;  %v58_v35 = vld [vmem:[%s4536_s0 + $0xf8] sm:$0xff] }
  0x93   :  { %2787 = vmatprep.mubr.msk.bf16.mxu1 %vm240_vm0, %v95_v36  ;;  %2923 = vmatprep.mubr.msk.bf16.mxu0 %vm240_vm0, %v1653_v37  ;;  %v1615_v36 = vld [vmem:[%s4537_s3 + $0xf0] sm:$0xff]  ;;  %v1616_v37 = vld [vmem:[%s4537_s3 + $0xf8] sm:$0xff]  ;;  %v106_v42 = vpack.c.bf16 %v58_v35, %v57_v34  ;;  %v79_v34 = vld [vmem:[%s4536_s0 + $0x1a0] sm:$0xff] }
  0x94   :  { %v1664_v43 = vpack.c.bf16 %v1616_v37, %v1615_v36  ;;  %v80_v35 = vld [vmem:[%s4536_s0 + $0x1a8] sm:$0xff]  ;;  %v1637_v36 = vld [vmem:[%s4537_s3 + $0x1a0] sm:$0xff] }
  0x95   :  { %v1638_v37 = vld [vmem:[%s4537_s3 + $0x1a8] sm:$0xff]  ;;  %v117_v40 = vpack.c.bf16 %v80_v35, %v79_v34 }
  0x96   :  { %v1675_v41 = vpack.c.bf16 %v1638_v37, %v1637_v36 }
  0x9a   :  { %2788 = vmatmul.mubr.msk.bf16.gmra.mrb[8].mxu1 %vm240_vm0, %v96_v46  ;;  %2924 = vmatmul.mubr.msk.bf16.gmra.mrb[8].mxu0 %vm240_vm0, %v1654_v47  ;;  %v61_v46 = vld [vmem:[%s4536_s0 + $0x110] sm:$0xff]  ;;  %v62_v47 = vld [vmem:[%s4536_s0 + $0x118] sm:$0xff] }
  0x9b   :  { %2791 = vmatprep.mubr.msk.bf16.mxu1 %vm240_vm0, %v97_v48  ;;  %2927 = vmatprep.mubr.msk.bf16.mxu0 %vm240_vm0, %v1655_v49  ;;  %v1619_v48 = vld [vmem:[%s4537_s3 + $0x110] sm:$0xff]  ;;  %v1620_v49 = vld [vmem:[%s4537_s3 + $0x118] sm:$0xff]  ;;  %v108_v54 = vpack.c.bf16 %v62_v47, %v61_v46  ;;  %v83_v46 = vld [vmem:[%s4536_s0 + $0x1c0] sm:$0xff] }
  0x9c   :  { %v1666_v55 = vpack.c.bf16 %v1620_v49, %v1619_v48  ;;  %v84_v47 = vld [vmem:[%s4536_s0 + $0x1c8] sm:$0xff]  ;;  %v1641_v48 = vld [vmem:[%s4537_s3 + $0x1c0] sm:$0xff] }
  0x9d   :  { %v1642_v49 = vld [vmem:[%s4537_s3 + $0x1c8] sm:$0xff]  ;;  %v119_v52 = vpack.c.bf16 %v84_v47, %v83_v46 }
  0x9e   :  { %v1677_v53 = vpack.c.bf16 %v1642_v49, %v1641_v48 }
  0xa2   :  { %2792 = vmatmul.mubr.msk.bf16.gmra.mrb[12].mxu1 %vm240_vm0, %v98_v58  ;;  %2928 = vmatmul.mubr.msk.bf16.gmra.mrb[12].mxu0 %vm240_vm0, %v1656_v59  ;;  %v65_v58 = vld [vmem:[%s4536_s0 + $0x130] sm:$0xff]  ;;  %v66_v59 = vld [vmem:[%s4536_s0 + $0x138] sm:$0xff] }
  0xa3   :  { %2795 = vmatprep.mubr.msk.bf16.mxu1 %vm240_vm0, %v99_v60  ;;  %2931 = vmatprep.mubr.msk.bf16.mxu0 %vm240_vm0, %v1657_v61  ;;  %v1623_v60 = vld [vmem:[%s4537_s3 + $0x130] sm:$0xff]  ;;  %v1624_v61 = vld [vmem:[%s4537_s3 + $0x138] sm:$0xff]  ;;  %v110_v2 = vpack.c.bf16 %v66_v59, %v65_v58  ;;  %v87_v58 = vld [vmem:[%s4536_s0 + $0x1e0] sm:$0xff] }
  0xa4   :  { %v1668_v3 = vpack.c.bf16 %v1624_v61, %v1623_v60  ;;  %v88_v59 = vld [vmem:[%s4536_s0 + $0x1e8] sm:$0xff]  ;;  %v1645_v60 = vld [vmem:[%s4537_s3 + $0x1e0] sm:$0xff] }
  0xa5   :  { %v1646_v61 = vld [vmem:[%s4537_s3 + $0x1e8] sm:$0xff]  ;;  %v121_v0 = vpack.c.bf16 %v88_v59, %v87_v58 }
  0xa6   :  { %v1679_v1 = vpack.c.bf16 %v1646_v61, %v1645_v60 }
  0xaa   :  { %2796 = vmatmul.mubr.msk.bf16.gmra.mrb[16].mxu1 %vm240_vm0, %v100_v6  ;;  %2932 = vmatmul.mubr.msk.bf16.gmra.mrb[16].mxu0 %vm240_vm0, %v1658_v7  ;;  %v69_v6 = vld [vmem:[%s4536_s0 + $0x150] sm:$0xff]  ;;  %v70_v7 = vld [vmem:[%s4536_s0 + $0x158] sm:$0xff] }
  0xab   :  { %2799 = vmatprep.mubr.msk.bf16.mxu1 %vm240_vm0, %v101_v8  ;;  %2935 = vmatprep.mubr.msk.bf16.mxu0 %vm240_vm0, %v1659_v9  ;;  %v1627_v8 = vld [vmem:[%s4537_s3 + $0x150] sm:$0xff]  ;;  %v1628_v9 = vld [vmem:[%s4537_s3 + $0x158] sm:$0xff]  ;;  %v112_v14 = vpack.c.bf16 %v70_v7, %v69_v6 }
  0xac   :  { %v1670_v15 = vpack.c.bf16 %v1628_v9, %v1627_v8 }
  0xb2   :  { %2800 = vmatmul.mubr.msk.bf16.gmra.mrb[20].mxu1 %vm240_vm0, %v102_v18  ;;  %2936 = vmatmul.mubr.msk.bf16.gmra.mrb[20].mxu0 %vm240_vm0, %v1660_v19  ;;  %v73_v18 = vld [vmem:[%s4536_s0 + $0x170] sm:$0xff]  ;;  %v74_v19 = vld [vmem:[%s4536_s0 + $0x178] sm:$0xff] }
  0xb3   :  { %2803 = vmatprep.mubr.msk.bf16.mxu1 %vm240_vm0, %v103_v20  ;;  %2939 = vmatprep.mubr.msk.bf16.mxu0 %vm240_vm0, %v1661_v21  ;;  %v1631_v20 = vld [vmem:[%s4537_s3 + $0x170] sm:$0xff]  ;;  %v1632_v21 = vld [vmem:[%s4537_s3 + $0x178] sm:$0xff]  ;;  %v114_v26 = vpack.c.bf16 %v74_v19, %v73_v18 }
  0xb4   :  { %v1672_v27 = vpack.c.bf16 %v1632_v21, %v1631_v20 }
  0xba   :  { %2804 = vmatmul.mubr.msk.bf16.gmra.mrb[24].mxu1 %vm240_vm0, %v104_v30  ;;  %2940 = vmatmul.mubr.msk.bf16.gmra.mrb[24].mxu0 %vm240_vm0, %v1662_v31  ;;  %v77_v30 = vld [vmem:[%s4536_s0 + $0x190] sm:$0xff]  ;;  %v78_v31 = vld [vmem:[%s4536_s0 + $0x198] sm:$0xff] }
  0xbb   :  { %2807 = vmatprep.mubr.msk.bf16.mxu1 %vm240_vm0, %v105_v32  ;;  %2943 = vmatprep.mubr.msk.bf16.mxu0 %vm240_vm0, %v1663_v33  ;;  %v1635_v32 = vld [vmem:[%s4537_s3 + $0x190] sm:$0xff]  ;;  %v1636_v33 = vld [vmem:[%s4537_s3 + $0x198] sm:$0xff]  ;;  %v116_v38 = vpack.c.bf16 %v78_v31, %v77_v30 }
  0xbc   :  { %v1674_v39 = vpack.c.bf16 %v1636_v33, %v1635_v32 }
  0xc2   :  { %2808 = vmatmul.mubr.msk.bf16.gmra.mrb[28].mxu1 %vm240_vm0, %v106_v42  ;;  %2944 = vmatmul.mubr.msk.bf16.gmra.mrb[28].mxu0 %vm240_vm0, %v1664_v43  ;;  %v81_v42 = vld [vmem:[%s4536_s0 + $0x1b0] sm:$0xff]  ;;  %v82_v43 = vld [vmem:[%s4536_s0 + $0x1b8] sm:$0xff] }
  0xc3   :  { %2811 = vmatprep.mubr.msk.bf16.mxu1 %vm240_vm0, %v107_v44  ;;  %2947 = vmatprep.mubr.msk.bf16.mxu0 %vm240_vm0, %v1665_v45  ;;  %v1639_v44 = vld [vmem:[%s4537_s3 + $0x1b0] sm:$0xff]  ;;  %v1640_v45 = vld [vmem:[%s4537_s3 + $0x1b8] sm:$0xff]  ;;  %v118_v50 = vpack.c.bf16 %v82_v43, %v81_v42 }
  0xc4   :  { %v1676_v51 = vpack.c.bf16 %v1640_v45, %v1639_v44 }
  0xca   :  { %2812 = vmatmul.mubr.msk.bf16.gmra.mrb[32].mxu1 %vm240_vm0, %v108_v54  ;;  %2948 = vmatmul.mubr.msk.bf16.gmra.mrb[32].mxu0 %vm240_vm0, %v1666_v55  ;;  %v85_v54 = vld [vmem:[%s4536_s0 + $0x1d0] sm:$0xff]  ;;  %v86_v55 = vld [vmem:[%s4536_s0 + $0x1d8] sm:$0xff] }
  0xcb   :  { %2815 = vmatprep.mubr.msk.bf16.mxu1 %vm240_vm0, %v109_v56  ;;  %2951 = vmatprep.mubr.msk.bf16.mxu0 %vm240_vm0, %v1667_v57  ;;  %v1643_v56 = vld [vmem:[%s4537_s3 + $0x1d0] sm:$0xff]  ;;  %v1644_v57 = vld [vmem:[%s4537_s3 + $0x1d8] sm:$0xff]  ;;  %v120_v62 = vpack.c.bf16 %v86_v55, %v85_v54 }
  0xcc   :  { %v1678_v63 = vpack.c.bf16 %v1644_v57, %v1643_v56 }
  0xd2   :  { %2816 = vmatmul.mubr.msk.bf16.gmra.mrb[36].mxu1 %vm240_vm0, %v110_v2  ;;  %2952 = vmatmul.mubr.msk.bf16.gmra.mrb[36].mxu0 %vm240_vm0, %v1668_v3  ;;  %v89_v2 = vld [vmem:[%s4536_s0 + $0x1f0] sm:$0xff]  ;;  %v90_v3 = vld [vmem:[%s4536_s0 + $0x1f8] sm:$0xff] }
  0xd3   :  { %2819 = vmatprep.mubr.msk.bf16.mxu1 %vm240_vm0, %v111_v4  ;;  %2955 = vmatprep.mubr.msk.bf16.mxu0 %vm240_vm0, %v1669_v5  ;;  %v1647_v4 = vld [vmem:[%s4537_s3 + $0x1f0] sm:$0xff]  ;;  %v1648_v5 = vld [vmem:[%s4537_s3 + $0x1f8] sm:$0xff]  ;;  %v122_v6 = vpack.c.bf16 %v90_v3, %v89_v2 }
  0xd4   :  { %v1680_v7 = vpack.c.bf16 %v1648_v5, %v1647_v4 }
  0xda   :  { %2820 = vmatmul.mubr.msk.bf16.gmra.mrb[40].mxu1 %vm240_vm0, %v112_v14  ;;  %2956 = vmatmul.mubr.msk.bf16.gmra.mrb[40].mxu0 %vm240_vm0, %v1670_v15  ;;  %v4147_v15 = vld [vmem:[%s4539_s6] ss:$0 sm:$0xff] }
  0xdb   :  { %2823 = vmatprep.mubr.msk.bf16.mxu1 %vm240_vm0, %v113_v16  ;;  %2959 = vmatprep.mubr.msk.bf16.mxu0 %vm240_vm0, %v1671_v17 }
  0xe2   :  { %2824 = vmatmul.mubr.msk.bf16.gmra.mrb[44].mxu1 %vm240_vm0, %v114_v26  ;;  %2960 = vmatmul.mubr.msk.bf16.gmra.mrb[44].mxu0 %vm240_vm0, %v1672_v27 }
  0xe3   :  { %2827 = vmatprep.mubr.msk.bf16.mxu1 %vm240_vm0, %v115_v28  ;;  %2963 = vmatprep.mubr.msk.bf16.mxu0 %vm240_vm0, %v1673_v29 }
  0xea   :  { %2828 = vmatmul.mubr.msk.bf16.gmra.mrb[48].mxu1 %vm240_vm0, %v116_v38  ;;  %2964 = vmatmul.mubr.msk.bf16.gmra.mrb[48].mxu0 %vm240_vm0, %v1674_v39 }
  0xeb   :  { %2831 = vmatprep.mubr.msk.bf16.mxu1 %vm240_vm0, %v117_v40  ;;  %2967 = vmatprep.mubr.msk.bf16.mxu0 %vm240_vm0, %v1675_v41 }
  0xf2   :  { %2832 = vmatmul.mubr.msk.bf16.gmra.mrb[52].mxu1 %vm240_vm0, %v118_v50  ;;  %2968 = vmatmul.mubr.msk.bf16.gmra.mrb[52].mxu0 %vm240_vm0, %v1676_v51 }
  0xf3   :  { %2835 = vmatprep.mubr.msk.bf16.mxu1 %vm240_vm0, %v119_v52  ;;  %2971 = vmatprep.mubr.msk.bf16.mxu0 %vm240_vm0, %v1677_v53 }
  0xfa   :  { %2836 = vmatmul.mubr.msk.bf16.gmra.mrb[56].mxu1 %vm240_vm0, %v120_v62  ;;  %2972 = vmatmul.mubr.msk.bf16.gmra.mrb[56].mxu0 %vm240_vm0, %v1678_v63 }
  0xfb   :  { %2839 = vmatprep.mubr.msk.bf16.mxu1 %vm240_vm0, %v121_v0  ;;  %2975 = vmatprep.mubr.msk.bf16.mxu0 %vm240_vm0, %v1679_v1 }
 0x102   :  { %2840 = vmatmul.mubr.msk.bf16.gmra.mrb[60].mxu1 %vm240_vm0, %v122_v6  ;;  %2976 = vmatmul.mubr.msk.bf16.gmra.mrb[60].mxu0 %vm240_vm0, %v1680_v7 }
 0x15d   :  { %v2781_v8 = vpop.f32.mrb[0].mxu1  ;;  %v2917_v9 = vpop.f32.mrb[0].mxu0 }
 0x15e   :  { %v768_v11 = vpop.f32.mrb[1].mxu1  ;;  %v2979_v12 = vadd.f32 %v2917_v9, %v2781_v8  ;;  %v1828_v13 = vpop.f32.mrb[1].mxu0 }
 0x15f   :  { %v2782_v14 = vpop.f32.mrb[2].mxu1  ;;  %v2980_v16 = vadd.f32 %v1828_v13, %v768_v11  ;;  %v2918_v17 = vpop.f32.mrb[2].mxu0 }
 0x160   :  { %v771_v18 = vpop.f32.mrb[3].mxu1  ;;  %v2156_v19 = vmul.f32 %v2979_v12, %v4142_v10  ;;  %v2981_v20 = vadd.f32 %v2918_v17, %v2782_v14  ;;  %v1831_v21 = vpop.f32.mrb[3].mxu0 }
 0x161   :  { %v2154_v22 = vmul.f32 %v2980_v16, %v4142_v10  ;;  %v2982_v23 = vadd.f32 %v1831_v21, %v771_v18 }
 0x162   :  { %v2227_v24 = vadd.f32 %v4147_v15, %v2156_v19  ;;  %v2157_v25 = vmul.f32 %v2981_v20, %v4142_v10 }
 0x163   :  { %v2225_v26 = vadd.f32 %v4147_v15, %v2154_v22  ;;  %v2155_v27 = vmul.f32 %v2982_v23, %v4142_v10 }
 0x164   :  { %v2291_v28 = vmax.f32 %v2227_v24, 0.0  ;;  %v2228_v29 = vadd.f32 %v4147_v15, %v2157_v25 }
 0x165   :  { %v2785_v30 = vpop.f32.mrb[4].mxu1  ;;  %v2289_v31 = vmax.f32 %v2225_v26, 0.0  ;;  %v2226_v32 = vadd.f32 %v4147_v15, %v2155_v27  ;;  %v2921_v33 = vpop.f32.mrb[4].mxu0 }
 0x166   :  { %v784_v34 = vpop.f32.mrb[5].mxu1  ;;  %2355 = vst.msk [vmem:[%s4540_s7 + $0x10] sm:$0xff] %vm240_vm0, %v2291_v28  ;;  %v2292_v35 = vmax.f32 %v2228_v29, 0.0  ;;  %v2983_v36 = vadd.f32 %v2921_v33, %v2785_v30  ;;  %v1844_v37 = vpop.f32.mrb[5].mxu0 }
 0x167   :  { %v2786_v38 = vpop.f32.mrb[6].mxu1  ;;  %2353 = vst.msk [vmem:[%s4540_s7] sm:$0xff] %vm240_vm0, %v2289_v31  ;;  %v2290_v39 = vmax.f32 %v2226_v32, 0.0  ;;  %v2984_v40 = vadd.f32 %v1844_v37, %v784_v34  ;;  %v2922_v41 = vpop.f32.mrb[6].mxu0 }
 0x168   :  { %v787_v42 = vpop.f32.mrb[7].mxu1  ;;  %2356 = vst.msk [vmem:[%s4540_s7 + $0x18] sm:$0xff] %vm240_vm0, %v2292_v35  ;;  %v2160_v43 = vmul.f32 %v2983_v36, %v4142_v10  ;;  %v2985_v44 = vadd.f32 %v2922_v41, %v2786_v38  ;;  %v1847_v45 = vpop.f32.mrb[7].mxu0 }
 0x169   :  { %2354 = vst.msk [vmem:[%s4540_s7 + $0x8] sm:$0xff] %vm240_vm0, %v2290_v39  ;;  %v2158_v46 = vmul.f32 %v2984_v40, %v4142_v10  ;;  %v2986_v47 = vadd.f32 %v1847_v45, %v787_v42 }
 0x16a   :  { %v2231_v48 = vadd.f32 %v4147_v15, %v2160_v43  ;;  %v2161_v49 = vmul.f32 %v2985_v44, %v4142_v10 }
 0x16b   :  { %v2229_v50 = vadd.f32 %v4147_v15, %v2158_v46  ;;  %v2159_v51 = vmul.f32 %v2986_v47, %v4142_v10 }
 0x16c   :  { %v2295_v52 = vmax.f32 %v2231_v48, 0.0  ;;  %v2232_v53 = vadd.f32 %v4147_v15, %v2161_v49 }
 0x16d   :  { %v2789_v54 = vpop.f32.mrb[8].mxu1  ;;  %v2293_v55 = vmax.f32 %v2229_v50, 0.0  ;;  %v2230_v56 = vadd.f32 %v4147_v15, %v2159_v51  ;;  %v2925_v57 = vpop.f32.mrb[8].mxu0 }
 0x16e   :  { %v800_v58 = vpop.f32.mrb[9].mxu1  ;;  %2359 = vst.msk [vmem:[%s4540_s7 + $0x30] sm:$0xff] %vm240_vm0, %v2295_v52  ;;  %v2296_v59 = vmax.f32 %v2232_v53, 0.0  ;;  %v2987_v60 = vadd.f32 %v2925_v57, %v2789_v54  ;;  %v1860_v61 = vpop.f32.mrb[9].mxu0 }
 0x16f   :  { %v2790_v62 = vpop.f32.mrb[10].mxu1  ;;  %2357 = vst.msk [vmem:[%s4540_s7 + $0x20] sm:$0xff] %vm240_vm0, %v2293_v55  ;;  %v2294_v63 = vmax.f32 %v2230_v56, 0.0  ;;  %v2988_v0 = vadd.f32 %v1860_v61, %v800_v58  ;;  %v2926_v1 = vpop.f32.mrb[10].mxu0 }
 0x170   :  { %v803_v2 = vpop.f32.mrb[11].mxu1  ;;  %2360 = vst.msk [vmem:[%s4540_s7 + $0x38] sm:$0xff] %vm240_vm0, %v2296_v59  ;;  %v2164_v3 = vmul.f32 %v2987_v60, %v4142_v10  ;;  %v2989_v4 = vadd.f32 %v2926_v1, %v2790_v62  ;;  %v1863_v5 = vpop.f32.mrb[11].mxu0 }
 0x171   :  { %2358 = vst.msk [vmem:[%s4540_s7 + $0x28] sm:$0xff] %vm240_vm0, %v2294_v63  ;;  %v2162_v6 = vmul.f32 %v2988_v0, %v4142_v10  ;;  %v2990_v7 = vadd.f32 %v1863_v5, %v803_v2 }
 0x172   :  { %v2235_v8 = vadd.f32 %v4147_v15, %v2164_v3  ;;  %v2165_v9 = vmul.f32 %v2989_v4, %v4142_v10 }
 0x173   :  { %v2233_v11 = vadd.f32 %v4147_v15, %v2162_v6  ;;  %v2163_v12 = vmul.f32 %v2990_v7, %v4142_v10 }
 0x174   :  { %v2299_v13 = vmax.f32 %v2235_v8, 0.0  ;;  %v2236_v14 = vadd.f32 %v4147_v15, %v2165_v9 }
 0x175   :  { %v2793_v16 = vpop.f32.mrb[12].mxu1  ;;  %v2297_v17 = vmax.f32 %v2233_v11, 0.0  ;;  %v2234_v18 = vadd.f32 %v4147_v15, %v2163_v12  ;;  %v2929_v19 = vpop.f32.mrb[12].mxu0 }
 0x176   :  { %v816_v20 = vpop.f32.mrb[13].mxu1  ;;  %2363 = vst.msk [vmem:[%s4540_s7 + $0x50] sm:$0xff] %vm240_vm0, %v2299_v13  ;;  %v2300_v21 = vmax.f32 %v2236_v14, 0.0  ;;  %v2991_v22 = vadd.f32 %v2929_v19, %v2793_v16  ;;  %v1876_v23 = vpop.f32.mrb[13].mxu0 }
 0x177   :  { %v2794_v24 = vpop.f32.mrb[14].mxu1  ;;  %2361 = vst.msk [vmem:[%s4540_s7 + $0x40] sm:$0xff] %vm240_vm0, %v2297_v17  ;;  %v2298_v25 = vmax.f32 %v2234_v18, 0.0  ;;  %v2992_v26 = vadd.f32 %v1876_v23, %v816_v20  ;;  %v2930_v27 = vpop.f32.mrb[14].mxu0 }
 0x178   :  { %v819_v28 = vpop.f32.mrb[15].mxu1  ;;  %2364 = vst.msk [vmem:[%s4540_s7 + $0x58] sm:$0xff] %vm240_vm0, %v2300_v21  ;;  %v2168_v29 = vmul.f32 %v2991_v22, %v4142_v10  ;;  %v2993_v30 = vadd.f32 %v2930_v27, %v2794_v24  ;;  %v1879_v31 = vpop.f32.mrb[15].mxu0 }
 0x179   :  { %2362 = vst.msk [vmem:[%s4540_s7 + $0x48] sm:$0xff] %vm240_vm0, %v2298_v25  ;;  %v2166_v32 = vmul.f32 %v2992_v26, %v4142_v10  ;;  %v2994_v33 = vadd.f32 %v1879_v31, %v819_v28 }
 0x17a   :  { %v2239_v34 = vadd.f32 %v4147_v15, %v2168_v29  ;;  %v2169_v35 = vmul.f32 %v2993_v30, %v4142_v10 }
 0x17b   :  { %v2237_v36 = vadd.f32 %v4147_v15, %v2166_v32  ;;  %v2167_v37 = vmul.f32 %v2994_v33, %v4142_v10 }
 0x17c   :  { %v2303_v38 = vmax.f32 %v2239_v34, 0.0  ;;  %v2240_v39 = vadd.f32 %v4147_v15, %v2169_v35 }
 0x17d   :  { %v2797_v40 = vpop.f32.mrb[16].mxu1  ;;  %v2301_v41 = vmax.f32 %v2237_v36, 0.0  ;;  %v2238_v42 = vadd.f32 %v4147_v15, %v2167_v37  ;;  %v2933_v43 = vpop.f32.mrb[16].mxu0 }
 0x17e   :  { %v832_v44 = vpop.f32.mrb[17].mxu1  ;;  %2367 = vst.msk [vmem:[%s4540_s7 + $0x70] sm:$0xff] %vm240_vm0, %v2303_v38  ;;  %v2304_v45 = vmax.f32 %v2240_v39, 0.0  ;;  %v2995_v46 = vadd.f32 %v2933_v43, %v2797_v40  ;;  %v1892_v47 = vpop.f32.mrb[17].mxu0 }
 0x17f   :  { %v2798_v48 = vpop.f32.mrb[18].mxu1  ;;  %2365 = vst.msk [vmem:[%s4540_s7 + $0x60] sm:$0xff] %vm240_vm0, %v2301_v41  ;;  %v2302_v49 = vmax.f32 %v2238_v42, 0.0  ;;  %v2996_v50 = vadd.f32 %v1892_v47, %v832_v44  ;;  %v2934_v51 = vpop.f32.mrb[18].mxu0 }
 0x180   :  { %v835_v52 = vpop.f32.mrb[19].mxu1  ;;  %2368 = vst.msk [vmem:[%s4540_s7 + $0x78] sm:$0xff] %vm240_vm0, %v2304_v45  ;;  %v2172_v53 = vmul.f32 %v2995_v46, %v4142_v10  ;;  %v2997_v54 = vadd.f32 %v2934_v51, %v2798_v48  ;;  %v1895_v55 = vpop.f32.mrb[19].mxu0 }
 0x181   :  { %2366 = vst.msk [vmem:[%s4540_s7 + $0x68] sm:$0xff] %vm240_vm0, %v2302_v49  ;;  %v2170_v56 = vmul.f32 %v2996_v50, %v4142_v10  ;;  %v2998_v57 = vadd.f32 %v1895_v55, %v835_v52 }
 0x182   :  { %v2243_v58 = vadd.f32 %v4147_v15, %v2172_v53  ;;  %v2173_v59 = vmul.f32 %v2997_v54, %v4142_v10 }
 0x183   :  { %v2241_v60 = vadd.f32 %v4147_v15, %v2170_v56  ;;  %v2171_v61 = vmul.f32 %v2998_v57, %v4142_v10 }
 0x184   :  { %v2307_v62 = vmax.f32 %v2243_v58, 0.0  ;;  %v2244_v63 = vadd.f32 %v4147_v15, %v2173_v59 }
 0x185   :  { %v2801_v0 = vpop.f32.mrb[20].mxu1  ;;  %v2305_v1 = vmax.f32 %v2241_v60, 0.0  ;;  %v2242_v2 = vadd.f32 %v4147_v15, %v2171_v61  ;;  %v2937_v3 = vpop.f32.mrb[20].mxu0 }
 0x186   :  { %v848_v4 = vpop.f32.mrb[21].mxu1  ;;  %2371 = vst.msk [vmem:[%s4540_s7 + $0x90] sm:$0xff] %vm240_vm0, %v2307_v62  ;;  %v2308_v5 = vmax.f32 %v2244_v63, 0.0  ;;  %v2999_v6 = vadd.f32 %v2937_v3, %v2801_v0  ;;  %v1908_v7 = vpop.f32.mrb[21].mxu0 }
 0x187   :  { %v2802_v8 = vpop.f32.mrb[22].mxu1  ;;  %2369 = vst.msk [vmem:[%s4540_s7 + $0x80] sm:$0xff] %vm240_vm0, %v2305_v1  ;;  %v2306_v9 = vmax.f32 %v2242_v2, 0.0  ;;  %v3000_v11 = vadd.f32 %v1908_v7, %v848_v4  ;;  %v2938_v12 = vpop.f32.mrb[22].mxu0 }
 0x188   :  { %v851_v13 = vpop.f32.mrb[23].mxu1  ;;  %2372 = vst.msk [vmem:[%s4540_s7 + $0x98] sm:$0xff] %vm240_vm0, %v2308_v5  ;;  %v2176_v14 = vmul.f32 %v2999_v6, %v4142_v10  ;;  %v3001_v16 = vadd.f32 %v2938_v12, %v2802_v8  ;;  %v1911_v17 = vpop.f32.mrb[23].mxu0 }
 0x189   :  { %2370 = vst.msk [vmem:[%s4540_s7 + $0x88] sm:$0xff] %vm240_vm0, %v2306_v9  ;;  %v2174_v18 = vmul.f32 %v3000_v11, %v4142_v10  ;;  %v3002_v19 = vadd.f32 %v1911_v17, %v851_v13 }
 0x18a   :  { %v2247_v20 = vadd.f32 %v4147_v15, %v2176_v14  ;;  %v2177_v21 = vmul.f32 %v3001_v16, %v4142_v10 }
 0x18b   :  { %v2245_v22 = vadd.f32 %v4147_v15, %v2174_v18  ;;  %v2175_v23 = vmul.f32 %v3002_v19, %v4142_v10 }
 0x18c   :  { %v2311_v24 = vmax.f32 %v2247_v20, 0.0  ;;  %v2248_v25 = vadd.f32 %v4147_v15, %v2177_v21 }
 0x18d   :  { %v2805_v26 = vpop.f32.mrb[24].mxu1  ;;  %v2309_v27 = vmax.f32 %v2245_v22, 0.0  ;;  %v2246_v28 = vadd.f32 %v4147_v15, %v2175_v23  ;;  %v2941_v29 = vpop.f32.mrb[24].mxu0 }
 0x18e   :  { %v864_v30 = vpop.f32.mrb[25].mxu1  ;;  %2375 = vst.msk [vmem:[%s4540_s7 + $0xb0] sm:$0xff] %vm240_vm0, %v2311_v24  ;;  %v2312_v31 = vmax.f32 %v2248_v25, 0.0  ;;  %v3003_v32 = vadd.f32 %v2941_v29, %v2805_v26  ;;  %v1924_v33 = vpop.f32.mrb[25].mxu0 }
 0x18f   :  { %v2806_v34 = vpop.f32.mrb[26].mxu1  ;;  %2373 = vst.msk [vmem:[%s4540_s7 + $0xa0] sm:$0xff] %vm240_vm0, %v2309_v27  ;;  %v2310_v35 = vmax.f32 %v2246_v28, 0.0  ;;  %v3004_v36 = vadd.f32 %v1924_v33, %v864_v30  ;;  %v2942_v37 = vpop.f32.mrb[26].mxu0 }
 0x190   :  { %v867_v38 = vpop.f32.mrb[27].mxu1  ;;  %2376 = vst.msk [vmem:[%s4540_s7 + $0xb8] sm:$0xff] %vm240_vm0, %v2312_v31  ;;  %v2180_v39 = vmul.f32 %v3003_v32, %v4142_v10  ;;  %v3005_v40 = vadd.f32 %v2942_v37, %v2806_v34  ;;  %v1927_v41 = vpop.f32.mrb[27].mxu0 }
 0x191   :  { %2374 = vst.msk [vmem:[%s4540_s7 + $0xa8] sm:$0xff] %vm240_vm0, %v2310_v35  ;;  %v2178_v42 = vmul.f32 %v3004_v36, %v4142_v10  ;;  %v3006_v43 = vadd.f32 %v1927_v41, %v867_v38 }
 0x192   :  { %v2251_v44 = vadd.f32 %v4147_v15, %v2180_v39  ;;  %v2181_v45 = vmul.f32 %v3005_v40, %v4142_v10 }
 0x193   :  { %v2249_v46 = vadd.f32 %v4147_v15, %v2178_v42  ;;  %v2179_v47 = vmul.f32 %v3006_v43, %v4142_v10 }
 0x194   :  { %v2315_v48 = vmax.f32 %v2251_v44, 0.0  ;;  %v2252_v49 = vadd.f32 %v4147_v15, %v2181_v45 }
 0x195   :  { %v2809_v50 = vpop.f32.mrb[28].mxu1  ;;  %v2313_v51 = vmax.f32 %v2249_v46, 0.0  ;;  %v2250_v52 = vadd.f32 %v4147_v15, %v2179_v47  ;;  %v2945_v53 = vpop.f32.mrb[28].mxu0 }
 0x196   :  { %v880_v54 = vpop.f32.mrb[29].mxu1  ;;  %2379 = vst.msk [vmem:[%s4540_s7 + $0xd0] sm:$0xff] %vm240_vm0, %v2315_v48  ;;  %v2316_v55 = vmax.f32 %v2252_v49, 0.0  ;;  %v3007_v56 = vadd.f32 %v2945_v53, %v2809_v50  ;;  %v1940_v57 = vpop.f32.mrb[29].mxu0 }
 0x197   :  { %v2810_v58 = vpop.f32.mrb[30].mxu1  ;;  %2377 = vst.msk [vmem:[%s4540_s7 + $0xc0] sm:$0xff] %vm240_vm0, %v2313_v51  ;;  %v2314_v59 = vmax.f32 %v2250_v52, 0.0  ;;  %v3008_v60 = vadd.f32 %v1940_v57, %v880_v54  ;;  %v2946_v61 = vpop.f32.mrb[30].mxu0 }
 0x198   :  { %v883_v62 = vpop.f32.mrb[31].mxu1  ;;  %2380 = vst.msk [vmem:[%s4540_s7 + $0xd8] sm:$0xff] %vm240_vm0, %v2316_v55  ;;  %v2184_v63 = vmul.f32 %v3007_v56, %v4142_v10  ;;  %v3009_v0 = vadd.f32 %v2946_v61, %v2810_v58  ;;  %v1943_v1 = vpop.f32.mrb[31].mxu0 }
 0x199   :  { %2378 = vst.msk [vmem:[%s4540_s7 + $0xc8] sm:$0xff] %vm240_vm0, %v2314_v59  ;;  %v2182_v2 = vmul.f32 %v3008_v60, %v4142_v10  ;;  %v3010_v3 = vadd.f32 %v1943_v1, %v883_v62 }
 0x19a   :  { %v2255_v4 = vadd.f32 %v4147_v15, %v2184_v63  ;;  %v2185_v5 = vmul.f32 %v3009_v0, %v4142_v10 }
 0x19b   :  { %v2253_v6 = vadd.f32 %v4147_v15, %v2182_v2  ;;  %v2183_v7 = vmul.f32 %v3010_v3, %v4142_v10 }
 0x19c   :  { %v2319_v8 = vmax.f32 %v2255_v4, 0.0  ;;  %v2256_v9 = vadd.f32 %v4147_v15, %v2185_v5 }
 0x19d   :  { %v2813_v11 = vpop.f32.mrb[32].mxu1  ;;  %v2317_v12 = vmax.f32 %v2253_v6, 0.0  ;;  %v2254_v13 = vadd.f32 %v4147_v15, %v2183_v7  ;;  %v2949_v14 = vpop.f32.mrb[32].mxu0 }
 0x19e   :  { %v896_v16 = vpop.f32.mrb[33].mxu1  ;;  %2383 = vst.msk [vmem:[%s4540_s7 + $0xf0] sm:$0xff] %vm240_vm0, %v2319_v8  ;;  %v2320_v17 = vmax.f32 %v2256_v9, 0.0  ;;  %v3011_v18 = vadd.f32 %v2949_v14, %v2813_v11  ;;  %v1956_v19 = vpop.f32.mrb[33].mxu0 }
 0x19f   :  { %v2814_v20 = vpop.f32.mrb[34].mxu1  ;;  %2381 = vst.msk [vmem:[%s4540_s7 + $0xe0] sm:$0xff] %vm240_vm0, %v2317_v12  ;;  %v2318_v21 = vmax.f32 %v2254_v13, 0.0  ;;  %v3012_v22 = vadd.f32 %v1956_v19, %v896_v16  ;;  %v2950_v23 = vpop.f32.mrb[34].mxu0 }
 0x1a0   :  { %v899_v24 = vpop.f32.mrb[35].mxu1  ;;  %2384 = vst.msk [vmem:[%s4540_s7 + $0xf8] sm:$0xff] %vm240_vm0, %v2320_v17  ;;  %v2188_v25 = vmul.f32 %v3011_v18, %v4142_v10  ;;  %v3013_v26 = vadd.f32 %v2950_v23, %v2814_v20  ;;  %v1959_v27 = vpop.f32.mrb[35].mxu0 }
 0x1a1   :  { %2382 = vst.msk [vmem:[%s4540_s7 + $0xe8] sm:$0xff] %vm240_vm0, %v2318_v21  ;;  %v2186_v28 = vmul.f32 %v3012_v22, %v4142_v10  ;;  %v3014_v29 = vadd.f32 %v1959_v27, %v899_v24 }
 0x1a2   :  { %v2259_v30 = vadd.f32 %v4147_v15, %v2188_v25  ;;  %v2189_v31 = vmul.f32 %v3013_v26, %v4142_v10 }
 0x1a3   :  { %v2257_v32 = vadd.f32 %v4147_v15, %v2186_v28  ;;  %v2187_v33 = vmul.f32 %v3014_v29, %v4142_v10 }
 0x1a4   :  { %v2323_v34 = vmax.f32 %v2259_v30, 0.0  ;;  %v2260_v35 = vadd.f32 %v4147_v15, %v2189_v31 }
 0x1a5   :  { %v2817_v36 = vpop.f32.mrb[36].mxu1  ;;  %v2321_v37 = vmax.f32 %v2257_v32, 0.0  ;;  %v2258_v38 = vadd.f32 %v4147_v15, %v2187_v33  ;;  %v2953_v39 = vpop.f32.mrb[36].mxu0 }
 0x1a6   :  { %v912_v40 = vpop.f32.mrb[37].mxu1  ;;  %2387 = vst.msk [vmem:[%s4540_s7 + $0x110] sm:$0xff] %vm240_vm0, %v2323_v34  ;;  %v2324_v41 = vmax.f32 %v2260_v35, 0.0  ;;  %v3015_v42 = vadd.f32 %v2953_v39, %v2817_v36  ;;  %v1972_v43 = vpop.f32.mrb[37].mxu0 }
 0x1a7   :  { %v2818_v44 = vpop.f32.mrb[38].mxu1  ;;  %2385 = vst.msk [vmem:[%s4540_s7 + $0x100] sm:$0xff] %vm240_vm0, %v2321_v37  ;;  %v2322_v45 = vmax.f32 %v2258_v38, 0.0  ;;  %v3016_v46 = vadd.f32 %v1972_v43, %v912_v40  ;;  %v2954_v47 = vpop.f32.mrb[38].mxu0 }
 0x1a8   :  { %v915_v48 = vpop.f32.mrb[39].mxu1  ;;  %2388 = vst.msk [vmem:[%s4540_s7 + $0x118] sm:$0xff] %vm240_vm0, %v2324_v41  ;;  %v2192_v49 = vmul.f32 %v3015_v42, %v4142_v10  ;;  %v3017_v50 = vadd.f32 %v2954_v47, %v2818_v44  ;;  %v1975_v51 = vpop.f32.mrb[39].mxu0 }
 0x1a9   :  { %2386 = vst.msk [vmem:[%s4540_s7 + $0x108] sm:$0xff] %vm240_vm0, %v2322_v45  ;;  %v2190_v52 = vmul.f32 %v3016_v46, %v4142_v10  ;;  %v3018_v53 = vadd.f32 %v1975_v51, %v915_v48 }
 0x1aa   :  { %v2263_v54 = vadd.f32 %v4147_v15, %v2192_v49  ;;  %v2193_v55 = vmul.f32 %v3017_v50, %v4142_v10 }
 0x1ab   :  { %v2261_v56 = vadd.f32 %v4147_v15, %v2190_v52  ;;  %v2191_v57 = vmul.f32 %v3018_v53, %v4142_v10 }
 0x1ac   :  { %v2327_v58 = vmax.f32 %v2263_v54, 0.0  ;;  %v2264_v59 = vadd.f32 %v4147_v15, %v2193_v55 }
 0x1ad   :  { %v2821_v60 = vpop.f32.mrb[40].mxu1  ;;  %v2325_v61 = vmax.f32 %v2261_v56, 0.0  ;;  %v2262_v62 = vadd.f32 %v4147_v15, %v2191_v57  ;;  %v2957_v63 = vpop.f32.mrb[40].mxu0 }
 0x1ae   :  { %v928_v0 = vpop.f32.mrb[41].mxu1  ;;  %2391 = vst.msk [vmem:[%s4540_s7 + $0x130] sm:$0xff] %vm240_vm0, %v2327_v58  ;;  %v2328_v1 = vmax.f32 %v2264_v59, 0.0  ;;  %v3019_v2 = vadd.f32 %v2957_v63, %v2821_v60  ;;  %v1988_v3 = vpop.f32.mrb[41].mxu0 }
 0x1af   :  { %v2822_v4 = vpop.f32.mrb[42].mxu1  ;;  %2389 = vst.msk [vmem:[%s4540_s7 + $0x120] sm:$0xff] %vm240_vm0, %v2325_v61  ;;  %v2326_v5 = vmax.f32 %v2262_v62, 0.0  ;;  %v3020_v6 = vadd.f32 %v1988_v3, %v928_v0  ;;  %v2958_v7 = vpop.f32.mrb[42].mxu0 }
 0x1b0   :  { %v931_v8 = vpop.f32.mrb[43].mxu1  ;;  %2392 = vst.msk [vmem:[%s4540_s7 + $0x138] sm:$0xff] %vm240_vm0, %v2328_v1  ;;  %v2196_v9 = vmul.f32 %v3019_v2, %v4142_v10  ;;  %v3021_v11 = vadd.f32 %v2958_v7, %v2822_v4  ;;  %v1991_v12 = vpop.f32.mrb[43].mxu0 }
 0x1b1   :  { %2390 = vst.msk [vmem:[%s4540_s7 + $0x128] sm:$0xff] %vm240_vm0, %v2326_v5  ;;  %v2194_v13 = vmul.f32 %v3020_v6, %v4142_v10  ;;  %v3022_v14 = vadd.f32 %v1991_v12, %v931_v8 }
 0x1b2   :  { %v2267_v16 = vadd.f32 %v4147_v15, %v2196_v9  ;;  %v2197_v17 = vmul.f32 %v3021_v11, %v4142_v10 }
 0x1b3   :  { %v2265_v18 = vadd.f32 %v4147_v15, %v2194_v13  ;;  %v2195_v19 = vmul.f32 %v3022_v14, %v4142_v10 }
 0x1b4   :  { %v2331_v20 = vmax.f32 %v2267_v16, 0.0  ;;  %v2268_v21 = vadd.f32 %v4147_v15, %v2197_v17 }
 0x1b5   :  { %v2825_v22 = vpop.f32.mrb[44].mxu1  ;;  %v2329_v23 = vmax.f32 %v2265_v18, 0.0  ;;  %v2266_v24 = vadd.f32 %v4147_v15, %v2195_v19  ;;  %v2961_v25 = vpop.f32.mrb[44].mxu0 }
 0x1b6   :  { %v944_v26 = vpop.f32.mrb[45].mxu1  ;;  %2395 = vst.msk [vmem:[%s4540_s7 + $0x150] sm:$0xff] %vm240_vm0, %v2331_v20  ;;  %v2332_v27 = vmax.f32 %v2268_v21, 0.0  ;;  %v3023_v28 = vadd.f32 %v2961_v25, %v2825_v22  ;;  %v2004_v29 = vpop.f32.mrb[45].mxu0 }
 0x1b7   :  { %v2826_v30 = vpop.f32.mrb[46].mxu1  ;;  %2393 = vst.msk [vmem:[%s4540_s7 + $0x140] sm:$0xff] %vm240_vm0, %v2329_v23  ;;  %v2330_v31 = vmax.f32 %v2266_v24, 0.0  ;;  %v3024_v32 = vadd.f32 %v2004_v29, %v944_v26  ;;  %v2962_v33 = vpop.f32.mrb[46].mxu0 }
 0x1b8   :  { %v947_v34 = vpop.f32.mrb[47].mxu1  ;;  %2396 = vst.msk [vmem:[%s4540_s7 + $0x158] sm:$0xff] %vm240_vm0, %v2332_v27  ;;  %v2200_v35 = vmul.f32 %v3023_v28, %v4142_v10  ;;  %v3025_v36 = vadd.f32 %v2962_v33, %v2826_v30  ;;  %v2007_v37 = vpop.f32.mrb[47].mxu0 }
 0x1b9   :  { %2394 = vst.msk [vmem:[%s4540_s7 + $0x148] sm:$0xff] %vm240_vm0, %v2330_v31  ;;  %v2198_v38 = vmul.f32 %v3024_v32, %v4142_v10  ;;  %v3026_v39 = vadd.f32 %v2007_v37, %v947_v34 }
 0x1ba   :  { %v2271_v40 = vadd.f32 %v4147_v15, %v2200_v35  ;;  %v2201_v41 = vmul.f32 %v3025_v36, %v4142_v10 }
 0x1bb   :  { %v2269_v42 = vadd.f32 %v4147_v15, %v2198_v38  ;;  %v2199_v43 = vmul.f32 %v3026_v39, %v4142_v10 }
 0x1bc   :  { %v2335_v44 = vmax.f32 %v2271_v40, 0.0  ;;  %v2272_v45 = vadd.f32 %v4147_v15, %v2201_v41 }
 0x1bd   :  { %v2829_v46 = vpop.f32.mrb[48].mxu1  ;;  %v2333_v47 = vmax.f32 %v2269_v42, 0.0  ;;  %v2270_v48 = vadd.f32 %v4147_v15, %v2199_v43  ;;  %v2965_v49 = vpop.f32.mrb[48].mxu0 }
 0x1be   :  { %v960_v50 = vpop.f32.mrb[49].mxu1  ;;  %2399 = vst.msk [vmem:[%s4540_s7 + $0x170] sm:$0xff] %vm240_vm0, %v2335_v44  ;;  %v2336_v51 = vmax.f32 %v2272_v45, 0.0  ;;  %v3027_v52 = vadd.f32 %v2965_v49, %v2829_v46  ;;  %v2020_v53 = vpop.f32.mrb[49].mxu0 }
 0x1bf   :  { %v2830_v54 = vpop.f32.mrb[50].mxu1  ;;  %2397 = vst.msk [vmem:[%s4540_s7 + $0x160] sm:$0xff] %vm240_vm0, %v2333_v47  ;;  %v2334_v55 = vmax.f32 %v2270_v48, 0.0  ;;  %v3028_v56 = vadd.f32 %v2020_v53, %v960_v50  ;;  %v2966_v57 = vpop.f32.mrb[50].mxu0 }
 0x1c0   :  { %v963_v58 = vpop.f32.mrb[51].mxu1  ;;  %2400 = vst.msk [vmem:[%s4540_s7 + $0x178] sm:$0xff] %vm240_vm0, %v2336_v51  ;;  %v2204_v59 = vmul.f32 %v3027_v52, %v4142_v10  ;;  %v3029_v60 = vadd.f32 %v2966_v57, %v2830_v54  ;;  %v2023_v61 = vpop.f32.mrb[51].mxu0 }
 0x1c1   :  { %2398 = vst.msk [vmem:[%s4540_s7 + $0x168] sm:$0xff] %vm240_vm0, %v2334_v55  ;;  %v2202_v62 = vmul.f32 %v3028_v56, %v4142_v10  ;;  %v3030_v63 = vadd.f32 %v2023_v61, %v963_v58 }
 0x1c2   :  { %v2275_v0 = vadd.f32 %v4147_v15, %v2204_v59  ;;  %v2205_v1 = vmul.f32 %v3029_v60, %v4142_v10 }
 0x1c3   :  { %v2273_v2 = vadd.f32 %v4147_v15, %v2202_v62  ;;  %v2203_v3 = vmul.f32 %v3030_v63, %v4142_v10 }
 0x1c4   :  { %v2339_v4 = vmax.f32 %v2275_v0, 0.0  ;;  %v2276_v5 = vadd.f32 %v4147_v15, %v2205_v1 }
 0x1c5   :  { %v2833_v6 = vpop.f32.mrb[52].mxu1  ;;  %v2337_v7 = vmax.f32 %v2273_v2, 0.0  ;;  %v2274_v8 = vadd.f32 %v4147_v15, %v2203_v3  ;;  %v2969_v9 = vpop.f32.mrb[52].mxu0 }
 0x1c6   :  { %v976_v11 = vpop.f32.mrb[53].mxu1  ;;  %2403 = vst.msk [vmem:[%s4540_s7 + $0x190] sm:$0xff] %vm240_vm0, %v2339_v4  ;;  %v2340_v12 = vmax.f32 %v2276_v5, 0.0  ;;  %v3031_v13 = vadd.f32 %v2969_v9, %v2833_v6  ;;  %v2036_v14 = vpop.f32.mrb[53].mxu0 }
 0x1c7   :  { %v2834_v16 = vpop.f32.mrb[54].mxu1  ;;  %2401 = vst.msk [vmem:[%s4540_s7 + $0x180] sm:$0xff] %vm240_vm0, %v2337_v7  ;;  %v2338_v17 = vmax.f32 %v2274_v8, 0.0  ;;  %v3032_v18 = vadd.f32 %v2036_v14, %v976_v11  ;;  %v2970_v19 = vpop.f32.mrb[54].mxu0 }
 0x1c8   :  { %v979_v20 = vpop.f32.mrb[55].mxu1  ;;  %2404 = vst.msk [vmem:[%s4540_s7 + $0x198] sm:$0xff] %vm240_vm0, %v2340_v12  ;;  %v2208_v21 = vmul.f32 %v3031_v13, %v4142_v10  ;;  %v3033_v22 = vadd.f32 %v2970_v19, %v2834_v16  ;;  %v2039_v23 = vpop.f32.mrb[55].mxu0 }
 0x1c9   :  { %2402 = vst.msk [vmem:[%s4540_s7 + $0x188] sm:$0xff] %vm240_vm0, %v2338_v17  ;;  %v2206_v24 = vmul.f32 %v3032_v18, %v4142_v10  ;;  %v3034_v25 = vadd.f32 %v2039_v23, %v979_v20 }
 0x1ca   :  { %v2279_v26 = vadd.f32 %v4147_v15, %v2208_v21  ;;  %v2209_v27 = vmul.f32 %v3033_v22, %v4142_v10 }
 0x1cb   :  { %v2277_v28 = vadd.f32 %v4147_v15, %v2206_v24  ;;  %v2207_v29 = vmul.f32 %v3034_v25, %v4142_v10 }
 0x1cc   :  { %v2343_v30 = vmax.f32 %v2279_v26, 0.0  ;;  %v2280_v31 = vadd.f32 %v4147_v15, %v2209_v27 }
 0x1cd   :  { %v2837_v32 = vpop.f32.mrb[56].mxu1  ;;  %v2341_v33 = vmax.f32 %v2277_v28, 0.0  ;;  %v2278_v34 = vadd.f32 %v4147_v15, %v2207_v29  ;;  %v2973_v35 = vpop.f32.mrb[56].mxu0 }
 0x1ce   :  { %v992_v36 = vpop.f32.mrb[57].mxu1  ;;  %2407 = vst.msk [vmem:[%s4540_s7 + $0x1b0] sm:$0xff] %vm240_vm0, %v2343_v30  ;;  %v2344_v37 = vmax.f32 %v2280_v31, 0.0  ;;  %v3035_v38 = vadd.f32 %v2973_v35, %v2837_v32  ;;  %v2052_v39 = vpop.f32.mrb[57].mxu0 }
 0x1cf   :  { %v2838_v40 = vpop.f32.mrb[58].mxu1  ;;  %2405 = vst.msk [vmem:[%s4540_s7 + $0x1a0] sm:$0xff] %vm240_vm0, %v2341_v33  ;;  %v2342_v41 = vmax.f32 %v2278_v34, 0.0  ;;  %v3036_v42 = vadd.f32 %v2052_v39, %v992_v36  ;;  %v2974_v43 = vpop.f32.mrb[58].mxu0 }
 0x1d0   :  { %v995_v44 = vpop.f32.mrb[59].mxu1  ;;  %2408 = vst.msk [vmem:[%s4540_s7 + $0x1b8] sm:$0xff] %vm240_vm0, %v2344_v37  ;;  %v2212_v45 = vmul.f32 %v3035_v38, %v4142_v10  ;;  %v3037_v46 = vadd.f32 %v2974_v43, %v2838_v40  ;;  %v2055_v47 = vpop.f32.mrb[59].mxu0 }
 0x1d1   :  { %2406 = vst.msk [vmem:[%s4540_s7 + $0x1a8] sm:$0xff] %vm240_vm0, %v2342_v41  ;;  %v2210_v48 = vmul.f32 %v3036_v42, %v4142_v10  ;;  %v3038_v49 = vadd.f32 %v2055_v47, %v995_v44 }
 0x1d2   :  { %v2283_v50 = vadd.f32 %v4147_v15, %v2212_v45  ;;  %v2213_v51 = vmul.f32 %v3037_v46, %v4142_v10 }
 0x1d3   :  { %v2281_v52 = vadd.f32 %v4147_v15, %v2210_v48  ;;  %v2211_v53 = vmul.f32 %v3038_v49, %v4142_v10 }
 0x1d4   :  { %v2347_v54 = vmax.f32 %v2283_v50, 0.0  ;;  %v2284_v55 = vadd.f32 %v4147_v15, %v2213_v51 }
 0x1d5   :  { %v2841_v56 = vpop.f32.mrb[60].mxu1  ;;  %v2345_v57 = vmax.f32 %v2281_v52, 0.0  ;;  %v2282_v58 = vadd.f32 %v4147_v15, %v2211_v53  ;;  %v2977_v59 = vpop.f32.mrb[60].mxu0 }
 0x1d6   :  { %v1008_v60 = vpop.f32.mrb[61].mxu1  ;;  %2411 = vst.msk [vmem:[%s4540_s7 + $0x1d0] sm:$0xff] %vm240_vm0, %v2347_v54  ;;  %v2348_v61 = vmax.f32 %v2284_v55, 0.0  ;;  %v3039_v62 = vadd.f32 %v2977_v59, %v2841_v56  ;;  %v2068_v63 = vpop.f32.mrb[61].mxu0 }
 0x1d7   :  { %v2842_v0 = vpop.f32.mrb[62].mxu1  ;;  %2409 = vst.msk [vmem:[%s4540_s7 + $0x1c0] sm:$0xff] %vm240_vm0, %v2345_v57  ;;  %v2346_v1 = vmax.f32 %v2282_v58, 0.0  ;;  %v3040_v2 = vadd.f32 %v2068_v63, %v1008_v60  ;;  %v2978_v3 = vpop.f32.mrb[62].mxu0 }
 0x1d8   :  { %v1011_v4 = vpop.f32.mrb[63].mxu1  ;;  %2412 = vst.msk [vmem:[%s4540_s7 + $0x1d8] sm:$0xff] %vm240_vm0, %v2348_v61  ;;  %v2216_v5 = vmul.f32 %v3039_v62, %v4142_v10  ;;  %v3041_v6 = vadd.f32 %v2978_v3, %v2842_v0  ;;  %v2071_v7 = vpop.f32.mrb[63].mxu0 }
 0x1d9   :  { %2410 = vst.msk [vmem:[%s4540_s7 + $0x1c8] sm:$0xff] %vm240_vm0, %v2346_v1  ;;  %v2214_v8 = vmul.f32 %v3040_v2, %v4142_v10  ;;  %v3042_v9 = vadd.f32 %v2071_v7, %v1011_v4 }
 0x1da   :  { %v2287_v11 = vadd.f32 %v4147_v15, %v2216_v5  ;;  %v2217_v12 = vmul.f32 %v3041_v6, %v4142_v10 }
 0x1db   :  { %v2285_v13 = vadd.f32 %v4147_v15, %v2214_v8  ;;  %v2215_v14 = vmul.f32 %v3042_v9, %v4142_v10 }
 0x1dc   :  { %v2351_v16 = vmax.f32 %v2287_v11, 0.0  ;;  %v2288_v17 = vadd.f32 %v4147_v15, %v2217_v12 }
 0x1dd   :  { %v2349_v18 = vmax.f32 %v2285_v13, 0.0  ;;  %v2286_v19 = vadd.f32 %v4147_v15, %v2215_v14 }
 0x1de   :  { %2415 = vst.msk [vmem:[%s4540_s7 + $0x1f0] sm:$0xff] %vm240_vm0, %v2351_v16  ;;  %v2352_v20 = vmax.f32 %v2288_v17, 0.0 }
 0x1df   :  { %2413 = vst.msk [vmem:[%s4540_s7 + $0x1e0] sm:$0xff] %vm240_vm0, %v2349_v18  ;;  %v2350_v21 = vmax.f32 %v2286_v19, 0.0 }
 0x1e0   :  { %2416 = vst.msk [vmem:[%s4540_s7 + $0x1f8] sm:$0xff] %vm240_vm0, %v2352_v20 }
 0x1e1   :  { %2414 = vst.msk [vmem:[%s4540_s7 + $0x1e8] sm:$0xff] %vm240_vm0, %v2350_v21 }

</bundles_post_ra>
